<compile_context>
chip_gen: v6e
topology: v6e:2x2x1
jax: 0.10.0
libtpu: 0.0.40
codegen_flags: <defaults>
</compile_context>

<pallas_src>
import functools

import jax
import jax.numpy as jnp
from jax.experimental import pallas as pl
from jax.experimental.pallas import tpu as pltpu


# ----------------------------- fused forward kernel ------------------------------------


def _supce_xception_kernel(
    x_ref,      # (NB, H, W, Cin)        f32   NB images per grid step
    w1_ref,     # (9*Cin, C1)            bf16  stem conv (BN1 scale folded), im2col layout
    b1_ref,     # (1, C1)                f32   BN1 folded bias
    w2_ref,     # (9*C1, C2)             bf16  depthwise1 (*) pointwise1 (*BN2 scale)
    b2_ref,     # (1, C2)                f32   BN2 folded bias
    w3_ref,     # (9*C2, D)              bf16  depthwise2 (*) pointwise2 (*BN3 scale)
    b3_ref,     # (1, D)                 f32   BN3 folded bias
    fcw_ref,    # (D, num_classes)       bf16  classifier weights
    fcb_ref,    # (1, num_classes)       f32   classifier bias
    o_ref,      # (1, NB, num_classes)   f32   logits for this step's images
    pad0_ref,   # VMEM (NB, H+2, W+2, Cin) f32  zero-haloed stem input
    pad1_ref,   # VMEM (NB, H+2, W+2, C1)  f32  zero-haloed block-1 input
    pad2_ref,   # VMEM (NB, H+2, W+2, C2)  f32  zero-haloed block-2 input
    col_ref,    # VMEM (NB*H*W, 9*Cmax)    bf16 im2col tile (MXU LHS), reused per stage
):
    NB, Hp, Wp, _ = pad0_ref.shape
    H, W = Hp - 2, Wp - 2
    M = NB * H * W

    def conv_stage(pad_ref, interior, w_ref, b_ref):
        """3x3 conv (any weights already folded into w_ref) + bias + ReLU, via one
        K-widened MXU matmul on an im2col tile.  `interior` is (NB, H, W, C) f32."""
        C = pad_ref.shape[-1]
        Kc = 9 * C

        # Zero only the 1-wide halo strips (not the whole buffer).  Done every grid
        # step so correctness never relies on scratch persistence / megacore sharding.
        pad_ref[:, 0:1, :, :] = jnp.zeros((NB, 1, Wp, C), jnp.float32)
        pad_ref[:, H + 1:Hp, :, :] = jnp.zeros((NB, 1, Wp, C), jnp.float32)
        pad_ref[:, 1:H + 1, 0:1, :] = jnp.zeros((NB, H, 1, C), jnp.float32)
        pad_ref[:, 1:H + 1, W + 1:Wp, :] = jnp.zeros((NB, H, 1, C), jnp.float32)

        # Write the activation straight into the padded interior (single store).
        pad_ref[:, 1:H + 1, 1:W + 1, :] = interior

        # im2col: 9 static shifted slices written side by side -> (M, 9*C) bf16 tile.
        for kh in range(3):
            for kw in range(3):
                t = kh * 3 + kw
                tap = pad_ref[:, kh:kh + H, kw:kw + W, :]           # (NB, H, W, C) f32
                col_ref[:, t * C:(t + 1) * C] = (
                    tap.reshape(M, C).astype(jnp.bfloat16))

        # One MXU matmul with effective K = 9*C, f32 accumulate + BN/ReLU epilogue.
        acc = jnp.dot(col_ref[:, :Kc], w_ref[...],
                      preferred_element_type=jnp.float32)            # (M, Cout) f32
        return jnp.maximum(acc + b_ref[...], 0.0)

    C1 = w1_ref.shape[-1]
    C2 = w2_ref.shape[-1]
    D = w3_ref.shape[-1]

    # ---- stem: dense 3x3 conv + folded BN + ReLU ----------------------------------------
    a1 = conv_stage(pad0_ref, x_ref[...], w1_ref, b1_ref)                   # (M, C1)
    # ---- separable block 1: (depthwise*pointwise) folded 3x3 conv + BN + ReLU -----------
    a2 = conv_stage(pad1_ref, a1.reshape(NB, H, W, C1), w2_ref, b2_ref)     # (M, C2)
    # ---- separable block 2 ----------------------------------------------------------------
    a3 = conv_stage(pad2_ref, a2.reshape(NB, H, W, C2), w3_ref, b3_ref)     # (M, D)

    # ---- fused global-average-pool + classifier -------------------------------------------
    feats = [jnp.mean(a3[i * H * W:(i + 1) * H * W, :], axis=0, keepdims=True)
             for i in range(NB)]
    feat = feats[0] if NB == 1 else jnp.concatenate(feats, axis=0)          # (NB, D) f32
    logits = jnp.dot(feat.astype(jnp.bfloat16), fcw_ref[...],
                     preferred_element_type=jnp.float32) + fcb_ref[...]     # (NB, nc)
    o_ref[0] = logits


# ----------------------------- parameters (deterministic, synthetic) --------------------


def init_params(key, in_ch=3, c1=16, c2=32, dim_in=32, num_classes=2):
    ks = jax.random.split(key, 16)
    raw = {}
    raw["conv1_w"] = 0.1 * jax.random.normal(ks[0], (3, 3, in_ch, c1), jnp.float32)
    raw["dw1_w"] = 0.1 * jax.random.normal(ks[1], (3, 3, c1), jnp.float32)
    raw["pw1_w"] = 0.1 * jax.random.normal(ks[2], (c1, c2), jnp.float32)
    raw["dw2_w"] = 0.1 * jax.random.normal(ks[3], (3, 3, c2), jnp.float32)
    raw["pw2_w"] = 0.1 * jax.random.normal(ks[4], (c2, dim_in), jnp.float32)
    # eval-mode batchnorm stats -> (scale, bias)
    for name, c, k0 in (("bn1", c1, 5), ("bn2", c2, 8), ("bn3", dim_in, 11)):
        gamma = 1.0 + 0.1 * jax.random.normal(ks[k0], (c,), jnp.float32)
        beta = 0.1 * jax.random.normal(ks[k0 + 1], (c,), jnp.float32)
        mean = 0.05 * jax.random.normal(ks[k0 + 2], (c,), jnp.float32)
        var = jnp.ones((c,), jnp.float32)
        scale = gamma / jnp.sqrt(var + 1e-5)
        raw[name + "_s"] = scale
        raw[name + "_b"] = beta - mean * scale
    raw["fc_w"] = 0.1 * jax.random.normal(ks[14], (dim_in, num_classes), jnp.float32)
    raw["fc_b"] = 0.1 * jax.random.normal(ks[15], (num_classes,), jnp.float32)
    return raw


def prepare_params(raw):
    """Fold BN scales (and the depthwise kernels) into MXU weight matrices, bf16."""
    p = {}
    # stem: fold BN1 scale; (3,3,Cin,C1) -> im2col layout (9*Cin, C1)
    w1 = raw["conv1_w"] * raw["bn1_s"]
    p["w1"] = w1.reshape(9 * w1.shape[2], w1.shape[3]).astype(jnp.bfloat16)
    p["b1"] = raw["bn1_b"].reshape(1, -1).astype(jnp.float32)
    # block 1: fold depthwise into pointwise (with BN2 scale) -> (9*C1, C2)
    pw1 = raw["pw1_w"] * raw["bn2_s"]                                    # (C1, C2)
    w2 = raw["dw1_w"][:, :, :, None] * pw1[None, None, :, :]            # (3,3,C1,C2)
    p["w2"] = w2.reshape(9 * w2.shape[2], w2.shape[3]).astype(jnp.bfloat16)
    p["b2"] = raw["bn2_b"].reshape(1, -1).astype(jnp.float32)
    # block 2
    pw2 = raw["pw2_w"] * raw["bn3_s"]                                    # (C2, D)
    w3 = raw["dw2_w"][:, :, :, None] * pw2[None, None, :, :]            # (3,3,C2,D)
    p["w3"] = w3.reshape(9 * w3.shape[2], w3.shape[3]).astype(jnp.bfloat16)
    p["b3"] = raw["bn3_b"].reshape(1, -1).astype(jnp.float32)
    p["fcw"] = raw["fc_w"].astype(jnp.bfloat16)                          # (D, nc)
    p["fcb"] = raw["fc_b"].reshape(1, -1).astype(jnp.float32)
    return p


# ----------------------------- forward pass (single pallas_call) -------------------------


def supce_xception_forward(p, x_nchw, images_per_step=None):
    """x_nchw: (N, C, H, W) float32 -> logits (N, num_classes)."""
    x = jnp.transpose(x_nchw, (0, 2, 3, 1)).astype(jnp.float32)         # NCHW -> NHWC
    N, H, W, Cin = x.shape
    C1 = p["w1"].shape[-1]
    C2 = p["w2"].shape[-1]
    D = p["w3"].shape[-1]
    nc = p["fcw"].shape[-1]

    # Batch images into the matmul M dimension; keep >= 2 grid steps when N >= 2 so both
    # v7x TensorCores get work (per-step overhead is negligible on single-TC v5e/v6e).
    if images_per_step is None:
        images_per_step = N // 2 if (N >= 2 and N % 2 == 0) else 1
    assert N % images_per_step == 0
    NB = images_per_step
    steps = N // NB
    Cmax = max(Cin, C1, C2)

    out = pl.pallas_call(
        _supce_xception_kernel,
        out_shape=jax.ShapeDtypeStruct((steps, NB, nc), jnp.float32),
        grid_spec=pltpu.PrefetchScalarGridSpec(
            num_scalar_prefetch=0,
            grid=(steps,),                               # NB images per grid step
            in_specs=[
                pl.BlockSpec((NB, H, W, Cin), lambda n: (n, 0, 0, 0)),   # x
                pl.BlockSpec((9 * Cin, C1), lambda n: (0, 0)),           # w1 (bf16)
                pl.BlockSpec((1, C1), lambda n: (0, 0)),                 # b1
                pl.BlockSpec((9 * C1, C2), lambda n: (0, 0)),            # w2 (bf16)
                pl.BlockSpec((1, C2), lambda n: (0, 0)),                 # b2
                pl.BlockSpec((9 * C2, D), lambda n: (0, 0)),             # w3 (bf16)
                pl.BlockSpec((1, D), lambda n: (0, 0)),                  # b3
                pl.BlockSpec((D, nc), lambda n: (0, 0)),                 # fc_w (bf16)
                pl.BlockSpec((1, nc), lambda n: (0, 0)),                 # fc_b
            ],
            out_specs=pl.BlockSpec((1, NB, nc), lambda n: (n, 0, 0)),
            scratch_shapes=[
                pltpu.VMEM((NB, H + 2, W + 2, Cin), jnp.float32),   # padded stem input
                pltpu.VMEM((NB, H + 2, W + 2, C1), jnp.float32),    # padded block-1 input
                pltpu.VMEM((NB, H + 2, W + 2, C2), jnp.float32),    # padded block-2 input
                pltpu.VMEM((NB * H * W, 9 * Cmax), jnp.bfloat16),   # im2col tile (MXU LHS)
            ],
        ),
        compiler_params=pltpu.CompilerParams(
            dimension_semantics=("parallel",),           # grid steps split across TCs on v7x
        ),
    )(
        x,
        p["w1"], p["b1"],
        p["w2"], p["b2"],
        p["w3"], p["b3"],
        p["fcw"], p["fcb"],
    )
    return out.reshape(N, nc)


# ----------------------------- pure-JAX f32 reference (correctness check) ----------------


def reference_forward(raw, x_nchw):
    x = jnp.transpose(x_nchw, (0, 2, 3, 1)).astype(jnp.float32)

    def bn(v, s, b):
        return v * s + b

    dn = ("NHWC", "HWIO", "NHWC")
    y = jax.lax.conv_general_dilated(x, raw["conv1_w"], (1, 1), "SAME",
                                     dimension_numbers=dn)
    y = jax.nn.relu(bn(y, raw["bn1_s"], raw["bn1_b"]))

    dw1 = raw["dw1_w"].reshape(3, 3, 1, -1)
    y = jax.lax.conv_general_dilated(y, dw1, (1, 1), "SAME", dimension_numbers=dn,
                                     feature_group_count=y.shape[-1])
    y = jnp.einsum("nhwc,cd->nhwd", y, raw["pw1_w"])
    y = jax.nn.relu(bn(y, raw["bn2_s"], raw["bn2_b"]))

    dw2 = raw["dw2_w"].reshape(3, 3, 1, -1)
    y = jax.lax.conv_general_dilated(y, dw2, (1, 1), "SAME", dimension_numbers=dn,
                                     feature_group_count=y.shape[-1])
    y = jnp.einsum("nhwc,cd->nhwd", y, raw["pw2_w"])
    y = jax.nn.relu(bn(y, raw["bn3_s"], raw["bn3_b"]))

    feat = jnp.mean(y, axis=(1, 2))
    return feat @ raw["fc_w"] + raw["fc_b"]


# ----------------------------- main ------------------------------------------------------

if __name__ == "__main__":
    key = jax.random.PRNGKey(0)
    k_params, k_x = jax.random.split(key)

    raw_params = init_params(k_params)
    params = prepare_params(raw_params)
    x = jax.random.normal(k_x, (2, 3, 16, 16), jnp.float32)   # NCHW, like PyTorch

    fwd = jax.jit(functools.partial(supce_xception_forward, params))
    out = jax.block_until_ready(fwd(x))

    assert out.shape == (2, 2), out.shape
    assert out.dtype == jnp.float32
    assert bool(jnp.all(jnp.isfinite(out)))

    # Loose tolerance: weights/activations feeding the MXU are bf16 in the kernel.
    ref = reference_forward(raw_params, x)
    err = float(jnp.max(jnp.abs(out - ref)))
    assert err < 5e-2, f"max abs error vs f32 reference: {err}"

    print("KERNEL_OK")
</pallas_src>

<mosaic_0001>
module attributes {stable_mosaic.version = 11 : i64} {
  func.func @_supce_xception_kernel(%arg0: i32, %arg1: memref<1x16x16x3xf32, #tpu.memory_space<vmem>>, %arg2: memref<27x16xbf16, #tpu.memory_space<vmem>>, %arg3: memref<1x16xf32, #tpu.memory_space<vmem>>, %arg4: memref<144x32xbf16, #tpu.memory_space<vmem>>, %arg5: memref<1x32xf32, #tpu.memory_space<vmem>>, %arg6: memref<288x32xbf16, #tpu.memory_space<vmem>>, %arg7: memref<1x32xf32, #tpu.memory_space<vmem>>, %arg8: memref<32x2xbf16, #tpu.memory_space<vmem>>, %arg9: memref<1x2xf32, #tpu.memory_space<vmem>>, %arg10: memref<1x1x2xf32, #tpu.memory_space<vmem>>, %arg11: memref<1x18x18x3xf32, #tpu.memory_space<vmem>>, %arg12: memref<1x18x18x16xf32, #tpu.memory_space<vmem>>, %arg13: memref<1x18x18x32xf32, #tpu.memory_space<vmem>>, %arg14: memref<256x288xbf16, #tpu.memory_space<vmem>>) attributes {dimension_semantics = [#tpu.dimension_semantics<parallel>], iteration_bounds = array<i64: 2>, scalar_prefetch = 0 : i64, scratch_operands = 4 : i64, tpu.core_type = #tpu.core_type<tc>, window_params = [{transform_indices = @transform_0, window_bounds = array<i64: 1, 16, 16, 3>}, {pipeline_mode = #tpu.pipeline_mode<synchronous>, transform_indices = @transform_1, window_bounds = array<i64: 27, 16>}, {pipeline_mode = #tpu.pipeline_mode<synchronous>, transform_indices = @transform_2, window_bounds = array<i64: 1, 16>}, {pipeline_mode = #tpu.pipeline_mode<synchronous>, transform_indices = @transform_3, window_bounds = array<i64: 144, 32>}, {pipeline_mode = #tpu.pipeline_mode<synchronous>, transform_indices = @transform_4, window_bounds = array<i64: 1, 32>}, {pipeline_mode = #tpu.pipeline_mode<synchronous>, transform_indices = @transform_5, window_bounds = array<i64: 288, 32>}, {pipeline_mode = #tpu.pipeline_mode<synchronous>, transform_indices = @transform_6, window_bounds = array<i64: 1, 32>}, {pipeline_mode = #tpu.pipeline_mode<synchronous>, transform_indices = @transform_7, window_bounds = array<i64: 32, 2>}, {pipeline_mode = #tpu.pipeline_mode<synchronous>, transform_indices = @transform_8, window_bounds = array<i64: 1, 2>}, {transform_indices = @transform_9, window_bounds = array<i64: 1, 1, 2>}]} {
    %c0 = arith.constant 0 : index
    %c0_0 = arith.constant 0 : index
    %c0_1 = arith.constant 0 : index
    %c0_2 = arith.constant 0 : index
    %0 = vector.load %arg1[%c0, %c0_0, %c0_1, %c0_2] : memref<1x16x16x3xf32, #tpu.memory_space<vmem>>, vector<1x16x16x3xf32>
    %cst = arith.constant 0.000000e+00 : f32
    %1 = vector.broadcast %cst : f32 to vector<1x1x18x3xf32>
    %c0_3 = arith.constant 0 : index
    %c0_4 = arith.constant 0 : index
    %c0_5 = arith.constant 0 : index
    %c0_6 = arith.constant 0 : index
    %2 = vector.load %arg11[%c0_3, %c0_4, %c0_5, %c0_6] : memref<1x18x18x3xf32, #tpu.memory_space<vmem>>, vector<1x1x18x3xf32>
    tpu.vector_store %arg11[%c0_3, %c0_4, %c0_5, %c0_6], %1 {strides = array<i32>} : memref<1x18x18x3xf32, #tpu.memory_space<vmem>>, vector<1x1x18x3xf32>,
    %cst_7 = arith.constant 0.000000e+00 : f32
    %3 = vector.broadcast %cst_7 : f32 to vector<1x1x18x3xf32>
    %c0_8 = arith.constant 0 : index
    %c17 = arith.constant 17 : index
    %c0_9 = arith.constant 0 : index
    %c0_10 = arith.constant 0 : index
    %4 = vector.load %arg11[%c0_8, %c17, %c0_9, %c0_10] : memref<1x18x18x3xf32, #tpu.memory_space<vmem>>, vector<1x1x18x3xf32>
    tpu.vector_store %arg11[%c0_8, %c17, %c0_9, %c0_10], %3 {strides = array<i32>} : memref<1x18x18x3xf32, #tpu.memory_space<vmem>>, vector<1x1x18x3xf32>,
    %cst_11 = arith.constant 0.000000e+00 : f32
    %5 = vector.broadcast %cst_11 : f32 to vector<1x16x1x3xf32>
    %c0_12 = arith.constant 0 : index
    %c1 = arith.constant 1 : index
    %c0_13 = arith.constant 0 : index
    %c0_14 = arith.constant 0 : index
    %6 = vector.load %arg11[%c0_12, %c1, %c0_13, %c0_14] : memref<1x18x18x3xf32, #tpu.memory_space<vmem>>, vector<1x16x1x3xf32>
    tpu.vector_store %arg11[%c0_12, %c1, %c0_13, %c0_14], %5 {strides = array<i32>} : memref<1x18x18x3xf32, #tpu.memory_space<vmem>>, vector<1x16x1x3xf32>,
    %cst_15 = arith.constant 0.000000e+00 : f32
    %7 = vector.broadcast %cst_15 : f32 to vector<1x16x1x3xf32>
    %c0_16 = arith.constant 0 : index
    %c1_17 = arith.constant 1 : index
    %c17_18 = arith.constant 17 : index
    %c0_19 = arith.constant 0 : index
    %8 = vector.load %arg11[%c0_16, %c1_17, %c17_18, %c0_19] : memref<1x18x18x3xf32, #tpu.memory_space<vmem>>, vector<1x16x1x3xf32>
    tpu.vector_store %arg11[%c0_16, %c1_17, %c17_18, %c0_19], %7 {strides = array<i32>} : memref<1x18x18x3xf32, #tpu.memory_space<vmem>>, vector<1x16x1x3xf32>,
    %c0_20 = arith.constant 0 : index
    %c1_21 = arith.constant 1 : index
    %c1_22 = arith.constant 1 : index
    %c0_23 = arith.constant 0 : index
    %9 = vector.load %arg11[%c0_20, %c1_21, %c1_22, %c0_23] : memref<1x18x18x3xf32, #tpu.memory_space<vmem>>, vector<1x16x16x3xf32>
    tpu.vector_store %arg11[%c0_20, %c1_21, %c1_22, %c0_23], %0 {strides = array<i32>} : memref<1x18x18x3xf32, #tpu.memory_space<vmem>>, vector<1x16x16x3xf32>,
    %c0_24 = arith.constant 0 : index
    %c0_25 = arith.constant 0 : index
    %c0_26 = arith.constant 0 : index
    %c0_27 = arith.constant 0 : index
    %10 = vector.load %arg11[%c0_24, %c0_25, %c0_26, %c0_27] : memref<1x18x18x3xf32, #tpu.memory_space<vmem>>, vector<1x16x16x3xf32>
    %11 = vector.shape_cast %10 : vector<1x16x16x3xf32> to vector<256x3xf32>
    %12 = arith.truncf %11 : vector<256x3xf32> to vector<256x3xbf16>
    %c0_28 = arith.constant 0 : index
    %c0_29 = arith.constant 0 : index
    %13 = vector.load %arg14[%c0_28, %c0_29] : memref<256x288xbf16, #tpu.memory_space<vmem>>, vector<256x3xbf16>
    tpu.vector_store %arg14[%c0_28, %c0_29], %12 {strides = array<i32>} : memref<256x288xbf16, #tpu.memory_space<vmem>>, vector<256x3xbf16>,
    %c0_30 = arith.constant 0 : index
    %c0_31 = arith.constant 0 : index
    %c1_32 = arith.constant 1 : index
    %c0_33 = arith.constant 0 : index
    %14 = vector.load %arg11[%c0_30, %c0_31, %c1_32, %c0_33] : memref<1x18x18x3xf32, #tpu.memory_space<vmem>>, vector<1x16x16x3xf32>
    %15 = vector.shape_cast %14 : vector<1x16x16x3xf32> to vector<256x3xf32>
    %16 = arith.truncf %15 : vector<256x3xf32> to vector<256x3xbf16>
    %c0_34 = arith.constant 0 : index
    %c3 = arith.constant 3 : index
    %17 = vector.load %arg14[%c0_34, %c3] : memref<256x288xbf16, #tpu.memory_space<vmem>>, vector<256x3xbf16>
    tpu.vector_store %arg14[%c0_34, %c3], %16 {strides = array<i32>} : memref<256x288xbf16, #tpu.memory_space<vmem>>, vector<256x3xbf16>,
    %c0_35 = arith.constant 0 : index
    %c0_36 = arith.constant 0 : index
    %c2 = arith.constant 2 : index
    %c0_37 = arith.constant 0 : index
    %18 = vector.load %arg11[%c0_35, %c0_36, %c2, %c0_37] : memref<1x18x18x3xf32, #tpu.memory_space<vmem>>, vector<1x16x16x3xf32>
    %19 = vector.shape_cast %18 : vector<1x16x16x3xf32> to vector<256x3xf32>
    %20 = arith.truncf %19 : vector<256x3xf32> to vector<256x3xbf16>
    %c0_38 = arith.constant 0 : index
    %c6 = arith.constant 6 : index
    %21 = vector.load %arg14[%c0_38, %c6] : memref<256x288xbf16, #tpu.memory_space<vmem>>, vector<256x3xbf16>
    tpu.vector_store %arg14[%c0_38, %c6], %20 {strides = array<i32>} : memref<256x288xbf16, #tpu.memory_space<vmem>>, vector<256x3xbf16>,
    %c0_39 = arith.constant 0 : index
    %c1_40 = arith.constant 1 : index
    %c0_41 = arith.constant 0 : index
    %c0_42 = arith.constant 0 : index
    %22 = vector.load %arg11[%c0_39, %c1_40, %c0_41, %c0_42] : memref<1x18x18x3xf32, #tpu.memory_space<vmem>>, vector<1x16x16x3xf32>
    %23 = vector.shape_cast %22 : vector<1x16x16x3xf32> to vector<256x3xf32>
    %24 = arith.truncf %23 : vector<256x3xf32> to vector<256x3xbf16>
    %c0_43 = arith.constant 0 : index
    %c9 = arith.constant 9 : index
    %25 = vector.load %arg14[%c0_43, %c9] : memref<256x288xbf16, #tpu.memory_space<vmem>>, vector<256x3xbf16>
    tpu.vector_store %arg14[%c0_43, %c9], %24 {strides = array<i32>} : memref<256x288xbf16, #tpu.memory_space<vmem>>, vector<256x3xbf16>,
    %c0_44 = arith.constant 0 : index
    %c1_45 = arith.constant 1 : index
    %c1_46 = arith.constant 1 : index
    %c0_47 = arith.constant 0 : index
    %26 = vector.load %arg11[%c0_44, %c1_45, %c1_46, %c0_47] : memref<1x18x18x3xf32, #tpu.memory_space<vmem>>, vector<1x16x16x3xf32>
    %27 = vector.shape_cast %26 : vector<1x16x16x3xf32> to vector<256x3xf32>
    %28 = arith.truncf %27 : vector<256x3xf32> to vector<256x3xbf16>
    %c0_48 = arith.constant 0 : index
    %c12 = arith.constant 12 : index
    %29 = vector.load %arg14[%c0_48, %c12] : memref<256x288xbf16, #tpu.memory_space<vmem>>, vector<256x3xbf16>
    tpu.vector_store %arg14[%c0_48, %c12], %28 {strides = array<i32>} : memref<256x288xbf16, #tpu.memory_space<vmem>>, vector<256x3xbf16>,
    %c0_49 = arith.constant 0 : index
    %c1_50 = arith.constant 1 : index
    %c2_51 = arith.constant 2 : index
    %c0_52 = arith.constant 0 : index
    %30 = vector.load %arg11[%c0_49, %c1_50, %c2_51, %c0_52] : memref<1x18x18x3xf32, #tpu.memory_space<vmem>>, vector<1x16x16x3xf32>
    %31 = vector.shape_cast %30 : vector<1x16x16x3xf32> to vector<256x3xf32>
    %32 = arith.truncf %31 : vector<256x3xf32> to vector<256x3xbf16>
    %c0_53 = arith.constant 0 : index
    %c15 = arith.constant 15 : index
    %33 = vector.load %arg14[%c0_53, %c15] : memref<256x288xbf16, #tpu.memory_space<vmem>>, vector<256x3xbf16>
    tpu.vector_store %arg14[%c0_53, %c15], %32 {strides = array<i32>} : memref<256x288xbf16, #tpu.memory_space<vmem>>, vector<256x3xbf16>,
    %c0_54 = arith.constant 0 : index
    %c2_55 = arith.constant 2 : index
    %c0_56 = arith.constant 0 : index
    %c0_57 = arith.constant 0 : index
    %34 = vector.load %arg11[%c0_54, %c2_55, %c0_56, %c0_57] : memref<1x18x18x3xf32, #tpu.memory_space<vmem>>, vector<1x16x16x3xf32>
    %35 = vector.shape_cast %34 : vector<1x16x16x3xf32> to vector<256x3xf32>
    %36 = arith.truncf %35 : vector<256x3xf32> to vector<256x3xbf16>
    %c0_58 = arith.constant 0 : index
    %c18 = arith.constant 18 : index
    %37 = vector.load %arg14[%c0_58, %c18] : memref<256x288xbf16, #tpu.memory_space<vmem>>, vector<256x3xbf16>
    tpu.vector_store %arg14[%c0_58, %c18], %36 {strides = array<i32>} : memref<256x288xbf16, #tpu.memory_space<vmem>>, vector<256x3xbf16>,
    %c0_59 = arith.constant 0 : index
    %c2_60 = arith.constant 2 : index
    %c1_61 = arith.constant 1 : index
    %c0_62 = arith.constant 0 : index
    %38 = vector.load %arg11[%c0_59, %c2_60, %c1_61, %c0_62] : memref<1x18x18x3xf32, #tpu.memory_space<vmem>>, vector<1x16x16x3xf32>
    %39 = vector.shape_cast %38 : vector<1x16x16x3xf32> to vector<256x3xf32>
    %40 = arith.truncf %39 : vector<256x3xf32> to vector<256x3xbf16>
    %c0_63 = arith.constant 0 : index
    %c21 = arith.constant 21 : index
    %41 = vector.load %arg14[%c0_63, %c21] : memref<256x288xbf16, #tpu.memory_space<vmem>>, vector<256x3xbf16>
    tpu.vector_store %arg14[%c0_63, %c21], %40 {strides = array<i32>} : memref<256x288xbf16, #tpu.memory_space<vmem>>, vector<256x3xbf16>,
    %c0_64 = arith.constant 0 : index
    %c2_65 = arith.constant 2 : index
    %c2_66 = arith.constant 2 : index
    %c0_67 = arith.constant 0 : index
    %42 = vector.load %arg11[%c0_64, %c2_65, %c2_66, %c0_67] : memref<1x18x18x3xf32, #tpu.memory_space<vmem>>, vector<1x16x16x3xf32>
    %43 = vector.shape_cast %42 : vector<1x16x16x3xf32> to vector<256x3xf32>
    %44 = arith.truncf %43 : vector<256x3xf32> to vector<256x3xbf16>
    %c0_68 = arith.constant 0 : index
    %c24 = arith.constant 24 : index
    %45 = vector.load %arg14[%c0_68, %c24] : memref<256x288xbf16, #tpu.memory_space<vmem>>, vector<256x3xbf16>
    tpu.vector_store %arg14[%c0_68, %c24], %44 {strides = array<i32>} : memref<256x288xbf16, #tpu.memory_space<vmem>>, vector<256x3xbf16>,
    %c0_69 = arith.constant 0 : index
    %c0_70 = arith.constant 0 : index
    %46 = vector.load %arg14[%c0_69, %c0_70] : memref<256x288xbf16, #tpu.memory_space<vmem>>, vector<256x27xbf16>
    %c0_71 = arith.constant 0 : index
    %c0_72 = arith.constant 0 : index
    %47 = vector.load %arg2[%c0_71, %c0_72] : memref<27x16xbf16, #tpu.memory_space<vmem>>, vector<27x16xbf16>
    %cst_73 = arith.constant dense<0.000000e+00> : vector<256x16xf32>
    %48 = tpu.matmul %46, %47, %cst_73 {dimension_numbers = #tpu.dot_dimension_numbers<[1], [0], [0], [1], [0, 0, 1, 1], [], []>} : vector<256x27xbf16>, vector<27x16xbf16>, vector<256x16xf32> -> vector<256x16xf32>
    %c0_74 = arith.constant 0 : index
    %c0_75 = arith.constant 0 : index
    %49 = vector.load %arg3[%c0_74, %c0_75] : memref<1x16xf32, #tpu.memory_space<vmem>>, vector<1x16xf32>
    %50 = vector.broadcast %49 : vector<1x16xf32> to vector<256x16xf32>
    %51 = arith.addf %48, %50 : vector<256x16xf32>
    %cst_76 = arith.constant 0.000000e+00 : f32
    %52 = vector.broadcast %cst_76 : f32 to vector<256x16xf32>
    %53 = arith.maximumf %51, %52 : vector<256x16xf32>
    %54 = vector.shape_cast %53 : vector<256x16xf32> to vector<1x16x16x16xf32>
    %cst_77 = arith.constant 0.000000e+00 : f32
    %55 = vector.broadcast %cst_77 : f32 to vector<1x1x18x16xf32>
    %c0_78 = arith.constant 0 : index
    %c0_79 = arith.constant 0 : index
    %c0_80 = arith.constant 0 : index
    %c0_81 = arith.constant 0 : index
    %56 = vector.load %arg12[%c0_78, %c0_79, %c0_80, %c0_81] : memref<1x18x18x16xf32, #tpu.memory_space<vmem>>, vector<1x1x18x16xf32>
    tpu.vector_store %arg12[%c0_78, %c0_79, %c0_80, %c0_81], %55 {strides = array<i32>} : memref<1x18x18x16xf32, #tpu.memory_space<vmem>>, vector<1x1x18x16xf32>,
    %cst_82 = arith.constant 0.000000e+00 : f32
    %57 = vector.broadcast %cst_82 : f32 to vector<1x1x18x16xf32>
    %c0_83 = arith.constant 0 : index
    %c17_84 = arith.constant 17 : index
    %c0_85 = arith.constant 0 : index
    %c0_86 = arith.constant 0 : index
    %58 = vector.load %arg12[%c0_83, %c17_84, %c0_85, %c0_86] : memref<1x18x18x16xf32, #tpu.memory_space<vmem>>, vector<1x1x18x16xf32>
    tpu.vector_store %arg12[%c0_83, %c17_84, %c0_85, %c0_86], %57 {strides = array<i32>} : memref<1x18x18x16xf32, #tpu.memory_space<vmem>>, vector<1x1x18x16xf32>,
    %cst_87 = arith.constant 0.000000e+00 : f32
    %59 = vector.broadcast %cst_87 : f32 to vector<1x16x1x16xf32>
    %c0_88 = arith.constant 0 : index
    %c1_89 = arith.constant 1 : index
    %c0_90 = arith.constant 0 : index
    %c0_91 = arith.constant 0 : index
    %60 = vector.load %arg12[%c0_88, %c1_89, %c0_90, %c0_91] : memref<1x18x18x16xf32, #tpu.memory_space<vmem>>, vector<1x16x1x16xf32>
    tpu.vector_store %arg12[%c0_88, %c1_89, %c0_90, %c0_91], %59 {strides = array<i32>} : memref<1x18x18x16xf32, #tpu.memory_space<vmem>>, vector<1x16x1x16xf32>,
    %cst_92 = arith.constant 0.000000e+00 : f32
    %61 = vector.broadcast %cst_92 : f32 to vector<1x16x1x16xf32>
    %c0_93 = arith.constant 0 : index
    %c1_94 = arith.constant 1 : index
    %c17_95 = arith.constant 17 : index
    %c0_96 = arith.constant 0 : index
    %62 = vector.load %arg12[%c0_93, %c1_94, %c17_95, %c0_96] : memref<1x18x18x16xf32, #tpu.memory_space<vmem>>, vector<1x16x1x16xf32>
    tpu.vector_store %arg12[%c0_93, %c1_94, %c17_95, %c0_96], %61 {strides = array<i32>} : memref<1x18x18x16xf32, #tpu.memory_space<vmem>>, vector<1x16x1x16xf32>,
    %c0_97 = arith.constant 0 : index
    %c1_98 = arith.constant 1 : index
    %c1_99 = arith.constant 1 : index
    %c0_100 = arith.constant 0 : index
    %63 = vector.load %arg12[%c0_97, %c1_98, %c1_99, %c0_100] : memref<1x18x18x16xf32, #tpu.memory_space<vmem>>, vector<1x16x16x16xf32>
    tpu.vector_store %arg12[%c0_97, %c1_98, %c1_99, %c0_100], %54 {strides = array<i32>} : memref<1x18x18x16xf32, #tpu.memory_space<vmem>>, vector<1x16x16x16xf32>,
    %c0_101 = arith.constant 0 : index
    %c0_102 = arith.constant 0 : index
    %c0_103 = arith.constant 0 : index
    %c0_104 = arith.constant 0 : index
    %64 = vector.load %arg12[%c0_101, %c0_102, %c0_103, %c0_104] : memref<1x18x18x16xf32, #tpu.memory_space<vmem>>, vector<1x16x16x16xf32>
    %65 = vector.shape_cast %64 : vector<1x16x16x16xf32> to vector<256x16xf32>
    %66 = arith.truncf %65 : vector<256x16xf32> to vector<256x16xbf16>
    %c0_105 = arith.constant 0 : index
    %c0_106 = arith.constant 0 : index
    %67 = vector.load %arg14[%c0_105, %c0_106] : memref<256x288xbf16, #tpu.memory_space<vmem>>, vector<256x16xbf16>
    tpu.vector_store %arg14[%c0_105, %c0_106], %66 {strides = array<i32>} : memref<256x288xbf16, #tpu.memory_space<vmem>>, vector<256x16xbf16>,
    %c0_107 = arith.constant 0 : index
    %c0_108 = arith.constant 0 : index
    %c1_109 = arith.constant 1 : index
    %c0_110 = arith.constant 0 : index
    %68 = vector.load %arg12[%c0_107, %c0_108, %c1_109, %c0_110] : memref<1x18x18x16xf32, #tpu.memory_space<vmem>>, vector<1x16x16x16xf32>
    %69 = vector.shape_cast %68 : vector<1x16x16x16xf32> to vector<256x16xf32>
    %70 = arith.truncf %69 : vector<256x16xf32> to vector<256x16xbf16>
    %c0_111 = arith.constant 0 : index
    %c16 = arith.constant 16 : index
    %71 = vector.load %arg14[%c0_111, %c16] : memref<256x288xbf16, #tpu.memory_space<vmem>>, vector<256x16xbf16>
    tpu.vector_store %arg14[%c0_111, %c16], %70 {strides = array<i32>} : memref<256x288xbf16, #tpu.memory_space<vmem>>, vector<256x16xbf16>,
    %c0_112 = arith.constant 0 : index
    %c0_113 = arith.constant 0 : index
    %c2_114 = arith.constant 2 : index
    %c0_115 = arith.constant 0 : index
    %72 = vector.load %arg12[%c0_112, %c0_113, %c2_114, %c0_115] : memref<1x18x18x16xf32, #tpu.memory_space<vmem>>, vector<1x16x16x16xf32>
    %73 = vector.shape_cast %72 : vector<1x16x16x16xf32> to vector<256x16xf32>
    %74 = arith.truncf %73 : vector<256x16xf32> to vector<256x16xbf16>
    %c0_116 = arith.constant 0 : index
    %c32 = arith.constant 32 : index
    %75 = vector.load %arg14[%c0_116, %c32] : memref<256x288xbf16, #tpu.memory_space<vmem>>, vector<256x16xbf16>
    tpu.vector_store %arg14[%c0_116, %c32], %74 {strides = array<i32>} : memref<256x288xbf16, #tpu.memory_space<vmem>>, vector<256x16xbf16>,
    %c0_117 = arith.constant 0 : index
    %c1_118 = arith.constant 1 : index
    %c0_119 = arith.constant 0 : index
    %c0_120 = arith.constant 0 : index
    %76 = vector.load %arg12[%c0_117, %c1_118, %c0_119, %c0_120] : memref<1x18x18x16xf32, #tpu.memory_space<vmem>>, vector<1x16x16x16xf32>
    %77 = vector.shape_cast %76 : vector<1x16x16x16xf32> to vector<256x16xf32>
    %78 = arith.truncf %77 : vector<256x16xf32> to vector<256x16xbf16>
    %c0_121 = arith.constant 0 : index
    %c48 = arith.constant 48 : index
    %79 = vector.load %arg14[%c0_121, %c48] : memref<256x288xbf16, #tpu.memory_space<vmem>>, vector<256x16xbf16>
    tpu.vector_store %arg14[%c0_121, %c48], %78 {strides = array<i32>} : memref<256x288xbf16, #tpu.memory_space<vmem>>, vector<256x16xbf16>,
    %c0_122 = arith.constant 0 : index
    %c1_123 = arith.constant 1 : index
    %c1_124 = arith.constant 1 : index
    %c0_125 = arith.constant 0 : index
    %80 = vector.load %arg12[%c0_122, %c1_123, %c1_124, %c0_125] : memref<1x18x18x16xf32, #tpu.memory_space<vmem>>, vector<1x16x16x16xf32>
    %81 = vector.shape_cast %80 : vector<1x16x16x16xf32> to vector<256x16xf32>
    %82 = arith.truncf %81 : vector<256x16xf32> to vector<256x16xbf16>
    %c0_126 = arith.constant 0 : index
    %c64 = arith.constant 64 : index
    %83 = vector.load %arg14[%c0_126, %c64] : memref<256x288xbf16, #tpu.memory_space<vmem>>, vector<256x16xbf16>
    tpu.vector_store %arg14[%c0_126, %c64], %82 {strides = array<i32>} : memref<256x288xbf16, #tpu.memory_space<vmem>>, vector<256x16xbf16>,
    %c0_127 = arith.constant 0 : index
    %c1_128 = arith.constant 1 : index
    %c2_129 = arith.constant 2 : index
    %c0_130 = arith.constant 0 : index
    %84 = vector.load %arg12[%c0_127, %c1_128, %c2_129, %c0_130] : memref<1x18x18x16xf32, #tpu.memory_space<vmem>>, vector<1x16x16x16xf32>
    %85 = vector.shape_cast %84 : vector<1x16x16x16xf32> to vector<256x16xf32>
    %86 = arith.truncf %85 : vector<256x16xf32> to vector<256x16xbf16>
    %c0_131 = arith.constant 0 : index
    %c80 = arith.constant 80 : index
    %87 = vector.load %arg14[%c0_131, %c80] : memref<256x288xbf16, #tpu.memory_space<vmem>>, vector<256x16xbf16>
    tpu.vector_store %arg14[%c0_131, %c80], %86 {strides = array<i32>} : memref<256x288xbf16, #tpu.memory_space<vmem>>, vector<256x16xbf16>,
    %c0_132 = arith.constant 0 : index
    %c2_133 = arith.constant 2 : index
    %c0_134 = arith.constant 0 : index
    %c0_135 = arith.constant 0 : index
    %88 = vector.load %arg12[%c0_132, %c2_133, %c0_134, %c0_135] : memref<1x18x18x16xf32, #tpu.memory_space<vmem>>, vector<1x16x16x16xf32>
    %89 = vector.shape_cast %88 : vector<1x16x16x16xf32> to vector<256x16xf32>
    %90 = arith.truncf %89 : vector<256x16xf32> to vector<256x16xbf16>
    %c0_136 = arith.constant 0 : index
    %c96 = arith.constant 96 : index
    %91 = vector.load %arg14[%c0_136, %c96] : memref<256x288xbf16, #tpu.memory_space<vmem>>, vector<256x16xbf16>
    tpu.vector_store %arg14[%c0_136, %c96], %90 {strides = array<i32>} : memref<256x288xbf16, #tpu.memory_space<vmem>>, vector<256x16xbf16>,
    %c0_137 = arith.constant 0 : index
    %c2_138 = arith.constant 2 : index
    %c1_139 = arith.constant 1 : index
    %c0_140 = arith.constant 0 : index
    %92 = vector.load %arg12[%c0_137, %c2_138, %c1_139, %c0_140] : memref<1x18x18x16xf32, #tpu.memory_space<vmem>>, vector<1x16x16x16xf32>
    %93 = vector.shape_cast %92 : vector<1x16x16x16xf32> to vector<256x16xf32>
    %94 = arith.truncf %93 : vector<256x16xf32> to vector<256x16xbf16>
    %c0_141 = arith.constant 0 : index
    %c112 = arith.constant 112 : index
    %95 = vector.load %arg14[%c0_141, %c112] : memref<256x288xbf16, #tpu.memory_space<vmem>>, vector<256x16xbf16>
    tpu.vector_store %arg14[%c0_141, %c112], %94 {strides = array<i32>} : memref<256x288xbf16, #tpu.memory_space<vmem>>, vector<256x16xbf16>,
    %c0_142 = arith.constant 0 : index
    %c2_143 = arith.constant 2 : index
    %c2_144 = arith.constant 2 : index
    %c0_145 = arith.constant 0 : index
    %96 = vector.load %arg12[%c0_142, %c2_143, %c2_144, %c0_145] : memref<1x18x18x16xf32, #tpu.memory_space<vmem>>, vector<1x16x16x16xf32>
    %97 = vector.shape_cast %96 : vector<1x16x16x16xf32> to vector<256x16xf32>
    %98 = arith.truncf %97 : vector<256x16xf32> to vector<256x16xbf16>
    %c0_146 = arith.constant 0 : index
    %c128 = arith.constant 128 : index
    %99 = vector.load %arg14[%c0_146, %c128] : memref<256x288xbf16, #tpu.memory_space<vmem>>, vector<256x16xbf16>
    tpu.vector_store %arg14[%c0_146, %c128], %98 {strides = array<i32>} : memref<256x288xbf16, #tpu.memory_space<vmem>>, vector<256x16xbf16>,
    %c0_147 = arith.constant 0 : index
    %c0_148 = arith.constant 0 : index
    %100 = vector.load %arg14[%c0_147, %c0_148] : memref<256x288xbf16, #tpu.memory_space<vmem>>, vector<256x144xbf16>
    %c0_149 = arith.constant 0 : index
    %c0_150 = arith.constant 0 : index
    %101 = vector.load %arg4[%c0_149, %c0_150] : memref<144x32xbf16, #tpu.memory_space<vmem>>, vector<144x32xbf16>
    %cst_151 = arith.constant dense<0.000000e+00> : vector<256x32xf32>
    %102 = tpu.matmul %100, %101, %cst_151 {dimension_numbers = #tpu.dot_dimension_numbers<[1], [0], [0], [1], [0, 0, 1, 1], [], []>} : vector<256x144xbf16>, vector<144x32xbf16>, vector<256x32xf32> -> vector<256x32xf32>
    %c0_152 = arith.constant 0 : index
    %c0_153 = arith.constant 0 : index
    %103 = vector.load %arg5[%c0_152, %c0_153] : memref<1x32xf32, #tpu.memory_space<vmem>>, vector<1x32xf32>
    %104 = vector.broadcast %103 : vector<1x32xf32> to vector<256x32xf32>
    %105 = arith.addf %102, %104 : vector<256x32xf32>
    %cst_154 = arith.constant 0.000000e+00 : f32
    %106 = vector.broadcast %cst_154 : f32 to vector<256x32xf32>
    %107 = arith.maximumf %105, %106 : vector<256x32xf32>
    %108 = vector.shape_cast %107 : vector<256x32xf32> to vector<1x16x16x32xf32>
    %cst_155 = arith.constant 0.000000e+00 : f32
    %109 = vector.broadcast %cst_155 : f32 to vector<1x1x18x32xf32>
    %c0_156 = arith.constant 0 : index
    %c0_157 = arith.constant 0 : index
    %c0_158 = arith.constant 0 : index
    %c0_159 = arith.constant 0 : index
    %110 = vector.load %arg13[%c0_156, %c0_157, %c0_158, %c0_159] : memref<1x18x18x32xf32, #tpu.memory_space<vmem>>, vector<1x1x18x32xf32>
    tpu.vector_store %arg13[%c0_156, %c0_157, %c0_158, %c0_159], %109 {strides = array<i32>} : memref<1x18x18x32xf32, #tpu.memory_space<vmem>>, vector<1x1x18x32xf32>,
    %cst_160 = arith.constant 0.000000e+00 : f32
    %111 = vector.broadcast %cst_160 : f32 to vector<1x1x18x32xf32>
    %c0_161 = arith.constant 0 : index
    %c17_162 = arith.constant 17 : index
    %c0_163 = arith.constant 0 : index
    %c0_164 = arith.constant 0 : index
    %112 = vector.load %arg13[%c0_161, %c17_162, %c0_163, %c0_164] : memref<1x18x18x32xf32, #tpu.memory_space<vmem>>, vector<1x1x18x32xf32>
    tpu.vector_store %arg13[%c0_161, %c17_162, %c0_163, %c0_164], %111 {strides = array<i32>} : memref<1x18x18x32xf32, #tpu.memory_space<vmem>>, vector<1x1x18x32xf32>,
    %cst_165 = arith.constant 0.000000e+00 : f32
    %113 = vector.broadcast %cst_165 : f32 to vector<1x16x1x32xf32>
    %c0_166 = arith.constant 0 : index
    %c1_167 = arith.constant 1 : index
    %c0_168 = arith.constant 0 : index
    %c0_169 = arith.constant 0 : index
    %114 = vector.load %arg13[%c0_166, %c1_167, %c0_168, %c0_169] : memref<1x18x18x32xf32, #tpu.memory_space<vmem>>, vector<1x16x1x32xf32>
    tpu.vector_store %arg13[%c0_166, %c1_167, %c0_168, %c0_169], %113 {strides = array<i32>} : memref<1x18x18x32xf32, #tpu.memory_space<vmem>>, vector<1x16x1x32xf32>,
    %cst_170 = arith.constant 0.000000e+00 : f32
    %115 = vector.broadcast %cst_170 : f32 to vector<1x16x1x32xf32>
    %c0_171 = arith.constant 0 : index
    %c1_172 = arith.constant 1 : index
    %c17_173 = arith.constant 17 : index
    %c0_174 = arith.constant 0 : index
    %116 = vector.load %arg13[%c0_171, %c1_172, %c17_173, %c0_174] : memref<1x18x18x32xf32, #tpu.memory_space<vmem>>, vector<1x16x1x32xf32>
    tpu.vector_store %arg13[%c0_171, %c1_172, %c17_173, %c0_174], %115 {strides = array<i32>} : memref<1x18x18x32xf32, #tpu.memory_space<vmem>>, vector<1x16x1x32xf32>,
    %c0_175 = arith.constant 0 : index
    %c1_176 = arith.constant 1 : index
    %c1_177 = arith.constant 1 : index
    %c0_178 = arith.constant 0 : index
    %117 = vector.load %arg13[%c0_175, %c1_176, %c1_177, %c0_178] : memref<1x18x18x32xf32, #tpu.memory_space<vmem>>, vector<1x16x16x32xf32>
    tpu.vector_store %arg13[%c0_175, %c1_176, %c1_177, %c0_178], %108 {strides = array<i32>} : memref<1x18x18x32xf32, #tpu.memory_space<vmem>>, vector<1x16x16x32xf32>,
    %c0_179 = arith.constant 0 : index
    %c0_180 = arith.constant 0 : index
    %c0_181 = arith.constant 0 : index
    %c0_182 = arith.constant 0 : index
    %118 = vector.load %arg13[%c0_179, %c0_180, %c0_181, %c0_182] : memref<1x18x18x32xf32, #tpu.memory_space<vmem>>, vector<1x16x16x32xf32>
    %119 = vector.shape_cast %118 : vector<1x16x16x32xf32> to vector<256x32xf32>
    %120 = arith.truncf %119 : vector<256x32xf32> to vector<256x32xbf16>
    %c0_183 = arith.constant 0 : index
    %c0_184 = arith.constant 0 : index
    %121 = vector.load %arg14[%c0_183, %c0_184] : memref<256x288xbf16, #tpu.memory_space<vmem>>, vector<256x32xbf16>
    tpu.vector_store %arg14[%c0_183, %c0_184], %120 {strides = array<i32>} : memref<256x288xbf16, #tpu.memory_space<vmem>>, vector<256x32xbf16>,
    %c0_185 = arith.constant 0 : index
    %c0_186 = arith.constant 0 : index
    %c1_187 = arith.constant 1 : index
    %c0_188 = arith.constant 0 : index
    %122 = vector.load %arg13[%c0_185, %c0_186, %c1_187, %c0_188] : memref<1x18x18x32xf32, #tpu.memory_space<vmem>>, vector<1x16x16x32xf32>
    %123 = vector.shape_cast %122 : vector<1x16x16x32xf32> to vector<256x32xf32>
    %124 = arith.truncf %123 : vector<256x32xf32> to vector<256x32xbf16>
    %c0_189 = arith.constant 0 : index
    %c32_190 = arith.constant 32 : index
    %125 = vector.load %arg14[%c0_189, %c32_190] : memref<256x288xbf16, #tpu.memory_space<vmem>>, vector<256x32xbf16>
    tpu.vector_store %arg14[%c0_189, %c32_190], %124 {strides = array<i32>} : memref<256x288xbf16, #tpu.memory_space<vmem>>, vector<256x32xbf16>,
    %c0_191 = arith.constant 0 : index
    %c0_192 = arith.constant 0 : index
    %c2_193 = arith.constant 2 : index
    %c0_194 = arith.constant 0 : index
    %126 = vector.load %arg13[%c0_191, %c0_192, %c2_193, %c0_194] : memref<1x18x18x32xf32, #tpu.memory_space<vmem>>, vector<1x16x16x32xf32>
    %127 = vector.shape_cast %126 : vector<1x16x16x32xf32> to vector<256x32xf32>
    %128 = arith.truncf %127 : vector<256x32xf32> to vector<256x32xbf16>
    %c0_195 = arith.constant 0 : index
    %c64_196 = arith.constant 64 : index
    %129 = vector.load %arg14[%c0_195, %c64_196] : memref<256x288xbf16, #tpu.memory_space<vmem>>, vector<256x32xbf16>
    tpu.vector_store %arg14[%c0_195, %c64_196], %128 {strides = array<i32>} : memref<256x288xbf16, #tpu.memory_space<vmem>>, vector<256x32xbf16>,
    %c0_197 = arith.constant 0 : index
    %c1_198 = arith.constant 1 : index
    %c0_199 = arith.constant 0 : index
    %c0_200 = arith.constant 0 : index
    %130 = vector.load %arg13[%c0_197, %c1_198, %c0_199, %c0_200] : memref<1x18x18x32xf32, #tpu.memory_space<vmem>>, vector<1x16x16x32xf32>
    %131 = vector.shape_cast %130 : vector<1x16x16x32xf32> to vector<256x32xf32>
    %132 = arith.truncf %131 : vector<256x32xf32> to vector<256x32xbf16>
    %c0_201 = arith.constant 0 : index
    %c96_202 = arith.constant 96 : index
    %133 = vector.load %arg14[%c0_201, %c96_202] : memref<256x288xbf16, #tpu.memory_space<vmem>>, vector<256x32xbf16>
    tpu.vector_store %arg14[%c0_201, %c96_202], %132 {strides = array<i32>} : memref<256x288xbf16, #tpu.memory_space<vmem>>, vector<256x32xbf16>,
    %c0_203 = arith.constant 0 : index
    %c1_204 = arith.constant 1 : index
    %c1_205 = arith.constant 1 : index
    %c0_206 = arith.constant 0 : index
    %134 = vector.load %arg13[%c0_203, %c1_204, %c1_205, %c0_206] : memref<1x18x18x32xf32, #tpu.memory_space<vmem>>, vector<1x16x16x32xf32>
    %135 = vector.shape_cast %134 : vector<1x16x16x32xf32> to vector<256x32xf32>
    %136 = arith.truncf %135 : vector<256x32xf32> to vector<256x32xbf16>
    %c0_207 = arith.constant 0 : index
    %c128_208 = arith.constant 128 : index
    %137 = vector.load %arg14[%c0_207, %c128_208] : memref<256x288xbf16, #tpu.memory_space<vmem>>, vector<256x32xbf16>
    tpu.vector_store %arg14[%c0_207, %c128_208], %136 {strides = array<i32>} : memref<256x288xbf16, #tpu.memory_space<vmem>>, vector<256x32xbf16>,
    %c0_209 = arith.constant 0 : index
    %c1_210 = arith.constant 1 : index
    %c2_211 = arith.constant 2 : index
    %c0_212 = arith.constant 0 : index
    %138 = vector.load %arg13[%c0_209, %c1_210, %c2_211, %c0_212] : memref<1x18x18x32xf32, #tpu.memory_space<vmem>>, vector<1x16x16x32xf32>
    %139 = vector.shape_cast %138 : vector<1x16x16x32xf32> to vector<256x32xf32>
    %140 = arith.truncf %139 : vector<256x32xf32> to vector<256x32xbf16>
    %c0_213 = arith.constant 0 : index
    %c160 = arith.constant 160 : index
    %141 = vector.load %arg14[%c0_213, %c160] : memref<256x288xbf16, #tpu.memory_space<vmem>>, vector<256x32xbf16>
    tpu.vector_store %arg14[%c0_213, %c160], %140 {strides = array<i32>} : memref<256x288xbf16, #tpu.memory_space<vmem>>, vector<256x32xbf16>,
    %c0_214 = arith.constant 0 : index
    %c2_215 = arith.constant 2 : index
    %c0_216 = arith.constant 0 : index
    %c0_217 = arith.constant 0 : index
    %142 = vector.load %arg13[%c0_214, %c2_215, %c0_216, %c0_217] : memref<1x18x18x32xf32, #tpu.memory_space<vmem>>, vector<1x16x16x32xf32>
    %143 = vector.shape_cast %142 : vector<1x16x16x32xf32> to vector<256x32xf32>
    %144 = arith.truncf %143 : vector<256x32xf32> to vector<256x32xbf16>
    %c0_218 = arith.constant 0 : index
    %c192 = arith.constant 192 : index
    %145 = vector.load %arg14[%c0_218, %c192] : memref<256x288xbf16, #tpu.memory_space<vmem>>, vector<256x32xbf16>
    tpu.vector_store %arg14[%c0_218, %c192], %144 {strides = array<i32>} : memref<256x288xbf16, #tpu.memory_space<vmem>>, vector<256x32xbf16>,
    %c0_219 = arith.constant 0 : index
    %c2_220 = arith.constant 2 : index
    %c1_221 = arith.constant 1 : index
    %c0_222 = arith.constant 0 : index
    %146 = vector.load %arg13[%c0_219, %c2_220, %c1_221, %c0_222] : memref<1x18x18x32xf32, #tpu.memory_space<vmem>>, vector<1x16x16x32xf32>
    %147 = vector.shape_cast %146 : vector<1x16x16x32xf32> to vector<256x32xf32>
    %148 = arith.truncf %147 : vector<256x32xf32> to vector<256x32xbf16>
    %c0_223 = arith.constant 0 : index
    %c224 = arith.constant 224 : index
    %149 = vector.load %arg14[%c0_223, %c224] : memref<256x288xbf16, #tpu.memory_space<vmem>>, vector<256x32xbf16>
    tpu.vector_store %arg14[%c0_223, %c224], %148 {strides = array<i32>} : memref<256x288xbf16, #tpu.memory_space<vmem>>, vector<256x32xbf16>,
    %c0_224 = arith.constant 0 : index
    %c2_225 = arith.constant 2 : index
    %c2_226 = arith.constant 2 : index
    %c0_227 = arith.constant 0 : index
    %150 = vector.load %arg13[%c0_224, %c2_225, %c2_226, %c0_227] : memref<1x18x18x32xf32, #tpu.memory_space<vmem>>, vector<1x16x16x32xf32>
    %151 = vector.shape_cast %150 : vector<1x16x16x32xf32> to vector<256x32xf32>
    %152 = arith.truncf %151 : vector<256x32xf32> to vector<256x32xbf16>
    %c0_228 = arith.constant 0 : index
    %c256 = arith.constant 256 : index
    %153 = vector.load %arg14[%c0_228, %c256] : memref<256x288xbf16, #tpu.memory_space<vmem>>, vector<256x32xbf16>
    tpu.vector_store %arg14[%c0_228, %c256], %152 {strides = array<i32>} : memref<256x288xbf16, #tpu.memory_space<vmem>>, vector<256x32xbf16>,
    %c0_229 = arith.constant 0 : index
    %c0_230 = arith.constant 0 : index
    %154 = vector.load %arg14[%c0_229, %c0_230] : memref<256x288xbf16, #tpu.memory_space<vmem>>, vector<256x288xbf16>
    %c0_231 = arith.constant 0 : index
    %c0_232 = arith.constant 0 : index
    %155 = vector.load %arg6[%c0_231, %c0_232] : memref<288x32xbf16, #tpu.memory_space<vmem>>, vector<288x32xbf16>
    %cst_233 = arith.constant dense<0.000000e+00> : vector<256x32xf32>
    %156 = tpu.matmul %154, %155, %cst_233 {dimension_numbers = #tpu.dot_dimension_numbers<[1], [0], [0], [1], [0, 0, 1, 1], [], []>} : vector<256x288xbf16>, vector<288x32xbf16>, vector<256x32xf32> -> vector<256x32xf32>
    %c0_234 = arith.constant 0 : index
    %c0_235 = arith.constant 0 : index
    %157 = vector.load %arg7[%c0_234, %c0_235] : memref<1x32xf32, #tpu.memory_space<vmem>>, vector<1x32xf32>
    %158 = vector.broadcast %157 : vector<1x32xf32> to vector<256x32xf32>
    %159 = arith.addf %156, %158 : vector<256x32xf32>
    %cst_236 = arith.constant 0.000000e+00 : f32
    %160 = vector.broadcast %cst_236 : f32 to vector<256x32xf32>
    %161 = arith.maximumf %159, %160 : vector<256x32xf32>
    %cst_237 = arith.constant dense<0.000000e+00> : vector<32xf32>
    %162 = vector.multi_reduction <add>, %161, %cst_237 [0] : vector<256x32xf32> to vector<32xf32>
    %163 = vector.shape_cast %162 : vector<32xf32> to vector<1x32xf32>
    %cst_238 = arith.constant 2.560000e+02 : f32
    %164 = vector.broadcast %cst_238 : f32 to vector<1x32xf32>
    %165 = arith.divf %163, %164 : vector<1x32xf32>
    %166 = arith.truncf %165 : vector<1x32xf32> to vector<1x32xbf16>
    %c0_239 = arith.constant 0 : index
    %c0_240 = arith.constant 0 : index
    %167 = vector.load %arg8[%c0_239, %c0_240] : memref<32x2xbf16, #tpu.memory_space<vmem>>, vector<32x2xbf16>
    %cst_241 = arith.constant dense<0.000000e+00> : vector<1x2xf32>
    %168 = tpu.matmul %166, %167, %cst_241 {dimension_numbers = #tpu.dot_dimension_numbers<[1], [0], [0], [1], [0, 0, 1, 1], [], []>} : vector<1x32xbf16>, vector<32x2xbf16>, vector<1x2xf32> -> vector<1x2xf32>
    %c0_242 = arith.constant 0 : index
    %c0_243 = arith.constant 0 : index
    %169 = vector.load %arg9[%c0_242, %c0_243] : memref<1x2xf32, #tpu.memory_space<vmem>>, vector<1x2xf32>
    %170 = arith.addf %168, %169 : vector<1x2xf32>
    %c0_244 = arith.constant 0 : index
    %c0_245 = arith.constant 0 : index
    %c0_246 = arith.constant 0 : index
    %171 = vector.load %arg10[%c0_244, %c0_245, %c0_246] : memref<1x1x2xf32, #tpu.memory_space<vmem>>, vector<1x1x2xf32>
    %172 = vector.shape_cast %171 : vector<1x1x2xf32> to vector<1x2xf32>
    %173 = vector.shape_cast %170 : vector<1x2xf32> to vector<1x1x2xf32>
    tpu.vector_store %arg10[%c0_244, %c0_245, %c0_246], %173 {strides = array<i32>} : memref<1x1x2xf32, #tpu.memory_space<vmem>>, vector<1x1x2xf32>,
    return
  }
  func.func @transform_0(%arg0: i32) -> (i32, i32, i32, i32) {
    %c0_i32 = arith.constant 0 : i32
    %c0_i32_0 = arith.constant 0 : i32
    %c0_i32_1 = arith.constant 0 : i32
    %c0_i32_2 = arith.constant 0 : i32
    return %arg0, %c0_i32, %c0_i32_0, %c0_i32_1 : i32, i32, i32, i32
  }
  func.func @transform_1(%arg0: i32) -> (i32, i32) {
    %c0_i32 = arith.constant 0 : i32
    %c0_i32_0 = arith.constant 0 : i32
    %c0_i32_1 = arith.constant 0 : i32
    return %c0_i32, %c0_i32_0 : i32, i32
  }
  func.func @transform_2(%arg0: i32) -> (i32, i32) {
    %c0_i32 = arith.constant 0 : i32
    %c0_i32_0 = arith.constant 0 : i32
    %c0_i32_1 = arith.constant 0 : i32
    return %c0_i32, %c0_i32_0 : i32, i32
  }
  func.func @transform_3(%arg0: i32) -> (i32, i32) {
    %c0_i32 = arith.constant 0 : i32
    %c0_i32_0 = arith.constant 0 : i32
    %c0_i32_1 = arith.constant 0 : i32
    return %c0_i32, %c0_i32_0 : i32, i32
  }
  func.func @transform_4(%arg0: i32) -> (i32, i32) {
    %c0_i32 = arith.constant 0 : i32
    %c0_i32_0 = arith.constant 0 : i32
    %c0_i32_1 = arith.constant 0 : i32
    return %c0_i32, %c0_i32_0 : i32, i32
  }
  func.func @transform_5(%arg0: i32) -> (i32, i32) {
    %c0_i32 = arith.constant 0 : i32
    %c0_i32_0 = arith.constant 0 : i32
    %c0_i32_1 = arith.constant 0 : i32
    return %c0_i32, %c0_i32_0 : i32, i32
  }
  func.func @transform_6(%arg0: i32) -> (i32, i32) {
    %c0_i32 = arith.constant 0 : i32
    %c0_i32_0 = arith.constant 0 : i32
    %c0_i32_1 = arith.constant 0 : i32
    return %c0_i32, %c0_i32_0 : i32, i32
  }
  func.func @transform_7(%arg0: i32) -> (i32, i32) {
    %c0_i32 = arith.constant 0 : i32
    %c0_i32_0 = arith.constant 0 : i32
    %c0_i32_1 = arith.constant 0 : i32
    return %c0_i32, %c0_i32_0 : i32, i32
  }
  func.func @transform_8(%arg0: i32) -> (i32, i32) {
    %c0_i32 = arith.constant 0 : i32
    %c0_i32_0 = arith.constant 0 : i32
    %c0_i32_1 = arith.constant 0 : i32
    return %c0_i32, %c0_i32_0 : i32, i32
  }
  func.func @transform_9(%arg0: i32) -> (i32, i32, i32) {
    %c0_i32 = arith.constant 0 : i32
    %c0_i32_0 = arith.constant 0 : i32
    %c0_i32_1 = arith.constant 0 : i32
    return %arg0, %c0_i32, %c0_i32_0 : i32, i32, i32
  }
}

</mosaic_0001>

<bundles_post_ra>
// kernel: supce_xception_forward.1
= control target key start
LH: loop header
LB: loop body
LE: loop exit
PB: predicated region body
PF: predicated region fallthrough
CT: control target
= control target key end

     0   :  { %14 = vsyncpa [#allocation7], 0  ;;  %s15068_s0 = inlined_call_operand.vmem [shape: f32[2,16,16,3], index: 0, kind: input, shape index: {}]   ;;  %s15069_s1 = inlined_call_operand.vmem [shape: bf16[27,16], index: 1, kind: input, shape index: {}]   ;;  %s15070_s2 = inlined_call_operand.vmem [shape: f32[1,16], index: 2, kind: input, shape index: {}]   ;;  %s15071_s3 = inlined_call_operand.vmem [shape: bf16[144,32], index: 3, kind: input, shape index: {}]   ;;  %s15072_s4 = inlined_call_operand.vmem [shape: f32[1,32], index: 4, kind: input, shape index: {}]   ;;  %s15073_s5 = inlined_call_operand.vmem [shape: bf16[288,32], index: 5, kind: input, shape index: {}]   ;;  %s15074_s6 = inlined_call_operand.vmem [shape: f32[1,32], index: 6, kind: input, shape index: {}]   ;;  %s15075_s7 = inlined_call_operand.vmem [shape: bf16[32,2], index: 7, kind: input, shape index: {}]   ;;  %s15076_s8 = inlined_call_operand.vmem [shape: f32[1,2], index: 8, kind: input, shape index: {}]   ;;  %s15077_s9 = inlined_call_operand.hbm [shape: f32[2,1,2], index: 9, kind: output, shape index: {}]  }
   0x1   :  { %16 = vsyncpa [#allocation7 + $0x1], 0  ;;  %s11536_s30 = smov 0   ;;  %s11538_s10 = smov 0  }
   0x2   :  { %s11540_s11 = smov 0   ;;  %s11542_s12 = smov 0  }
   0x3 LB: > { %s11557_s13 = sadd.s32 4294967295, %s11464_s12   ;;  %s9078_s14 = sadd.s32 4294967294, %s11464_s12   ;;  %s11464_s12 = sphi %s11542_s12, %s15083_s12   ;;  %s11460_s11 = sphi %s11540_s11, %s15082_s11   ;;  %s11456_s10 = sphi %s11538_s10, %s15081_s10   ;;  %s11452_s30 = sphi %s11536_s30, %s15080_s30  }
   0x4   : > { %s11561_s15 = sadd.s32 1, %s11464_s12   ;;  %s223_s16 = sadd.s32 1, %s11460_s11 }
   0x5   : > { %s220_s17 = ssub.s32 %s11464_s12, %s11561_s15  ;;  %p233_p0 = scmp.ne.s32.totalorder %s11460_s11, %s11456_s10 }
   0x6   : > { %p221_p1 = scmp.eq.s32.totalorder %s220_s17, 0  ;;  %p234_p2 = scmp.eq.s32.totalorder %s11557_s13, 1 }
   0x7   : > { %p239_p3 = scmp.ne.s32.totalorder %s11456_s10, %s11452_s30  ;;  %p240_p4 = scmp.eq.s32.totalorder %s9078_s14, 1 }
   0x8   : > { %s11572_s18 = scalar_select %p221_p1, %s11460_s11, %s223_s16  }
   0x9   : > { %p11574_p5 = por %p234_p2, %p233_p0  ;;  %p11578_p6 = por %p240_p4, %p239_p3 }
   0xa   : > { %p9081_p7 = scmp.ge.s32.totalorder %s11464_s12, 1  ;;  %p290_p8 = scmp.lt.s32.totalorder %s11464_s12, 3 }
   0xc   : > { %p291_p9 = pnand %p9081_p7, %p290_p8 }
   0xd   : > { %p325_p10 = scmp.lt.s32.totalorder (!%p291_p9), %s11557_s13, 1  ;;  %s11467_s26 = smov (!%p291_p9), 3  }
   0xe   : > { %294 = sbr.rel (%p291_p9) target bundleno = 2012 (0x7dc), region = 56  ;;  %s11468_s27 = smov (!%p291_p9), 6  }
   0xf   : > { %s11469_s28 = smov (!%p291_p9), 9   ;;  %s11470_s29 = smov (!%p291_p9), 12  }
  0x10   : > { %s11471_s14 = smov (!%p291_p9), 15   ;;  %s11472_s16 = smov (!%p291_p9), 18  }
  0x11   : > { %s11473_s17 = smov (!%p291_p9), 21   ;;  %s11475_s23 = smov (!%p291_p9), 24  }
  0x12   : > { %s11478_s24 = smov (!%p291_p9), 32  }
  0x13   : > { %vm363_vm0 = vcmask 23552   ;;  %vm366_vm1 = vcmask 17408   ;;  %vm373_vm2 = vcmask 16384   ;;  %v11466_v0 = vmov 0.0   ;;  %s326_s21 = scalar_select %p325_p10, %s11557_s13, 1 }
  0x14   : > { %364 = vst.msk [vmem:[#allocation2] sm:$0xff] %vm363_vm0, %v11466_v0  ;;  %365 = vst.msk [vmem:[#allocation2 + $0x8] sm:$0xff] %vm363_vm0, %v11466_v0  ;;  %vm598_vm3 = vcmask 19456   ;;  %vm855_vm4 = vcmask 44056   ;;  %vm3071_vm5 = vcmask 130048   ;;  %vm2871_vm6 = vcmask 1044480  }
  0x15   : > { %369 = vst.msk [vmem:[#allocation2 + $0x198] sm:$0xff] %vm363_vm0, %v11466_v0  ;;  %370 = vst.msk [vmem:[#allocation2 + $0x1a0] sm:$0xff] %vm363_vm0, %v11466_v0  ;;  %s10130_s22 = sshll.u32 %s326_s21, 8  ;;  %vm2872_vm7 = vcmask 1045504   ;;  %vm1112_vm8 = vcmask 68656   ;;  %vm1369_vm9 = vcmask 93256  }
  0x16   : > { %367 = vst.msk [vmem:[#allocation2 + $0x10] sm:$0x3] %vm366_vm1, %v11466_v0  ;;  %371 = vst.msk [vmem:[#allocation2 + $0x1a8] sm:$0x3] %vm366_vm1, %v11466_v0  ;;  %s11665_s25 = scalar_lea.vmem %s15068_s0, %s10130_s22  ;;  %vm1626_vm10 = vcmask 117856   ;;  %vm1883_vm11 = vcmask 142456  }
  0x17   : > { %390 = vst.msk [vmem:[#allocation2 + $0x29] sm:$0x1] %vm373_vm2, %v11466_v0  ;;  %374 = vst.msk [vmem:[#allocation2 + $0x18] sm:$0x1] %vm373_vm2, %v11466_v0  ;;  %v331_v1 = vld [vmem:[%s11665_s25] sm:$0xff]  ;;  %v333_v2 = vld [vmem:[%s11665_s25 + $0x10] sm:$0xff] }
  0x18   : > { %375 = vst.msk [vmem:[#allocation2 + $0x30] sm:$0x1] %vm373_vm2, %v11466_v0  ;;  %376 = vst.msk [vmem:[#allocation2 + $0x48] sm:$0x1] %vm373_vm2, %v11466_v0  ;;  %v332_v3 = vld [vmem:[%s11665_s25 + $0x8] sm:$0xff]  ;;  %v335_v4 = vld [vmem:[%s11665_s25 + $0x20] sm:$0xff] }
  0x19   : > { %377 = vst.msk [vmem:[#allocation2 + $0x60] sm:$0x1] %vm373_vm2, %v11466_v0  ;;  %378 = vst.msk [vmem:[#allocation2 + $0x78] sm:$0x1] %vm373_vm2, %v11466_v0  ;;  %v334_v5 = vld [vmem:[%s11665_s25 + $0x18] sm:$0xff]  ;;  %v337_v6 = vld [vmem:[%s11665_s25 + $0x30] sm:$0xff] }
  0x1a   : > { %379 = vst.msk [vmem:[#allocation2 + $0x90] sm:$0x1] %vm373_vm2, %v11466_v0  ;;  %380 = vst.msk [vmem:[#allocation2 + $0xa8] sm:$0x1] %vm373_vm2, %v11466_v0  ;;  %v336_v9 = vld [vmem:[%s11665_s25 + $0x28] sm:$0xff]  ;;  %v339_v11 = vld [vmem:[%s11665_s25 + $0x40] sm:$0xff] }
  0x1b   : > { %381 = vst.msk [vmem:[#allocation2 + $0xc0] sm:$0x1] %vm373_vm2, %v11466_v0  ;;  %382 = vst.msk [vmem:[#allocation2 + $0xd8] sm:$0x1] %vm373_vm2, %v11466_v0  ;;  %v631_v7 = vld [vmem:[#allocation2 + $0x1] sm:$0xff]  ;;  %v338_v12 = vld [vmem:[%s11665_s25 + $0x38] sm:$0xff] }
  0x1c   : > { %383 = vst.msk [vmem:[#allocation2 + $0xf0] sm:$0x1] %vm373_vm2, %v11466_v0  ;;  %384 = vst.msk [vmem:[#allocation2 + $0x108] sm:$0x1] %vm373_vm2, %v11466_v0  ;;  %v10163_v10 = vpack.c.bf16 %v631_v7, %v631_v7  ;;  %v341_v13 = vld [vmem:[%s11665_s25 + $0x50] sm:$0xff]  ;;  %v340_v14 = vld [vmem:[%s11665_s25 + $0x48] sm:$0xff] }
  0x1d   : > { %385 = vst.msk [vmem:[#allocation2 + $0x120] sm:$0x1] %vm373_vm2, %v11466_v0  ;;  %386 = vst.msk [vmem:[#allocation2 + $0x138] sm:$0x1] %vm373_vm2, %v11466_v0  ;;  %v632_v8 = vld [vmem:[#allocation2 + $0x9] sm:$0xff]  ;;  %v343_v15 = vld [vmem:[%s11665_s25 + $0x60] sm:$0xff] }
  0x1e   : > { %387 = vst.msk [vmem:[#allocation2 + $0x150] sm:$0x1] %vm373_vm2, %v11466_v0  ;;  %388 = vst.msk [vmem:[#allocation2 + $0x168] sm:$0x1] %vm373_vm2, %v11466_v0  ;;  %v342_v16 = vld [vmem:[%s11665_s25 + $0x58] sm:$0xff]  ;;  %759 = vrot.lane.b32.xlu0 %v10163_v10, %s11467_s26  ;;  %v10164_v17 = vpack.c.bf16 %v632_v8, %v632_v8  ;;  %v345_v18 = vld [vmem:[%s11665_s25 + $0x70] sm:$0xff] }
  0x1f   : > { %389 = vst.msk [vmem:[#allocation2 + $0x180] sm:$0x1] %vm373_vm2, %v11466_v0  ;;  %391 = vst.msk [vmem:[#allocation2 + $0x41] sm:$0x1] %vm373_vm2, %v11466_v0  ;;  %v344_v19 = vld [vmem:[%s11665_s25 + $0x68] sm:$0xff]  ;;  %v347_v20 = vld [vmem:[%s11665_s25 + $0x80] sm:$0xff] }
  0x20   : > { %392 = vst.msk [vmem:[#allocation2 + $0x59] sm:$0x1] %vm373_vm2, %v11466_v0  ;;  %393 = vst.msk [vmem:[#allocation2 + $0x71] sm:$0x1] %vm373_vm2, %v11466_v0  ;;  %v346_v21 = vld [vmem:[%s11665_s25 + $0x78] sm:$0xff]  ;;  %v349_v22 = vld [vmem:[%s11665_s25 + $0x90] sm:$0xff] }
  0x21   : > { %394 = vst.msk [vmem:[#allocation2 + $0x89] sm:$0x1] %vm373_vm2, %v11466_v0  ;;  %395 = vst.msk [vmem:[#allocation2 + $0xa1] sm:$0x1] %vm373_vm2, %v11466_v0  ;;  %v348_v23 = vld [vmem:[%s11665_s25 + $0x88] sm:$0xff]  ;;  %v351_v24 = vld [vmem:[%s11665_s25 + $0xa0] sm:$0xff] }
  0x22   : > { %396 = vst.msk [vmem:[#allocation2 + $0xb9] sm:$0x1] %vm373_vm2, %v11466_v0  ;;  %397 = vst.msk [vmem:[#allocation2 + $0xd1] sm:$0x1] %vm373_vm2, %v11466_v0  ;;  %v350_v25 = vld [vmem:[%s11665_s25 + $0x98] sm:$0xff]  ;;  %v353_v26 = vld [vmem:[%s11665_s25 + $0xb0] sm:$0xff]  ;;  %761 = vrot.lane.b32.xlu0 %v10164_v17, %s11467_s26 }
  0x23   : > { %398 = vst.msk [vmem:[#allocation2 + $0xe9] sm:$0x1] %vm373_vm2, %v11466_v0  ;;  %399 = vst.msk [vmem:[#allocation2 + $0x101] sm:$0x1] %vm373_vm2, %v11466_v0  ;;  %v352_v33 = vld [vmem:[%s11665_s25 + $0xa8] sm:$0xff]  ;;  %v355_v34 = vld [vmem:[%s11665_s25 + $0xc0] sm:$0xff] }
  0x24   : > { %400 = vst.msk [vmem:[#allocation2 + $0x119] sm:$0x1] %vm373_vm2, %v11466_v0  ;;  %401 = vst.msk [vmem:[#allocation2 + $0x131] sm:$0x1] %vm373_vm2, %v11466_v0  ;;  %v354_v41 = vld [vmem:[%s11665_s25 + $0xb8] sm:$0xff]  ;;  %v357_v42 = vld [vmem:[%s11665_s25 + $0xd0] sm:$0xff] }
  0x25   : > { %402 = vst.msk [vmem:[#allocation2 + $0x149] sm:$0x1] %vm373_vm2, %v11466_v0  ;;  %403 = vst.msk [vmem:[#allocation2 + $0x161] sm:$0x1] %vm373_vm2, %v11466_v0  ;;  %v356_v43 = vld [vmem:[%s11665_s25 + $0xc8] sm:$0xff]  ;;  %v359_v45 = vld [vmem:[%s11665_s25 + $0xe0] sm:$0xff] }
  0x26   : > { %404 = vst.msk [vmem:[#allocation2 + $0x179] sm:$0x1] %vm373_vm2, %v11466_v0  ;;  %405 = vst.msk [vmem:[#allocation2 + $0x191] sm:$0x1] %vm373_vm2, %v11466_v0  ;;  %v358_v46 = vld [vmem:[%s11665_s25 + $0xd8] sm:$0xff]  ;;  %v360_v48 = vld [vmem:[%s11665_s25 + $0xe8] sm:$0xff] }
  0x27   : > { %406 = vst.msk [vmem:[#allocation2 + $0x19] sm:$0xff] %vm363_vm0, %v331_v1  ;;  %408 = vst.msk [vmem:[#allocation2 + $0x31] sm:$0xff] %vm363_vm0, %v333_v2  ;;  %v438_v2 = vld [vmem:[#allocation2] sm:$0xff]  ;;  %vm2141_vm12 = vcmask 167056   ;;  %vm2398_vm13 = vcmask 191656   ;;  %vm2655_vm14 = vcmask 216256  }
  0x28   : > { %407 = vst.msk [vmem:[#allocation2 + $0x21] sm:$0xff] %vm363_vm0, %v332_v3  ;;  %410 = vst.msk [vmem:[#allocation2 + $0x49] sm:$0xff] %vm363_vm0, %v335_v4  ;;  %v10131_v4 = vpack.c.bf16 %v438_v2, %v438_v2  ;;  %vm3306_vm15 = vcmask 125952   ;;  %vm2822_vm1 = vcmask 220160   ;;  %vm3081_vm2 = vcmask 122880  }
  0x29   : > { %409 = vst.msk [vmem:[#allocation2 + $0x39] sm:$0xff] %vm363_vm0, %v334_v5  ;;  %412 = vst.msk [vmem:[#allocation2 + $0x61] sm:$0xff] %vm363_vm0, %v337_v6  ;;  %v439_v6 = vld [vmem:[#allocation2 + $0x8] sm:$0xff] }
  0x2a   : > { %411 = vst.msk [vmem:[#allocation2 + $0x51] sm:$0xff] %vm363_vm0, %v336_v9  ;;  %414 = vst.msk [vmem:[#allocation2 + $0x79] sm:$0xff] %vm363_vm0, %v339_v11  ;;  %v10132_v9 = vpack.c.bf16 %v439_v6, %v439_v6 }
  0x2b   : > { %413 = vst.msk [vmem:[#allocation2 + $0x69] sm:$0xff] %vm363_vm0, %v338_v12  ;;  %416 = vst.msk [vmem:[#allocation2 + $0x91] sm:$0xff] %vm363_vm0, %v341_v13 }
  0x2c   : > { %415 = vst.msk [vmem:[#allocation2 + $0x81] sm:$0xff] %vm363_vm0, %v340_v14  ;;  %418 = vst.msk [vmem:[#allocation2 + $0xa9] sm:$0xff] %vm363_vm0, %v343_v15 }
  0x2d   : > { %417 = vst.msk [vmem:[#allocation2 + $0x99] sm:$0xff] %vm363_vm0, %v342_v16  ;;  %420 = vst.msk [vmem:[#allocation2 + $0xc1] sm:$0xff] %vm363_vm0, %v345_v18 }
  0x2e   : > { %419 = vst.msk [vmem:[#allocation2 + $0xb1] sm:$0xff] %vm363_vm0, %v344_v19  ;;  %422 = vst.msk [vmem:[#allocation2 + $0xd9] sm:$0xff] %vm363_vm0, %v347_v20  ;;  %v633_v27 = vld [vmem:[#allocation2 + $0x19] sm:$0xff]  ;;  %v635_v28 = vld [vmem:[#allocation2 + $0x31] sm:$0xff] }
  0x2f   : > { %421 = vst.msk [vmem:[#allocation2 + $0xc9] sm:$0xff] %vm363_vm0, %v346_v21  ;;  %424 = vst.msk [vmem:[#allocation2 + $0xf1] sm:$0xff] %vm363_vm0, %v349_v22  ;;  %v634_v29 = vld [vmem:[#allocation2 + $0x21] sm:$0xff]  ;;  %v11713_v30 = vpack.c.bf16 %v633_v27, %v633_v27  ;;  %v11715_v31 = vpack.c.bf16 %v635_v28, %v635_v28  ;;  %v637_v32 = vld [vmem:[#allocation2 + $0x49] sm:$0xff] }
  0x30   : > { %423 = vst.msk [vmem:[#allocation2 + $0xe1] sm:$0xff] %vm363_vm0, %v348_v23  ;;  %426 = vst.msk [vmem:[#allocation2 + $0x109] sm:$0xff] %vm363_vm0, %v351_v24  ;;  %v11721_v35 = vpack.c.bf16 %v634_v29, %v634_v29  ;;  %v636_v36 = vld [vmem:[#allocation2 + $0x39] sm:$0xff]  ;;  %v11727_v37 = vpack.c.bf16 %v637_v32, %v637_v32  ;;  %v639_v38 = vld [vmem:[#allocation2 + $0x61] sm:$0xff] }
  0x31   : > { %425 = vst.msk [vmem:[#allocation2 + $0xf9] sm:$0xff] %vm363_vm0, %v350_v25  ;;  %428 = vst.msk [vmem:[#allocation2 + $0x121] sm:$0xff] %vm363_vm0, %v353_v26  ;;  %763 = vrot.lane.b32.xlu1 %v11713_v30, %s11467_s26  ;;  %767 = vrot.lane.b32.xlu0 %v11715_v31, %s11467_s26  ;;  %v11731_v39 = vpack.c.bf16 %v636_v36, %v636_v36  ;;  %v638_v40 = vld [vmem:[#allocation2 + $0x51] sm:$0xff]  ;;  %v11738_v44 = vpack.c.bf16 %v639_v38, %v639_v38  ;;  %v641_v47 = vld [vmem:[#allocation2 + $0x79] sm:$0xff] }
  0x32   : > { %427 = vst.msk [vmem:[#allocation2 + $0x111] sm:$0xff] %vm363_vm0, %v352_v33  ;;  %430 = vst.msk [vmem:[#allocation2 + $0x139] sm:$0xff] %vm363_vm0, %v355_v34  ;;  %v11750_v49 = vpack.c.bf16 %v638_v40, %v638_v40  ;;  %v640_v50 = vld [vmem:[#allocation2 + $0x69] sm:$0xff]  ;;  %v11755_v51 = vpack.c.bf16 %v641_v47, %v641_v47  ;;  %v643_v52 = vld [vmem:[#allocation2 + $0x91] sm:$0xff] }
  0x33   : > { %429 = vst.msk [vmem:[#allocation2 + $0x129] sm:$0xff] %vm363_vm0, %v354_v41  ;;  %432 = vst.msk [vmem:[#allocation2 + $0x151] sm:$0xff] %vm363_vm0, %v357_v42  ;;  %v1145_v53 = vld [vmem:[#allocation2 + $0x18] sm:$0xff]  ;;  %v11759_v54 = vpack.c.bf16 %v640_v50, %v640_v50  ;;  %v1147_v56 = vld [vmem:[#allocation2 + $0x30] sm:$0xff]  ;;  %v10175_v63 = vpack.c.bf16 %v643_v52, %v643_v52 }
  0x34   : > { %431 = vst.msk [vmem:[#allocation2 + $0x141] sm:$0xff] %vm363_vm0, %v356_v43  ;;  %434 = vst.msk [vmem:[#allocation2 + $0x169] sm:$0xff] %vm363_vm0, %v359_v45  ;;  %v11761_v55 = vpack.c.bf16 %v1145_v53, %v1145_v53  ;;  %v1146_v57 = vld [vmem:[#allocation2 + $0x20] sm:$0xff]  ;;  %v1148_v58 = vld [vmem:[#allocation2 + $0x38] sm:$0xff]  ;;  %v11763_v60 = vpack.c.bf16 %v1147_v56, %v1147_v56 }
  0x35   : > { %765 = vrot.lane.b32.xlu1 %v11721_v35, %s11467_s26  ;;  %771 = vrot.lane.b32.xlu0 %v11727_v37, %s11467_s26  ;;  %433 = vst.msk [vmem:[#allocation2 + $0x159] sm:$0xff] %vm363_vm0, %v358_v46  ;;  %435 = vst.msk [vmem:[#allocation2 + $0x171] sm:$0xff] %vm363_vm0, %v360_v48  ;;  %v642_v59 = vld [vmem:[#allocation2 + $0x81] sm:$0xff]  ;;  %v11765_v61 = vpack.c.bf16 %v1146_v57, %v1146_v57  ;;  %v11767_v62 = vpack.c.bf16 %v1148_v58, %v1148_v58  ;;  %v645_v1 = vld [vmem:[#allocation2 + $0xa9] sm:$0xff] }
  0x36   : > { %601 = vst.msk [vmem:[#allocation5 + $0x18] sm:$0xf] %vm598_vm3, %v11761_v55  ;;  %v11773_v3 = vld [vmem:[#allocation2 + $0x99] sm:$0xff]  ;;  %v1919_v5 = vld [vmem:[#allocation2 + $0x48] sm:$0xff]  ;;  %603 = vst.msk [vmem:[#allocation5 + $0x30] sm:$0xf] %vm598_vm3, %v11763_v60  ;;  %v11783_v7 = vpack.c.bf16 %v642_v59, %v642_v59  ;;  %v10177_v20 = vpack.c.bf16 %v645_v1, %v645_v1 }
  0x37   : > { %602 = vst.msk [vmem:[#allocation5 + $0x24] sm:$0xf] %vm598_vm3, %v11765_v61  ;;  %604 = vst.msk [vmem:[#allocation5 + $0x3c] sm:$0xf] %vm598_vm3, %v11767_v62  ;;  %v11785_v8 = vpack.c.bf16 %v1919_v5, %v1919_v5  ;;  %v1920_v10 = vld [vmem:[#allocation2 + $0x50] sm:$0xff]  ;;  %v446_v11 = vld [vmem:[#allocation2 + $0x60] sm:$0xff]  ;;  %v10176_v38 = vpack.c.bf16 %v11773_v3, %v11773_v3 }
  0x38   : > { %v448_v12 = vld [vmem:[#allocation2 + $0x78] sm:$0xff]  ;;  %v647_v13 = vld [vmem:[#allocation2 + $0xc1] sm:$0xff]  ;;  %599 = vst.msk [vmem:[#allocation5] sm:$0xf] %vm598_vm3, %v10131_v4  ;;  %v11788_v14 = vpack.c.bf16 %v1920_v10, %v1920_v10  ;;  %v11790_v15 = vpack.c.bf16 %v446_v11, %v446_v11  ;;  %v450_v18 = vld [vmem:[#allocation2 + $0x90] sm:$0xff] }
  0x39   : > { %769 = vrot.lane.b32.xlu1 %v11731_v39, %s11467_s26  ;;  %775 = vrot.lane.b32.xlu0 %v11738_v44, %s11467_s26  ;;  %v11792_v16 = vpack.c.bf16 %v448_v12, %v448_v12  ;;  %v447_v17 = vld [vmem:[#allocation2 + $0x68] sm:$0xff]  ;;  %v449_v19 = vld [vmem:[#allocation2 + $0x80] sm:$0xff]  ;;  %600 = vst.msk [vmem:[#allocation5 + $0xc] sm:$0xf] %vm598_vm3, %v10132_v9  ;;  %605 = vst.msk [vmem:[#allocation5 + $0x48] sm:$0xf] %vm598_vm3, %v11785_v8  ;;  %v11800_v22 = vpack.c.bf16 %v450_v18, %v450_v18 }
  0x3a   : > { %v11798_v21 = vpack.c.bf16 %v447_v17, %v447_v17  ;;  %v11802_v23 = vpack.c.bf16 %v449_v19, %v449_v19  ;;  %v452_v24 = vld [vmem:[#allocation2 + $0xa8] sm:$0xff]  ;;  %v451_v25 = vld [vmem:[#allocation2 + $0x98] sm:$0xff]  ;;  %v454_v26 = vld [vmem:[#allocation2 + $0xc0] sm:$0xff]  ;;  %607 = vst.msk [vmem:[#allocation5 + $0x60] sm:$0xf] %vm598_vm3, %v11790_v15  ;;  %v10179_v50 = vpack.c.bf16 %v647_v13, %v647_v13 }
  0x3b   : > { %v646_v27 = vld [vmem:[#allocation2 + $0xb1] sm:$0xff]  ;;  %606 = vst.msk [vmem:[#allocation5 + $0x54] sm:$0xf] %vm598_vm3, %v11788_v14  ;;  %609 = vst.msk [vmem:[#allocation5 + $0x78] sm:$0xf] %vm598_vm3, %v11792_v16  ;;  %v11810_v28 = vpack.c.bf16 %v452_v24, %v452_v24  ;;  %v11812_v29 = vpack.c.bf16 %v451_v25, %v451_v25  ;;  %v11814_v32 = vpack.c.bf16 %v454_v26, %v454_v26  ;;  %v455_v36 = vld [vmem:[#allocation2 + $0xc8] sm:$0xff] }
  0x3c   : > { %v453_v33 = vld [vmem:[#allocation2 + $0xb0] sm:$0xff]  ;;  %v456_v34 = vld [vmem:[#allocation2 + $0xd8] sm:$0xff]  ;;  %608 = vst.msk [vmem:[#allocation5 + $0x6c] sm:$0xf] %vm598_vm3, %v11798_v21  ;;  %611 = vst.msk [vmem:[#allocation5 + $0x90] sm:$0xf] %vm598_vm3, %v11800_v22  ;;  %v11830_v42 = vpack.c.bf16 %v455_v36, %v455_v36  ;;  %v10178_v57 = vpack.c.bf16 %v646_v27, %v646_v27 }
  0x3d   : > { %773 = vrot.lane.b32.xlu1 %v11750_v49, %s11467_s26  ;;  %779 = vrot.lane.b32.xlu0 %v11755_v51, %s11467_s26  ;;  %610 = vst.msk [vmem:[#allocation5 + $0x84] sm:$0xf] %vm598_vm3, %v11802_v23  ;;  %v11826_v40 = vpack.c.bf16 %v453_v33, %v453_v33  ;;  %v11828_v41 = vpack.c.bf16 %v456_v34, %v456_v34  ;;  %v458_v43 = vld [vmem:[#allocation2 + $0xf0] sm:$0xff]  ;;  %v457_v45 = vld [vmem:[#allocation2 + $0xe0] sm:$0xff]  ;;  %613 = vst.msk [vmem:[#allocation5 + $0xa8] sm:$0xf] %vm598_vm3, %v11810_v28 }
  0x3e   : > { %v649_v46 = vld [vmem:[#allocation2 + $0xd9] sm:$0xff]  ;;  %612 = vst.msk [vmem:[#allocation5 + $0x9c] sm:$0xf] %vm598_vm3, %v11812_v29  ;;  %615 = vst.msk [vmem:[#allocation5 + $0xc0] sm:$0xf] %vm598_vm3, %v11814_v32  ;;  %v11838_v47 = vpack.c.bf16 %v458_v43, %v458_v43  ;;  %v11840_v48 = vpack.c.bf16 %v457_v45, %v457_v45  ;;  %v648_v52 = vld [vmem:[#allocation2 + $0xc9] sm:$0xff] }
  0x3f   : > { %614 = vst.msk [vmem:[#allocation5 + $0xb4] sm:$0xf] %vm598_vm3, %v11826_v40  ;;  %617 = vst.msk [vmem:[#allocation5 + $0xd8] sm:$0xf] %vm598_vm3, %v11828_v41  ;;  %v460_v53 = vld [vmem:[#allocation2 + $0x108] sm:$0xff]  ;;  %v459_v56 = vld [vmem:[#allocation2 + $0xf8] sm:$0xff]  ;;  %v10181_v1 = vpack.c.bf16 %v649_v46, %v649_v46  ;;  %v10180_v5 = vpack.c.bf16 %v648_v52, %v648_v52 }
  0x40   : > { %616 = vst.msk [vmem:[#allocation5 + $0xcc] sm:$0xf] %vm598_vm3, %v11830_v42  ;;  %619 = vst.msk [vmem:[#allocation5 + $0xf0] sm:$0xf] %vm598_vm3, %v11838_v47  ;;  %v11854_v58 = vpack.c.bf16 %v460_v53, %v460_v53  ;;  %v11856_v59 = vpack.c.bf16 %v459_v56, %v459_v56  ;;  %v650_v2 = vld [vmem:[#allocation2 + $0xe1] sm:$0xff]  ;;  %v461_v4 = vld [vmem:[#allocation2 + $0x110] sm:$0xff] }
  0x41   : > { %777 = vrot.lane.b32.xlu1 %v11759_v54, %s11467_s26  ;;  %783 = vrot.lane.b32.xlu0 %v10175_v63, %s11467_s26  ;;  %618 = vst.msk [vmem:[#allocation5 + $0xe4] sm:$0xf] %vm598_vm3, %v11840_v48  ;;  %v651_v63 = vld [vmem:[#allocation2 + $0xf1] sm:$0xff]  ;;  %v462_v3 = vld [vmem:[#allocation2 + $0x120] sm:$0xff]  ;;  %v11864_v9 = vpack.c.bf16 %v461_v4, %v461_v4  ;;  %v653_v10 = vld [vmem:[#allocation2 + $0x109] sm:$0xff]  ;;  %v10182_v18 = vpack.c.bf16 %v650_v2, %v650_v2 }
  0x42   : > { %621 = vst.msk [vmem:[#allocation5 + $0x108] sm:$0xf] %vm598_vm3, %v11854_v58  ;;  %620 = vst.msk [vmem:[#allocation5 + $0xfc] sm:$0xf] %vm598_vm3, %v11856_v59  ;;  %v10155_v6 = vpack.c.bf16 %v462_v3, %v462_v3  ;;  %v10183_v11 = vpack.c.bf16 %v651_v63, %v651_v63  ;;  %v652_v12 = vld [vmem:[#allocation2 + $0xf9] sm:$0xff]  ;;  %v463_v17 = vld [vmem:[#allocation2 + $0x128] sm:$0xff]  ;;  %v10185_v25 = vpack.c.bf16 %v653_v10, %v653_v10 }
  0x43   : > { %622 = vst.msk [vmem:[#allocation5 + $0x114] sm:$0xf] %vm598_vm3, %v11864_v9  ;;  %v464_v13 = vld [vmem:[#allocation2 + $0x138] sm:$0xff]  ;;  %v655_v24 = vld [vmem:[#allocation2 + $0x121] sm:$0xff]  ;;  %v466_v27 = vld [vmem:[#allocation2 + $0x150] sm:$0xff]  ;;  %v10184_v34 = vpack.c.bf16 %v652_v12, %v652_v12 }
  0x44   : > { %623 = vst.msk [vmem:[#allocation5 + $0x120] sm:$0xf] %vm598_vm3, %v10155_v6  ;;  %v10157_v19 = vpack.c.bf16 %v464_v13, %v464_v13  ;;  %v654_v26 = vld [vmem:[#allocation2 + $0x111] sm:$0xff]  ;;  %v465_v33 = vld [vmem:[#allocation2 + $0x140] sm:$0xff]  ;;  %v10159_v36 = vpack.c.bf16 %v466_v27, %v466_v27  ;;  %v10187_v45 = vpack.c.bf16 %v655_v24, %v655_v24  ;;  %v468_v46 = vld [vmem:[#allocation2 + $0x168] sm:$0xff] }
  0x45   : > { %781 = vrot.lane.b32.xlu1 %v11783_v7, %s11467_s26  ;;  %787 = vrot.lane.b32.xlu0 %v10177_v20, %s11467_s26  ;;  %v10156_v20 = vpack.c.bf16 %v463_v17, %v463_v17  ;;  %v657_v43 = vld [vmem:[#allocation2 + $0x139] sm:$0xff]  ;;  %v10186_v52 = vpack.c.bf16 %v654_v26, %v654_v26  ;;  %v10161_v53 = vpack.c.bf16 %v468_v46, %v468_v46  ;;  %v469_v2 = vld [vmem:[#allocation2 + $0x170] sm:$0xff]  ;;  %v888_v17 = vld [vmem:[#allocation2 + $0x2] sm:$0xff] }
  0x46   : > { %625 = vst.msk [vmem:[#allocation5 + $0x138] sm:$0xf] %vm598_vm3, %v10157_v19  ;;  %627 = vst.msk [vmem:[#allocation5 + $0x150] sm:$0xf] %vm598_vm3, %v10159_v36  ;;  %v10189_v63 = vpack.c.bf16 %v657_v43, %v657_v43  ;;  %v10162_v4 = vpack.c.bf16 %v469_v2, %v469_v2  ;;  %v661_v10 = vld [vmem:[#allocation2 + $0x169] sm:$0xff]  ;;  %v660_v12 = vld [vmem:[#allocation2 + $0x159] sm:$0xff] }
  0x47   : > { %624 = vst.msk [vmem:[#allocation5 + $0x12c] sm:$0xf] %vm598_vm3, %v10156_v20  ;;  %629 = vst.msk [vmem:[#allocation5 + $0x168] sm:$0xf] %vm598_vm3, %v10161_v53  ;;  %v10193_v13 = vpack.c.bf16 %v661_v10, %v661_v10  ;;  %v662_v19 = vld [vmem:[#allocation2 + $0x171] sm:$0xff]  ;;  %v10195_v20 = vpack.c.bf16 %v888_v17, %v888_v17  ;;  %v890_v24 = vld [vmem:[#allocation2 + $0x1a] sm:$0xff] }
  0x48   : > { %630 = vst.msk [vmem:[#allocation5 + $0x174] sm:$0xf] %vm598_vm3, %v10162_v4  ;;  %v889_v26 = vld [vmem:[#allocation2 + $0xa] sm:$0xff]  ;;  %v10197_v27 = vpack.c.bf16 %v890_v24, %v890_v24  ;;  %v891_v36 = vld [vmem:[#allocation2 + $0x22] sm:$0xff]  ;;  %v893_v46 = vld [vmem:[#allocation2 + $0x3a] sm:$0xff] }
  0x49   : > { %785 = vrot.lane.b32.xlu1 %v10176_v38, %s11467_s26  ;;  %791 = vrot.lane.b32.xlu0 %v10179_v50, %s11467_s26  ;;  %v10158_v38 = vpack.c.bf16 %v465_v33, %v465_v33  ;;  %v467_v50 = vld [vmem:[#allocation2 + $0x158] sm:$0xff]  ;;  %v894_v43 = vld [vmem:[#allocation2 + $0x4a] sm:$0xff]  ;;  %v11901_v53 = vpack.c.bf16 %v893_v46, %v893_v46  ;;  %3072 = vst.msk [vmem:[#allocation3] sm:$0xff] %vm3071_vm5, %v11466_v0  ;;  %3073 = vst.msk [vmem:[#allocation3 + $0x8] sm:$0xff] %vm3071_vm5, %v11466_v0 }
  0x4a   : > { %v10160_v56 = vpack.c.bf16 %v467_v50, %v467_v50  ;;  %v892_v33 = vld [vmem:[#allocation2 + $0x32] sm:$0xff]  ;;  %v11898_v50 = vpack.c.bf16 %v894_v43, %v894_v43  ;;  %v897_v2 = vld [vmem:[#allocation2 + $0x6a] sm:$0xff]  ;;  %3077 = vst.msk [vmem:[#allocation3 + $0x198] sm:$0xff] %vm3071_vm5, %v11466_v0  ;;  %3078 = vst.msk [vmem:[#allocation3 + $0x1a0] sm:$0xff] %vm3071_vm5, %v11466_v0 }
  0x4b   : > { %626 = vst.msk [vmem:[#allocation5 + $0x144] sm:$0xf] %vm598_vm3, %v10158_v38  ;;  %v11893_v38 = vpack.c.bf16 %v892_v33, %v892_v33  ;;  %v11917_v4 = vpack.c.bf16 %v897_v2, %v897_v2 }
  0x4c   : > { %628 = vst.msk [vmem:[#allocation5 + $0x15c] sm:$0xf] %vm598_vm3, %v10160_v56  ;;  %v895_v56 = vld [vmem:[#allocation2 + $0x52] sm:$0xff]  ;;  %vm5827_vm3 = vcmask 261120  }
  0x4d   : > { %789 = vrot.lane.b32.xlu1 %v10178_v57, %s11467_s26  ;;  %795 = vrot.lane.b32.xlu0 %v10181_v1, %s11467_s26  ;;  %v656_v57 = vld [vmem:[#allocation2 + $0x129] sm:$0xff]  ;;  %v659_v1 = vld [vmem:[#allocation2 + $0x151] sm:$0xff]  ;;  %3099 = vst.msk [vmem:[#allocation3 + $0x41] sm:$0x1] %vm3081_vm2, %v11466_v0  ;;  %3082 = vst.msk [vmem:[#allocation3 + $0x18] sm:$0x1] %vm3081_vm2, %v11466_v0 }
  0x4e   : > { %v10188_v3 = vpack.c.bf16 %v656_v57, %v656_v57  ;;  %v10191_v6 = vpack.c.bf16 %v659_v1, %v659_v1  ;;  %v11909_v1 = vpack.c.bf16 %v895_v56, %v895_v56  ;;  %3083 = vst.msk [vmem:[#allocation3 + $0x30] sm:$0x1] %vm3081_vm2, %v11466_v0  ;;  %3084 = vst.msk [vmem:[#allocation3 + $0x48] sm:$0x1] %vm3081_vm2, %v11466_v0 }
  0x4f   : > { %3085 = vst.msk [vmem:[#allocation3 + $0x60] sm:$0x1] %vm3081_vm2, %v11466_v0  ;;  %3086 = vst.msk [vmem:[#allocation3 + $0x78] sm:$0x1] %vm3081_vm2, %v11466_v0 }
  0x50   : > { %3087 = vst.msk [vmem:[#allocation3 + $0x90] sm:$0x1] %vm3081_vm2, %v11466_v0  ;;  %3088 = vst.msk [vmem:[#allocation3 + $0xa8] sm:$0x1] %vm3081_vm2, %v11466_v0 }
  0x51   : > { %793 = vrot.lane.b32.xlu1 %v10180_v5, %s11467_s26  ;;  %799 = vrot.lane.b32.xlu0 %v10183_v11, %s11467_s26  ;;  %v658_v5 = vld [vmem:[#allocation2 + $0x141] sm:$0xff]  ;;  %3089 = vst.msk [vmem:[#allocation3 + $0xc0] sm:$0x1] %vm3081_vm2, %v11466_v0  ;;  %3090 = vst.msk [vmem:[#allocation3 + $0xd8] sm:$0x1] %vm3081_vm2, %v11466_v0 }
  0x52   : > { %v10190_v11 = vpack.c.bf16 %v658_v5, %v658_v5  ;;  %v899_v5 = vld [vmem:[#allocation2 + $0x82] sm:$0xff]  ;;  %3091 = vst.msk [vmem:[#allocation3 + $0xf0] sm:$0x1] %vm3081_vm2, %v11466_v0  ;;  %3092 = vst.msk [vmem:[#allocation3 + $0x108] sm:$0x1] %vm3081_vm2, %v11466_v0 }
  0x53   : > { %3093 = vst.msk [vmem:[#allocation3 + $0x120] sm:$0x1] %vm3081_vm2, %v11466_v0  ;;  %3094 = vst.msk [vmem:[#allocation3 + $0x138] sm:$0x1] %vm3081_vm2, %v11466_v0 }
  0x54   : > { %3095 = vst.msk [vmem:[#allocation3 + $0x150] sm:$0x1] %vm3081_vm2, %v11466_v0  ;;  %3096 = vst.msk [vmem:[#allocation3 + $0x168] sm:$0x1] %vm3081_vm2, %v11466_v0 }
  0x55   : > { %797 = vrot.lane.b32.xlu1 %v10182_v18, %s11467_s26  ;;  %803 = vrot.lane.b32.xlu0 %v10185_v25, %s11467_s26  ;;  %v10192_v18 = vpack.c.bf16 %v660_v12, %v660_v12  ;;  %v10194_v25 = vpack.c.bf16 %v662_v19, %v662_v19  ;;  %3097 = vst.msk [vmem:[#allocation3 + $0x180] sm:$0x1] %vm3081_vm2, %v11466_v0  ;;  %3098 = vst.msk [vmem:[#allocation3 + $0x29] sm:$0x1] %vm3081_vm2, %v11466_v0 }
  0x56   : > { %3100 = vst.msk [vmem:[#allocation3 + $0x59] sm:$0x1] %vm3081_vm2, %v11466_v0  ;;  %3101 = vst.msk [vmem:[#allocation3 + $0x71] sm:$0x1] %vm3081_vm2, %v11466_v0 }
  0x57   : > { %3102 = vst.msk [vmem:[#allocation3 + $0x89] sm:$0x1] %vm3081_vm2, %v11466_v0  ;;  %3103 = vst.msk [vmem:[#allocation3 + $0xa1] sm:$0x1] %vm3081_vm2, %v11466_v0 }
  0x58   : > { %3104 = vst.msk [vmem:[#allocation3 + $0xb9] sm:$0x1] %vm3081_vm2, %v11466_v0  ;;  %3105 = vst.msk [vmem:[#allocation3 + $0xd1] sm:$0x1] %vm3081_vm2, %v11466_v0 }
  0x59   : > { %801 = vrot.lane.b32.xlu1 %v10184_v34, %s11467_s26  ;;  %807 = vrot.lane.b32.xlu0 %v10187_v45, %s11467_s26  ;;  %v10196_v34 = vpack.c.bf16 %v889_v26, %v889_v26  ;;  %v10198_v45 = vpack.c.bf16 %v891_v36, %v891_v36  ;;  %3106 = vst.msk [vmem:[#allocation3 + $0xe9] sm:$0x1] %vm3081_vm2, %v11466_v0  ;;  %3107 = vst.msk [vmem:[#allocation3 + $0x101] sm:$0x1] %vm3081_vm2, %v11466_v0 }
  0x5a   : > { %3108 = vst.msk [vmem:[#allocation3 + $0x119] sm:$0x1] %vm3081_vm2, %v11466_v0  ;;  %3109 = vst.msk [vmem:[#allocation3 + $0x131] sm:$0x1] %vm3081_vm2, %v11466_v0 }
  0x5b   : > { %3110 = vst.msk [vmem:[#allocation3 + $0x149] sm:$0x1] %vm3081_vm2, %v11466_v0  ;;  %3111 = vst.msk [vmem:[#allocation3 + $0x161] sm:$0x1] %vm3081_vm2, %v11466_v0 }
  0x5c   : > { %3112 = vst.msk [vmem:[#allocation3 + $0x179] sm:$0x1] %vm3081_vm2, %v11466_v0  ;;  %3113 = vst.msk [vmem:[#allocation3 + $0x191] sm:$0x1] %vm3081_vm2, %v11466_v0  ;;  %vm6833_vm2 = vcmask 1044224  }
  0x5d   : > { %805 = vrot.lane.b32.xlu1 %v10186_v52, %s11467_s26  ;;  %811 = vrot.lane.b32.xlu0 %v10189_v63, %s11467_s26  ;;  %v896_v52 = vld [vmem:[#allocation2 + $0x62] sm:$0xff]  ;;  %v898_v63 = vld [vmem:[#allocation2 + $0x7a] sm:$0xff]  ;;  %5828 = vst.msk [vmem:[#allocation4] sm:$0xff] %vm5827_vm3, %v11466_v0  ;;  %5829 = vst.msk [vmem:[#allocation4 + $0x8] sm:$0xff] %vm5827_vm3, %v11466_v0 }
  0x5e   : > { %v11905_v57 = vpack.c.bf16 %v896_v52, %v896_v52  ;;  %5833 = vst.msk [vmem:[#allocation4 + $0x198] sm:$0xff] %vm5827_vm3, %v11466_v0  ;;  %5834 = vst.msk [vmem:[#allocation4 + $0x1a0] sm:$0xff] %vm5827_vm3, %v11466_v0 }
  0x61   : > { %809 = vrot.lane.b32.xlu1 %v10188_v3, %s11467_s26  ;;  %815 = vrot.lane.b32.xlu0 %v10191_v6, %s11467_s26  ;;  %v11913_v3 = vpack.c.bf16 %v898_v63, %v898_v63  ;;  %v11923_v6 = vpack.c.bf16 %v899_v5, %v899_v5 }
  0x65   : > { %813 = vrot.lane.b32.xlu1 %v10190_v11, %s11467_s26  ;;  %819 = vrot.lane.b32.xlu0 %v10193_v13, %s11467_s26 }
  0x69   : > { %817 = vrot.lane.b32.xlu1 %v10192_v18, %s11467_s26  ;;  %1016 = vrot.lane.b32.xlu0 %v10195_v20, %s11468_s27  ;;  %v11289_v18 = vld [vmem:[%s15069_s1] sm:$0xff]  }
  0x6d   : > { %821 = vrot.lane.b32.xlu1 %v10194_v25, %s11467_s26  ;;  %1020 = vrot.lane.b32.xlu0 %v10197_v27, %s11468_s27  ;;  %s11485_s26 = smov [#allocation6]  }
  0x71   : > { %1018 = vrot.lane.b32.xlu1 %v10196_v34, %s11468_s27  ;;  %1024 = vrot.lane.b32.xlu0 %v11893_v38, %s11468_s27 }
  0x75   : > { %1022 = vrot.lane.b32.xlu1 %v10198_v45, %s11468_s27  ;;  %1028 = vrot.lane.b32.xlu0 %v11898_v50, %s11468_s27 }
  0x79   : > { %1026 = vrot.lane.b32.xlu1 %v11901_v53, %s11468_s27  ;;  %1032 = vrot.lane.b32.xlu0 %v11905_v57, %s11468_s27 }
  0x7d   : > { %1030 = vrot.lane.b32.xlu1 %v11909_v1, %s11468_s27  ;;  %1036 = vrot.lane.b32.xlu0 %v11913_v3, %s11468_s27 }
  0x81   : > { %1034 = vrot.lane.b32.xlu1 %v11917_v4, %s11468_s27  ;;  %1273 = vrot.lane.b32.xlu0 %v11761_v55, %s11469_s28 }
  0x85   : > { %1038 = vrot.lane.b32.xlu1 %v11923_v6, %s11468_s27  ;;  %1277 = vrot.lane.b32.xlu0 %v11763_v60, %s11469_s28 }
  0x89   : > { %1275 = vrot.lane.b32.xlu1 %v11765_v61, %s11469_s28  ;;  %1530 = vrot.lane.b32.xlu0 %v11713_v30, %s11470_s29  ;;  %v11288_v61 = vld [vmem:[%s15069_s1 + $0x8] sm:$0x3f]  }
  0x8d   : > { %1279 = vrot.lane.b32.xlu1 %v11767_v62, %s11469_s28  ;;  %1534 = vrot.lane.b32.xlu0 %v11715_v31, %s11470_s29 }
  0x90   : > { %v760_v30 = vpop.permute.xlu0 %759 }
  0x91   : > { %1532 = vrot.lane.b32.xlu1 %v11721_v35, %s11470_s29  ;;  %1787 = vrot.lane.b32.xlu0 %v10197_v27, %s11471_s14  ;;  %856 = vst.msk [vmem:[#allocation5] sm:$0xf] %vm855_vm4, %v760_v30 }
  0x94   : > { %v762_v35 = vpop.permute.xlu0 %761 }
  0x95   : > { %1536 = vrot.lane.b32.xlu1 %v11731_v39, %s11470_s29  ;;  %1791 = vrot.lane.b32.xlu0 %v11893_v38, %s11471_s14  ;;  %857 = vst.msk [vmem:[#allocation5 + $0xc] sm:$0xf] %vm855_vm4, %v762_v35 }
  0x99   : > { %1789 = vrot.lane.b32.xlu1 %v10198_v45, %s11471_s14  ;;  %2045 = vrot.lane.b32.xlu0 %v11763_v60, %s11472_s16 }
  0x9d   : > { %1793 = vrot.lane.b32.xlu1 %v11901_v53, %s11471_s14  ;;  %2049 = vrot.lane.b32.xlu0 %v11785_v8, %s11472_s16 }
  0xa1   : > { %2047 = vrot.lane.b32.xlu1 %v11767_v62, %s11472_s16  ;;  %2302 = vrot.lane.b32.xlu0 %v11715_v31, %s11473_s17  ;;  %v11474_v62 = vmov 65535  }
  0xa2   : > { %v2873_v10 = vsel %vm2871_vm6, 4294967295, %v11474_v62  ;;  %v1669_v62 = vld [vmem:[#allocation2 + $0x92] sm:$0xff]  ;;  %vm3820_vm6 = vcmask 388352  }
  0xa3   : > { %v764_v55 = vpop.permute.xlu1 %763  ;;  %v768_v60 = vpop.permute.xlu0 %767  ;;  %v2874_v11 = vsel %vm2872_vm7, %v2873_v10, 0  ;;  %vm4077_vm7 = vcmask 519552  }
  0xa4   : > { %858 = vst.msk [vmem:[#allocation5 + $0x18] sm:$0xf] %vm855_vm4, %v764_v55  ;;  %860 = vst.msk [vmem:[#allocation5 + $0x30] sm:$0xf] %vm855_vm4, %v768_v60  ;;  %v2876_v12 = vand.u32 %v11288_v61, %v2874_v11  ;;  %v1413_v61 = vld [vmem:[#allocation2 + $0x99] sm:$0xff] }
  0xa5   : > { %2051 = vrot.lane.b32.xlu1 %v11788_v14, %s11472_s16  ;;  %2306 = vrot.lane.b32.xlu0 %v11727_v37, %s11473_s17 }
  0xa6   : > { %11146 = vmatprep.subr.bf16.mxu0 %v2876_v12 }
  0xa7   : > { %v766_v31 = vpop.permute.xlu1 %765  ;;  %v772_v13 = vpop.permute.xlu0 %771  ;;  %11147 = vmatpush3.bf16.msra.mxu0 %v2876_v12  ;;  %v10301_v12 = vpack.c.bf16 %v1669_v62, %v1669_v62 }
  0xa8   : > { %859 = vst.msk [vmem:[#allocation5 + $0x24] sm:$0xf] %vm855_vm4, %v766_v31  ;;  %862 = vst.msk [vmem:[#allocation5 + $0x48] sm:$0xf] %vm855_vm4, %v772_v13  ;;  %11148 = vmatprep.subr.bf16.mxu0 %v11289_v18  ;;  %v10270_v31 = vpack.c.bf16 %v1413_v61, %v1413_v61 }
  0xa9   : > { %2304 = vrot.lane.b32.xlu1 %v11731_v39, %s11473_s17  ;;  %2559 = vrot.lane.b32.xlu0 %v11893_v38, %s11475_s23 }
  0xab   : > { %v770_v17 = vpop.permute.xlu1 %769  ;;  %v776_v19 = vpop.permute.xlu0 %775  ;;  %11149 = vmatpush3.bf16.msra.mxu0 %v11289_v18 }
  0xac   : > { %861 = vst.msk [vmem:[#allocation5 + $0x3c] sm:$0xf] %vm855_vm4, %v770_v17  ;;  %864 = vst.msk [vmem:[#allocation5 + $0x60] sm:$0xf] %vm855_vm4, %v776_v19  ;;  %v1670_v17 = vld [vmem:[#allocation2 + $0x9a] sm:$0xff] }
  0xad   : > { %2308 = vrot.lane.b32.xlu1 %v11750_v49, %s11473_s17  ;;  %2563 = vrot.lane.b32.xlu0 %v11898_v50, %s11475_s23 }
  0xaf   : > { %v774_v39 = vpop.permute.xlu1 %773  ;;  %v780_v20 = vpop.permute.xlu0 %779 }
  0xb0   : > { %863 = vst.msk [vmem:[#allocation5 + $0x54] sm:$0xf] %vm855_vm4, %v774_v39  ;;  %866 = vst.msk [vmem:[#allocation5 + $0x78] sm:$0xf] %vm855_vm4, %v780_v20 }
  0xb1   : > { %2561 = vrot.lane.b32.xlu1 %v11901_v53, %s11475_s23  ;;  %1281 = vrot.lane.b32.xlu0 %v11785_v8, %s11469_s28 }
  0xb3   : > { %v778_v24 = vpop.permute.xlu1 %777  ;;  %v784_v25 = vpop.permute.xlu0 %783 }
  0xb4   : > { %865 = vst.msk [vmem:[#allocation5 + $0x6c] sm:$0xf] %vm855_vm4, %v778_v24  ;;  %868 = vst.msk [vmem:[#allocation5 + $0x90] sm:$0xf] %vm855_vm4, %v784_v25 }
  0xb5   : > { %2565 = vrot.lane.b32.xlu1 %v11909_v1, %s11475_s23  ;;  %1285 = vrot.lane.b32.xlu0 %v11790_v15, %s11469_s28 }
  0xb7   : > { %v782_v26 = vpop.permute.xlu1 %781  ;;  %v788_v27 = vpop.permute.xlu0 %787 }
  0xb8   : > { %867 = vst.msk [vmem:[#allocation5 + $0x84] sm:$0xf] %vm855_vm4, %v782_v26  ;;  %870 = vst.msk [vmem:[#allocation5 + $0xa8] sm:$0xf] %vm855_vm4, %v788_v27 }
  0xb9   : > { %1283 = vrot.lane.b32.xlu1 %v11788_v14, %s11469_s28  ;;  %1538 = vrot.lane.b32.xlu0 %v11727_v37, %s11470_s29 }
  0xbb   : > { %v786_v8 = vpop.permute.xlu1 %785  ;;  %v792_v33 = vpop.permute.xlu0 %791 }
  0xbc   : > { %869 = vst.msk [vmem:[#allocation5 + $0x9c] sm:$0xf] %vm855_vm4, %v786_v8  ;;  %872 = vst.msk [vmem:[#allocation5 + $0xc0] sm:$0xf] %vm855_vm4, %v792_v33  ;;  %v2185_v8 = vld [vmem:[#allocation2 + $0xb1] sm:$0xff] }
  0xbd   : > { %1287 = vrot.lane.b32.xlu1 %v11798_v21, %s11469_s28  ;;  %1542 = vrot.lane.b32.xlu0 %v11738_v44, %s11470_s29 }
  0xbf   : > { %v790_v34 = vpop.permute.xlu1 %789  ;;  %v796_v14 = vpop.permute.xlu0 %795 }
  0xc0   : > { %871 = vst.msk [vmem:[#allocation5 + $0xb4] sm:$0xf] %vm855_vm4, %v790_v34  ;;  %874 = vst.msk [vmem:[#allocation5 + $0xd8] sm:$0xf] %vm855_vm4, %v796_v14  ;;  %v12117_v14 = vpack.c.bf16 %v2185_v8, %v2185_v8 }
  0xc1   : > { %1540 = vrot.lane.b32.xlu1 %v11750_v49, %s11470_s29  ;;  %1795 = vrot.lane.b32.xlu0 %v11898_v50, %s11471_s14 }
  0xc3   : > { %v794_v37 = vpop.permute.xlu1 %793  ;;  %v800_v36 = vpop.permute.xlu0 %799 }
  0xc4   : > { %873 = vst.msk [vmem:[#allocation5 + $0xcc] sm:$0xf] %vm855_vm4, %v794_v37  ;;  %876 = vst.msk [vmem:[#allocation5 + $0xf0] sm:$0xf] %vm855_vm4, %v800_v36 }
  0xc5   : > { %1544 = vrot.lane.b32.xlu1 %v11759_v54, %s11470_s29  ;;  %1799 = vrot.lane.b32.xlu0 %v11905_v57, %s11471_s14 }
  0xc7   : > { %v798_v38 = vpop.permute.xlu1 %797  ;;  %v804_v49 = vpop.permute.xlu0 %803 }
  0xc8   : > { %875 = vst.msk [vmem:[#allocation5 + $0xe4] sm:$0xf] %vm855_vm4, %v798_v38  ;;  %878 = vst.msk [vmem:[#allocation5 + $0x108] sm:$0xf] %vm855_vm4, %v804_v49  ;;  %v2442_v49 = vld [vmem:[#allocation2 + $0xb2] sm:$0xff] }
  0xc9   : > { %1797 = vrot.lane.b32.xlu1 %v11909_v1, %s11471_s14  ;;  %2053 = vrot.lane.b32.xlu0 %v11790_v15, %s11472_s16 }
  0xcb   : > { %v802_v43 = vpop.permute.xlu1 %801  ;;  %v808_v45 = vpop.permute.xlu0 %807 }
  0xcc   : > { %877 = vst.msk [vmem:[#allocation5 + $0xfc] sm:$0xf] %vm855_vm4, %v802_v43  ;;  %880 = vst.msk [vmem:[#allocation5 + $0x120] sm:$0xf] %vm855_vm4, %v808_v45 }
  0xcd   : > { %1801 = vrot.lane.b32.xlu1 %v11917_v4, %s11471_s14  ;;  %2057 = vrot.lane.b32.xlu0 %v11792_v16, %s11472_s16 }
  0xcf   : > { %v806_v46 = vpop.permute.xlu1 %805  ;;  %v812_v50 = vpop.permute.xlu0 %811 }
  0xd0   : > { %879 = vst.msk [vmem:[#allocation5 + $0x114] sm:$0xf] %vm855_vm4, %v806_v46  ;;  %882 = vst.msk [vmem:[#allocation5 + $0x138] sm:$0xf] %vm855_vm4, %v812_v50  ;;  %v12131_v46 = vpack.c.bf16 %v2442_v49, %v2442_v49 }
  0xd1   : > { %2055 = vrot.lane.b32.xlu1 %v11798_v21, %s11472_s16  ;;  %2310 = vrot.lane.b32.xlu0 %v11738_v44, %s11473_s17 }
  0xd3   : > { %v810_v15 = vpop.permute.xlu1 %809  ;;  %v816_v52 = vpop.permute.xlu0 %815 }
  0xd4   : > { %881 = vst.msk [vmem:[#allocation5 + $0x12c] sm:$0xf] %vm855_vm4, %v810_v15  ;;  %884 = vst.msk [vmem:[#allocation5 + $0x150] sm:$0xf] %vm855_vm4, %v816_v52 }
  0xd5   : > { %2059 = vrot.lane.b32.xlu1 %v11802_v23, %s11472_s16  ;;  %2314 = vrot.lane.b32.xlu0 %v11755_v51, %s11473_s17 }
  0xd7   : > { %v814_v53 = vpop.permute.xlu1 %813  ;;  %v820_v21 = vpop.permute.xlu0 %819 }
  0xd8   : > { %883 = vst.msk [vmem:[#allocation5 + $0x144] sm:$0xf] %vm855_vm4, %v814_v53  ;;  %886 = vst.msk [vmem:[#allocation5 + $0x168] sm:$0xf] %vm855_vm4, %v820_v21 }
  0xd9   : > { %2312 = vrot.lane.b32.xlu1 %v11759_v54, %s11473_s17  ;;  %2567 = vrot.lane.b32.xlu0 %v11905_v57, %s11475_s23 }
  0xdb   : > { %v818_v44 = vpop.permute.xlu1 %817  ;;  %v1017_v56 = vpop.permute.xlu0 %1016 }
  0xdc   : > { %885 = vst.msk [vmem:[#allocation5 + $0x15c] sm:$0xf] %vm855_vm4, %v818_v44 }
  0xdd   : > { %2316 = vrot.lane.b32.xlu1 %v11783_v7, %s11473_s17  ;;  %1113 = vst.msk [vmem:[#allocation5] sm:$0xf] %vm1112_vm8, %v1017_v56  ;;  %2571 = vrot.lane.b32.xlu0 %v11913_v3, %s11475_s23  ;;  %v1410_v7 = vld [vmem:[#allocation2 + $0x79] sm:$0xff]  ;;  %v3146_v56 = vld [vmem:[#allocation3] sm:$0xff] }
  0xde   : > { %v10267_v2 = vpack.c.bf16 %v1410_v7, %v1410_v7 }
  0xdf   : > { %v822_v51 = vpop.permute.xlu1 %821  ;;  %v1021_v54 = vpop.permute.xlu0 %1020 }
  0xe0   : > { %887 = vst.msk [vmem:[#allocation5 + $0x174] sm:$0xf] %vm855_vm4, %v822_v51  ;;  %vm3563_vm4 = vcmask 257152  }
  0xe1   : > { %2569 = vrot.lane.b32.xlu1 %v11917_v4, %s11475_s23  ;;  %1115 = vst.msk [vmem:[#allocation5 + $0x18] sm:$0xf] %vm1112_vm8, %v1021_v54  ;;  %1289 = vrot.lane.b32.xlu0 %v11792_v16, %s11469_s28  ;;  %v1412_v4 = vld [vmem:[#allocation2 + $0x91] sm:$0xff]  ;;  %v1411_v16 = vld [vmem:[#allocation2 + $0x81] sm:$0xff] }
  0xe2   : > { %v10269_v35 = vpack.c.bf16 %v1412_v4, %v1412_v4  ;;  %v10268_v60 = vpack.c.bf16 %v1411_v16, %v1411_v16  ;;  %v1416_v54 = vld [vmem:[#allocation2 + $0xc1] sm:$0xff] }
  0xe3   : > { %v1019_v57 = vpop.permute.xlu1 %1018  ;;  %v1025_v63 = vpop.permute.xlu0 %1024 }
  0xe4   : > { %1114 = vst.msk [vmem:[#allocation5 + $0xc] sm:$0xf] %vm1112_vm8, %v1019_v57  ;;  %1117 = vst.msk [vmem:[#allocation5 + $0x30] sm:$0xf] %vm1112_vm8, %v1025_v63  ;;  %v10273_v63 = vpack.c.bf16 %v1416_v54, %v1416_v54 }
  0xe5   : > { %2573 = vrot.lane.b32.xlu1 %v11923_v6, %s11475_s23  ;;  %1293 = vrot.lane.b32.xlu0 %v11800_v22, %s11469_s28 }
  0xe7   : > { %v1023_v1 = vpop.permute.xlu1 %1022  ;;  %v1029_v5 = vpop.permute.xlu0 %1028 }
  0xe8   : > { %1116 = vst.msk [vmem:[#allocation5 + $0x24] sm:$0xf] %vm1112_vm8, %v1023_v1  ;;  %1119 = vst.msk [vmem:[#allocation5 + $0x48] sm:$0xf] %vm1112_vm8, %v1029_v5 }
  0xe9   : > { %1291 = vrot.lane.b32.xlu1 %v11802_v23, %s11469_s28  ;;  %1546 = vrot.lane.b32.xlu0 %v10267_v2, %s11470_s29  ;;  %v3147_v2 = vld [vmem:[#allocation3 + $0x8] sm:$0xff] }
  0xea   : > { %v10420_v16 = vpack.c.bf16 %v3147_v2, %v3147_v2 }
  0xeb   : > { %v1027_v30 = vpop.permute.xlu1 %1026  ;;  %v1033_v55 = vpop.permute.xlu0 %1032 }
  0xec   : > { %1118 = vst.msk [vmem:[#allocation5 + $0x3c] sm:$0xf] %vm1112_vm8, %v1027_v30  ;;  %1121 = vst.msk [vmem:[#allocation5 + $0x60] sm:$0xf] %vm1112_vm8, %v1033_v55  ;;  %v1673_v30 = vld [vmem:[#allocation2 + $0xc2] sm:$0xff] }
  0xed   : > { %1295 = vrot.lane.b32.xlu1 %v11812_v29, %s11469_s28  ;;  %1550 = vrot.lane.b32.xlu0 %v10269_v35, %s11470_s29 }
  0xef   : > { %v1031_v23 = vpop.permute.xlu1 %1030  ;;  %v1037_v10 = vpop.permute.xlu0 %1036 }
  0xf0   : > { %1120 = vst.msk [vmem:[#allocation5 + $0x54] sm:$0xf] %vm1112_vm8, %v1031_v23  ;;  %1123 = vst.msk [vmem:[#allocation5 + $0x78] sm:$0xf] %vm1112_vm8, %v1037_v10  ;;  %v12169_v23 = vpack.c.bf16 %v1673_v30, %v1673_v30 }
  0xf1   : > { %1548 = vrot.lane.b32.xlu1 %v10268_v60, %s11470_s29  ;;  %1803 = vrot.lane.b32.xlu0 %v11913_v3, %s11471_s14  ;;  %v10302_v3 = vpack.c.bf16 %v1670_v17, %v1670_v17 }
  0xf3   : > { %v1035_v11 = vpop.permute.xlu1 %1034  ;;  %v1274_v13 = vpop.permute.xlu0 %1273 }
  0xf4   : > { %1122 = vst.msk [vmem:[#allocation5 + $0x6c] sm:$0xf] %vm1112_vm8, %v1035_v11  ;;  %v1674_v11 = vld [vmem:[#allocation2 + $0xca] sm:$0xff] }
  0xf5   : > { %1552 = vrot.lane.b32.xlu1 %v10270_v31, %s11470_s29  ;;  %1370 = vst.msk [vmem:[#allocation5] sm:$0xf] %vm1369_vm9, %v1274_v13  ;;  %1807 = vrot.lane.b32.xlu0 %v10301_v12, %s11471_s14 }
  0xf7   : > { %v1039_v18 = vpop.permute.xlu1 %1038  ;;  %v1278_v19 = vpop.permute.xlu0 %1277 }
  0xf8   : > { %1124 = vst.msk [vmem:[#allocation5 + $0x84] sm:$0xf] %vm1112_vm8, %v1039_v18 }
  0xf9   : > { %1805 = vrot.lane.b32.xlu1 %v11923_v6, %s11471_s14  ;;  %1372 = vst.msk [vmem:[#allocation5 + $0x18] sm:$0xf] %vm1369_vm9, %v1278_v19  ;;  %2061 = vrot.lane.b32.xlu0 %v11800_v22, %s11472_s16  ;;  %v2184_v6 = vld [vmem:[#allocation2 + $0xa9] sm:$0xff]  ;;  %v10306_v19 = vpack.c.bf16 %v1674_v11, %v1674_v11 }
  0xfa   : > { %v10365_v26 = vpack.c.bf16 %v2184_v6, %v2184_v6  ;;  %v2192_v11 = vld [vmem:[#allocation2 + $0x109] sm:$0xff] }
  0xfb   : > { %v1276_v39 = vpop.permute.xlu1 %1275  ;;  %v1531_v20 = vpop.permute.xlu0 %1530 }
  0xfc   : > { %1371 = vst.msk [vmem:[#allocation5 + $0xc] sm:$0xf] %vm1369_vm9, %v1276_v39 }
  0xfd   : > { %1809 = vrot.lane.b32.xlu1 %v10302_v3, %s11471_s14  ;;  %1627 = vst.msk [vmem:[#allocation5] sm:$0xf] %vm1626_vm10, %v1531_v20  ;;  %2065 = vrot.lane.b32.xlu0 %v11810_v28, %s11472_s16 }
  0xff   : > { %v1280_v24 = vpop.permute.xlu1 %1279  ;;  %v1535_v25 = vpop.permute.xlu0 %1534 }
 0x100   : > { %1373 = vst.msk [vmem:[#allocation5 + $0x24] sm:$0xf] %vm1369_vm9, %v1280_v24  ;;  %v2188_v24 = vld [vmem:[#allocation2 + $0xd9] sm:$0xff] }
 0x101   : > { %2063 = vrot.lane.b32.xlu1 %v11812_v29, %s11472_s16  ;;  %1629 = vst.msk [vmem:[#allocation5 + $0x18] sm:$0xf] %vm1626_vm10, %v1535_v25  ;;  %2318 = vrot.lane.b32.xlu0 %v10269_v35, %s11473_s17  ;;  %v2441_v29 = vld [vmem:[#allocation2 + $0xaa] sm:$0xff]  ;;  %v10369_v25 = vpack.c.bf16 %v2188_v24, %v2188_v24 }
 0x102   : > { %v12121_v36 = vpack.c.bf16 %v2441_v29, %v2441_v29 }
 0x103   : > { %v1533_v22 = vpop.permute.xlu1 %1532  ;;  %v1788_v27 = vpop.permute.xlu0 %1787 }
 0x104   : > { %1628 = vst.msk [vmem:[#allocation5 + $0xc] sm:$0xf] %vm1626_vm10, %v1533_v22 }
 0x105   : > { %2067 = vrot.lane.b32.xlu1 %v11826_v40, %s11472_s16  ;;  %1884 = vst.msk [vmem:[#allocation5] sm:$0xf] %vm1883_vm11, %v1788_v27  ;;  %2322 = vrot.lane.b32.xlu0 %v10365_v26, %s11473_s17 }
 0x107   : > { %v1537_v33 = vpop.permute.xlu1 %1536  ;;  %v1792_v34 = vpop.permute.xlu0 %1791 }
 0x108   : > { %1630 = vst.msk [vmem:[#allocation5 + $0x24] sm:$0xf] %vm1626_vm10, %v1537_v33 }
 0x109   : > { %2320 = vrot.lane.b32.xlu1 %v10270_v31, %s11473_s17  ;;  %1886 = vst.msk [vmem:[#allocation5 + $0x18] sm:$0xf] %vm1883_vm11, %v1792_v34  ;;  %2575 = vrot.lane.b32.xlu0 %v10301_v12, %s11475_s23 }
 0x10b   : > { %v1790_v37 = vpop.permute.xlu1 %1789  ;;  %v2046_v38 = vpop.permute.xlu0 %2045 }
 0x10c   : > { %1885 = vst.msk [vmem:[#allocation5 + $0xc] sm:$0xf] %vm1883_vm11, %v1790_v37  ;;  %v2446_v37 = vld [vmem:[#allocation2 + $0xe2] sm:$0xff] }
 0x10d   : > { %2324 = vrot.lane.b32.xlu1 %v12117_v14, %s11473_s17  ;;  %2142 = vst.msk [vmem:[#allocation5] sm:$0xf] %vm2141_vm12, %v2046_v38  ;;  %2579 = vrot.lane.b32.xlu0 %v12121_v36, %s11475_s23  ;;  %v10402_v49 = vpack.c.bf16 %v2446_v37, %v2446_v37 }
 0x10f   : > { %v1794_v43 = vpop.permute.xlu1 %1793  ;;  %v2050_v45 = vpop.permute.xlu0 %2049 }
 0x110   : > { %1887 = vst.msk [vmem:[#allocation5 + $0x24] sm:$0xf] %vm1883_vm11, %v1794_v43 }
 0x111   : > { %2577 = vrot.lane.b32.xlu1 %v10302_v3, %s11475_s23  ;;  %2144 = vst.msk [vmem:[#allocation5 + $0x18] sm:$0xf] %vm2141_vm12, %v2050_v45  ;;  %1040 = vrot.lane.b32.xlu0 %v10301_v12, %s11468_s27 }
 0x113   : > { %v2048_v50 = vpop.permute.xlu1 %2047  ;;  %v2303_v15 = vpop.permute.xlu0 %2302 }
 0x114   : > { %2143 = vst.msk [vmem:[#allocation5 + $0xc] sm:$0xf] %vm2141_vm12, %v2048_v50 }
 0x115   : > { %2581 = vrot.lane.b32.xlu1 %v12131_v46, %s11475_s23  ;;  %2399 = vst.msk [vmem:[#allocation5] sm:$0xf] %vm2398_vm13, %v2303_v15  ;;  %1044 = vrot.lane.b32.xlu0 %v12121_v36, %s11468_s27 }
 0x117   : > { %v2052_v52 = vpop.permute.xlu1 %2051  ;;  %v2307_v53 = vpop.permute.xlu0 %2306 }
 0x118   : > { %2145 = vst.msk [vmem:[#allocation5 + $0x24] sm:$0xf] %vm2141_vm12, %v2052_v52 }
 0x119   : > { %1042 = vrot.lane.b32.xlu1 %v10302_v3, %s11468_s27  ;;  %2401 = vst.msk [vmem:[#allocation5 + $0x18] sm:$0xf] %vm2398_vm13, %v2307_v53  ;;  %1297 = vrot.lane.b32.xlu0 %v11810_v28, %s11469_s28  ;;  %v10419_v28 = vpack.c.bf16 %v3146_v56, %v3146_v56 }
 0x11b   : > { %v2305_v21 = vpop.permute.xlu1 %2304  ;;  %v2560_v44 = vpop.permute.xlu0 %2559 }
 0x11c   : > { %2400 = vst.msk [vmem:[#allocation5 + $0xc] sm:$0xf] %vm2398_vm13, %v2305_v21  ;;  %v1420_v21 = vld [vmem:[#allocation2 + $0xf1] sm:$0xff] }
 0x11d   : > { %1046 = vrot.lane.b32.xlu1 %v12131_v46, %s11468_s27  ;;  %2656 = vst.msk [vmem:[#allocation5] sm:$0xf] %vm2655_vm14, %v2560_v44  ;;  %1301 = vrot.lane.b32.xlu0 %v11814_v32, %s11469_s28  ;;  %v10277_v54 = vpack.c.bf16 %v1420_v21, %v1420_v21 }
 0x11f   : > { %v2309_v51 = vpop.permute.xlu1 %2308  ;;  %v2564_v57 = vpop.permute.xlu0 %2563 }
 0x120   : > { %2402 = vst.msk [vmem:[#allocation5 + $0x24] sm:$0xf] %vm2398_vm13, %v2309_v51 }
 0x121   : > { %1299 = vrot.lane.b32.xlu1 %v11826_v40, %s11469_s28  ;;  %2658 = vst.msk [vmem:[#allocation5 + $0x18] sm:$0xf] %vm2655_vm14, %v2564_v57  ;;  %1554 = vrot.lane.b32.xlu0 %v10365_v26, %s11470_s29  ;;  %v1417_v40 = vld [vmem:[#allocation2 + $0xc9] sm:$0xff]  ;;  %v2189_v26 = vld [vmem:[#allocation2 + $0xe1] sm:$0xff] }
 0x122   : > { %v10274_v55 = vpack.c.bf16 %v1417_v40, %v1417_v40  ;;  %v10370_v33 = vpack.c.bf16 %v2189_v26, %v2189_v26 }
 0x123   : > { %v2562_v7 = vpop.permute.xlu1 %2561  ;;  %v1282_v4 = vpop.permute.xlu0 %1281 }
 0x124   : > { %2657 = vst.msk [vmem:[#allocation5 + $0xc] sm:$0xf] %vm2655_vm14, %v2562_v7  ;;  %v2688_v1 = vld [vmem:[#allocation5] sm:$0xf] }
 0x125   : > { %1303 = vrot.lane.b32.xlu1 %v11830_v42, %s11469_s28  ;;  %3307 = vst.msk [vmem:[#allocation5] sm:$0xf] %vm3306_vm15, %v10419_v28  ;;  %1558 = vrot.lane.b32.xlu0 %v10273_v63, %s11470_s29 }
 0x126   : > { %1374 = vst.msk [vmem:[#allocation5 + $0x30] sm:$0xf] %vm1369_vm9, %v1282_v4  ;;  %v1677_v4 = vld [vmem:[#allocation2 + $0xf2] sm:$0xff] }
 0x127   : > { %v2566_v5 = vpop.permute.xlu1 %2565  ;;  %v1286_v35 = vpop.permute.xlu0 %1285  ;;  %v12246_v30 = vpack.c.bf16 %v1677_v4, %v1677_v4 }
 0x128   : > { %2659 = vst.msk [vmem:[#allocation5 + $0x24] sm:$0xf] %vm2655_vm14, %v2566_v5  ;;  %v2690_v10 = vld [vmem:[#allocation5 + $0x18] sm:$0xf] }
 0x129   : > { %1556 = vrot.lane.b32.xlu1 %v12117_v14, %s11470_s29  ;;  %1376 = vst.msk [vmem:[#allocation5 + $0x48] sm:$0xf] %vm1369_vm9, %v1286_v35  ;;  %1811 = vrot.lane.b32.xlu0 %v12121_v36, %s11471_s14 }
 0x12b   : > { %v2689_v60 = vld [vmem:[#allocation5 + $0xc] sm:$0xf]  ;;  %v1284_v61 = vpop.permute.xlu1 %1283  ;;  %v1539_v31 = vpop.permute.xlu0 %1538 }
 0x12c   : > { %3308 = vst.msk [vmem:[#allocation5 + $0xc] sm:$0xf] %vm3306_vm15, %v10420_v16  ;;  %v9373_v62 = vcombine.low %v2688_v1, %v2689_v60 }
 0x12d   : > { %1375 = vst.msk [vmem:[#allocation5 + $0x3c] sm:$0xf] %vm1369_vm9, %v1284_v61  ;;  %1560 = vrot.lane.b32.xlu1 %v10274_v55, %s11470_s29  ;;  %1815 = vrot.lane.b32.xlu0 %v12169_v23, %s11471_s14 }
 0x12e   : > { %1631 = vst.msk [vmem:[#allocation5 + $0x30] sm:$0xf] %vm1626_vm10, %v1539_v31  ;;  %11150 = vmatprep.mubr.msk.bf16.mxu0 %vm2822_vm1, %v9373_v62 }
 0x12f   : > { %v2691_v12 = vld [vmem:[#allocation5 + $0x24] sm:$0xf]  ;;  %v1288_v13 = vpop.permute.xlu1 %1287  ;;  %v1543_v18 = vpop.permute.xlu0 %1542 }
 0x130   : > { %1377 = vst.msk [vmem:[#allocation5 + $0x54] sm:$0xf] %vm1369_vm9, %v1288_v13  ;;  %v9374_v17 = vcombine.low %v2690_v10, %v2691_v12  ;;  %v12272_v13 = vpack.c.bf16 %v2192_v11, %v2192_v11  ;;  %v2196_v11 = vld [vmem:[#allocation2 + $0x139] sm:$0xff] }
 0x131   : > { %1813 = vrot.lane.b32.xlu1 %v12131_v46, %s11471_s14  ;;  %1633 = vst.msk [vmem:[#allocation5 + $0x48] sm:$0xf] %vm1626_vm10, %v1543_v18  ;;  %2069 = vrot.lane.b32.xlu0 %v11814_v32, %s11472_s16 }
 0x132   : > { %11151 = vmatmul.mubr.msk.bf16.vlgmr.msra.gmra.mxu0 %vm2822_vm1, %v9374_v17  ;;  %v361_v17 = vld [vmem:[%s11665_s25 + $0xf0] sm:$0xff] }
 0x133   : > { %v1541_v3 = vpop.permute.xlu1 %1540  ;;  %v1796_v39 = vpop.permute.xlu0 %1795  ;;  %436 = vst.msk [vmem:[#allocation2 + $0x181] sm:$0xff] %vm363_vm0, %v361_v17  ;;  %v12432_v17 = vpack.c.bf16 %v2196_v11, %v2196_v11 }
 0x134   : > { %1632 = vst.msk [vmem:[#allocation5 + $0x3c] sm:$0xf] %vm1626_vm10, %v1541_v3 }
 0x135   : > { %1817 = vrot.lane.b32.xlu1 %v10306_v19, %s11471_s14  ;;  %1888 = vst.msk [vmem:[#allocation5 + $0x30] sm:$0xf] %vm1883_vm11, %v1796_v39  ;;  %2073 = vrot.lane.b32.xlu0 %v11828_v41, %s11472_s16  ;;  %v362_v39 = vld [vmem:[%s11665_s25 + $0xf8] sm:$0xff]  ;;  %s11482_s25 = smov 96  }
 0x136   : > { %437 = vst.msk [vmem:[#allocation2 + $0x189] sm:$0xff] %vm363_vm0, %v362_v39  ;;  %vm3074_vm0 = vcmask 123904  }
 0x137   : > { %v1545_v20 = vpop.permute.xlu1 %1544  ;;  %v1800_v6 = vpop.permute.xlu0 %1799  ;;  %3075 = vst.msk [vmem:[#allocation3 + $0x10] sm:$0x3] %vm3074_vm0, %v11466_v0  ;;  %3079 = vst.msk [vmem:[#allocation3 + $0x1a8] sm:$0x3] %vm3074_vm0, %v11466_v0  ;;  %vm9008_vm0 = vcmask 8192  }
 0x138   : > { %1634 = vst.msk [vmem:[#allocation5 + $0x54] sm:$0xf] %vm1626_vm10, %v1545_v20 }
 0x139   : > { %2071 = vrot.lane.b32.xlu1 %v11830_v42, %s11472_s16  ;;  %1890 = vst.msk [vmem:[#allocation5 + $0x48] sm:$0xf] %vm1883_vm11, %v1800_v6  ;;  %2326 = vrot.lane.b32.xlu0 %v10273_v63, %s11473_s17  ;;  %v2445_v42 = vld [vmem:[#allocation2 + $0xda] sm:$0xff] }
 0x13a   : > { %v10401_v34 = vpack.c.bf16 %v2445_v42, %v2445_v42  ;;  %v1165_v42 = vld [vmem:[#allocation2 + $0x108] sm:$0xff] }
 0x13b   : > { %v1798_v32 = vpop.permute.xlu1 %1797  ;;  %v2054_v22 = vpop.permute.xlu0 %2053 }
 0x13c   : > { %1889 = vst.msk [vmem:[#allocation5 + $0x3c] sm:$0xf] %vm1883_vm11, %v1798_v32  ;;  %v2450_v32 = vld [vmem:[#allocation2 + $0x112] sm:$0xff] }
 0x13d   : > { %2075 = vrot.lane.b32.xlu1 %v11840_v48, %s11472_s16  ;;  %2146 = vst.msk [vmem:[#allocation5 + $0x30] sm:$0xf] %vm2141_vm12, %v2054_v22  ;;  %2330 = vrot.lane.b32.xlu0 %v10369_v25, %s11473_s17  ;;  %v12367_v26 = vpack.c.bf16 %v2450_v32, %v2450_v32 }
 0x13f   : > { %v1802_v27 = vpop.permute.xlu1 %1801  ;;  %v2058_v8 = vpop.permute.xlu0 %2057 }
 0x140   : > { %1891 = vst.msk [vmem:[#allocation5 + $0x54] sm:$0xf] %vm1883_vm11, %v1802_v27 }
 0x141   : > { %2328 = vrot.lane.b32.xlu1 %v10274_v55, %s11473_s17  ;;  %2148 = vst.msk [vmem:[#allocation5 + $0x48] sm:$0xf] %vm2141_vm12, %v2058_v8  ;;  %2583 = vrot.lane.b32.xlu0 %v12169_v23, %s11475_s23  ;;  %v1678_v55 = vld [vmem:[#allocation2 + $0xfa] sm:$0xff] }
 0x143   : > { %v2056_v29 = vpop.permute.xlu1 %2055  ;;  %v2311_v14 = vpop.permute.xlu0 %2310 }
 0x144   : > { %2147 = vst.msk [vmem:[#allocation5 + $0x3c] sm:$0xf] %vm2141_vm12, %v2056_v29  ;;  %v10247_v29 = vpack.c.bf16 %v1165_v42, %v1165_v42 }
 0x145   : > { %2332 = vrot.lane.b32.xlu1 %v10370_v33, %s11473_s17  ;;  %2403 = vst.msk [vmem:[#allocation5 + $0x30] sm:$0xf] %vm2398_vm13, %v2311_v14  ;;  %2587 = vrot.lane.b32.xlu0 %v10401_v34, %s11475_s23 }
 0x147   : > { %v2060_v36 = vpop.permute.xlu1 %2059  ;;  %v2315_v38 = vpop.permute.xlu0 %2314 }
 0x148   : > { %2149 = vst.msk [vmem:[#allocation5 + $0x54] sm:$0xf] %vm2141_vm12, %v2060_v36  ;;  %v1166_v36 = vld [vmem:[#allocation2 + $0x110] sm:$0xff] }
 0x149   : > { %2585 = vrot.lane.b32.xlu1 %v10306_v19, %s11475_s23  ;;  %2405 = vst.msk [vmem:[#allocation5 + $0x48] sm:$0xf] %vm2398_vm13, %v2315_v38  ;;  %1048 = vrot.lane.b32.xlu0 %v12169_v23, %s11468_s27  ;;  %v12256_v23 = vpack.c.bf16 %v1678_v55, %v1678_v55 }
 0x14b   : > { %v2313_v43 = vpop.permute.xlu1 %2312  ;;  %v2568_v45 = vpop.permute.xlu0 %2567 }
 0x14c   : > { %2404 = vst.msk [vmem:[#allocation5 + $0x3c] sm:$0xf] %vm2398_vm13, %v2313_v43 }
 0x14d   : > { %2589 = vrot.lane.b32.xlu1 %v10402_v49, %s11475_s23  ;;  %2660 = vst.msk [vmem:[#allocation5 + $0x30] sm:$0xf] %vm2655_vm14, %v2568_v45  ;;  %1052 = vrot.lane.b32.xlu0 %v10401_v34, %s11468_s27 }
 0x14f   : > { %v2317_v46 = vpop.permute.xlu1 %2316  ;;  %v2572_v50 = vpop.permute.xlu0 %2571 }
 0x150   : > { %2406 = vst.msk [vmem:[#allocation5 + $0x54] sm:$0xf] %vm2398_vm13, %v2317_v46 }
 0x151   : > { %1050 = vrot.lane.b32.xlu1 %v10306_v19, %s11468_s27  ;;  %2662 = vst.msk [vmem:[#allocation5 + $0x48] sm:$0xf] %vm2655_vm14, %v2572_v50  ;;  %1305 = vrot.lane.b32.xlu0 %v11828_v41, %s11469_s28 }
 0x153   : > { %v2570_v15 = vpop.permute.xlu1 %2569  ;;  %v1290_v52 = vpop.permute.xlu0 %1289 }
 0x154   : > { %2661 = vst.msk [vmem:[#allocation5 + $0x3c] sm:$0xf] %vm2655_vm14, %v2570_v15  ;;  %v2692_v44 = vld [vmem:[#allocation5 + $0x30] sm:$0xf]  ;;  %v10248_v15 = vpack.c.bf16 %v1166_v36, %v1166_v36 }
 0x155   : > { %1054 = vrot.lane.b32.xlu1 %v10402_v49, %s11468_s27  ;;  %1378 = vst.msk [vmem:[#allocation5 + $0x60] sm:$0xf] %vm1369_vm9, %v1290_v52  ;;  %1309 = vrot.lane.b32.xlu0 %v11838_v47, %s11469_s28  ;;  %v1168_v52 = vld [vmem:[#allocation2 + $0x128] sm:$0xff] }
 0x157   : > { %v2574_v53 = vpop.permute.xlu1 %2573  ;;  %v1294_v56 = vpop.permute.xlu0 %1293 }
 0x158   : > { %2663 = vst.msk [vmem:[#allocation5 + $0x54] sm:$0xf] %vm2655_vm14, %v2574_v53  ;;  %v2694_v28 = vld [vmem:[#allocation5 + $0x48] sm:$0xf] }
 0x159   : > { %1307 = vrot.lane.b32.xlu1 %v11840_v48, %s11469_s28  ;;  %1380 = vst.msk [vmem:[#allocation5 + $0x78] sm:$0xf] %vm1369_vm9, %v1294_v56  ;;  %1562 = vrot.lane.b32.xlu0 %v10369_v25, %s11470_s29  ;;  %v1421_v48 = vld [vmem:[#allocation2 + $0xf9] sm:$0xff]  ;;  %v1424_v56 = vld [vmem:[#allocation2 + $0x121] sm:$0xff] }
 0x15a   : > { %v12241_v5 = vpack.c.bf16 %v1421_v48, %v1421_v48 }
 0x15b   : > { %v2693_v41 = vld [vmem:[#allocation5 + $0x3c] sm:$0xf]  ;;  %v1292_v51 = vpop.permute.xlu1 %1291  ;;  %v1547_v7 = vpop.permute.xlu0 %1546 }
 0x15c   : > { %1379 = vst.msk [vmem:[#allocation5 + $0x6c] sm:$0xf] %vm1369_vm9, %v1292_v51  ;;  %v9375_v57 = vcombine.low %v2692_v44, %v2693_v41  ;;  %v10250_v51 = vpack.c.bf16 %v1168_v52, %v1168_v52 }
 0x15d   : > { %1311 = vrot.lane.b32.xlu1 %v11856_v59, %s11469_s28  ;;  %1635 = vst.msk [vmem:[#allocation5 + $0x60] sm:$0xf] %vm1626_vm10, %v1547_v7  ;;  %1566 = vrot.lane.b32.xlu0 %v10277_v54, %s11470_s29  ;;  %v1425_v7 = vld [vmem:[#allocation2 + $0x129] sm:$0xff] }
 0x15e   : > { %11154 = vmatprep.mubr.msk.bf16.mxu0 %vm2822_vm1, %v9375_v57  ;;  %v10281_v57 = vpack.c.bf16 %v1424_v56, %v1424_v56 }
 0x15f   : > { %v2695_v63 = vld [vmem:[#allocation5 + $0x54] sm:$0xf]  ;;  %v1296_v1 = vpop.permute.xlu1 %1295  ;;  %v1551_v40 = vpop.permute.xlu0 %1550 }
 0x160   : > { %1381 = vst.msk [vmem:[#allocation5 + $0x84] sm:$0xf] %vm1369_vm9, %v1296_v1  ;;  %v9376_v2 = vcombine.low %v2694_v28, %v2695_v63  ;;  %v1681_v63 = vld [vmem:[#allocation2 + $0x122] sm:$0xff] }
 0x161   : > { %1564 = vrot.lane.b32.xlu1 %v10370_v33, %s11470_s29  ;;  %1637 = vst.msk [vmem:[#allocation5 + $0x78] sm:$0xf] %vm1626_vm10, %v1551_v40  ;;  %1819 = vrot.lane.b32.xlu0 %v10401_v34, %s11471_s14  ;;  %v1167_v34 = vld [vmem:[#allocation2 + $0x120] sm:$0xff]  ;;  %v12405_v40 = vpack.c.bf16 %v1681_v63, %v1681_v63 }
 0x162   : > { %11155 = vmatmul.mubr.msk.bf16.gmra.mxu0 %vm2822_vm1, %v9376_v2  ;;  %v10249_v43 = vpack.c.bf16 %v1167_v34, %v1167_v34  ;;  %v10282_v2 = vpack.c.bf16 %v1425_v7, %v1425_v7 }
 0x163   : > { %v1549_v16 = vpop.permute.xlu1 %1548  ;;  %v1804_v35 = vpop.permute.xlu0 %1803 }
 0x164   : > { %1636 = vst.msk [vmem:[#allocation5 + $0x6c] sm:$0xf] %vm1626_vm10, %v1549_v16  ;;  %v1682_v16 = vld [vmem:[#allocation2 + $0x12a] sm:$0xff] }
 0x165   : > { %1568 = vrot.lane.b32.xlu1 %v12241_v5, %s11470_s29  ;;  %1892 = vst.msk [vmem:[#allocation5 + $0x60] sm:$0xf] %vm1883_vm11, %v1804_v35  ;;  %1823 = vrot.lane.b32.xlu0 %v12246_v30, %s11471_s14  ;;  %v1939_v35 = vld [vmem:[#allocation2 + $0x138] sm:$0xff] }
 0x167   : > { %v1553_v60 = vpop.permute.xlu1 %1552  ;;  %v1808_v61 = vpop.permute.xlu0 %1807 }
 0x168   : > { %1638 = vst.msk [vmem:[#allocation5 + $0x84] sm:$0xf] %vm1626_vm10, %v1553_v60  ;;  %v12415_v60 = vpack.c.bf16 %v1682_v16, %v1682_v16 }
 0x169   : > { %1821 = vrot.lane.b32.xlu1 %v10402_v49, %s11471_s14  ;;  %1894 = vst.msk [vmem:[#allocation5 + $0x78] sm:$0xf] %vm1883_vm11, %v1808_v61  ;;  %2077 = vrot.lane.b32.xlu0 %v11838_v47, %s11472_s16 }
 0x16b   : > { %v1806_v62 = vpop.permute.xlu1 %1805  ;;  %v2062_v10 = vpop.permute.xlu0 %2061 }
 0x16c   : > { %1893 = vst.msk [vmem:[#allocation5 + $0x6c] sm:$0xf] %vm1883_vm11, %v1806_v62 }
 0x16d   : > { %1825 = vrot.lane.b32.xlu1 %v12256_v23, %s11471_s14  ;;  %2150 = vst.msk [vmem:[#allocation5 + $0x60] sm:$0xf] %vm2141_vm12, %v2062_v10  ;;  %2081 = vrot.lane.b32.xlu0 %v11854_v58, %s11472_s16  ;;  %v2193_v58 = vld [vmem:[#allocation2 + $0x111] sm:$0xff]  ;;  %v1940_v10 = vld [vmem:[#allocation2 + $0x140] sm:$0xff] }
 0x16e   : > { %v12349_v3 = vpack.c.bf16 %v2193_v58, %v2193_v58  ;;  %v2197_v58 = vld [vmem:[#allocation2 + $0x141] sm:$0xff] }
 0x16f   : > { %v1810_v31 = vpop.permute.xlu1 %1809  ;;  %v2066_v12 = vpop.permute.xlu0 %2065 }
 0x170   : > { %1895 = vst.msk [vmem:[#allocation5 + $0x84] sm:$0xf] %vm1883_vm11, %v1810_v31 }
 0x171   : > { %2079 = vrot.lane.b32.xlu1 %v11856_v59, %s11472_s16  ;;  %2152 = vst.msk [vmem:[#allocation5 + $0x78] sm:$0xf] %vm2141_vm12, %v2066_v12  ;;  %2334 = vrot.lane.b32.xlu0 %v10277_v54, %s11473_s17 }
 0x173   : > { %v2064_v47 = vpop.permute.xlu1 %2063  ;;  %v2319_v18 = vpop.permute.xlu0 %2318 }
 0x174   : > { %2151 = vst.msk [vmem:[#allocation5 + $0x6c] sm:$0xf] %vm2141_vm12, %v2064_v47  ;;  %v12428_v47 = vpack.c.bf16 %v1940_v10, %v1940_v10 }
 0x175   : > { %2083 = vrot.lane.b32.xlu1 %v11864_v9, %s11472_s16  ;;  %2407 = vst.msk [vmem:[#allocation5 + $0x60] sm:$0xf] %vm2398_vm13, %v2319_v18  ;;  %2338 = vrot.lane.b32.xlu0 %v12272_v13, %s11473_s17  ;;  %v2449_v9 = vld [vmem:[#allocation2 + $0x10a] sm:$0xff] }
 0x176   : > { %v12355_v24 = vpack.c.bf16 %v2449_v9, %v2449_v9  ;;  %v2453_v9 = vld [vmem:[#allocation2 + $0x13a] sm:$0xff] }
 0x177   : > { %v2068_v59 = vpop.permute.xlu1 %2067  ;;  %v2323_v19 = vpop.permute.xlu0 %2322 }
 0x178   : > { %2153 = vst.msk [vmem:[#allocation5 + $0x84] sm:$0xf] %vm2141_vm12, %v2068_v59 }
 0x179   : > { %2336 = vrot.lane.b32.xlu1 %v12241_v5, %s11473_s17  ;;  %2409 = vst.msk [vmem:[#allocation5 + $0x78] sm:$0xf] %vm2398_vm13, %v2323_v19  ;;  %2591 = vrot.lane.b32.xlu0 %v12246_v30, %s11475_s23 }
 0x17b   : > { %v2321_v20 = vpop.permute.xlu1 %2320  ;;  %v2576_v6 = vpop.permute.xlu0 %2575 }
 0x17c   : > { %2408 = vst.msk [vmem:[#allocation5 + $0x6c] sm:$0xf] %vm2398_vm13, %v2321_v20  ;;  %v12447_v20 = vpack.c.bf16 %v2453_v9, %v2453_v9 }
 0x17d   : > { %2340 = vrot.lane.b32.xlu1 %v12349_v3, %s11473_s17  ;;  %2664 = vst.msk [vmem:[#allocation5 + $0x60] sm:$0xf] %vm2655_vm14, %v2576_v6  ;;  %2595 = vrot.lane.b32.xlu0 %v12355_v24, %s11475_s23  ;;  %v2454_v6 = vld [vmem:[#allocation2 + $0x142] sm:$0xff] }
 0x17f   : > { %v2325_v25 = vpop.permute.xlu1 %2324  ;;  %v2580_v22 = vpop.permute.xlu0 %2579 }
 0x180   : > { %2410 = vst.msk [vmem:[#allocation5 + $0x84] sm:$0xf] %vm2398_vm13, %v2325_v25 }
 0x181   : > { %2593 = vrot.lane.b32.xlu1 %v12256_v23, %s11475_s23  ;;  %2666 = vst.msk [vmem:[#allocation5 + $0x78] sm:$0xf] %vm2655_vm14, %v2580_v22  ;;  %1056 = vrot.lane.b32.xlu0 %v12246_v30, %s11468_s27  ;;  %v12458_v22 = vpack.c.bf16 %v2454_v6, %v2454_v6 }
 0x183   : > { %v2578_v27 = vpop.permute.xlu1 %2577  ;;  %v1041_v8 = vpop.permute.xlu0 %1040 }
 0x184   : > { %2665 = vst.msk [vmem:[#allocation5 + $0x6c] sm:$0xf] %vm2655_vm14, %v2578_v27  ;;  %v2696_v14 = vld [vmem:[#allocation5 + $0x60] sm:$0xf] }
 0x185   : > { %2597 = vrot.lane.b32.xlu1 %v12367_v26, %s11475_s23  ;;  %1125 = vst.msk [vmem:[#allocation5 + $0x90] sm:$0xf] %vm1112_vm8, %v1041_v8  ;;  %1060 = vrot.lane.b32.xlu0 %v12355_v24, %s11468_s27  ;;  %v1171_v8 = vld [vmem:[#allocation2 + $0x150] sm:$0xff] }
 0x187   : > { %v2582_v33 = vpop.permute.xlu1 %2581  ;;  %v1045_v37 = vpop.permute.xlu0 %1044 }
 0x188   : > { %2667 = vst.msk [vmem:[#allocation5 + $0x84] sm:$0xf] %vm2655_vm14, %v2582_v33  ;;  %v2698_v46 = vld [vmem:[#allocation5 + $0x78] sm:$0xf] }
 0x189   : > { %1058 = vrot.lane.b32.xlu1 %v12256_v23, %s11468_s27  ;;  %1127 = vst.msk [vmem:[#allocation5 + $0xa8] sm:$0xf] %vm1112_vm8, %v1045_v37  ;;  %1313 = vrot.lane.b32.xlu0 %v10247_v29, %s11469_s28  ;;  %v10345_v23 = vpack.c.bf16 %v1939_v35, %v1939_v35  ;;  %v10253_v37 = vpack.c.bf16 %v1171_v8, %v1171_v8 }
 0x18b   : > { %v2697_v38 = vld [vmem:[#allocation5 + $0x6c] sm:$0xf]  ;;  %v1043_v49 = vpop.permute.xlu1 %1042  ;;  %v1298_v50 = vpop.permute.xlu0 %1297 }
 0x18c   : > { %1126 = vst.msk [vmem:[#allocation5 + $0x9c] sm:$0xf] %vm1112_vm8, %v1043_v49  ;;  %v9377_v45 = vcombine.low %v2696_v14, %v2697_v38 }
 0x18d   : > { %1062 = vrot.lane.b32.xlu1 %v12367_v26, %s11468_s27  ;;  %1382 = vst.msk [vmem:[#allocation5 + $0x90] sm:$0xf] %vm1369_vm9, %v1298_v50  ;;  %1317 = vrot.lane.b32.xlu0 %v10249_v43, %s11469_s28 }
 0x18e   : > { %11158 = vmatprep.mubr.msk.bf16.mxu0 %vm2822_vm1, %v9377_v45 }
 0x18f   : > { %v2699_v53 = vld [vmem:[#allocation5 + $0x84] sm:$0xf]  ;;  %v1047_v21 = vpop.permute.xlu1 %1046  ;;  %v1302_v41 = vpop.permute.xlu0 %1301 }
 0x190   : > { %1128 = vst.msk [vmem:[#allocation5 + $0xb4] sm:$0xf] %vm1112_vm8, %v1047_v21  ;;  %v9378_v44 = vcombine.low %v2698_v46, %v2699_v53 }
 0x191   : > { %1315 = vrot.lane.b32.xlu1 %v10248_v15, %s11469_s28  ;;  %1384 = vst.msk [vmem:[#allocation5 + $0xa8] sm:$0xf] %vm1369_vm9, %v1302_v41  ;;  %1570 = vrot.lane.b32.xlu0 %v12272_v13, %s11470_s29  ;;  %v1428_v15 = vld [vmem:[#allocation2 + $0x151] sm:$0xff]  ;;  %v1429_v41 = vld [vmem:[#allocation2 + $0x159] sm:$0xff] }
 0x192   : > { %11159 = vmatmul.mubr.msk.bf16.gmra.mxu0 %vm2822_vm1, %v9378_v44  ;;  %v10285_v44 = vpack.c.bf16 %v1428_v15, %v1428_v15 }
 0x193   : > { %v1300_v54 = vpop.permute.xlu1 %1299  ;;  %v1555_v28 = vpop.permute.xlu0 %1554 }
 0x194   : > { %1383 = vst.msk [vmem:[#allocation5 + $0x9c] sm:$0xf] %vm1369_vm9, %v1300_v54  ;;  %v1685_v54 = vld [vmem:[#allocation2 + $0x152] sm:$0xff] }
 0x195   : > { %1319 = vrot.lane.b32.xlu1 %v10250_v51, %s11469_s28  ;;  %1639 = vst.msk [vmem:[#allocation5 + $0x90] sm:$0xf] %vm1626_vm10, %v1555_v28  ;;  %1574 = vrot.lane.b32.xlu0 %v10281_v57, %s11470_s29  ;;  %v10286_v28 = vpack.c.bf16 %v1429_v41, %v1429_v41 }
 0x197   : > { %v1304_v48 = vpop.permute.xlu1 %1303  ;;  %v1559_v1 = vpop.permute.xlu0 %1558 }
 0x198   : > { %1385 = vst.msk [vmem:[#allocation5 + $0xb4] sm:$0xf] %vm1369_vm9, %v1304_v48  ;;  %v12497_v48 = vpack.c.bf16 %v1685_v54, %v1685_v54 }
 0x199   : > { %1572 = vrot.lane.b32.xlu1 %v12349_v3, %s11470_s29  ;;  %1641 = vst.msk [vmem:[#allocation5 + $0xa8] sm:$0xf] %vm1626_vm10, %v1559_v1  ;;  %1827 = vrot.lane.b32.xlu0 %v12355_v24, %s11471_s14  ;;  %v12442_v3 = vpack.c.bf16 %v2197_v58, %v2197_v58  ;;  %v1686_v1 = vld [vmem:[#allocation2 + $0x15a] sm:$0xff] }
 0x19b   : > { %v1557_v4 = vpop.permute.xlu1 %1556  ;;  %v1812_v5 = vpop.permute.xlu0 %1811 }
 0x19c   : > { %1640 = vst.msk [vmem:[#allocation5 + $0x9c] sm:$0xf] %vm1626_vm10, %v1557_v4  ;;  %v1943_v4 = vld [vmem:[#allocation2 + $0x168] sm:$0xff] }
 0x19d   : > { %1576 = vrot.lane.b32.xlu1 %v10282_v2, %s11470_s29  ;;  %1896 = vst.msk [vmem:[#allocation5 + $0x90] sm:$0xf] %vm1883_vm11, %v1812_v5  ;;  %1831 = vrot.lane.b32.xlu0 %v12405_v40, %s11471_s14  ;;  %v12507_v5 = vpack.c.bf16 %v1686_v1, %v1686_v1 }
 0x19f   : > { %v1561_v30 = vpop.permute.xlu1 %1560  ;;  %v1816_v55 = vpop.permute.xlu0 %1815 }
 0x1a0   : > { %1642 = vst.msk [vmem:[#allocation5 + $0xb4] sm:$0xf] %vm1626_vm10, %v1561_v30  ;;  %v12511_v30 = vpack.c.bf16 %v1943_v4, %v1943_v4 }
 0x1a1   : > { %1829 = vrot.lane.b32.xlu1 %v12367_v26, %s11471_s14  ;;  %1898 = vst.msk [vmem:[#allocation5 + $0xa8] sm:$0xf] %vm1883_vm11, %v1816_v55  ;;  %2085 = vrot.lane.b32.xlu0 %v10249_v43, %s11472_s16  ;;  %v1172_v43 = vld [vmem:[#allocation2 + $0x158] sm:$0xff]  ;;  %v1944_v55 = vld [vmem:[#allocation2 + $0x170] sm:$0xff] }
 0x1a2   : > { %v10254_v53 = vpack.c.bf16 %v1172_v43, %v1172_v43 }
 0x1a3   : > { %v1814_v61 = vpop.permute.xlu1 %1813  ;;  %v2070_v62 = vpop.permute.xlu0 %2069 }
 0x1a4   : > { %1897 = vst.msk [vmem:[#allocation5 + $0x9c] sm:$0xf] %vm1883_vm11, %v1814_v61  ;;  %v2200_v61 = vld [vmem:[#allocation2 + $0x169] sm:$0xff] }
 0x1a5   : > { %1833 = vrot.lane.b32.xlu1 %v12415_v60, %s11471_s14  ;;  %2154 = vst.msk [vmem:[#allocation5 + $0x90] sm:$0xf] %vm2141_vm12, %v2070_v62  ;;  %2089 = vrot.lane.b32.xlu0 %v10345_v23, %s11472_s16  ;;  %v12521_v62 = vpack.c.bf16 %v1944_v55, %v1944_v55 }
 0x1a7   : > { %v1818_v31 = vpop.permute.xlu1 %1817  ;;  %v2074_v12 = vpop.permute.xlu0 %2073 }
 0x1a8   : > { %1899 = vst.msk [vmem:[#allocation5 + $0xb4] sm:$0xf] %vm1883_vm11, %v1818_v31  ;;  %v12525_v31 = vpack.c.bf16 %v2200_v61, %v2200_v61 }
 0x1a9   : > { %2087 = vrot.lane.b32.xlu1 %v10250_v51, %s11472_s16  ;;  %2156 = vst.msk [vmem:[#allocation5 + $0xa8] sm:$0xf] %vm2141_vm12, %v2074_v12  ;;  %2342 = vrot.lane.b32.xlu0 %v10281_v57, %s11473_s17  ;;  %v2201_v12 = vld [vmem:[#allocation2 + $0x171] sm:$0xff] }
 0x1ab   : > { %v2072_v13 = vpop.permute.xlu1 %2071  ;;  %v2327_v18 = vpop.permute.xlu0 %2326 }
 0x1ac   : > { %2155 = vst.msk [vmem:[#allocation5 + $0x9c] sm:$0xf] %vm2141_vm12, %v2072_v13  ;;  %v2457_v13 = vld [vmem:[#allocation2 + $0x16a] sm:$0xff] }
 0x1ad   : > { %2091 = vrot.lane.b32.xlu1 %v12428_v47, %s11472_s16  ;;  %2411 = vst.msk [vmem:[#allocation5 + $0x90] sm:$0xf] %vm2398_vm13, %v2327_v18  ;;  %2346 = vrot.lane.b32.xlu0 %v12432_v17, %s11473_s17  ;;  %v12535_v18 = vpack.c.bf16 %v2201_v12, %v2201_v12 }
 0x1af   : > { %v2076_v59 = vpop.permute.xlu1 %2075  ;;  %v2331_v19 = vpop.permute.xlu0 %2330 }
 0x1b0   : > { %2157 = vst.msk [vmem:[#allocation5 + $0xb4] sm:$0xf] %vm2141_vm12, %v2076_v59  ;;  %v12540_v59 = vpack.c.bf16 %v2457_v13, %v2457_v13 }
 0x1b1   : > { %2344 = vrot.lane.b32.xlu1 %v10282_v2, %s11473_s17  ;;  %2413 = vst.msk [vmem:[#allocation5 + $0xa8] sm:$0xf] %vm2398_vm13, %v2331_v19  ;;  %2599 = vrot.lane.b32.xlu0 %v12405_v40, %s11475_s23  ;;  %v2458_v19 = vld [vmem:[#allocation2 + $0x172] sm:$0xff] }
 0x1b3   : > { %v2329_v39 = vpop.permute.xlu1 %2328  ;;  %v2584_v24 = vpop.permute.xlu0 %2583 }
 0x1b4   : > { %2412 = vst.msk [vmem:[#allocation5 + $0x9c] sm:$0xf] %vm2398_vm13, %v2329_v39  ;;  %v12552_v39 = vld [vmem:[%s15070_s2] ss:$0 sm:$0xff] }
 0x1b5   : > { %2348 = vrot.lane.b32.xlu1 %v12442_v3, %s11473_s17  ;;  %2668 = vst.msk [vmem:[#allocation5 + $0x90] sm:$0xf] %vm2655_vm14, %v2584_v24  ;;  %2603 = vrot.lane.b32.xlu0 %v12447_v20, %s11475_s23  ;;  %v12556_v24 = vpack.c.bf16 %v2458_v19, %v2458_v19 }
 0x1b7   : > { %v2333_v32 = vpop.permute.xlu1 %2332  ;;  %v2588_v25 = vpop.permute.xlu0 %2587 }
 0x1b8   : > { %2414 = vst.msk [vmem:[#allocation5 + $0xb4] sm:$0xf] %vm2398_vm13, %v2333_v32 }
 0x1b9   : > { %2601 = vrot.lane.b32.xlu1 %v12415_v60, %s11475_s23  ;;  %2670 = vst.msk [vmem:[#allocation5 + $0xa8] sm:$0xf] %vm2655_vm14, %v2588_v25  ;;  %1064 = vrot.lane.b32.xlu0 %v12405_v40, %s11468_s27 }
 0x1bb   : > { %v2586_v26 = vpop.permute.xlu1 %2585  ;;  %v1049_v27 = vpop.permute.xlu0 %1048 }
 0x1bc   : > { %2669 = vst.msk [vmem:[#allocation5 + $0x9c] sm:$0xf] %vm2655_vm14, %v2586_v26  ;;  %v2700_v33 = vld [vmem:[#allocation5 + $0x90] sm:$0xf] }
 0x1bd   : > { %2605 = vrot.lane.b32.xlu1 %v12458_v22, %s11475_s23  ;;  %1129 = vst.msk [vmem:[#allocation5 + $0xc0] sm:$0xf] %vm1112_vm8, %v1049_v27  ;;  %1068 = vrot.lane.b32.xlu0 %v12447_v20, %s11468_s27 }
 0x1bf   : > { %v2590_v42 = vpop.permute.xlu1 %2589  ;;  %v1053_v29 = vpop.permute.xlu0 %1052 }
 0x1c0   : > { %2671 = vst.msk [vmem:[#allocation5 + $0xb4] sm:$0xf] %vm2655_vm14, %v2590_v42  ;;  %v2702_v38 = vld [vmem:[#allocation5 + $0xa8] sm:$0xf] }
 0x1c1   : > { %1066 = vrot.lane.b32.xlu1 %v12415_v60, %s11468_s27  ;;  %1131 = vst.msk [vmem:[#allocation5 + $0xd8] sm:$0xf] %vm1112_vm8, %v1053_v29  ;;  %1321 = vrot.lane.b32.xlu0 %v10345_v23, %s11469_s28 }
 0x1c3   : > { %v2701_v34 = vld [vmem:[#allocation5 + $0x9c] sm:$0xf]  ;;  %v1051_v14 = vpop.permute.xlu1 %1050  ;;  %v1306_v49 = vpop.permute.xlu0 %1305 }
 0x1c4   : > { %1130 = vst.msk [vmem:[#allocation5 + $0xcc] sm:$0xf] %vm1112_vm8, %v1051_v14  ;;  %v9379_v36 = vcombine.low %v2700_v33, %v2701_v34 }
 0x1c5   : > { %1070 = vrot.lane.b32.xlu1 %v12458_v22, %s11468_s27  ;;  %1386 = vst.msk [vmem:[#allocation5 + $0xc0] sm:$0xf] %vm1369_vm9, %v1306_v49  ;;  %1325 = vrot.lane.b32.xlu0 %v10253_v37, %s11469_s28 }
 0x1c6   : > { %11162 = vmatprep.mubr.msk.bf16.mxu0 %vm2822_vm1, %v9379_v36 }
 0x1c7   : > { %v2703_v45 = vld [vmem:[#allocation5 + $0xb4] sm:$0xf]  ;;  %v1055_v46 = vpop.permute.xlu1 %1054  ;;  %v1310_v52 = vpop.permute.xlu0 %1309 }
 0x1c8   : > { %1132 = vst.msk [vmem:[#allocation5 + $0xe4] sm:$0xf] %vm1112_vm8, %v1055_v46  ;;  %v9380_v50 = vcombine.low %v2702_v38, %v2703_v45 }
 0x1c9   : > { %1323 = vrot.lane.b32.xlu1 %v12428_v47, %s11469_s28  ;;  %1388 = vst.msk [vmem:[#allocation5 + $0xd8] sm:$0xf] %vm1369_vm9, %v1310_v52  ;;  %1578 = vrot.lane.b32.xlu0 %v12432_v17, %s11470_s29 }
 0x1ca   : > { %11163 = vmatmul.mubr.msk.bf16.gmra.mxu0 %vm2822_vm1, %v9380_v50 }
 0x1cb   : > { %v1308_v21 = vpop.permute.xlu1 %1307  ;;  %v1563_v56 = vpop.permute.xlu0 %1562 }
 0x1cc   : > { %1387 = vst.msk [vmem:[#allocation5 + $0xcc] sm:$0xf] %vm1369_vm9, %v1308_v21 }
 0x1cd   : > { %1327 = vrot.lane.b32.xlu1 %v10254_v53, %s11469_s28  ;;  %1643 = vst.msk [vmem:[#allocation5 + $0xc0] sm:$0xf] %vm1626_vm10, %v1563_v56  ;;  %1582 = vrot.lane.b32.xlu0 %v10285_v44, %s11470_s29 }
 0x1cf   : > { %v1312_v51 = vpop.permute.xlu1 %1311  ;;  %v1567_v57 = vpop.permute.xlu0 %1566 }
 0x1d0   : > { %1389 = vst.msk [vmem:[#allocation5 + $0xe4] sm:$0xf] %vm1369_vm9, %v1312_v51 }
 0x1d1   : > { %1580 = vrot.lane.b32.xlu1 %v12442_v3, %s11470_s29  ;;  %1645 = vst.msk [vmem:[#allocation5 + $0xd8] sm:$0xf] %vm1626_vm10, %v1567_v57  ;;  %1835 = vrot.lane.b32.xlu0 %v12447_v20, %s11471_s14 }
 0x1d3   : > { %v1565_v7 = vpop.permute.xlu1 %1564  ;;  %v1820_v63 = vpop.permute.xlu0 %1819 }
 0x1d4   : > { %1644 = vst.msk [vmem:[#allocation5 + $0xcc] sm:$0xf] %vm1626_vm10, %v1565_v7 }
 0x1d5   : > { %1584 = vrot.lane.b32.xlu1 %v10286_v28, %s11470_s29  ;;  %1900 = vst.msk [vmem:[#allocation5 + $0xc0] sm:$0xf] %vm1883_vm11, %v1820_v63  ;;  %1839 = vrot.lane.b32.xlu0 %v12497_v48, %s11471_s14 }
 0x1d7   : > { %v1569_v2 = vpop.permute.xlu1 %1568  ;;  %v1824_v40 = vpop.permute.xlu0 %1823 }
 0x1d8   : > { %1646 = vst.msk [vmem:[#allocation5 + $0xe4] sm:$0xf] %vm1626_vm10, %v1569_v2 }
 0x1d9   : > { %1837 = vrot.lane.b32.xlu1 %v12458_v22, %s11471_s14  ;;  %1902 = vst.msk [vmem:[#allocation5 + $0xd8] sm:$0xf] %vm1883_vm11, %v1824_v40  ;;  %2093 = vrot.lane.b32.xlu0 %v10253_v37, %s11472_s16  ;;  %v1175_v37 = vld [vmem:[#allocation2 + $0x180] sm:$0xff] }
 0x1da   : > { %v12580_v15 = vpack.c.bf16 %v1175_v37, %v1175_v37 }
 0x1db   : > { %v1822_v16 = vpop.permute.xlu1 %1821  ;;  %v2078_v35 = vpop.permute.xlu0 %2077 }
 0x1dc   : > { %1901 = vst.msk [vmem:[#allocation5 + $0xcc] sm:$0xf] %vm1883_vm11, %v1822_v16 }
 0x1dd   : > { %1841 = vrot.lane.b32.xlu1 %v12507_v5, %s11471_s14  ;;  %2158 = vst.msk [vmem:[#allocation5 + $0xc0] sm:$0xf] %vm2141_vm12, %v2078_v35  ;;  %2097 = vrot.lane.b32.xlu0 %v12511_v30, %s11472_s16 }
 0x1df   : > { %v1826_v60 = vpop.permute.xlu1 %1825  ;;  %v2082_v23 = vpop.permute.xlu0 %2081 }
 0x1e0   : > { %1903 = vst.msk [vmem:[#allocation5 + $0xe4] sm:$0xf] %vm1883_vm11, %v1826_v60 }
 0x1e1   : > { %2095 = vrot.lane.b32.xlu1 %v10254_v53, %s11472_s16  ;;  %2160 = vst.msk [vmem:[#allocation5 + $0xd8] sm:$0xf] %vm2141_vm12, %v2082_v23  ;;  %2350 = vrot.lane.b32.xlu0 %v10285_v44, %s11473_s17  ;;  %v1176_v44 = vld [vmem:[#allocation2 + $0x188] sm:$0xff] }
 0x1e2   : > { %v10258_v63 = vpack.c.bf16 %v1176_v44, %v1176_v44 }
 0x1e3   : > { %v2080_v10 = vpop.permute.xlu1 %2079  ;;  %v2335_v11 = vpop.permute.xlu0 %2334 }
 0x1e4   : > { %2159 = vst.msk [vmem:[#allocation5 + $0xcc] sm:$0xf] %vm2141_vm12, %v2080_v10 }
 0x1e5   : > { %2099 = vrot.lane.b32.xlu1 %v12521_v62, %s11472_s16  ;;  %2415 = vst.msk [vmem:[#allocation5 + $0xc0] sm:$0xf] %vm2398_vm13, %v2335_v11  ;;  %2354 = vrot.lane.b32.xlu0 %v12525_v31, %s11473_s17 }
 0x1e7   : > { %v2084_v47 = vpop.permute.xlu1 %2083  ;;  %v2339_v17 = vpop.permute.xlu0 %2338 }
 0x1e8   : > { %2161 = vst.msk [vmem:[#allocation5 + $0xe4] sm:$0xf] %vm2141_vm12, %v2084_v47 }
 0x1e9   : > { %2352 = vrot.lane.b32.xlu1 %v10286_v28, %s11473_s17  ;;  %2417 = vst.msk [vmem:[#allocation5 + $0xd8] sm:$0xf] %vm2398_vm13, %v2339_v17  ;;  %2607 = vrot.lane.b32.xlu0 %v12497_v48, %s11475_s23  ;;  %v1432_v28 = vld [vmem:[#allocation2 + $0x181] sm:$0xff] }
 0x1eb   : > { %v2337_v58 = vpop.permute.xlu1 %2336  ;;  %v2592_v9 = vpop.permute.xlu0 %2591 }
 0x1ec   : > { %2416 = vst.msk [vmem:[#allocation5 + $0xcc] sm:$0xf] %vm2398_vm13, %v2337_v58  ;;  %v1690_v58 = vld [vmem:[#allocation2 + $0x18a] sm:$0xff] }
 0x1ed   : > { %2356 = vrot.lane.b32.xlu1 %v12535_v18, %s11473_s17  ;;  %2672 = vst.msk [vmem:[#allocation5 + $0xc0] sm:$0xf] %vm2655_vm14, %v2592_v9  ;;  %2611 = vrot.lane.b32.xlu0 %v12540_v59, %s11475_s23 }
 0x1ef   : > { %v2341_v3 = vpop.permute.xlu1 %2340  ;;  %v2596_v20 = vpop.permute.xlu0 %2595 }
 0x1f0   : > { %2418 = vst.msk [vmem:[#allocation5 + $0xe4] sm:$0xf] %vm2398_vm13, %v2341_v3 }
 0x1f1   : > { %2609 = vrot.lane.b32.xlu1 %v12507_v5, %s11475_s23  ;;  %2674 = vst.msk [vmem:[#allocation5 + $0xd8] sm:$0xf] %vm2655_vm14, %v2596_v20  ;;  %1072 = vrot.lane.b32.xlu0 %v12497_v48, %s11468_s27 }
 0x1f2   : > { %v11152_v6 = vpop.f32.mrf.mxu0 }
 0x1f3   : > { %v2921_v32 = vadd.f32 %v11152_v6, %v12552_v39  ;;  %v2594_v25 = vpop.permute.xlu1 %2593  ;;  %v1057_v42 = vpop.permute.xlu0 %1056 }
 0x1f4   : > { %2673 = vst.msk [vmem:[#allocation5 + $0xcc] sm:$0xf] %vm2655_vm14, %v2594_v25  ;;  %v2912_v22 = vpop.f32.mrf.mxu0  ;;  %v2704_v36 = vld [vmem:[#allocation5 + $0xc0] sm:$0xf]  ;;  %v2204_v25 = vld [vmem:[#allocation2 + $0x199] sm:$0xff] }
 0x1f5   : > { %v3041_v26 = vmax.f32 %v2921_v32, 0.0  ;;  %v2913_v27 = vadd.f32 %v12552_v39, %v2912_v22  ;;  %2613 = vrot.lane.b32.xlu1 %v12556_v24, %s11475_s23  ;;  %1133 = vst.msk [vmem:[#allocation5 + $0xf0] sm:$0xf] %vm1112_vm8, %v1057_v42  ;;  %1076 = vrot.lane.b32.xlu0 %v12540_v59, %s11468_s27  ;;  %v1948_v32 = vld [vmem:[#allocation2 + $0x1a0] sm:$0xff]  ;;  %v10385_v42 = vpack.c.bf16 %v2204_v25, %v2204_v25 }
 0x1f6   : > { %v11153_v8 = vpop.f32.mrf.mxu0 }
 0x1f7   : > { %3116 = vst.msk [vmem:[#allocation3 + $0x31] sm:$0xff] %vm3071_vm5, %v3041_v26  ;;  %v3039_v33 = vmax.f32 %v2913_v27, 0.0  ;;  %v2924_v29 = vadd.f32 %v11153_v8, %v12552_v39  ;;  %v2598_v34 = vpop.permute.xlu1 %2597  ;;  %v1061_v43 = vpop.permute.xlu0 %1060  ;;  %v10354_v26 = vpack.c.bf16 %v1948_v32, %v1948_v32 }
 0x1f8   : > { %2675 = vst.msk [vmem:[#allocation5 + $0xe4] sm:$0xf] %vm2655_vm14, %v2598_v34  ;;  %v2915_v14 = vpop.f32.mrf.mxu0  ;;  %v2706_v53 = vld [vmem:[#allocation5 + $0xd8] sm:$0xf]  ;;  %v2461_v34 = vld [vmem:[#allocation2 + $0x19a] sm:$0xff] }
 0x1f9   : > { %3114 = vst.msk [vmem:[#allocation3 + $0x19] sm:$0xff] %vm3071_vm5, %v3039_v33  ;;  %v3042_v38 = vmax.f32 %v2924_v29, 0.0  ;;  %v2916_v49 = vadd.f32 %v12552_v39, %v2915_v14  ;;  %1074 = vrot.lane.b32.xlu1 %v12507_v5, %s11468_s27  ;;  %1329 = vrot.lane.b32.xlu0 %v12511_v30, %s11469_s28  ;;  %v10289_v30 = vpack.c.bf16 %v1432_v28, %v1432_v28  ;;  %v2205_v33 = vld [vmem:[#allocation2 + $0x1a1] sm:$0xff]  ;;  %v11291_v28 = vld [vmem:[%s15071_s3 + $0x30] sm:$0xff]  }
 0x1fa   : > { %1135 = vst.msk [vmem:[#allocation5 + $0x108] sm:$0xf] %vm1112_vm8, %v1061_v43  ;;  %v10386_v37 = vpack.c.bf16 %v2205_v33, %v2205_v33  ;;  %v10417_v43 = vpack.c.bf16 %v2461_v34, %v2461_v34 }
 0x1fb   : > { %v2705_v45 = vld [vmem:[#allocation5 + $0xcc] sm:$0xf]  ;;  %3117 = vst.msk [vmem:[#allocation3 + $0x39] sm:$0xff] %vm3071_vm5, %v3042_v38  ;;  %v3040_v46 = vmax.f32 %v2916_v49, 0.0  ;;  %v1059_v50 = vpop.permute.xlu1 %1058  ;;  %v1314_v21 = vpop.permute.xlu0 %1313 }
 0x1fc   : > { %1134 = vst.msk [vmem:[#allocation5 + $0xfc] sm:$0xf] %vm1112_vm8, %v1059_v50  ;;  %v9381_v52 = vcombine.low %v2704_v36, %v2705_v45  ;;  %v11290_v45 = vld [vmem:[%s15071_s3 + $0x38] sm:$0xff]  }
 0x1fd   : > { %3115 = vst.msk [vmem:[#allocation3 + $0x21] sm:$0xff] %vm3071_vm5, %v3040_v46  ;;  %1078 = vrot.lane.b32.xlu1 %v12556_v24, %s11468_s27  ;;  %1333 = vrot.lane.b32.xlu0 %v12580_v15, %s11469_s28  ;;  %v3339_v50 = vld [vmem:[#allocation3 + $0x1] sm:$0xff] }
 0x1fe   : > { %1390 = vst.msk [vmem:[#allocation5 + $0xf0] sm:$0xf] %vm1369_vm9, %v1314_v21  ;;  %11166 = vmatprep.mubr.msk.bf16.mxu0 %vm2822_vm1, %v9381_v52  ;;  %v3150_v56 = vld [vmem:[#allocation3 + $0x30] sm:$0xff] }
 0x1ff   : > { %v2707_v41 = vld [vmem:[#allocation5 + $0xe4] sm:$0xf]  ;;  %v1063_v51 = vpop.permute.xlu1 %1062  ;;  %v10423_v54 = vpack.c.bf16 %v3150_v56, %v3150_v56  ;;  %v1318_v48 = vpop.permute.xlu0 %1317  ;;  %v2462_v56 = vld [vmem:[#allocation2 + $0x1a2] sm:$0xff] }
 0x200   : > { %1136 = vst.msk [vmem:[#allocation5 + $0x114] sm:$0xf] %vm1112_vm8, %v1063_v51  ;;  %v9382_v57 = vcombine.low %v2706_v53, %v2707_v41  ;;  %v3853_v7 = vld [vmem:[#allocation3 + $0x18] sm:$0xff] }
 0x201   : > { %1331 = vrot.lane.b32.xlu1 %v12521_v62, %s11469_s28  ;;  %v12593_v1 = vpack.c.bf16 %v3853_v7, %v3853_v7  ;;  %3311 = vst.msk [vmem:[#allocation5 + $0x30] sm:$0xf] %vm3306_vm15, %v10423_v54  ;;  %1586 = vrot.lane.b32.xlu0 %v12525_v31, %s11470_s29  ;;  %v1433_v62 = vld [vmem:[#allocation2 + $0x189] sm:$0xff] }
 0x202   : > { %v5139_v2 = vld [vmem:[#allocation3 + $0x32] sm:$0xff]  ;;  %v5140_v4 = vld [vmem:[#allocation3 + $0x3a] sm:$0xff]  ;;  %1392 = vst.msk [vmem:[#allocation5 + $0x108] sm:$0xf] %vm1369_vm9, %v1318_v48  ;;  %11167 = vmatmul.mubr.msk.bf16.gmra.mxu0 %vm2822_vm1, %v9382_v57  ;;  %v10290_v12 = vpack.c.bf16 %v1433_v62, %v1433_v62  ;;  %v10451_v57 = vpack.c.bf16 %v3339_v50, %v3339_v50  ;;  %v3596_v48 = vld [vmem:[#allocation3 + $0x2] sm:$0xff] }
 0x203   : > { %v12598_v40 = vpack.c.bf16 %v5139_v2, %v5139_v2  ;;  %v12600_v5 = vpack.c.bf16 %v5140_v4, %v5140_v4  ;;  %v1316_v16 = vpop.permute.xlu1 %1315  ;;  %3309 = vst.msk [vmem:[#allocation5 + $0x18] sm:$0xf] %vm3306_vm15, %v12593_v1  ;;  %v3151_v35 = vld [vmem:[#allocation3 + $0x38] sm:$0xff]  ;;  %v1571_v61 = vpop.permute.xlu0 %1570 }
 0x204   : > { %1391 = vst.msk [vmem:[#allocation5 + $0xfc] sm:$0xf] %vm1369_vm9, %v1316_v16  ;;  %v3854_v55 = vld [vmem:[#allocation3 + $0x20] sm:$0xff]  ;;  %v10424_v60 = vpack.c.bf16 %v3151_v35, %v3151_v35  ;;  %v1689_v31 = vld [vmem:[#allocation2 + $0x182] sm:$0xff]  ;;  %v10418_v16 = vpack.c.bf16 %v2462_v56, %v2462_v56 }
 0x205   : > { %5299 = vst.msk [vmem:[#allocation5 + $0x4] sm:$0xf] %vm3306_vm15, %v12598_v40  ;;  %5300 = vst.msk [vmem:[#allocation5 + $0x10] sm:$0xf] %vm3306_vm15, %v12600_v5  ;;  %1335 = vrot.lane.b32.xlu1 %v10258_v63, %s11469_s28  ;;  %v12612_v23 = vpack.c.bf16 %v3854_v55, %v3854_v55  ;;  %1590 = vrot.lane.b32.xlu0 %v10289_v30, %s11470_s29  ;;  %v10321_v13 = vpack.c.bf16 %v1689_v31, %v1689_v31  ;;  %v3597_v31 = vld [vmem:[#allocation3 + $0xa] sm:$0xff]  ;;  %s11480_s28 = smov 64  }
 0x206   : > { %1647 = vst.msk [vmem:[#allocation5 + $0xf0] sm:$0xf] %vm1626_vm10, %v1571_v61  ;;  %v11292_v61 = vld [vmem:[%s15071_s3 + $0x28] sm:$0xff]  }
 0x207   : > { %3312 = vst.msk [vmem:[#allocation5 + $0x3c] sm:$0xf] %vm3306_vm15, %v10424_v60  ;;  %v1320_v10 = vpop.permute.xlu1 %1319  ;;  %3310 = vst.msk [vmem:[#allocation5 + $0x24] sm:$0xf] %vm3306_vm15, %v12612_v23  ;;  %v1575_v11 = vpop.permute.xlu0 %1574  ;;  %v10483_v60 = vpack.c.bf16 %v3596_v48, %v3596_v48 }
 0x208   : > { %1393 = vst.msk [vmem:[#allocation5 + $0x114] sm:$0xf] %vm1369_vm9, %v1320_v10 }
 0x209   : > { %1588 = vrot.lane.b32.xlu1 %v12535_v18, %s11470_s29  ;;  %1649 = vst.msk [vmem:[#allocation5 + $0x108] sm:$0xf] %vm1626_vm10, %v1575_v11  ;;  %1843 = vrot.lane.b32.xlu0 %v12540_v59, %s11471_s14  ;;  %v1947_v18 = vld [vmem:[#allocation2 + $0x198] sm:$0xff]  ;;  %v12632_v59 = vpack.c.bf16 %v1690_v58, %v1690_v58 }
 0x20a   : > { %v10353_v20 = vpack.c.bf16 %v1947_v18, %v1947_v18  ;;  %v10484_v18 = vpack.c.bf16 %v3597_v31, %v3597_v31 }
 0x20b   : > { %v1573_v47 = vpop.permute.xlu1 %1572  ;;  %v1828_v17 = vpop.permute.xlu0 %1827 }
 0x20c   : > { %1648 = vst.msk [vmem:[#allocation5 + $0xfc] sm:$0xf] %vm1626_vm10, %v1573_v47  ;;  %v11293_v47 = vld [vmem:[%s15071_s3 + $0x20] sm:$0xff]  }
 0x20d   : > { %1592 = vrot.lane.b32.xlu1 %v10290_v12, %s11470_s29  ;;  %1904 = vst.msk [vmem:[#allocation5 + $0xf0] sm:$0xf] %vm1883_vm11, %v1828_v17  ;;  %1847 = vrot.lane.b32.xlu0 %v10321_v13, %s11471_s14  ;;  %s11483_s29 = smov 112  }
 0x20f   : > { %v1577_v9 = vpop.permute.xlu1 %1576  ;;  %v1832_v19 = vpop.permute.xlu0 %1831 }
 0x210   : > { %1650 = vst.msk [vmem:[#allocation5 + $0x114] sm:$0xf] %vm1626_vm10, %v1577_v9 }
 0x211   : > { %1845 = vrot.lane.b32.xlu1 %v12556_v24, %s11471_s14  ;;  %1906 = vst.msk [vmem:[#allocation5 + $0x108] sm:$0xf] %vm1883_vm11, %v1832_v19  ;;  %2101 = vrot.lane.b32.xlu0 %v12580_v15, %s11472_s16  ;;  %v11476_v15 = vmov 0  }
 0x212   : > { %5634 = vmatprep.subr.bf16.mxu1 %v11476_v15 }
 0x213   : > { %v1830_v3 = vpop.permute.xlu1 %1829  ;;  %v2086_v6 = vpop.permute.xlu0 %2085  ;;  %5635 = vmatpush1.bf16.msra.mxu1 %v11290_v45  ;;  %v11295_v45 = vld [vmem:[%s15071_s3 + $0x10] sm:$0xff]  }
 0x214   : > { %1905 = vst.msk [vmem:[#allocation5 + $0xfc] sm:$0xf] %vm1883_vm11, %v1830_v3  ;;  %5636 = vmatprep.subr.bf16.mxu1 %v11476_v15 }
 0x215   : > { %1849 = vrot.lane.b32.xlu1 %v12632_v59, %s11471_s14  ;;  %2162 = vst.msk [vmem:[#allocation5 + $0xf0] sm:$0xf] %vm2141_vm12, %v2086_v6  ;;  %2105 = vrot.lane.b32.xlu0 %v10353_v20, %s11472_s16  ;;  %v4110_v20 = vld [vmem:[#allocation3 + $0x19] sm:$0xff]  ;;  %s10127_s14 = sshll.u32 %s11557_s13, 4 }
 0x216   : > { %v12716_v34 = vpack.c.bf16 %v4110_v20, %v4110_v20 }
 0x217   : > { %v1834_v24 = vpop.permute.xlu1 %1833  ;;  %v2090_v22 = vpop.permute.xlu0 %2089  ;;  %5637 = vmatpush1.bf16.msra.mxu1 %v11291_v28  ;;  %v4882_v28 = vld [vmem:[#allocation3 + $0x31] sm:$0xff] }
 0x218   : > { %1907 = vst.msk [vmem:[#allocation5 + $0x114] sm:$0xf] %vm1883_vm11, %v1834_v24  ;;  %5638 = vmatprep.subr.bf16.mxu1 %v11476_v15 }
 0x219   : > { %2103 = vrot.lane.b32.xlu1 %v10258_v63, %s11472_s16  ;;  %2164 = vst.msk [vmem:[#allocation5 + $0x108] sm:$0xf] %vm2141_vm12, %v2090_v22  ;;  %2358 = vrot.lane.b32.xlu0 %v10289_v30, %s11473_s17  ;;  %v3340_v30 = vld [vmem:[#allocation3 + $0x9] sm:$0xff] }
 0x21a   : > { %v10452_v10 = vpack.c.bf16 %v3340_v30, %v3340_v30  ;;  %v11294_v22 = vld [vmem:[%s15071_s3 + $0x18] sm:$0xff]  }
 0x21b   : > { %v2088_v27 = vpop.permute.xlu1 %2087  ;;  %v2343_v8 = vpop.permute.xlu0 %2342  ;;  %5639 = vmatpush1.bf16.msra.mxu1 %v11292_v61 }
 0x21c   : > { %2163 = vst.msk [vmem:[#allocation5 + $0xfc] sm:$0xf] %vm2141_vm12, %v2088_v27  ;;  %5640 = vmatprep.subr.bf16.mxu1 %v11476_v15 }
 0x21d   : > { %2107 = vrot.lane.b32.xlu1 %v10354_v26, %s11472_s16  ;;  %2419 = vst.msk [vmem:[#allocation5 + $0xf0] sm:$0xf] %vm2398_vm13, %v2343_v8  ;;  %2362 = vrot.lane.b32.xlu0 %v10385_v42, %s11473_s17  ;;  %s11477_s16 = smov 16  }
 0x21f   : > { %v2092_v29 = vpop.permute.xlu1 %2091  ;;  %v2347_v14 = vpop.permute.xlu0 %2346  ;;  %5641 = vmatpush1.bf16.msra.mxu1 %v11293_v47 }
 0x220   : > { %2165 = vst.msk [vmem:[#allocation5 + $0x114] sm:$0xf] %vm2141_vm12, %v2092_v29  ;;  %5642 = vmatprep.subr.bf16.mxu1 %v11476_v15 }
 0x221   : > { %2360 = vrot.lane.b32.xlu1 %v10290_v12, %s11473_s17  ;;  %2421 = vst.msk [vmem:[#allocation5 + $0x108] sm:$0xf] %vm2398_vm13, %v2347_v14  ;;  %2615 = vrot.lane.b32.xlu0 %v10321_v13, %s11475_s23 }
 0x222   : > { %v11156_v36 = vpop.f32.mrf.mxu0 }
 0x223   : > { %v2937_v38 = vadd.f32 %v11156_v36, %v12552_v39  ;;  %v2345_v49 = vpop.permute.xlu1 %2344  ;;  %v2600_v21 = vpop.permute.xlu0 %2599  ;;  %5643 = vmatpush1.bf16.msra.mxu1 %v11294_v22  ;;  %v4367_v36 = vld [vmem:[#allocation3 + $0x1a] sm:$0xff] }
 0x224   : > { %2420 = vst.msk [vmem:[#allocation5 + $0xfc] sm:$0xf] %vm2398_vm13, %v2345_v49  ;;  %v2928_v46 = vpop.f32.mrf.mxu0  ;;  %5644 = vmatprep.subr.bf16.mxu1 %v11476_v15 }
 0x225   : > { %v3045_v52 = vmax.f32 %v2937_v38, 0.0  ;;  %v2929_v53 = vadd.f32 %v12552_v39, %v2928_v46  ;;  %2364 = vrot.lane.b32.xlu1 %v10386_v37, %s11473_s17  ;;  %2676 = vst.msk [vmem:[#allocation5 + $0xf0] sm:$0xf] %vm2655_vm14, %v2600_v21  ;;  %2619 = vrot.lane.b32.xlu0 %v10417_v43, %s11475_s23  ;;  %v10579_v21 = vpack.c.bf16 %v4367_v36, %v4367_v36  ;;  %s11481_s17 = smov 80  }
 0x226   : > { %v11157_v44 = vpop.f32.mrf.mxu0 }
 0x227   : > { %3120 = vst.msk [vmem:[#allocation3 + $0x61] sm:$0xff] %vm3071_vm5, %v3045_v52  ;;  %v3043_v41 = vmax.f32 %v2929_v53, 0.0  ;;  %v2940_v51 = vadd.f32 %v11157_v44, %v12552_v39  ;;  %v2349_v54 = vpop.permute.xlu1 %2348  ;;  %v2604_v4 = vpop.permute.xlu0 %2603  ;;  %v4111_v52 = vld [vmem:[#allocation3 + $0x21] sm:$0xff]  ;;  %5645 = vmatpush1.bf16.msra.mxu1 %v11295_v45  ;;  %v4625_v44 = vld [vmem:[#allocation3 + $0x30] sm:$0xff] }
 0x228   : > { %2422 = vst.msk [vmem:[#allocation5 + $0x114] sm:$0xf] %vm2398_vm13, %v2349_v54  ;;  %v2931_v7 = vpop.f32.mrf.mxu0  ;;  %5646 = vmatprep.subr.bf16.mxu1 %v11476_v15 }
 0x229   : > { %3118 = vst.msk [vmem:[#allocation3 + $0x49] sm:$0xff] %vm3071_vm5, %v3043_v41  ;;  %v3046_v63 = vmax.f32 %v2940_v51, 0.0  ;;  %v2932_v2 = vadd.f32 %v12552_v39, %v2931_v7  ;;  %2617 = vrot.lane.b32.xlu1 %v12632_v59, %s11475_s23  ;;  %3467 = vrot.lane.b32.xlu0 %v10451_v57, %s11477_s16  ;;  %v10548_v41 = vpack.c.bf16 %v4111_v52, %v4111_v52  ;;  %v4368_v51 = vld [vmem:[#allocation3 + $0x22] sm:$0xff] }
 0x22a   : > { %2678 = vst.msk [vmem:[#allocation5 + $0x108] sm:$0xf] %vm2655_vm14, %v2604_v4  ;;  %v10611_v57 = vpack.c.bf16 %v4625_v44, %v4625_v44  ;;  %v10580_v48 = vpack.c.bf16 %v4368_v51, %v4368_v51 }
 0x22b   : > { %3121 = vst.msk [vmem:[#allocation3 + $0x69] sm:$0xff] %vm3071_vm5, %v3046_v63  ;;  %v3044_v35 = vmax.f32 %v2932_v2, 0.0  ;;  %v2602_v55 = vpop.permute.xlu1 %2601  ;;  %v1065_v62 = vpop.permute.xlu0 %1064  ;;  %v11297_v63 = vld [vmem:[%s15071_s3] sm:$0xff]   ;;  %v4626_v2 = vld [vmem:[#allocation3 + $0x38] sm:$0xff] }
 0x22c   : > { %2677 = vst.msk [vmem:[#allocation5 + $0xfc] sm:$0xf] %vm2655_vm14, %v2602_v55  ;;  %v2708_v58 = vld [vmem:[#allocation5 + $0xf0] sm:$0xf] }
 0x22d   : > { %3119 = vst.msk [vmem:[#allocation3 + $0x51] sm:$0xff] %vm3071_vm5, %v3044_v35  ;;  %2621 = vrot.lane.b32.xlu1 %v10418_v16, %s11475_s23  ;;  %3724 = vrot.lane.b32.xlu0 %v10483_v60, %s11478_s24  ;;  %s11479_s23 = smov 48   ;;  %v12760_v16 = vpack.c.bf16 %v4882_v28, %v4882_v28  ;;  %v10612_v35 = vpack.c.bf16 %v4626_v2, %v4626_v2  ;;  %v11298_v55 = vld [vmem:[%s15071_s3 + $0x40] sm:$0xff]   ;;  %v4883_v60 = vld [vmem:[#allocation3 + $0x39] sm:$0xff] }
 0x22e   : > { %1137 = vst.msk [vmem:[#allocation5 + $0x120] sm:$0xf] %vm1112_vm8, %v1065_v62  ;;  %v3154_v11 = vld [vmem:[#allocation3 + $0x60] sm:$0xff]  ;;  %v12774_v62 = vpack.c.bf16 %v4883_v60, %v4883_v60 }
 0x22f   : > { %v2606_v12 = vpop.permute.xlu1 %2605  ;;  %v10427_v13 = vpack.c.bf16 %v3154_v11, %v3154_v11  ;;  %v1069_v9 = vpop.permute.xlu0 %1068 }
 0x230   : > { %2679 = vst.msk [vmem:[#allocation5 + $0x114] sm:$0xf] %vm2655_vm14, %v2606_v12  ;;  %v3152_v17 = vld [vmem:[#allocation3 + $0x48] sm:$0xff] }
 0x231   : > { %3469 = vrot.lane.b32.xlu1 %v10452_v10, %s11477_s16  ;;  %v10425_v19 = vpack.c.bf16 %v3152_v17, %v3152_v17  ;;  %3315 = vst.msk [vmem:[#allocation5 + $0x60] sm:$0xf] %vm3306_vm15, %v10427_v13  ;;  %3981 = vrot.lane.b32.xlu0 %v12593_v1, %s11479_s23  ;;  %v2710_v33 = vld [vmem:[#allocation5 + $0x108] sm:$0xf] }
 0x232   : > { %v5143_v59 = vld [vmem:[#allocation3 + $0x62] sm:$0xff]  ;;  %v5144_v3 = vld [vmem:[#allocation3 + $0x6a] sm:$0xff]  ;;  %1139 = vst.msk [vmem:[#allocation5 + $0x138] sm:$0xf] %vm1112_vm8, %v1069_v9 }
 0x233   : > { %v12696_v6 = vpack.c.bf16 %v5143_v59, %v5143_v59  ;;  %v12698_v32 = vpack.c.bf16 %v5144_v3, %v5144_v3  ;;  %v2709_v24 = vld [vmem:[#allocation5 + $0xfc] sm:$0xf]  ;;  %v1067_v25 = vpop.permute.xlu1 %1066  ;;  %3313 = vst.msk [vmem:[#allocation5 + $0x48] sm:$0xf] %vm3306_vm15, %v10425_v19  ;;  %v1322_v29 = vpop.permute.xlu0 %1321  ;;  %v3155_v37 = vld [vmem:[#allocation3 + $0x68] sm:$0xff] }
 0x234   : > { %v5141_v26 = vld [vmem:[#allocation3 + $0x4a] sm:$0xff]  ;;  %v5142_v27 = vld [vmem:[#allocation3 + $0x52] sm:$0xff]  ;;  %1138 = vst.msk [vmem:[#allocation5 + $0x12c] sm:$0xf] %vm1112_vm8, %v1067_v25  ;;  %v9383_v42 = vcombine.low %v2708_v58, %v2709_v24  ;;  %v10428_v46 = vpack.c.bf16 %v3155_v37, %v3155_v37 }
 0x235   : > { %5303 = vst.msk [vmem:[#allocation5 + $0x34] sm:$0xf] %vm3306_vm15, %v12696_v6  ;;  %5304 = vst.msk [vmem:[#allocation5 + $0x40] sm:$0xf] %vm3306_vm15, %v12698_v32  ;;  %v12711_v8 = vpack.c.bf16 %v5141_v26, %v5141_v26  ;;  %v12713_v1 = vpack.c.bf16 %v5142_v27, %v5142_v27  ;;  %3726 = vrot.lane.b32.xlu1 %v10484_v18, %s11478_s24  ;;  %v3153_v14 = vld [vmem:[#allocation3 + $0x50] sm:$0xff]  ;;  %4238 = vrot.lane.b32.xlu0 %v12716_v34, %s11480_s28  ;;  %v4627_v20 = vld [vmem:[#allocation3 + $0x48] sm:$0xff] }
 0x236   : > { %1394 = vst.msk [vmem:[#allocation5 + $0x120] sm:$0xf] %vm1369_vm9, %v1322_v29  ;;  %11170 = vmatprep.mubr.msk.bf16.mxu0 %vm2822_vm1, %v9383_v42  ;;  %v10426_v38 = vpack.c.bf16 %v3153_v14, %v3153_v14  ;;  %v10613_v29 = vpack.c.bf16 %v4627_v20, %v4627_v20  ;;  %v4628_v36 = vld [vmem:[#allocation3 + $0x50] sm:$0xff] }
 0x237   : > { %5301 = vst.msk [vmem:[#allocation5 + $0x1c] sm:$0xf] %vm3306_vm15, %v12711_v8  ;;  %5302 = vst.msk [vmem:[#allocation5 + $0x28] sm:$0xf] %vm3306_vm15, %v12713_v1  ;;  %v2711_v49 = vld [vmem:[#allocation5 + $0x114] sm:$0xf]  ;;  %v1071_v43 = vpop.permute.xlu1 %1070  ;;  %v1326_v53 = vpop.permute.xlu0 %1325 }
 0x238   : > { %1140 = vst.msk [vmem:[#allocation5 + $0x144] sm:$0xf] %vm1112_vm8, %v1071_v43  ;;  %v9384_v50 = vcombine.low %v2710_v33, %v2711_v49  ;;  %v4885_v52 = vld [vmem:[#allocation3 + $0x51] sm:$0xff] }
 0x239   : > { %3314 = vst.msk [vmem:[#allocation5 + $0x54] sm:$0xf] %vm3306_vm15, %v10426_v38  ;;  %3983 = vrot.lane.b32.xlu1 %v12612_v23, %s11479_s23  ;;  %3316 = vst.msk [vmem:[#allocation5 + $0x6c] sm:$0xf] %vm3306_vm15, %v10428_v46  ;;  %4495 = vrot.lane.b32.xlu0 %v10579_v21, %s11481_s17  ;;  %v11296_v23 = vld [vmem:[%s15071_s3 + $0x8] sm:$0xff]   ;;  %v10614_v46 = vpack.c.bf16 %v4628_v36, %v4628_v36 }
 0x23a   : > { %1396 = vst.msk [vmem:[#allocation5 + $0x138] sm:$0xf] %vm1369_vm9, %v1326_v53  ;;  %11171 = vmatmul.mubr.msk.bf16.gmra.mxu0 %vm2822_vm1, %v9384_v50  ;;  %5647 = vmatpush1.bf16.msra.mxu1 %v11296_v23 }
 0x23b   : > { %v1324_v56 = vpop.permute.xlu1 %1323  ;;  %v1579_v54 = vpop.permute.xlu0 %1578  ;;  %5648 = vmatprep.subr.bf16.mxu1 %v11476_v15 }
 0x23c   : > { %1395 = vst.msk [vmem:[#allocation5 + $0x12c] sm:$0xf] %vm1369_vm9, %v1324_v56 }
 0x23d   : > { %4240 = vrot.lane.b32.xlu1 %v10548_v41, %s11480_s28  ;;  %1651 = vst.msk [vmem:[#allocation5 + $0x120] sm:$0xf] %vm1626_vm10, %v1579_v54  ;;  %4753 = vrot.lane.b32.xlu0 %v10611_v57, %s11482_s25 }
 0x23e   : > { %5649 = vmatpush1.bf16.msra.mxu1 %v11297_v63 }
 0x23f   : > { %v1328_v7 = vpop.permute.xlu1 %1327  ;;  %v1583_v4 = vpop.permute.xlu0 %1582  ;;  %5664 = vmatprep.subr.bf16.mxu1 %v11476_v15 }
 0x240   : > { %1397 = vst.msk [vmem:[#allocation5 + $0x144] sm:$0xf] %vm1369_vm9, %v1328_v7 }
 0x241   : > { %4497 = vrot.lane.b32.xlu1 %v10580_v48, %s11481_s17  ;;  %1653 = vst.msk [vmem:[#allocation5 + $0x138] sm:$0xf] %vm1626_vm10, %v1583_v4  ;;  %5010 = vrot.lane.b32.xlu0 %v12760_v16, %s11483_s29 }
 0x242   : > { %5665 = vmatpush2.bf16.msra.mxu1 %v11298_v55 }
 0x243   : > { %v1581_v30 = vpop.permute.xlu1 %1580  ;;  %v1836_v61 = vpop.permute.xlu0 %1835 }
 0x244   : > { %1652 = vst.msk [vmem:[#allocation5 + $0x12c] sm:$0xf] %vm1626_vm10, %v1581_v30 }
 0x245   : > { %4755 = vrot.lane.b32.xlu1 %v10612_v35, %s11482_s25  ;;  %1908 = vst.msk [vmem:[#allocation5 + $0x120] sm:$0xf] %vm1883_vm11, %v1836_v61  ;;  %3471 = vrot.lane.b32.xlu0 %v12716_v34, %s11477_s16  ;;  %v4884_v34 = vld [vmem:[#allocation3 + $0x49] sm:$0xff] }
 0x246   : > { %v12811_v49 = vpack.c.bf16 %v4884_v34, %v4884_v34 }
 0x247   : > { %v1585_v15 = vpop.permute.xlu1 %1584  ;;  %v1840_v10 = vpop.permute.xlu0 %1839 }
 0x248   : > { %1654 = vst.msk [vmem:[#allocation5 + $0x144] sm:$0xf] %vm1626_vm10, %v1585_v15 }
 0x249   : > { %5012 = vrot.lane.b32.xlu1 %v12774_v62, %s11483_s29  ;;  %1910 = vst.msk [vmem:[#allocation5 + $0x138] sm:$0xf] %vm1883_vm11, %v1840_v10  ;;  %3728 = vrot.lane.b32.xlu0 %v10579_v21, %s11478_s24 }
 0x24b   : > { %v1838_v31 = vpop.permute.xlu1 %1837  ;;  %v2094_v11 = vpop.permute.xlu0 %2093 }
 0x24c   : > { %1909 = vst.msk [vmem:[#allocation5 + $0x12c] sm:$0xf] %vm1883_vm11, %v1838_v31 }
 0x24d   : > { %3473 = vrot.lane.b32.xlu1 %v10548_v41, %s11477_s16  ;;  %2166 = vst.msk [vmem:[#allocation5 + $0x120] sm:$0xf] %vm2141_vm12, %v2094_v11  ;;  %3985 = vrot.lane.b32.xlu0 %v10611_v57, %s11479_s23  ;;  %v12826_v57 = vpack.c.bf16 %v4885_v52, %v4885_v52 }
 0x24f   : > { %v1842_v12 = vpop.permute.xlu1 %1841  ;;  %v2098_v47 = vpop.permute.xlu0 %2097 }
 0x250   : > { %1911 = vst.msk [vmem:[#allocation5 + $0x144] sm:$0xf] %vm1883_vm11, %v1842_v12 }
 0x251   : > { %3730 = vrot.lane.b32.xlu1 %v10580_v48, %s11478_s24  ;;  %2168 = vst.msk [vmem:[#allocation5 + $0x138] sm:$0xf] %vm2141_vm12, %v2098_v47  ;;  %4242 = vrot.lane.b32.xlu0 %v12760_v16, %s11480_s28 }
 0x252   : > { %v11160_v13 = vpop.f32.mrf.mxu0 }
 0x253   : > { %v2953_v17 = vadd.f32 %v11160_v13, %v12552_v39  ;;  %v2096_v58 = vpop.permute.xlu1 %2095  ;;  %v2351_v59 = vpop.permute.xlu0 %2350 }
 0x254   : > { %2167 = vst.msk [vmem:[#allocation5 + $0x12c] sm:$0xf] %vm2141_vm12, %v2096_v58  ;;  %v2944_v9 = vpop.f32.mrf.mxu0 }
 0x255   : > { %v3049_v18 = vmax.f32 %v2953_v17, 0.0  ;;  %v2945_v19 = vadd.f32 %v12552_v39, %v2944_v9  ;;  %3987 = vrot.lane.b32.xlu1 %v10612_v35, %s11479_s23  ;;  %2423 = vst.msk [vmem:[#allocation5 + $0x120] sm:$0xf] %vm2398_vm13, %v2351_v59  ;;  %4499 = vrot.lane.b32.xlu0 %v12598_v40, %s11481_s17  ;;  %v4630_v59 = vld [vmem:[#allocation3 + $0x68] sm:$0xff] }
 0x256   : > { %v11161_v3 = vpop.f32.mrf.mxu0 }
 0x257   : > { %3124 = vst.msk [vmem:[#allocation3 + $0x91] sm:$0xff] %vm3071_vm5, %v3049_v18  ;;  %v3047_v24 = vmax.f32 %v2945_v19, 0.0  ;;  %v2956_v25 = vadd.f32 %v11161_v3, %v12552_v39  ;;  %v2100_v22 = vpop.permute.xlu1 %2099  ;;  %v2355_v33 = vpop.permute.xlu0 %2354  ;;  %v4886_v18 = vld [vmem:[#allocation3 + $0x61] sm:$0xff] }
 0x258   : > { %2169 = vst.msk [vmem:[#allocation5 + $0x144] sm:$0xf] %vm2141_vm12, %v2100_v22  ;;  %v2947_v26 = vpop.f32.mrf.mxu0  ;;  %v12875_v20 = vpack.c.bf16 %v4886_v18, %v4886_v18  ;;  %v4887_v22 = vld [vmem:[#allocation3 + $0x69] sm:$0xff] }
 0x259   : > { %3122 = vst.msk [vmem:[#allocation3 + $0x79] sm:$0xff] %vm3071_vm5, %v3047_v24  ;;  %v3050_v27 = vmax.f32 %v2956_v25, 0.0  ;;  %v2948_v42 = vadd.f32 %v12552_v39, %v2947_v26  ;;  %4244 = vrot.lane.b32.xlu1 %v12774_v62, %s11480_s28  ;;  %4757 = vrot.lane.b32.xlu0 %v10613_v29, %s11482_s25  ;;  %v10616_v25 = vpack.c.bf16 %v4630_v59, %v4630_v59 }
 0x25a   : > { %2425 = vst.msk [vmem:[#allocation5 + $0x138] sm:$0xf] %vm2398_vm13, %v2355_v33 }
 0x25b   : > { %3125 = vst.msk [vmem:[#allocation3 + $0x99] sm:$0xff] %vm3071_vm5, %v3050_v27  ;;  %v3048_v14 = vmax.f32 %v2948_v42, 0.0  ;;  %v2353_v37 = vpop.permute.xlu1 %2352  ;;  %v2608_v38 = vpop.permute.xlu0 %2607  ;;  %v12885_v42 = vpack.c.bf16 %v4887_v22, %v4887_v22 }
 0x25c   : > { %2424 = vst.msk [vmem:[#allocation5 + $0x12c] sm:$0xf] %vm2398_vm13, %v2353_v37 }
 0x25d   : > { %3123 = vst.msk [vmem:[#allocation3 + $0x81] sm:$0xff] %vm3071_vm5, %v3048_v14  ;;  %4501 = vrot.lane.b32.xlu1 %v12600_v5, %s11481_s17  ;;  %5014 = vrot.lane.b32.xlu0 %v12811_v49, %s11483_s29 }
 0x25e   : > { %2680 = vst.msk [vmem:[#allocation5 + $0x120] sm:$0xf] %vm2655_vm14, %v2608_v38  ;;  %v3158_v43 = vld [vmem:[#allocation3 + $0x90] sm:$0xff] }
 0x25f   : > { %v2357_v45 = vpop.permute.xlu1 %2356  ;;  %v10431_v50 = vpack.c.bf16 %v3158_v43, %v3158_v43  ;;  %v2612_v21 = vpop.permute.xlu0 %2611 }
 0x260   : > { %2426 = vst.msk [vmem:[#allocation5 + $0x144] sm:$0xf] %vm2398_vm13, %v2357_v45  ;;  %v3156_v53 = vld [vmem:[#allocation3 + $0x78] sm:$0xff] }
 0x261   : > { %4759 = vrot.lane.b32.xlu1 %v10614_v46, %s11482_s25  ;;  %v10429_v44 = vpack.c.bf16 %v3156_v53, %v3156_v53  ;;  %3319 = vst.msk [vmem:[#allocation5 + $0x90] sm:$0xf] %vm3306_vm15, %v10431_v50  ;;  %3475 = vrot.lane.b32.xlu0 %v12760_v16, %s11477_s16  ;;  %v4631_v50 = vld [vmem:[#allocation3 + $0x78] sm:$0xff] }
 0x262   : > { %v5147_v56 = vld [vmem:[#allocation3 + $0x92] sm:$0xff]  ;;  %v5148_v41 = vld [vmem:[#allocation3 + $0x9a] sm:$0xff]  ;;  %2682 = vst.msk [vmem:[#allocation5 + $0x138] sm:$0xf] %vm2655_vm14, %v2612_v21 }
 0x263   : > { %v12820_v23 = vpack.c.bf16 %v5147_v56, %v5147_v56  ;;  %v12822_v51 = vpack.c.bf16 %v5148_v41, %v5148_v41  ;;  %v2610_v54 = vpop.permute.xlu1 %2609  ;;  %3317 = vst.msk [vmem:[#allocation5 + $0x78] sm:$0xf] %vm3306_vm15, %v10429_v44  ;;  %v3159_v28 = vld [vmem:[#allocation3 + $0x98] sm:$0xff]  ;;  %v1073_v16 = vpop.permute.xlu0 %1072 }
 0x264   : > { %v5145_v7 = vld [vmem:[#allocation3 + $0x7a] sm:$0xff]  ;;  %v5146_v48 = vld [vmem:[#allocation3 + $0x82] sm:$0xff]  ;;  %2681 = vst.msk [vmem:[#allocation5 + $0x12c] sm:$0xf] %vm2655_vm14, %v2610_v54  ;;  %v10432_v63 = vpack.c.bf16 %v3159_v28, %v3159_v28 }
 0x265   : > { %5307 = vst.msk [vmem:[#allocation5 + $0x64] sm:$0xf] %vm3306_vm15, %v12820_v23  ;;  %5308 = vst.msk [vmem:[#allocation5 + $0x70] sm:$0xf] %vm3306_vm15, %v12822_v51  ;;  %v12834_v2 = vpack.c.bf16 %v5145_v7, %v5145_v7  ;;  %v12836_v4 = vpack.c.bf16 %v5146_v48, %v5146_v48  ;;  %5016 = vrot.lane.b32.xlu1 %v12826_v57, %s11483_s29  ;;  %v3157_v30 = vld [vmem:[#allocation3 + $0x80] sm:$0xff]  ;;  %3732 = vrot.lane.b32.xlu0 %v12598_v40, %s11478_s24 }
 0x266   : > { %1141 = vst.msk [vmem:[#allocation5 + $0x150] sm:$0xf] %vm1112_vm8, %v1073_v16  ;;  %v10430_v35 = vpack.c.bf16 %v3157_v30, %v3157_v30  ;;  %v2712_v60 = vld [vmem:[#allocation5 + $0x120] sm:$0xf] }
 0x267   : > { %3320 = vst.msk [vmem:[#allocation5 + $0x9c] sm:$0xf] %vm3306_vm15, %v10432_v63  ;;  %5305 = vst.msk [vmem:[#allocation5 + $0x4c] sm:$0xf] %vm3306_vm15, %v12834_v2  ;;  %v2614_v55 = vpop.permute.xlu1 %2613  ;;  %v1077_v61 = vpop.permute.xlu0 %1076  ;;  %v4888_v28 = vld [vmem:[#allocation3 + $0x79] sm:$0xff] }
 0x268   : > { %5306 = vst.msk [vmem:[#allocation5 + $0x58] sm:$0xf] %vm3306_vm15, %v12836_v4  ;;  %3318 = vst.msk [vmem:[#allocation5 + $0x84] sm:$0xf] %vm3306_vm15, %v10430_v35  ;;  %v4632_v63 = vld [vmem:[#allocation3 + $0x80] sm:$0xff]  ;;  %v12928_v16 = vpack.c.bf16 %v4888_v28, %v4888_v28 }
 0x269   : > { %2683 = vst.msk [vmem:[#allocation5 + $0x144] sm:$0xf] %vm2655_vm14, %v2614_v55  ;;  %3477 = vrot.lane.b32.xlu1 %v12774_v62, %s11477_s16  ;;  %3989 = vrot.lane.b32.xlu0 %v10613_v29, %s11479_s23  ;;  %v2714_v11 = vld [vmem:[#allocation5 + $0x138] sm:$0xf]  ;;  %v10618_v55 = vpack.c.bf16 %v4632_v63, %v4632_v63 }
 0x26a   : > { %1143 = vst.msk [vmem:[#allocation5 + $0x168] sm:$0xf] %vm1112_vm8, %v1077_v61  ;;  %v4889_v61 = vld [vmem:[#allocation3 + $0x81] sm:$0xff] }
 0x26b   : > { %v2713_v15 = vld [vmem:[#allocation5 + $0x12c] sm:$0xf]  ;;  %v1075_v10 = vpop.permute.xlu1 %1074  ;;  %v1330_v40 = vpop.permute.xlu0 %1329 }
 0x26c   : > { %1142 = vst.msk [vmem:[#allocation5 + $0x15c] sm:$0xf] %vm1112_vm8, %v1075_v10  ;;  %v9385_v31 = vcombine.low %v2712_v60, %v2713_v15 }
 0x26d   : > { %3734 = vrot.lane.b32.xlu1 %v12600_v5, %s11478_s24  ;;  %1398 = vst.msk [vmem:[#allocation5 + $0x150] sm:$0xf] %vm1369_vm9, %v1330_v40  ;;  %4246 = vrot.lane.b32.xlu0 %v12811_v49, %s11480_s28  ;;  %v4629_v5 = vld [vmem:[#allocation3 + $0x60] sm:$0xff] }
 0x26e   : > { %11174 = vmatprep.mubr.msk.bf16.mxu0 %vm2822_vm1, %v9385_v31  ;;  %v10615_v9 = vpack.c.bf16 %v4629_v5, %v4629_v5 }
 0x26f   : > { %v1079_v62 = vpop.permute.xlu1 %1078  ;;  %v1334_v13 = vpop.permute.xlu0 %1333 }
 0x270   : > { %v2715_v12 = vld [vmem:[#allocation5 + $0x144] sm:$0xf]  ;;  %1144 = vst.msk [vmem:[#allocation5 + $0x174] sm:$0xf] %vm1112_vm8, %v1079_v62  ;;  %vm4334_vm8 = vcmask 650752  }
 0x271   : > { %v9386_v47 = vcombine.low %v2714_v11, %v2715_v12  ;;  %3991 = vrot.lane.b32.xlu1 %v10614_v46, %s11479_s23  ;;  %1400 = vst.msk [vmem:[#allocation5 + $0x168] sm:$0xf] %vm1369_vm9, %v1334_v13  ;;  %4503 = vrot.lane.b32.xlu0 %v12711_v8, %s11481_s17  ;;  %v12945_v13 = vpack.c.bf16 %v4889_v61, %v4889_v61 }
 0x273   : > { %11175 = vmatmul.mubr.msk.bf16.gmra.mxu0 %vm2822_vm1, %v9386_v47  ;;  %v1332_v17 = vpop.permute.xlu1 %1331  ;;  %v1587_v58 = vpop.permute.xlu0 %1586 }
 0x274   : > { %1399 = vst.msk [vmem:[#allocation5 + $0x15c] sm:$0xf] %vm1369_vm9, %v1332_v17 }
 0x275   : > { %4248 = vrot.lane.b32.xlu1 %v12826_v57, %s11480_s28  ;;  %1655 = vst.msk [vmem:[#allocation5 + $0x150] sm:$0xf] %vm1626_vm10, %v1587_v58  ;;  %4761 = vrot.lane.b32.xlu0 %v10615_v9, %s11482_s25 }
 0x277   : > { %v1336_v19 = vpop.permute.xlu1 %1335  ;;  %v1591_v3 = vpop.permute.xlu0 %1590 }
 0x278   : > { %1401 = vst.msk [vmem:[#allocation5 + $0x174] sm:$0xf] %vm1369_vm9, %v1336_v19  ;;  %vm4591_vm9 = vcmask 781952  }
 0x279   : > { %4505 = vrot.lane.b32.xlu1 %v12713_v1, %s11481_s17  ;;  %1657 = vst.msk [vmem:[#allocation5 + $0x168] sm:$0xf] %vm1626_vm10, %v1591_v3  ;;  %5018 = vrot.lane.b32.xlu0 %v12875_v20, %s11483_s29 }
 0x27b   : > { %v1589_v24 = vpop.permute.xlu1 %1588  ;;  %v1844_v26 = vpop.permute.xlu0 %1843 }
 0x27c   : > { %1656 = vst.msk [vmem:[#allocation5 + $0x15c] sm:$0xf] %vm1626_vm10, %v1589_v24 }
 0x27d   : > { %4763 = vrot.lane.b32.xlu1 %v10616_v25, %s11482_s25  ;;  %1912 = vst.msk [vmem:[#allocation5 + $0x150] sm:$0xf] %vm1883_vm11, %v1844_v26  ;;  %3479 = vrot.lane.b32.xlu0 %v12811_v49, %s11477_s16 }
 0x27f   : > { %v1593_v27 = vpop.permute.xlu1 %1592  ;;  %v1848_v33 = vpop.permute.xlu0 %1847 }
 0x280   : > { %1658 = vst.msk [vmem:[#allocation5 + $0x174] sm:$0xf] %vm1626_vm10, %v1593_v27  ;;  %vm4849_vm10 = vcmask 913152  }
 0x281   : > { %5020 = vrot.lane.b32.xlu1 %v12885_v42, %s11483_s29  ;;  %1914 = vst.msk [vmem:[#allocation5 + $0x168] sm:$0xf] %vm1883_vm11, %v1848_v33  ;;  %3736 = vrot.lane.b32.xlu0 %v12711_v8, %s11478_s24 }
 0x283   : > { %v1846_v29 = vpop.permute.xlu1 %1845  ;;  %v2102_v34 = vpop.permute.xlu0 %2101 }
 0x284   : > { %1913 = vst.msk [vmem:[#allocation5 + $0x15c] sm:$0xf] %vm1883_vm11, %v1846_v29 }
 0x285   : > { %3481 = vrot.lane.b32.xlu1 %v12826_v57, %s11477_s16  ;;  %2170 = vst.msk [vmem:[#allocation5 + $0x150] sm:$0xf] %vm2141_vm12, %v2102_v34  ;;  %3993 = vrot.lane.b32.xlu0 %v10615_v9, %s11479_s23  ;;  %v12918_v57 = vpack.c.bf16 %v4631_v50, %v4631_v50 }
 0x287   : > { %v1850_v14 = vpop.permute.xlu1 %1849  ;;  %v2106_v37 = vpop.permute.xlu0 %2105 }
 0x288   : > { %1915 = vst.msk [vmem:[#allocation5 + $0x174] sm:$0xf] %vm1883_vm11, %v1850_v14  ;;  %vm5106_vm11 = vcmask 1044352  }
 0x289   : > { %3738 = vrot.lane.b32.xlu1 %v12713_v1, %s11478_s24  ;;  %2172 = vst.msk [vmem:[#allocation5 + $0x168] sm:$0xf] %vm2141_vm12, %v2106_v37  ;;  %4250 = vrot.lane.b32.xlu0 %v12875_v20, %s11480_s28 }
 0x28a   : > { %v11164_v8 = vpop.f32.mrf.mxu0 }
 0x28b   : > { %v2969_v36 = vadd.f32 %v11164_v8, %v12552_v39  ;;  %v2104_v38 = vpop.permute.xlu1 %2103  ;;  %v2359_v46 = vpop.permute.xlu0 %2358 }
 0x28c   : > { %2171 = vst.msk [vmem:[#allocation5 + $0x15c] sm:$0xf] %vm2141_vm12, %v2104_v38  ;;  %v2960_v49 = vpop.f32.mrf.mxu0 }
 0x28d   : > { %v3053_v43 = vmax.f32 %v2969_v36, 0.0  ;;  %v2961_v45 = vadd.f32 %v12552_v39, %v2960_v49  ;;  %3995 = vrot.lane.b32.xlu1 %v10616_v25, %s11479_s23  ;;  %2427 = vst.msk [vmem:[#allocation5 + $0x150] sm:$0xf] %vm2398_vm13, %v2359_v46  ;;  %4507 = vrot.lane.b32.xlu0 %v12696_v6, %s11481_s17  ;;  %v4890_v49 = vld [vmem:[#allocation3 + $0x91] sm:$0xff] }
 0x28e   : > { %v11165_v1 = vpop.f32.mrf.mxu0 }
 0x28f   : > { %3128 = vst.msk [vmem:[#allocation3 + $0xc1] sm:$0xff] %vm3071_vm5, %v3053_v43  ;;  %v3051_v52 = vmax.f32 %v2961_v45, 0.0  ;;  %v2972_v53 = vadd.f32 %v11165_v1, %v12552_v39  ;;  %v2108_v21 = vpop.permute.xlu1 %2107  ;;  %v2363_v54 = vpop.permute.xlu0 %2362  ;;  %v4634_v45 = vld [vmem:[#allocation3 + $0x98] sm:$0xff]  ;;  %v12999_v1 = vpack.c.bf16 %v4890_v49, %v4890_v49 }
 0x290   : > { %2173 = vst.msk [vmem:[#allocation5 + $0x174] sm:$0xf] %vm2141_vm12, %v2108_v21  ;;  %v2963_v44 = vpop.f32.mrf.mxu0  ;;  %vm6062_vm12 = vcmask 257024  }
 0x291   : > { %3126 = vst.msk [vmem:[#allocation3 + $0xa9] sm:$0xff] %vm3071_vm5, %v3051_v52  ;;  %v3054_v56 = vmax.f32 %v2972_v53, 0.0  ;;  %v2964_v41 = vadd.f32 %v12552_v39, %v2963_v44  ;;  %4252 = vrot.lane.b32.xlu1 %v12885_v42, %s11480_s28  ;;  %4765 = vrot.lane.b32.xlu0 %v12918_v57, %s11482_s25  ;;  %v10620_v52 = vpack.c.bf16 %v4634_v45, %v4634_v45  ;;  %v4891_v53 = vld [vmem:[#allocation3 + $0x99] sm:$0xff]  ;;  %v5902_v44 = vld [vmem:[#allocation4] sm:$0xff] }
 0x292   : > { %2429 = vst.msk [vmem:[#allocation5 + $0x168] sm:$0xf] %vm2398_vm13, %v2363_v54 }
 0x293   : > { %3129 = vst.msk [vmem:[#allocation3 + $0xc9] sm:$0xff] %vm3071_vm5, %v3054_v56  ;;  %v3052_v7 = vmax.f32 %v2964_v41, 0.0  ;;  %v2361_v48 = vpop.permute.xlu1 %2360  ;;  %v2616_v39 = vpop.permute.xlu0 %2615  ;;  %v13009_v41 = vpack.c.bf16 %v4891_v53, %v4891_v53 }
 0x294   : > { %2428 = vst.msk [vmem:[#allocation5 + $0x15c] sm:$0xf] %vm2398_vm13, %v2361_v48  ;;  %v5903_v48 = vld [vmem:[#allocation4 + $0x8] sm:$0xff] }
 0x295   : > { %3127 = vst.msk [vmem:[#allocation3 + $0xb1] sm:$0xff] %vm3071_vm5, %v3052_v7  ;;  %4509 = vrot.lane.b32.xlu1 %v12698_v32, %s11481_s17  ;;  %5022 = vrot.lane.b32.xlu0 %v12928_v16, %s11483_s29 }
 0x296   : > { %2684 = vst.msk [vmem:[#allocation5 + $0x150] sm:$0xf] %vm2655_vm14, %v2616_v39  ;;  %v3162_v30 = vld [vmem:[#allocation3 + $0xc0] sm:$0xff] }
 0x297   : > { %v2365_v35 = vpop.permute.xlu1 %2364  ;;  %v10435_v60 = vpack.c.bf16 %v3162_v30, %v3162_v30  ;;  %v2620_v10 = vpop.permute.xlu0 %2619 }
 0x298   : > { %2430 = vst.msk [vmem:[#allocation5 + $0x174] sm:$0xf] %vm2398_vm13, %v2365_v35  ;;  %v4635_v15 = vld [vmem:[#allocation3 + $0xa8] sm:$0xff]  ;;  %vm5837_vm13 = vcmask 253952  }
 0x299   : > { %4767 = vrot.lane.b32.xlu1 %v10618_v55, %s11482_s25  ;;  %v12935_v31 = vpack.c.bf16 %v4635_v15, %v4635_v15  ;;  %3323 = vst.msk [vmem:[#allocation5 + $0xc0] sm:$0xf] %vm3306_vm15, %v10435_v60  ;;  %3483 = vrot.lane.b32.xlu0 %v12875_v20, %s11477_s16 }
 0x29a   : > { %v5151_v11 = vld [vmem:[#allocation3 + $0xc2] sm:$0xff]  ;;  %v5152_v40 = vld [vmem:[#allocation3 + $0xca] sm:$0xff]  ;;  %2686 = vst.msk [vmem:[#allocation5 + $0x168] sm:$0xf] %vm2655_vm14, %v2620_v10 }
 0x29b   : > { %v12939_v12 = vpack.c.bf16 %v5151_v11, %v5151_v11  ;;  %v12941_v62 = vpack.c.bf16 %v5152_v40, %v5152_v40  ;;  %v2618_v47 = vpop.permute.xlu1 %2617  ;;  %3321 = vst.msk [vmem:[#allocation5 + $0xa8] sm:$0xf] %vm3306_vm15, %v12935_v31  ;;  %v3163_v5 = vld [vmem:[#allocation3 + $0xc8] sm:$0xff]  ;;  %v3468_v3 = vpop.permute.xlu0 %3467 }
 0x29c   : > { %v5149_v17 = vld [vmem:[#allocation3 + $0xaa] sm:$0xff]  ;;  %v5150_v58 = vld [vmem:[#allocation3 + $0xb2] sm:$0xff]  ;;  %2685 = vst.msk [vmem:[#allocation5 + $0x15c] sm:$0xf] %vm2655_vm14, %v2618_v47  ;;  %v10436_v18 = vpack.c.bf16 %v3163_v5, %v3163_v5 }
 0x29d   : > { %v4636_v9 = vld [vmem:[#allocation3 + $0xb0] sm:$0xff]  ;;  %5311 = vst.msk [vmem:[#allocation5 + $0x94] sm:$0xf] %vm3306_vm15, %v12939_v12  ;;  %5312 = vst.msk [vmem:[#allocation5 + $0xa0] sm:$0xf] %vm3306_vm15, %v12941_v62  ;;  %v12954_v19 = vpack.c.bf16 %v5149_v17, %v5149_v17  ;;  %v12956_v59 = vpack.c.bf16 %v5150_v58, %v5150_v58  ;;  %5024 = vrot.lane.b32.xlu1 %v12945_v13, %s11483_s29  ;;  %3740 = vrot.lane.b32.xlu0 %v12696_v6, %s11478_s24 }
 0x29e   : > { %v12960_v20 = vpack.c.bf16 %v4636_v9, %v4636_v9  ;;  %3564 = vst.msk [vmem:[#allocation5] sm:$0xf] %vm3563_vm4, %v3468_v3  ;;  %v2716_v25 = vld [vmem:[#allocation5 + $0x150] sm:$0xf] }
 0x29f   : > { %3324 = vst.msk [vmem:[#allocation5 + $0xcc] sm:$0xf] %vm3306_vm15, %v10436_v18  ;;  %5309 = vst.msk [vmem:[#allocation5 + $0x7c] sm:$0xf] %vm3306_vm15, %v12954_v19  ;;  %v2622_v24 = vpop.permute.xlu1 %2621  ;;  %v3725_v22 = vpop.permute.xlu0 %3724 }
 0x2a0   : > { %5310 = vst.msk [vmem:[#allocation5 + $0x88] sm:$0xf] %vm3306_vm15, %v12956_v59  ;;  %3322 = vst.msk [vmem:[#allocation5 + $0xb4] sm:$0xf] %vm3306_vm15, %v12960_v20 }
 0x2a1   : > { %2687 = vst.msk [vmem:[#allocation5 + $0x174] sm:$0xf] %vm2655_vm14, %v2622_v24  ;;  %3485 = vrot.lane.b32.xlu1 %v12885_v42, %s11477_s16  ;;  %3997 = vrot.lane.b32.xlu0 %v12918_v57, %s11479_s23  ;;  %v2718_v33 = vld [vmem:[#allocation5 + $0x168] sm:$0xf]  ;;  %v10707_v57 = vpack.c.bf16 %v5902_v44, %v5902_v44  ;;  %vm5830_vm14 = vcmask 254976  }
 0x2a2   : > { %3821 = vst.msk [vmem:[#allocation5] sm:$0xf] %vm3820_vm6, %v3725_v22 }
 0x2a3   : > { %v2717_v26 = vld [vmem:[#allocation5 + $0x15c] sm:$0xf]  ;;  %v3470_v27 = vpop.permute.xlu1 %3469  ;;  %v3982_v29 = vpop.permute.xlu0 %3981  ;;  %5855 = vst.msk [vmem:[#allocation4 + $0x41] sm:$0x1] %vm5837_vm13, %v11466_v0  ;;  %5838 = vst.msk [vmem:[#allocation4 + $0x18] sm:$0x1] %vm5837_vm13, %v11466_v0 }
 0x2a4   : > { %3565 = vst.msk [vmem:[#allocation5 + $0xc] sm:$0xf] %vm3563_vm4, %v3470_v27  ;;  %v9387_v6 = vcombine.low %v2716_v25, %v2717_v26  ;;  %v4892_v25 = vld [vmem:[#allocation3 + $0xa9] sm:$0xff] }
 0x2a5   : > { %3742 = vrot.lane.b32.xlu1 %v12698_v32, %s11478_s24  ;;  %4078 = vst.msk [vmem:[#allocation5] sm:$0xf] %vm4077_vm7, %v3982_v29  ;;  %4254 = vrot.lane.b32.xlu0 %v12928_v16, %s11480_s28  ;;  %v4633_v32 = vld [vmem:[#allocation3 + $0x90] sm:$0xff] }
 0x2a6   : > { %11178 = vmatprep.mubr.msk.bf16.mxu0 %vm2822_vm1, %v9387_v6  ;;  %v10619_v38 = vpack.c.bf16 %v4633_v32, %v4633_v32  ;;  %v13058_v6 = vpack.c.bf16 %v4892_v25, %v4892_v25  ;;  %5839 = vst.msk [vmem:[#allocation4 + $0x30] sm:$0x1] %vm5837_vm13, %v11466_v0  ;;  %5840 = vst.msk [vmem:[#allocation4 + $0x48] sm:$0x1] %vm5837_vm13, %v11466_v0 }
 0x2a7   : > { %v3727_v34 = vpop.permute.xlu1 %3726  ;;  %v4239_v37 = vpop.permute.xlu0 %4238  ;;  %5841 = vst.msk [vmem:[#allocation4 + $0x60] sm:$0x1] %vm5837_vm13, %v11466_v0  ;;  %5842 = vst.msk [vmem:[#allocation4 + $0x78] sm:$0x1] %vm5837_vm13, %v11466_v0 }
 0x2a8   : > { %v2719_v42 = vld [vmem:[#allocation5 + $0x174] sm:$0xf]  ;;  %3822 = vst.msk [vmem:[#allocation5 + $0xc] sm:$0xf] %vm3820_vm6, %v3727_v34 }
 0x2a9   : > { %v9388_v14 = vcombine.low %v2718_v33, %v2719_v42  ;;  %3999 = vrot.lane.b32.xlu1 %v10618_v55, %s11479_s23  ;;  %4335 = vst.msk [vmem:[#allocation5] sm:$0xf] %vm4334_vm8, %v4239_v37  ;;  %4511 = vrot.lane.b32.xlu0 %v12834_v2, %s11481_s17  ;;  %v13030_v55 = vld [vmem:[%s15070_s2] ss:$0 sm:$0xff]  ;;  %v4893_v34 = vld [vmem:[#allocation3 + $0xb1] sm:$0xff] }
 0x2aa   : > { %v13076_v45 = vpack.c.bf16 %v4893_v34, %v4893_v34  ;;  %5843 = vst.msk [vmem:[#allocation4 + $0x90] sm:$0x1] %vm5837_vm13, %v11466_v0  ;;  %5844 = vst.msk [vmem:[#allocation4 + $0xa8] sm:$0x1] %vm5837_vm13, %v11466_v0 }
 0x2ab   : > { %11179 = vmatmul.mubr.msk.bf16.gmra.mxu0 %vm2822_vm1, %v9388_v14  ;;  %v3984_v8 = vpop.permute.xlu1 %3983  ;;  %v4496_v36 = vpop.permute.xlu0 %4495  ;;  %5845 = vst.msk [vmem:[#allocation4 + $0xc0] sm:$0x1] %vm5837_vm13, %v11466_v0  ;;  %5846 = vst.msk [vmem:[#allocation4 + $0xd8] sm:$0x1] %vm5837_vm13, %v11466_v0  ;;  %vm6576_vm1 = vcmask 781824  }
 0x2ac   : > { %4079 = vst.msk [vmem:[#allocation5 + $0xc] sm:$0xf] %vm4077_vm7, %v3984_v8 }
 0x2ad   : > { %4256 = vrot.lane.b32.xlu1 %v12945_v13, %s11480_s28  ;;  %4592 = vst.msk [vmem:[#allocation5] sm:$0xf] %vm4591_vm9, %v4496_v36  ;;  %4769 = vrot.lane.b32.xlu0 %v10619_v38, %s11482_s25 }
 0x2ae   : > { %5847 = vst.msk [vmem:[#allocation4 + $0xf0] sm:$0x1] %vm5837_vm13, %v11466_v0  ;;  %5848 = vst.msk [vmem:[#allocation4 + $0x108] sm:$0x1] %vm5837_vm13, %v11466_v0 }
 0x2af   : > { %v4241_v43 = vpop.permute.xlu1 %4240  ;;  %v4754_v46 = vpop.permute.xlu0 %4753  ;;  %5849 = vst.msk [vmem:[#allocation4 + $0x120] sm:$0x1] %vm5837_vm13, %v11466_v0  ;;  %5850 = vst.msk [vmem:[#allocation4 + $0x138] sm:$0x1] %vm5837_vm13, %v11466_v0 }
 0x2b0   : > { %4336 = vst.msk [vmem:[#allocation5 + $0xc] sm:$0xf] %vm4334_vm8, %v4241_v43 }
 0x2b1   : > { %4513 = vrot.lane.b32.xlu1 %v12836_v4, %s11481_s17  ;;  %4850 = vst.msk [vmem:[#allocation5] sm:$0xf] %vm4849_vm10, %v4754_v46  ;;  %5026 = vrot.lane.b32.xlu0 %v12999_v1, %s11483_s29 }
 0x2b2   : > { %5851 = vst.msk [vmem:[#allocation4 + $0x150] sm:$0x1] %vm5837_vm13, %v11466_v0  ;;  %5852 = vst.msk [vmem:[#allocation4 + $0x168] sm:$0x1] %vm5837_vm13, %v11466_v0 }
 0x2b3   : > { %v4498_v50 = vpop.permute.xlu1 %4497  ;;  %v5011_v21 = vpop.permute.xlu0 %5010  ;;  %5853 = vst.msk [vmem:[#allocation4 + $0x180] sm:$0x1] %vm5837_vm13, %v11466_v0  ;;  %5854 = vst.msk [vmem:[#allocation4 + $0x29] sm:$0x1] %vm5837_vm13, %v11466_v0 }
 0x2b4   : > { %4593 = vst.msk [vmem:[#allocation5 + $0xc] sm:$0xf] %vm4591_vm9, %v4498_v50 }
 0x2b5   : > { %4771 = vrot.lane.b32.xlu1 %v10620_v52, %s11482_s25  ;;  %5107 = vst.msk [vmem:[#allocation5] sm:$0xf] %vm5106_vm11, %v5011_v21  ;;  %3487 = vrot.lane.b32.xlu0 %v12928_v16, %s11477_s16  ;;  %v10708_v16 = vpack.c.bf16 %v5903_v48, %v5903_v48 }
 0x2b6   : > { %5856 = vst.msk [vmem:[#allocation4 + $0x59] sm:$0x1] %vm5837_vm13, %v11466_v0  ;;  %5857 = vst.msk [vmem:[#allocation4 + $0x71] sm:$0x1] %vm5837_vm13, %v11466_v0 }
 0x2b7   : > { %v4756_v56 = vpop.permute.xlu1 %4755  ;;  %v3472_v54 = vpop.permute.xlu0 %3471  ;;  %5858 = vst.msk [vmem:[#allocation4 + $0x89] sm:$0x1] %vm5837_vm13, %v11466_v0  ;;  %5859 = vst.msk [vmem:[#allocation4 + $0xa1] sm:$0x1] %vm5837_vm13, %v11466_v0 }
 0x2b8   : > { %4851 = vst.msk [vmem:[#allocation5 + $0xc] sm:$0xf] %vm4849_vm10, %v4756_v56 }
 0x2b9   : > { %5028 = vrot.lane.b32.xlu1 %v13009_v41, %s11483_s29  ;;  %3566 = vst.msk [vmem:[#allocation5 + $0x18] sm:$0xf] %vm3563_vm4, %v3472_v54  ;;  %3744 = vrot.lane.b32.xlu0 %v12834_v2, %s11478_s24 }
 0x2ba   : > { %5860 = vst.msk [vmem:[#allocation4 + $0xb9] sm:$0x1] %vm5837_vm13, %v11466_v0  ;;  %5861 = vst.msk [vmem:[#allocation4 + $0xd1] sm:$0x1] %vm5837_vm13, %v11466_v0 }
 0x2bb   : > { %v5013_v28 = vpop.permute.xlu1 %5012  ;;  %v3729_v63 = vpop.permute.xlu0 %3728  ;;  %5862 = vst.msk [vmem:[#allocation4 + $0xe9] sm:$0x1] %vm5837_vm13, %v11466_v0  ;;  %5863 = vst.msk [vmem:[#allocation4 + $0x101] sm:$0x1] %vm5837_vm13, %v11466_v0 }
 0x2bc   : > { %5108 = vst.msk [vmem:[#allocation5 + $0xc] sm:$0xf] %vm5106_vm11, %v5013_v28  ;;  %v5331_v7 = vld [vmem:[#allocation5] sm:$0xff] }
 0x2bd   : > { %3489 = vrot.lane.b32.xlu1 %v12945_v13, %s11477_s16  ;;  %6063 = vst.msk [vmem:[#allocation5] sm:$0xf] %vm6062_vm12, %v10707_v57  ;;  %4001 = vrot.lane.b32.xlu0 %v10619_v38, %s11479_s23 }
 0x2be   : > { %3823 = vst.msk [vmem:[#allocation5 + $0x18] sm:$0xf] %vm3820_vm6, %v3729_v63 }
 0x2bf   : > { %v3474_v39 = vpop.permute.xlu1 %3473  ;;  %v3986_v2 = vpop.permute.xlu0 %3985  ;;  %5864 = vst.msk [vmem:[#allocation4 + $0x119] sm:$0x1] %vm5837_vm13, %v11466_v0  ;;  %5865 = vst.msk [vmem:[#allocation4 + $0x131] sm:$0x1] %vm5837_vm13, %v11466_v0 }
 0x2c0   : > { %3567 = vst.msk [vmem:[#allocation5 + $0x24] sm:$0xf] %vm3563_vm4, %v3474_v39  ;;  %v11299_v39 = vld [vmem:[#allocation5 + $0x1c] ss:$12 sps:$4 sm:$0xff]  }
 0x2c1   : > { %3746 = vrot.lane.b32.xlu1 %v12836_v4, %s11478_s24  ;;  %4080 = vst.msk [vmem:[#allocation5 + $0x18] sm:$0xf] %vm4077_vm7, %v3986_v2  ;;  %4258 = vrot.lane.b32.xlu0 %v12999_v1, %s11480_s28 }
 0x2c2   : > { %v11168_v30 = vpop.f32.mrf.mxu0  ;;  %5866 = vst.msk [vmem:[#allocation4 + $0x149] sm:$0x1] %vm5837_vm13, %v11466_v0  ;;  %5867 = vst.msk [vmem:[#allocation4 + $0x161] sm:$0x1] %vm5837_vm13, %v11466_v0 }
 0x2c3   : > { %v5332_v35 = vld [vmem:[#allocation5 + $0xc] sm:$0xff]  ;;  %v2985_v60 = vadd.f32 %v13030_v55, %v11168_v30  ;;  %v3731_v61 = vpop.permute.xlu1 %3730  ;;  %v4243_v47 = vpop.permute.xlu0 %4242  ;;  %5868 = vst.msk [vmem:[#allocation4 + $0x179] sm:$0x1] %vm5837_vm13, %v11466_v0  ;;  %5869 = vst.msk [vmem:[#allocation4 + $0x191] sm:$0x1] %vm5837_vm13, %v11466_v0 }
 0x2c4   : > { %6064 = vst.msk [vmem:[#allocation5 + $0xc] sm:$0xf] %vm6062_vm12, %v10708_v16  ;;  %v2976_v4 = vpop.f32.mrf.mxu0  ;;  %v9697_v15 = vcombine.high %v5331_v7, %v5332_v35  ;;  %v9696_v10 = vcombine.low %v5331_v7, %v5332_v35 }
 0x2c5   : > { %3824 = vst.msk [vmem:[#allocation5 + $0x24] sm:$0xf] %vm3820_vm6, %v3731_v61  ;;  %v3057_v11 = vmax.f32 %v2985_v60, 0.0  ;;  %v2977_v40 = vadd.f32 %v13030_v55, %v2976_v4  ;;  %4003 = vrot.lane.b32.xlu1 %v10620_v52, %s11479_s23  ;;  %4515 = vrot.lane.b32.xlu0 %v12820_v23, %s11481_s17  ;;  %v4638_v61 = vld [vmem:[#allocation3 + $0xc8] sm:$0xff] }
 0x2c6   : > { %4337 = vst.msk [vmem:[#allocation5 + $0x18] sm:$0xf] %vm4334_vm8, %v4243_v47  ;;  %v11169_v13 = vpop.f32.mrf.mxu0  ;;  %9737 = vmatprep.mubr.msk.bf16.mxu1 %vm3071_vm5, %v9697_v15 }
 0x2c7   : > { %3132 = vst.msk [vmem:[#allocation3 + $0xf1] sm:$0xff] %vm3071_vm5, %v3057_v11  ;;  %v3055_v5 = vmax.f32 %v2977_v40, 0.0  ;;  %v2988_v17 = vadd.f32 %v13030_v55, %v11169_v13  ;;  %v3988_v58 = vpop.permute.xlu1 %3987  ;;  %5667 = vmatmul.mubr.bf16.vlgmr.msra.gmra.mxu1 %v9696_v10  ;;  %v4500_v24 = vpop.permute.xlu0 %4499  ;;  %v10624_v11 = vpack.c.bf16 %v4638_v61, %v4638_v61  ;;  %v4895_v40 = vld [vmem:[#allocation3 + $0xc9] sm:$0xff] }
 0x2c8   : > { %4081 = vst.msk [vmem:[#allocation5 + $0x24] sm:$0xf] %vm4077_vm7, %v3988_v58  ;;  %v2979_v9 = vpop.f32.mrf.mxu0  ;;  %9738 = vmatprep.mubr.msk.bf16.mxu1 %vm3071_vm5, %v11299_v39 }
 0x2c9   : > { %3130 = vst.msk [vmem:[#allocation3 + $0xd9] sm:$0xff] %vm3071_vm5, %v3055_v5  ;;  %v3058_v18 = vmax.f32 %v2988_v17, 0.0  ;;  %v2980_v3 = vadd.f32 %v13030_v55, %v2979_v9  ;;  %4260 = vrot.lane.b32.xlu1 %v13009_v41, %s11480_s28  ;;  %4773 = vrot.lane.b32.xlu0 %v12935_v31, %s11482_s25  ;;  %v13140_v5 = vpack.c.bf16 %v4895_v40, %v4895_v40 }
 0x2ca   : > { %4594 = vst.msk [vmem:[#allocation5 + $0x18] sm:$0xf] %vm4591_vm9, %v4500_v24 }
 0x2cb   : > { %3133 = vst.msk [vmem:[#allocation3 + $0xf9] sm:$0xff] %vm3071_vm5, %v3058_v18  ;;  %v3056_v22 = vmax.f32 %v2980_v3, 0.0  ;;  %v4245_v26 = vpop.permute.xlu1 %4244  ;;  %v4758_v27 = vpop.permute.xlu0 %4757 }
 0x2cc   : > { %4338 = vst.msk [vmem:[#allocation5 + $0x24] sm:$0xf] %vm4334_vm8, %v4245_v26 }
 0x2cd   : > { %3131 = vst.msk [vmem:[#allocation3 + $0xe1] sm:$0xff] %vm3071_vm5, %v3056_v22  ;;  %4517 = vrot.lane.b32.xlu1 %v12822_v51, %s11481_s17  ;;  %5030 = vrot.lane.b32.xlu0 %v13058_v6, %s11483_s29 }
 0x2ce   : > { %4852 = vst.msk [vmem:[#allocation5 + $0x18] sm:$0xf] %vm4849_vm10, %v4758_v27  ;;  %v3166_v33 = vld [vmem:[#allocation3 + $0xf0] sm:$0xff] }
 0x2cf   : > { %v4502_v29 = vpop.permute.xlu1 %4501  ;;  %v10439_v42 = vpack.c.bf16 %v3166_v33, %v3166_v33  ;;  %v5015_v37 = vpop.permute.xlu0 %5014  ;;  %v11301_v27 = vld [vmem:[#allocation5 + $0x34] ss:$12 sps:$4 sm:$0xff]   ;;  %5831 = vst.msk [vmem:[#allocation4 + $0x10] sm:$0x3] %vm5830_vm14, %v11466_v0  ;;  %5835 = vst.msk [vmem:[#allocation4 + $0x1a8] sm:$0x3] %vm5830_vm14, %v11466_v0 }
 0x2d0   : > { %4595 = vst.msk [vmem:[#allocation5 + $0x24] sm:$0xf] %vm4591_vm9, %v4502_v29  ;;  %v4639_v14 = vld [vmem:[#allocation3 + $0xd8] sm:$0xff] }
 0x2d1   : > { %4775 = vrot.lane.b32.xlu1 %v12960_v20, %s11482_s25  ;;  %v13066_v32 = vpack.c.bf16 %v4639_v14, %v4639_v14  ;;  %3327 = vst.msk [vmem:[#allocation5 + $0xf0] sm:$0xf] %vm3306_vm15, %v10439_v42  ;;  %3491 = vrot.lane.b32.xlu0 %v12999_v1, %s11477_s16 }
 0x2d2   : > { %v5155_v8 = vld [vmem:[#allocation3 + $0xf2] sm:$0xff]  ;;  %v5156_v36 = vld [vmem:[#allocation3 + $0xfa] sm:$0xff]  ;;  %5109 = vst.msk [vmem:[#allocation5 + $0x18] sm:$0xf] %vm5106_vm11, %v5015_v37 }
 0x2d3   : > { %v13070_v38 = vpack.c.bf16 %v5155_v8, %v5155_v8  ;;  %v13072_v49 = vpack.c.bf16 %v5156_v36, %v5156_v36  ;;  %v4760_v43 = vpop.permute.xlu1 %4759  ;;  %3325 = vst.msk [vmem:[#allocation5 + $0xd8] sm:$0xf] %vm3306_vm15, %v13066_v32  ;;  %v3167_v46 = vld [vmem:[#allocation3 + $0xf8] sm:$0xff]  ;;  %v3476_v56 = vpop.permute.xlu0 %3475 }
 0x2d4   : > { %v5153_v50 = vld [vmem:[#allocation3 + $0xda] sm:$0xff]  ;;  %v5154_v52 = vld [vmem:[#allocation3 + $0xe2] sm:$0xff]  ;;  %4853 = vst.msk [vmem:[#allocation5 + $0x24] sm:$0xf] %vm4849_vm10, %v4760_v43  ;;  %v10440_v21 = vpack.c.bf16 %v3167_v46, %v3167_v46 }
 0x2d5   : > { %v4640_v53 = vld [vmem:[#allocation3 + $0xe0] sm:$0xff]  ;;  %5315 = vst.msk [vmem:[#allocation5 + $0xc4] sm:$0xf] %vm3306_vm15, %v13070_v38  ;;  %5316 = vst.msk [vmem:[#allocation5 + $0xd0] sm:$0xf] %vm3306_vm15, %v13072_v49  ;;  %v13085_v44 = vpack.c.bf16 %v5153_v50, %v5153_v50  ;;  %v13087_v1 = vpack.c.bf16 %v5154_v52, %v5154_v52  ;;  %5032 = vrot.lane.b32.xlu1 %v13076_v45, %s11483_s29  ;;  %3748 = vrot.lane.b32.xlu0 %v12820_v23, %s11478_s24 }
 0x2d6   : > { %v13091_v54 = vpack.c.bf16 %v4640_v53, %v4640_v53  ;;  %3568 = vst.msk [vmem:[#allocation5 + $0x30] sm:$0xf] %vm3563_vm4, %v3476_v56  ;;  %v4896_v50 = vld [vmem:[#allocation3 + $0xd9] sm:$0xff] }
 0x2d7   : > { %3328 = vst.msk [vmem:[#allocation5 + $0xfc] sm:$0xf] %vm3306_vm15, %v10440_v21  ;;  %5313 = vst.msk [vmem:[#allocation5 + $0xac] sm:$0xf] %vm3306_vm15, %v13085_v44  ;;  %v5017_v57 = vpop.permute.xlu1 %5016  ;;  %v3733_v28 = vpop.permute.xlu0 %3732  ;;  %v13182_v56 = vpack.c.bf16 %v4896_v50, %v4896_v50 }
 0x2d8   : > { %5314 = vst.msk [vmem:[#allocation5 + $0xb8] sm:$0xf] %vm3306_vm15, %v13087_v1  ;;  %3326 = vst.msk [vmem:[#allocation5 + $0xe4] sm:$0xf] %vm3306_vm15, %v13091_v54 }
 0x2d9   : > { %5110 = vst.msk [vmem:[#allocation5 + $0x24] sm:$0xf] %vm5106_vm11, %v5017_v57  ;;  %3493 = vrot.lane.b32.xlu1 %v13009_v41, %s11477_s16  ;;  %4005 = vrot.lane.b32.xlu0 %v12935_v31, %s11479_s23  ;;  %v5333_v41 = vld [vmem:[#allocation5 + $0x18] sm:$0xff] }
 0x2da   : > { %3825 = vst.msk [vmem:[#allocation5 + $0x30] sm:$0xf] %vm3820_vm6, %v3733_v28 }
 0x2db   : > { %v3478_v7 = vpop.permute.xlu1 %3477  ;;  %v3990_v23 = vpop.permute.xlu0 %3989 }
 0x2dc   : > { %3569 = vst.msk [vmem:[#allocation5 + $0x3c] sm:$0xf] %vm3563_vm4, %v3478_v7 }
 0x2dd   : > { %3750 = vrot.lane.b32.xlu1 %v12822_v51, %s11478_s24  ;;  %4082 = vst.msk [vmem:[#allocation5 + $0x30] sm:$0xf] %vm4077_vm7, %v3990_v23  ;;  %4262 = vrot.lane.b32.xlu0 %v13058_v6, %s11480_s28  ;;  %v4637_v51 = vld [vmem:[#allocation3 + $0xc0] sm:$0xff] }
 0x2de   : > { %v10623_v35 = vpack.c.bf16 %v4637_v51, %v4637_v51  ;;  %v4897_v23 = vld [vmem:[#allocation3 + $0xe1] sm:$0xff] }
 0x2df   : > { %v3735_v48 = vpop.permute.xlu1 %3734  ;;  %v4247_v31 = vpop.permute.xlu0 %4246 }
 0x2e0   : > { %v5334_v63 = vld [vmem:[#allocation5 + $0x24] sm:$0xff]  ;;  %3826 = vst.msk [vmem:[#allocation5 + $0x3c] sm:$0xf] %vm3820_vm6, %v3735_v48 }
 0x2e1   : > { %v9698_v16 = vcombine.low %v5333_v41, %v5334_v63  ;;  %4007 = vrot.lane.b32.xlu1 %v12960_v20, %s11479_s23  ;;  %4339 = vst.msk [vmem:[#allocation5 + $0x30] sm:$0xf] %vm4334_vm8, %v4247_v31  ;;  %4519 = vrot.lane.b32.xlu0 %v12954_v19, %s11481_s17  ;;  %v4894_v20 = vld [vmem:[#allocation3 + $0xc1] sm:$0xff] }
 0x2e2   : > { %v13130_v15 = vpack.c.bf16 %v4894_v20, %v4894_v20 }
 0x2e3   : > { %5675 = vmatmul.mubr.bf16.gmra.mxu1 %v9698_v16  ;;  %v3992_v2 = vpop.permute.xlu1 %3991  ;;  %v4504_v30 = vpop.permute.xlu0 %4503 }
 0x2e4   : > { %4083 = vst.msk [vmem:[#allocation5 + $0x3c] sm:$0xf] %vm4077_vm7, %v3992_v2  ;;  %9739 = vmatprep.mubr.msk.bf16.mxu1 %vm3071_vm5, %v11301_v27  ;;  %v13198_v2 = vpack.c.bf16 %v4897_v23, %v4897_v23 }
 0x2e5   : > { %4264 = vrot.lane.b32.xlu1 %v13076_v45, %s11480_s28  ;;  %4596 = vst.msk [vmem:[#allocation5 + $0x30] sm:$0xf] %vm4591_vm9, %v4504_v30  ;;  %4777 = vrot.lane.b32.xlu0 %v10623_v35, %s11482_s25 }
 0x2e7   : > { %v4249_v60 = vpop.permute.xlu1 %4248  ;;  %v4762_v4 = vpop.permute.xlu0 %4761 }
 0x2e8   : > { %4340 = vst.msk [vmem:[#allocation5 + $0x3c] sm:$0xf] %vm4334_vm8, %v4249_v60 }
 0x2e9   : > { %4521 = vrot.lane.b32.xlu1 %v12956_v59, %s11481_s17  ;;  %4854 = vst.msk [vmem:[#allocation5 + $0x30] sm:$0xf] %vm4849_vm10, %v4762_v4  ;;  %5034 = vrot.lane.b32.xlu0 %v13130_v15, %s11483_s29 }
 0x2eb   : > { %v4506_v10 = vpop.permute.xlu1 %4505  ;;  %v5019_v47 = vpop.permute.xlu0 %5018 }
 0x2ec   : > { %4597 = vst.msk [vmem:[#allocation5 + $0x3c] sm:$0xf] %vm4591_vm9, %v4506_v10 }
 0x2ed   : > { %4779 = vrot.lane.b32.xlu1 %v10624_v11, %s11482_s25  ;;  %5111 = vst.msk [vmem:[#allocation5 + $0x30] sm:$0xf] %vm5106_vm11, %v5019_v47  ;;  %3495 = vrot.lane.b32.xlu0 %v13058_v6, %s11477_s16  ;;  %v3613_v47 = vld [vmem:[#allocation3 + $0xca] sm:$0xff] }
 0x2ef   : > { %v4764_v13 = vpop.permute.xlu1 %4763  ;;  %v3480_v17 = vpop.permute.xlu0 %3479 }
 0x2f0   : > { %4855 = vst.msk [vmem:[#allocation5 + $0x3c] sm:$0xf] %vm4849_vm10, %v4764_v13 }
 0x2f1   : > { %5036 = vrot.lane.b32.xlu1 %v13140_v5, %s11483_s29  ;;  %3570 = vst.msk [vmem:[#allocation5 + $0x48] sm:$0xf] %vm3563_vm4, %v3480_v17  ;;  %3752 = vrot.lane.b32.xlu0 %v12954_v19, %s11478_s24  ;;  %v10500_v17 = vpack.c.bf16 %v3613_v47, %v3613_v47 }
 0x2f3   : > { %v5021_v58 = vpop.permute.xlu1 %5020  ;;  %v3737_v9 = vpop.permute.xlu0 %3736 }
 0x2f4   : > { %5112 = vst.msk [vmem:[#allocation5 + $0x3c] sm:$0xf] %vm5106_vm11, %v5021_v58  ;;  %v5335_v22 = vld [vmem:[#allocation5 + $0x30] sm:$0xff] }
 0x2f5   : > { %3497 = vrot.lane.b32.xlu1 %v13076_v45, %s11477_s16  ;;  %3827 = vst.msk [vmem:[#allocation5 + $0x48] sm:$0xf] %vm3820_vm6, %v3737_v9  ;;  %4009 = vrot.lane.b32.xlu0 %v10623_v35, %s11479_s23 }
 0x2f7   : > { %v3482_v18 = vpop.permute.xlu1 %3481  ;;  %v3994_v3 = vpop.permute.xlu0 %3993 }
 0x2f8   : > { %3571 = vst.msk [vmem:[#allocation5 + $0x54] sm:$0xf] %vm3563_vm4, %v3482_v18 }
 0x2f9   : > { %3754 = vrot.lane.b32.xlu1 %v12956_v59, %s11478_s24  ;;  %4084 = vst.msk [vmem:[#allocation5 + $0x48] sm:$0xf] %vm4077_vm7, %v3994_v3  ;;  %4266 = vrot.lane.b32.xlu0 %v13130_v15, %s11480_s28  ;;  %v11303_v3 = vld [vmem:[#allocation5 + $0x4c] ss:$12 sps:$4 sm:$0xff]  }
 0x2fa   : > { %v11172_v19 = vpop.f32.mrf.mxu0 }
 0x2fb   : > { %v3001_v24 = vadd.f32 %v13030_v55, %v11172_v19  ;;  %v3739_v25 = vpop.permute.xlu1 %3738  ;;  %v5336_v26 = vld [vmem:[#allocation5 + $0x3c] sm:$0xff]  ;;  %v4251_v42 = vpop.permute.xlu0 %4250 }
 0x2fc   : > { %3828 = vst.msk [vmem:[#allocation5 + $0x54] sm:$0xf] %vm3820_vm6, %v3739_v25  ;;  %v2992_v6 = vpop.f32.mrf.mxu0  ;;  %v9700_v33 = vcombine.low %v5335_v22, %v5336_v26 }
 0x2fd   : > { %v3061_v29 = vmax.f32 %v3001_v24, 0.0  ;;  %v2993_v59 = vadd.f32 %v13030_v55, %v2992_v6  ;;  %4011 = vrot.lane.b32.xlu1 %v10624_v11, %s11479_s23  ;;  %4341 = vst.msk [vmem:[#allocation5 + $0x48] sm:$0xf] %vm4334_vm8, %v4251_v42  ;;  %4523 = vrot.lane.b32.xlu0 %v12939_v12, %s11481_s17  ;;  %v4641_v24 = vld [vmem:[#allocation3 + $0xf0] sm:$0xff]  ;;  %v4642_v6 = vld [vmem:[#allocation3 + $0xf8] sm:$0xff] }
 0x2fe   : > { %v11173_v34 = vpop.f32.mrf.mxu0  ;;  %5683 = vmatmul.mubr.bf16.gmra.mxu1 %v9700_v33  ;;  %v10627_v26 = vpack.c.bf16 %v4641_v24, %v4641_v24  ;;  %v10628_v42 = vpack.c.bf16 %v4642_v6, %v4642_v6 }
 0x2ff   : > { %3136 = vst.msk [vmem:[#allocation3 + $0x121] sm:$0xff] %vm3071_vm5, %v3061_v29  ;;  %v3059_v14 = vmax.f32 %v2993_v59, 0.0  ;;  %v3004_v37 = vadd.f32 %v13030_v55, %v11173_v34  ;;  %v3996_v8 = vpop.permute.xlu1 %3995  ;;  %v4508_v46 = vpop.permute.xlu0 %4507  ;;  %9740 = vmatprep.mubr.msk.bf16.mxu1 %vm3071_vm5, %v11303_v3  ;;  %v4899_v34 = vld [vmem:[#allocation3 + $0xf9] sm:$0xff] }
 0x300   : > { %4085 = vst.msk [vmem:[#allocation5 + $0x54] sm:$0xf] %vm4077_vm7, %v3996_v8  ;;  %v2995_v36 = vpop.f32.mrf.mxu0  ;;  %v13321_v8 = vpack.c.bf16 %v4899_v34, %v4899_v34 }
 0x301   : > { %3134 = vst.msk [vmem:[#allocation3 + $0x109] sm:$0xff] %vm3071_vm5, %v3059_v14  ;;  %v3062_v43 = vmax.f32 %v3004_v37, 0.0  ;;  %v2996_v45 = vadd.f32 %v13030_v55, %v2995_v36  ;;  %4268 = vrot.lane.b32.xlu1 %v13140_v5, %s11480_s28  ;;  %4781 = vrot.lane.b32.xlu0 %v13066_v32, %s11482_s25 }
 0x302   : > { %4598 = vst.msk [vmem:[#allocation5 + $0x48] sm:$0xf] %vm4591_vm9, %v4508_v46 }
 0x303   : > { %3137 = vst.msk [vmem:[#allocation3 + $0x129] sm:$0xff] %vm3071_vm5, %v3062_v43  ;;  %v3060_v52 = vmax.f32 %v2996_v45, 0.0  ;;  %v4253_v53 = vpop.permute.xlu1 %4252  ;;  %v4766_v21 = vpop.permute.xlu0 %4765 }
 0x304   : > { %4342 = vst.msk [vmem:[#allocation5 + $0x54] sm:$0xf] %vm4334_vm8, %v4253_v53 }
 0x305   : > { %3135 = vst.msk [vmem:[#allocation3 + $0x111] sm:$0xff] %vm3071_vm5, %v3060_v52  ;;  %4525 = vrot.lane.b32.xlu1 %v12941_v62, %s11481_s17  ;;  %5038 = vrot.lane.b32.xlu0 %v13182_v56, %s11483_s29 }
 0x306   : > { %4856 = vst.msk [vmem:[#allocation5 + $0x48] sm:$0xf] %vm4849_vm10, %v4766_v21  ;;  %v3170_v57 = vld [vmem:[#allocation3 + $0x120] sm:$0xff] }
 0x307   : > { %v4510_v28 = vpop.permute.xlu1 %4509  ;;  %v10443_v7 = vpack.c.bf16 %v3170_v57, %v3170_v57  ;;  %v5023_v48 = vpop.permute.xlu0 %5022  ;;  %v11305_v57 = vld [vmem:[#allocation5 + $0x64] ss:$12 sps:$4 sm:$0xff]  }
 0x308   : > { %4599 = vst.msk [vmem:[#allocation5 + $0x54] sm:$0xf] %vm4591_vm9, %v4510_v28  ;;  %v3168_v41 = vld [vmem:[#allocation3 + $0x108] sm:$0xff] }
 0x309   : > { %4783 = vrot.lane.b32.xlu1 %v13091_v54, %s11482_s25  ;;  %3331 = vst.msk [vmem:[#allocation5 + $0x120] sm:$0xf] %vm3306_vm15, %v10443_v7  ;;  %v10441_v39 = vpack.c.bf16 %v3168_v41, %v3168_v41  ;;  %3499 = vrot.lane.b32.xlu0 %v13130_v15, %s11477_s16 }
 0x30a   : > { %v5159_v62 = vld [vmem:[#allocation3 + $0x122] sm:$0xff]  ;;  %v5160_v63 = vld [vmem:[#allocation3 + $0x12a] sm:$0xff]  ;;  %5113 = vst.msk [vmem:[#allocation5 + $0x48] sm:$0xf] %vm5106_vm11, %v5023_v48 }
 0x30b   : > { %v13192_v16 = vpack.c.bf16 %v5159_v62, %v5159_v62  ;;  %v13194_v31 = vpack.c.bf16 %v5160_v63, %v5160_v63  ;;  %v4768_v51 = vpop.permute.xlu1 %4767  ;;  %v3171_v30 = vld [vmem:[#allocation3 + $0x128] sm:$0xff]  ;;  %3329 = vst.msk [vmem:[#allocation5 + $0x108] sm:$0xf] %vm3306_vm15, %v10441_v39  ;;  %v3484_v15 = vpop.permute.xlu0 %3483 }
 0x30c   : > { %v5157_v35 = vld [vmem:[#allocation3 + $0x10a] sm:$0xff]  ;;  %v5158_v20 = vld [vmem:[#allocation3 + $0x112] sm:$0xff]  ;;  %4857 = vst.msk [vmem:[#allocation5 + $0x54] sm:$0xf] %vm4849_vm10, %v4768_v51  ;;  %v10444_v60 = vpack.c.bf16 %v3171_v30, %v3171_v30 }
 0x30d   : > { %5319 = vst.msk [vmem:[#allocation5 + $0xf4] sm:$0xf] %vm3306_vm15, %v13192_v16  ;;  %5320 = vst.msk [vmem:[#allocation5 + $0x100] sm:$0xf] %vm3306_vm15, %v13194_v31  ;;  %v13206_v61 = vpack.c.bf16 %v5157_v35, %v5157_v35  ;;  %v13208_v4 = vpack.c.bf16 %v5158_v20, %v5158_v20  ;;  %5040 = vrot.lane.b32.xlu1 %v13198_v2, %s11483_s29  ;;  %v3169_v10 = vld [vmem:[#allocation3 + $0x110] sm:$0xff]  ;;  %3756 = vrot.lane.b32.xlu0 %v12939_v12, %s11478_s24  ;;  %v4643_v62 = vld [vmem:[#allocation3 + $0x108] sm:$0xff] }
 0x30e   : > { %3572 = vst.msk [vmem:[#allocation5 + $0x60] sm:$0xf] %vm3563_vm4, %v3484_v15  ;;  %v10442_v11 = vpack.c.bf16 %v3169_v10, %v3169_v10  ;;  %v4900_v15 = vld [vmem:[#allocation3 + $0x109] sm:$0xff] }
 0x30f   : > { %3332 = vst.msk [vmem:[#allocation5 + $0x12c] sm:$0xf] %vm3306_vm15, %v10444_v60  ;;  %5317 = vst.msk [vmem:[#allocation5 + $0xdc] sm:$0xf] %vm3306_vm15, %v13206_v61  ;;  %v5025_v40 = vpop.permute.xlu1 %5024  ;;  %v3741_v12 = vpop.permute.xlu0 %3740  ;;  %v10629_v60 = vpack.c.bf16 %v4643_v62, %v4643_v62 }
 0x310   : > { %5318 = vst.msk [vmem:[#allocation5 + $0xe8] sm:$0xf] %vm3306_vm15, %v13208_v4  ;;  %3330 = vst.msk [vmem:[#allocation5 + $0x114] sm:$0xf] %vm3306_vm15, %v10442_v11 }
 0x311   : > { %5114 = vst.msk [vmem:[#allocation5 + $0x54] sm:$0xf] %vm5106_vm11, %v5025_v40  ;;  %3501 = vrot.lane.b32.xlu1 %v13140_v5, %s11477_s16  ;;  %4013 = vrot.lane.b32.xlu0 %v13066_v32, %s11479_s23  ;;  %v5337_v5 = vld [vmem:[#allocation5 + $0x48] sm:$0xff]  ;;  %v4644_v40 = vld [vmem:[#allocation3 + $0x110] sm:$0xff] }
 0x312   : > { %3829 = vst.msk [vmem:[#allocation5 + $0x60] sm:$0xf] %vm3820_vm6, %v3741_v12  ;;  %v13362_v12 = vpack.c.bf16 %v4900_v15, %v4900_v15 }
 0x313   : > { %v3486_v13 = vpop.permute.xlu1 %3485  ;;  %v3998_v58 = vpop.permute.xlu0 %3997 }
 0x314   : > { %3573 = vst.msk [vmem:[#allocation5 + $0x6c] sm:$0xf] %vm3563_vm4, %v3486_v13 }
 0x315   : > { %3758 = vrot.lane.b32.xlu1 %v10500_v17, %s11478_s24  ;;  %4086 = vst.msk [vmem:[#allocation5 + $0x60] sm:$0xf] %vm4077_vm7, %v3998_v58  ;;  %4270 = vrot.lane.b32.xlu0 %v13182_v56, %s11480_s28  ;;  %v10630_v58 = vpack.c.bf16 %v4644_v40, %v4644_v40 }
 0x317   : > { %v3743_v9 = vpop.permute.xlu1 %3742  ;;  %v4255_v32 = vpop.permute.xlu0 %4254 }
 0x318   : > { %v5338_v18 = vld [vmem:[#allocation5 + $0x54] sm:$0xff]  ;;  %3830 = vst.msk [vmem:[#allocation5 + $0x6c] sm:$0xf] %vm3820_vm6, %v3743_v9 }
 0x319   : > { %v9702_v19 = vcombine.low %v5337_v5, %v5338_v18  ;;  %4015 = vrot.lane.b32.xlu1 %v13091_v54, %s11479_s23  ;;  %4343 = vst.msk [vmem:[#allocation5 + $0x60] sm:$0xf] %vm4334_vm8, %v4255_v32  ;;  %4527 = vrot.lane.b32.xlu0 %v13085_v44, %s11481_s17  ;;  %v4898_v54 = vld [vmem:[#allocation3 + $0xf1] sm:$0xff] }
 0x31a   : > { %v13311_v29 = vpack.c.bf16 %v4898_v54, %v4898_v54  ;;  %v4901_v5 = vld [vmem:[#allocation3 + $0x111] sm:$0xff] }
 0x31b   : > { %5691 = vmatmul.mubr.bf16.gmra.mxu1 %v9702_v19  ;;  %v4000_v25 = vpop.permute.xlu1 %3999  ;;  %v4512_v22 = vpop.permute.xlu0 %4511  ;;  %v13377_v54 = vpack.c.bf16 %v4901_v5, %v4901_v5 }
 0x31c   : > { %4087 = vst.msk [vmem:[#allocation5 + $0x6c] sm:$0xf] %vm4077_vm7, %v4000_v25  ;;  %9741 = vmatprep.mubr.msk.bf16.mxu1 %vm3071_vm5, %v11305_v57 }
 0x31d   : > { %4272 = vrot.lane.b32.xlu1 %v13198_v2, %s11480_s28  ;;  %4600 = vst.msk [vmem:[#allocation5 + $0x60] sm:$0xf] %vm4591_vm9, %v4512_v22  ;;  %4785 = vrot.lane.b32.xlu0 %v10627_v26, %s11482_s25 }
 0x31f   : > { %v4257_v27 = vpop.permute.xlu1 %4256  ;;  %v4770_v33 = vpop.permute.xlu0 %4769 }
 0x320   : > { %4344 = vst.msk [vmem:[#allocation5 + $0x6c] sm:$0xf] %vm4334_vm8, %v4257_v27 }
 0x321   : > { %4529 = vrot.lane.b32.xlu1 %v13087_v1, %s11481_s17  ;;  %4858 = vst.msk [vmem:[#allocation5 + $0x60] sm:$0xf] %vm4849_vm10, %v4770_v33  ;;  %5042 = vrot.lane.b32.xlu0 %v13311_v29, %s11483_s29 }
 0x323   : > { %v4514_v59 = vpop.permute.xlu1 %4513  ;;  %v5027_v14 = vpop.permute.xlu0 %5026 }
 0x324   : > { %4601 = vst.msk [vmem:[#allocation5 + $0x6c] sm:$0xf] %vm4591_vm9, %v4514_v59 }
 0x325   : > { %4787 = vrot.lane.b32.xlu1 %v10628_v42, %s11482_s25  ;;  %5115 = vst.msk [vmem:[#allocation5 + $0x60] sm:$0xf] %vm5106_vm11, %v5027_v14  ;;  %3503 = vrot.lane.b32.xlu0 %v13182_v56, %s11477_s16 }
 0x327   : > { %v4772_v37 = vpop.permute.xlu1 %4771  ;;  %v3488_v36 = vpop.permute.xlu0 %3487 }
 0x328   : > { %4859 = vst.msk [vmem:[#allocation5 + $0x6c] sm:$0xf] %vm4849_vm10, %v4772_v37 }
 0x329   : > { %5044 = vrot.lane.b32.xlu1 %v13321_v8, %s11483_s29  ;;  %3574 = vst.msk [vmem:[#allocation5 + $0x78] sm:$0xf] %vm3563_vm4, %v3488_v36  ;;  %3760 = vrot.lane.b32.xlu0 %v13085_v44, %s11478_s24 }
 0x32b   : > { %v5029_v43 = vpop.permute.xlu1 %5028  ;;  %v3745_v45 = vpop.permute.xlu0 %3744 }
 0x32c   : > { %5116 = vst.msk [vmem:[#allocation5 + $0x6c] sm:$0xf] %vm5106_vm11, %v5029_v43  ;;  %v5339_v21 = vld [vmem:[#allocation5 + $0x60] sm:$0xff] }
 0x32d   : > { %3505 = vrot.lane.b32.xlu1 %v13198_v2, %s11477_s16  ;;  %3831 = vst.msk [vmem:[#allocation5 + $0x78] sm:$0xf] %vm3820_vm6, %v3745_v45  ;;  %4017 = vrot.lane.b32.xlu0 %v10627_v26, %s11479_s23 }
 0x32f   : > { %v3490_v46 = vpop.permute.xlu1 %3489  ;;  %v4002_v50 = vpop.permute.xlu0 %4001 }
 0x330   : > { %3575 = vst.msk [vmem:[#allocation5 + $0x84] sm:$0xf] %vm3563_vm4, %v3490_v46 }
 0x331   : > { %3762 = vrot.lane.b32.xlu1 %v13087_v1, %s11478_s24  ;;  %4088 = vst.msk [vmem:[#allocation5 + $0x78] sm:$0xf] %vm4077_vm7, %v4002_v50  ;;  %4274 = vrot.lane.b32.xlu0 %v13311_v29, %s11480_s28 }
 0x333   : > { %v11176_v44 = vpop.f32.mrf.mxu0  ;;  %v3747_v53 = vpop.permute.xlu1 %3746  ;;  %v5340_v56 = vld [vmem:[#allocation5 + $0x6c] sm:$0xff] }
 0x334   : > { %v3017_v52 = vadd.f32 %v13030_v55, %v11176_v44  ;;  %3832 = vst.msk [vmem:[#allocation5 + $0x84] sm:$0xf] %vm3820_vm6, %v3747_v53  ;;  %v9704_v7 = vcombine.low %v5339_v21, %v5340_v56  ;;  %v4259_v48 = vpop.permute.xlu0 %4258  ;;  %v11307_v44 = vld [vmem:[#allocation5 + $0x7c] ss:$12 sps:$4 sm:$0xff]  }
 0x335   : > { %v3008_v28 = vpop.f32.mrf.mxu0  ;;  %4019 = vrot.lane.b32.xlu1 %v10628_v42, %s11479_s23  ;;  %4345 = vst.msk [vmem:[#allocation5 + $0x78] sm:$0xf] %vm4334_vm8, %v4259_v48  ;;  %4531 = vrot.lane.b32.xlu0 %v13070_v38, %s11481_s17 }
 0x336   : > { %v3065_v23 = vmax.f32 %v3017_v52, 0.0  ;;  %v3009_v1 = vadd.f32 %v13030_v55, %v3008_v28  ;;  %5699 = vmatmul.mubr.bf16.gmra.mxu1 %v9704_v7  ;;  %v4902_v28 = vld [vmem:[#allocation3 + $0x121] sm:$0xff] }
 0x337   : > { %v11177_v41 = vpop.f32.mrf.mxu0  ;;  %v4004_v51 = vpop.permute.xlu1 %4003  ;;  %9742 = vmatprep.mubr.msk.bf16.mxu1 %vm3071_vm5, %v11307_v44  ;;  %v13425_v48 = vpack.c.bf16 %v4902_v28, %v4902_v28 }
 0x338   : > { %3140 = vst.msk [vmem:[#allocation3 + $0x151] sm:$0xff] %vm3071_vm5, %v3065_v23  ;;  %v3063_v63 = vmax.f32 %v3009_v1, 0.0  ;;  %v3020_v39 = vadd.f32 %v13030_v55, %v11177_v41  ;;  %v4516_v20 = vpop.permute.xlu0 %4515  ;;  %v4646_v23 = vld [vmem:[#allocation3 + $0x128] sm:$0xff] }
 0x339   : > { %4089 = vst.msk [vmem:[#allocation5 + $0x84] sm:$0xf] %vm4077_vm7, %v4004_v51  ;;  %v3011_v2 = vpop.f32.mrf.mxu0  ;;  %4276 = vrot.lane.b32.xlu1 %v13321_v8, %s11480_s28  ;;  %4789 = vrot.lane.b32.xlu0 %v10629_v60, %s11482_s25  ;;  %v10632_v62 = vpack.c.bf16 %v4646_v23, %v4646_v23 }
 0x33a   : > { %3138 = vst.msk [vmem:[#allocation3 + $0x139] sm:$0xff] %vm3071_vm5, %v3063_v63  ;;  %v3066_v30 = vmax.f32 %v3020_v39, 0.0  ;;  %v3012_v35 = vadd.f32 %v13030_v55, %v3011_v2  ;;  %v4903_v63 = vld [vmem:[#allocation3 + $0x129] sm:$0xff] }
 0x33b   : > { %4602 = vst.msk [vmem:[#allocation5 + $0x78] sm:$0xf] %vm4591_vm9, %v4516_v20  ;;  %v4261_v11 = vpop.permute.xlu1 %4260  ;;  %v13435_v2 = vpack.c.bf16 %v4903_v63, %v4903_v63 }
 0x33c   : > { %3141 = vst.msk [vmem:[#allocation3 + $0x159] sm:$0xff] %vm3071_vm5, %v3066_v30  ;;  %v3064_v10 = vmax.f32 %v3012_v35, 0.0  ;;  %v4774_v47 = vpop.permute.xlu0 %4773 }
 0x33d   : > { %4346 = vst.msk [vmem:[#allocation5 + $0x84] sm:$0xf] %vm4334_vm8, %v4261_v11  ;;  %4533 = vrot.lane.b32.xlu1 %v13072_v49, %s11481_s17  ;;  %5046 = vrot.lane.b32.xlu0 %v13362_v12, %s11483_s29 }
 0x33e   : > { %3139 = vst.msk [vmem:[#allocation3 + $0x141] sm:$0xff] %vm3071_vm5, %v3064_v10 }
 0x33f   : > { %4860 = vst.msk [vmem:[#allocation5 + $0x78] sm:$0xf] %vm4849_vm10, %v4774_v47  ;;  %v3174_v13 = vld [vmem:[#allocation3 + $0x150] sm:$0xff]  ;;  %v4518_v17 = vpop.permute.xlu1 %4517 }
 0x340   : > { %v10447_v9 = vpack.c.bf16 %v3174_v13, %v3174_v13  ;;  %4603 = vst.msk [vmem:[#allocation5 + $0x84] sm:$0xf] %vm4591_vm9, %v4518_v17  ;;  %v5031_v3 = vpop.permute.xlu0 %5030 }
 0x341   : > { %v3172_v18 = vld [vmem:[#allocation3 + $0x138] sm:$0xff]  ;;  %4791 = vrot.lane.b32.xlu1 %v10630_v58, %s11482_s25  ;;  %5117 = vst.msk [vmem:[#allocation5 + $0x78] sm:$0xf] %vm5106_vm11, %v5031_v3  ;;  %3507 = vrot.lane.b32.xlu0 %v13311_v29, %s11477_s16 }
 0x342   : > { %v10445_v19 = vpack.c.bf16 %v3172_v18, %v3172_v18  ;;  %3335 = vst.msk [vmem:[#allocation5 + $0x150] sm:$0xf] %vm3306_vm15, %v10447_v9  ;;  %v4647_v18 = vld [vmem:[#allocation3 + $0x138] sm:$0xff] }
 0x343   : > { %v5163_v32 = vld [vmem:[#allocation3 + $0x152] sm:$0xff]  ;;  %v5164_v24 = vld [vmem:[#allocation3 + $0x15a] sm:$0xff]  ;;  %v4776_v26 = vpop.permute.xlu1 %4775 }
 0x344   : > { %v13371_v25 = vpack.c.bf16 %v5163_v32, %v5163_v32  ;;  %v13373_v22 = vpack.c.bf16 %v5164_v24, %v5164_v24  ;;  %3333 = vst.msk [vmem:[#allocation5 + $0x138] sm:$0xf] %vm3306_vm15, %v10445_v19  ;;  %v3175_v27 = vld [vmem:[#allocation3 + $0x158] sm:$0xff]  ;;  %v3492_v29 = vpop.permute.xlu0 %3491 }
 0x345   : > { %v5161_v6 = vld [vmem:[#allocation3 + $0x13a] sm:$0xff]  ;;  %v5162_v33 = vld [vmem:[#allocation3 + $0x142] sm:$0xff]  ;;  %4861 = vst.msk [vmem:[#allocation5 + $0x84] sm:$0xf] %vm4849_vm10, %v4776_v26  ;;  %v10448_v59 = vpack.c.bf16 %v3175_v27, %v3175_v27  ;;  %5048 = vrot.lane.b32.xlu1 %v13377_v54, %s11483_s29  ;;  %3764 = vrot.lane.b32.xlu0 %v13070_v38, %s11478_s24 }
 0x346   : > { %5323 = vst.msk [vmem:[#allocation5 + $0x124] sm:$0xf] %vm3306_vm15, %v13371_v25  ;;  %5324 = vst.msk [vmem:[#allocation5 + $0x130] sm:$0xf] %vm3306_vm15, %v13373_v22  ;;  %v13385_v42 = vpack.c.bf16 %v5161_v6, %v5161_v6  ;;  %v13387_v34 = vpack.c.bf16 %v5162_v33, %v5162_v33  ;;  %v3173_v14 = vld [vmem:[#allocation3 + $0x140] sm:$0xff] }
 0x347   : > { %3576 = vst.msk [vmem:[#allocation5 + $0x90] sm:$0xf] %vm3563_vm4, %v3492_v29  ;;  %v10446_v37 = vpack.c.bf16 %v3173_v14, %v3173_v14  ;;  %v5033_v36 = vpop.permute.xlu1 %5032  ;;  %v4904_v33 = vld [vmem:[#allocation3 + $0x139] sm:$0xff] }
 0x348   : > { %3336 = vst.msk [vmem:[#allocation5 + $0x15c] sm:$0xf] %vm3306_vm15, %v10448_v59  ;;  %5321 = vst.msk [vmem:[#allocation5 + $0x10c] sm:$0xf] %vm3306_vm15, %v13385_v42  ;;  %v3749_v43 = vpop.permute.xlu0 %3748  ;;  %v5341_v50 = vld [vmem:[#allocation5 + $0x78] sm:$0xff]  ;;  %v4648_v14 = vld [vmem:[#allocation3 + $0x140] sm:$0xff] }
 0x349   : > { %5322 = vst.msk [vmem:[#allocation5 + $0x118] sm:$0xf] %vm3306_vm15, %v13387_v34  ;;  %3334 = vst.msk [vmem:[#allocation5 + $0x144] sm:$0xf] %vm3306_vm15, %v10446_v37  ;;  %3509 = vrot.lane.b32.xlu1 %v13321_v8, %s11477_s16  ;;  %4021 = vrot.lane.b32.xlu0 %v10629_v60, %s11479_s23 }
 0x34a   : > { %5118 = vst.msk [vmem:[#allocation5 + $0x84] sm:$0xf] %vm5106_vm11, %v5033_v36  ;;  %v13480_v36 = vpack.c.bf16 %v4904_v33, %v4904_v33 }
 0x34b   : > { %3833 = vst.msk [vmem:[#allocation5 + $0x90] sm:$0xf] %vm3820_vm6, %v3749_v43  ;;  %v3494_v45 = vpop.permute.xlu1 %3493 }
 0x34c   : > { %3577 = vst.msk [vmem:[#allocation5 + $0x9c] sm:$0xf] %vm3563_vm4, %v3494_v45  ;;  %v4006_v46 = vpop.permute.xlu0 %4005  ;;  %v10634_v45 = vpack.c.bf16 %v4648_v14, %v4648_v14 }
 0x34d   : > { %3766 = vrot.lane.b32.xlu1 %v13072_v49, %s11478_s24  ;;  %4090 = vst.msk [vmem:[#allocation5 + $0x90] sm:$0xf] %vm4077_vm7, %v4006_v46  ;;  %4278 = vrot.lane.b32.xlu0 %v13362_v12, %s11480_s28  ;;  %v4645_v49 = vld [vmem:[#allocation3 + $0x120] sm:$0xff] }
 0x34e   : > { %v10631_v57 = vpack.c.bf16 %v4645_v49, %v4645_v49  ;;  %v4905_v46 = vld [vmem:[#allocation3 + $0x141] sm:$0xff] }
 0x34f   : > { %v3751_v38 = vpop.permute.xlu1 %3750 }
 0x350   : > { %3834 = vst.msk [vmem:[#allocation5 + $0x9c] sm:$0xf] %vm3820_vm6, %v3751_v38  ;;  %v4263_v53 = vpop.permute.xlu0 %4262 }
 0x351   : > { %v5342_v8 = vld [vmem:[#allocation5 + $0x84] sm:$0xff]  ;;  %4023 = vrot.lane.b32.xlu1 %v10630_v58, %s11479_s23  ;;  %4347 = vst.msk [vmem:[#allocation5 + $0x90] sm:$0xf] %vm4334_vm8, %v4263_v53  ;;  %4535 = vrot.lane.b32.xlu0 %v13206_v61, %s11481_s17 }
 0x352   : > { %v9706_v52 = vcombine.low %v5341_v50, %v5342_v8 }
 0x353   : > { %v4008_v21 = vpop.permute.xlu1 %4007 }
 0x354   : > { %5707 = vmatmul.mubr.bf16.gmra.mxu1 %v9706_v52  ;;  %4091 = vst.msk [vmem:[#allocation5 + $0x9c] sm:$0xf] %vm4077_vm7, %v4008_v21  ;;  %v4520_v56 = vpop.permute.xlu0 %4519 }
 0x355   : > { %4280 = vrot.lane.b32.xlu1 %v13377_v54, %s11480_s28  ;;  %4604 = vst.msk [vmem:[#allocation5 + $0x90] sm:$0xf] %vm4591_vm9, %v4520_v56  ;;  %4793 = vrot.lane.b32.xlu0 %v10631_v57, %s11482_s25  ;;  %v13494_v56 = vpack.c.bf16 %v4905_v46, %v4905_v46 }
 0x357   : > { %v4265_v7 = vpop.permute.xlu1 %4264 }
 0x358   : > { %4348 = vst.msk [vmem:[#allocation5 + $0x9c] sm:$0xf] %vm4334_vm8, %v4265_v7  ;;  %v4778_v1 = vpop.permute.xlu0 %4777 }
 0x359   : > { %4537 = vrot.lane.b32.xlu1 %v13208_v4, %s11481_s17  ;;  %4862 = vst.msk [vmem:[#allocation5 + $0x90] sm:$0xf] %vm4849_vm10, %v4778_v1  ;;  %5050 = vrot.lane.b32.xlu0 %v13425_v48, %s11483_s29 }
 0x35b   : > { %v4522_v41 = vpop.permute.xlu1 %4521 }
 0x35c   : > { %4605 = vst.msk [vmem:[#allocation5 + $0x9c] sm:$0xf] %vm4591_vm9, %v4522_v41  ;;  %v5035_v39 = vpop.permute.xlu0 %5034 }
 0x35d   : > { %4795 = vrot.lane.b32.xlu1 %v10632_v62, %s11482_s25  ;;  %5119 = vst.msk [vmem:[#allocation5 + $0x90] sm:$0xf] %vm5106_vm11, %v5035_v39  ;;  %3511 = vrot.lane.b32.xlu0 %v13362_v12, %s11477_s16  ;;  %v11309_v12 = vld [vmem:[#allocation5 + $0x94] ss:$12 sps:$4 sm:$0xff]  }
 0x35e   : > { %9743 = vmatprep.mubr.msk.bf16.mxu1 %vm3071_vm5, %v11309_v12 }
 0x35f   : > { %v4780_v51 = vpop.permute.xlu1 %4779 }
 0x360   : > { %4863 = vst.msk [vmem:[#allocation5 + $0x9c] sm:$0xf] %vm4849_vm10, %v4780_v51  ;;  %v3496_v30 = vpop.permute.xlu0 %3495 }
 0x361   : > { %5052 = vrot.lane.b32.xlu1 %v13435_v2, %s11483_s29  ;;  %3578 = vst.msk [vmem:[#allocation5 + $0xa8] sm:$0xf] %vm3563_vm4, %v3496_v30  ;;  %3768 = vrot.lane.b32.xlu0 %v13206_v61, %s11478_s24 }
 0x363   : > { %v5037_v35 = vpop.permute.xlu1 %5036 }
 0x364   : > { %5120 = vst.msk [vmem:[#allocation5 + $0x9c] sm:$0xf] %vm5106_vm11, %v5037_v35  ;;  %v3753_v20 = vpop.permute.xlu0 %3752  ;;  %v5343_v40 = vld [vmem:[#allocation5 + $0x90] sm:$0xff] }
 0x365   : > { %3513 = vrot.lane.b32.xlu1 %v13377_v54, %s11477_s16  ;;  %3835 = vst.msk [vmem:[#allocation5 + $0xa8] sm:$0xf] %vm3820_vm6, %v3753_v20  ;;  %4025 = vrot.lane.b32.xlu0 %v10631_v57, %s11479_s23  ;;  %v11400_v54 = vld [vmem:[%s15070_s2] ss:$0 sm:$0xff] }
 0x367   : > { %v3498_v60 = vpop.permute.xlu1 %3497 }
 0x368   : > { %3579 = vst.msk [vmem:[#allocation5 + $0xb4] sm:$0xf] %vm3563_vm4, %v3498_v60  ;;  %v4010_v15 = vpop.permute.xlu0 %4009  ;;  %v11311_v60 = vld [vmem:[#allocation5 + $0xac] ss:$12 sps:$4 sm:$0xff]  }
 0x369   : > { %3770 = vrot.lane.b32.xlu1 %v13208_v4, %s11478_s24  ;;  %4092 = vst.msk [vmem:[#allocation5 + $0xa8] sm:$0xf] %vm4077_vm7, %v4010_v15  ;;  %4282 = vrot.lane.b32.xlu0 %v13425_v48, %s11480_s28 }
 0x36b   : > { %v11180_v61 = vpop.f32.mrf.mxu0  ;;  %v3755_v11 = vpop.permute.xlu1 %3754  ;;  %v5344_v47 = vld [vmem:[#allocation5 + $0x9c] sm:$0xff] }
 0x36c   : > { %v3033_v10 = vadd.f32 %v13030_v55, %v11180_v61  ;;  %3836 = vst.msk [vmem:[#allocation5 + $0xb4] sm:$0xf] %vm3820_vm6, %v3755_v11  ;;  %v9708_v13 = vcombine.low %v5343_v40, %v5344_v47  ;;  %v4267_v9 = vpop.permute.xlu0 %4266  ;;  %v4649_v40 = vld [vmem:[#allocation3 + $0x150] sm:$0xff] }
 0x36d   : > { %v3024_v4 = vpop.f32.mrf.mxu0  ;;  %4027 = vrot.lane.b32.xlu1 %v10632_v62, %s11479_s23  ;;  %4349 = vst.msk [vmem:[#allocation5 + $0xa8] sm:$0xf] %vm4334_vm8, %v4267_v9  ;;  %4539 = vrot.lane.b32.xlu0 %v13192_v16, %s11481_s17 }
 0x36e   : > { %v3069_v17 = vmax.f32 %v3033_v10, 0.0  ;;  %v3025_v58 = vadd.f32 %v13030_v55, %v3024_v4  ;;  %5715 = vmatmul.mubr.bf16.gmra.mxu1 %v9708_v13 }
 0x36f   : > { %v11181_v5 = vpop.f32.mrf.mxu0  ;;  %v4012_v32 = vpop.permute.xlu1 %4011  ;;  %9744 = vmatprep.mubr.msk.bf16.mxu1 %vm3071_vm5, %v11311_v60 }
 0x370   : > { %3144 = vst.msk [vmem:[#allocation3 + $0x181] sm:$0xff] %vm3071_vm5, %v3069_v17  ;;  %v3067_v3 = vmax.f32 %v3025_v58, 0.0  ;;  %v3036_v19 = vadd.f32 %v13030_v55, %v11181_v5  ;;  %v4524_v6 = vpop.permute.xlu0 %4523  ;;  %v10633_v55 = vpack.c.bf16 %v4647_v18, %v4647_v18  ;;  %v10635_v58 = vpack.c.bf16 %v4649_v40, %v4649_v40  ;;  %v4906_v5 = vld [vmem:[#allocation3 + $0x151] sm:$0xff] }
 0x371   : > { %4093 = vst.msk [vmem:[#allocation5 + $0xb4] sm:$0xf] %vm4077_vm7, %v4012_v32  ;;  %v3027_v24 = vpop.f32.mrf.mxu0  ;;  %4284 = vrot.lane.b32.xlu1 %v13435_v2, %s11480_s28  ;;  %v13550_v32 = vpack.c.bf16 %v4906_v5, %v4906_v5 }
 0x372   : > { %3142 = vst.msk [vmem:[#allocation3 + $0x169] sm:$0xff] %vm3071_vm5, %v3067_v3  ;;  %v3070_v26 = vmax.f32 %v3036_v19, 0.0  ;;  %v3028_v27 = vadd.f32 %v11400_v54, %v3027_v24  ;;  %4797 = vrot.lane.b32.xlu0 %v10633_v55, %s11482_s25  ;;  %v4650_v3 = vld [vmem:[#allocation3 + $0x158] sm:$0xff] }
 0x373   : > { %4606 = vst.msk [vmem:[#allocation5 + $0xa8] sm:$0xf] %vm4591_vm9, %v4524_v6  ;;  %v4269_v29 = vpop.permute.xlu1 %4268  ;;  %v4907_v6 = vld [vmem:[#allocation3 + $0x159] sm:$0xff] }
 0x374   : > { %3145 = vst.msk [vmem:[#allocation3 + $0x189] sm:$0xff] %vm3071_vm5, %v3070_v26  ;;  %v3068_v59 = vmax.f32 %v3028_v27, 0.0  ;;  %v4782_v37 = vpop.permute.xlu0 %4781  ;;  %v10636_v26 = vpack.c.bf16 %v4650_v3, %v4650_v3  ;;  %v13568_v14 = vpack.c.bf16 %v4907_v6, %v4907_v6 }
 0x375   : > { %4350 = vst.msk [vmem:[#allocation5 + $0xb4] sm:$0xf] %vm4334_vm8, %v4269_v29  ;;  %4541 = vrot.lane.b32.xlu1 %v13194_v31, %s11481_s17 }
 0x376   : > { %3143 = vst.msk [vmem:[#allocation3 + $0x171] sm:$0xff] %vm3071_vm5, %v3068_v59  ;;  %5054 = vrot.lane.b32.xlu0 %v13480_v36, %s11483_s29 }
 0x377   : > { %4864 = vst.msk [vmem:[#allocation5 + $0xa8] sm:$0xf] %vm4849_vm10, %v4782_v37  ;;  %v4526_v43 = vpop.permute.xlu1 %4525 }
 0x378   : > { %4607 = vst.msk [vmem:[#allocation5 + $0xb4] sm:$0xf] %vm4591_vm9, %v4526_v43  ;;  %v5039_v50 = vpop.permute.xlu0 %5038 }
 0x379   : > { %v3176_v38 = vld [vmem:[#allocation3 + $0x168] sm:$0xff]  ;;  %4799 = vrot.lane.b32.xlu1 %v10634_v45, %s11482_s25  ;;  %5121 = vst.msk [vmem:[#allocation5 + $0xa8] sm:$0xf] %vm5106_vm11, %v5039_v50 }
 0x37a   : > { %v10449_v8 = vpack.c.bf16 %v3176_v38, %v3176_v38  ;;  %3515 = vrot.lane.b32.xlu0 %v13425_v48, %s11477_s16  ;;  %v4908_v60 = vld [vmem:[#allocation3 + $0x169] sm:$0xff] }
 0x37b   : > { %v5167_v44 = vld [vmem:[#allocation3 + $0x182] sm:$0xff]  ;;  %v5168_v52 = vld [vmem:[#allocation3 + $0x18a] sm:$0xff]  ;;  %v4784_v21 = vpop.permute.xlu1 %4783 }
 0x37c   : > { %v13488_v53 = vpack.c.bf16 %v5167_v44, %v5167_v44  ;;  %v13490_v49 = vpack.c.bf16 %v5168_v52, %v5168_v52  ;;  %3337 = vst.msk [vmem:[#allocation5 + $0x168] sm:$0xf] %vm3306_vm15, %v10449_v8  ;;  %v3500_v1 = vpop.permute.xlu0 %3499 }
 0x37d   : > { %v5165_v57 = vld [vmem:[#allocation3 + $0x16a] sm:$0xff]  ;;  %v5166_v28 = vld [vmem:[#allocation3 + $0x172] sm:$0xff]  ;;  %4865 = vst.msk [vmem:[#allocation5 + $0xb4] sm:$0xf] %vm4849_vm10, %v4784_v21  ;;  %5056 = vrot.lane.b32.xlu1 %v13494_v56, %s11483_s29 }
 0x37e   : > { %5327 = vst.msk [vmem:[#allocation5 + $0x154] sm:$0xf] %vm3306_vm15, %v13488_v53  ;;  %5328 = vst.msk [vmem:[#allocation5 + $0x160] sm:$0xf] %vm3306_vm15, %v13490_v49  ;;  %v13502_v7 = vpack.c.bf16 %v5165_v57, %v5165_v57  ;;  %v13504_v23 = vpack.c.bf16 %v5166_v28, %v5166_v28  ;;  %v3177_v48 = vld [vmem:[#allocation3 + $0x170] sm:$0xff]  ;;  %3772 = vrot.lane.b32.xlu0 %v13192_v16, %s11478_s24 }
 0x37f   : > { %3580 = vst.msk [vmem:[#allocation5 + $0xc0] sm:$0xf] %vm3563_vm4, %v3500_v1  ;;  %v10450_v41 = vpack.c.bf16 %v3177_v48, %v3177_v48  ;;  %v5041_v62 = vpop.permute.xlu1 %5040  ;;  %v13527_v16 = vld [vmem:[%s15072_s4] ss:$0 sm:$0xff] }
 0x380   : > { %5325 = vst.msk [vmem:[#allocation5 + $0x13c] sm:$0xf] %vm3306_vm15, %v13502_v7  ;;  %5326 = vst.msk [vmem:[#allocation5 + $0x148] sm:$0xf] %vm3306_vm15, %v13504_v23  ;;  %v3757_v63 = vpop.permute.xlu0 %3756  ;;  %v5345_v35 = vld [vmem:[#allocation5 + $0xa8] sm:$0xff] }
 0x381   : > { %5122 = vst.msk [vmem:[#allocation5 + $0xb4] sm:$0xf] %vm5106_vm11, %v5041_v62  ;;  %3517 = vrot.lane.b32.xlu1 %v13435_v2, %s11477_s16  ;;  %v11313_v28 = vld [vmem:[#allocation5 + $0xc4] ss:$12 sps:$4 sm:$0xff]  }
 0x382   : > { %3338 = vst.msk [vmem:[#allocation5 + $0x174] sm:$0xf] %vm3306_vm15, %v10450_v41  ;;  %4029 = vrot.lane.b32.xlu0 %v10633_v55, %s11479_s23 }
 0x383   : > { %3837 = vst.msk [vmem:[#allocation5 + $0xc0] sm:$0xf] %vm3820_vm6, %v3757_v63  ;;  %v3502_v39 = vpop.permute.xlu1 %3501  ;;  %v4651_v63 = vld [vmem:[#allocation3 + $0x168] sm:$0xff] }
 0x384   : > { %3581 = vst.msk [vmem:[#allocation5 + $0xcc] sm:$0xf] %vm3563_vm4, %v3502_v39  ;;  %v4014_v51 = vpop.permute.xlu0 %4013 }
 0x385   : > { %3774 = vrot.lane.b32.xlu1 %v13194_v31, %s11478_s24  ;;  %4094 = vst.msk [vmem:[#allocation5 + $0xc0] sm:$0xf] %vm4077_vm7, %v4014_v51 }
 0x386   : > { %4286 = vrot.lane.b32.xlu0 %v13480_v36, %s11480_s28 }
 0x387   : > { %v3759_v2 = vpop.permute.xlu1 %3758  ;;  %v5668_v30 = vpop.f32.mrf.mxu1 }
 0x388   : > { %v5346_v20 = vld [vmem:[#allocation5 + $0xb4] sm:$0xff]  ;;  %3838 = vst.msk [vmem:[#allocation5 + $0xcc] sm:$0xf] %vm3820_vm6, %v3759_v2  ;;  %v5669_v31 = vadd.f32 %v13527_v16, %v5668_v30  ;;  %v4271_v10 = vpop.permute.xlu0 %4270 }
 0x389   : > { %v9710_v15 = vcombine.low %v5345_v35, %v5346_v20  ;;  %4031 = vrot.lane.b32.xlu1 %v10634_v45, %s11479_s23  ;;  %v5670_v61 = vpop.f32.mrf.mxu1  ;;  %4351 = vst.msk [vmem:[#allocation5 + $0xc0] sm:$0xf] %vm4334_vm8, %v4271_v10  ;;  %v10637_v20 = vpack.c.bf16 %v4651_v63, %v4651_v63  ;;  %v13613_v10 = vpack.c.bf16 %v4908_v60, %v4908_v60 }
 0x38a   : > { %v5795_v11 = vmax.f32 %v5669_v31, 0.0  ;;  %4543 = vrot.lane.b32.xlu0 %v13385_v42, %s11481_s17 }
 0x38b   : > { %5723 = vmatmul.mubr.bf16.gmra.mxu1 %v9710_v15  ;;  %v4016_v47 = vpop.permute.xlu1 %4015  ;;  %v5671_v12 = vpop.f32.mrf.mxu1  ;;  %v4652_v15 = vld [vmem:[#allocation3 + $0x170] sm:$0xff] }
 0x38c   : > { %5870 = vst.msk [vmem:[#allocation4 + $0x19] sm:$0xff] %vm5827_vm3, %v5795_v11  ;;  %v5672_v4 = vadd.f32 %v13527_v16, %v5671_v12  ;;  %v4528_v17 = vpop.permute.xlu0 %4527  ;;  %9745 = vmatprep.mubr.msk.bf16.mxu1 %vm3071_vm5, %v11313_v28  ;;  %v10638_v12 = vpack.c.bf16 %v4652_v15, %v4652_v15  ;;  %v4911_v15 = vld [vmem:[#allocation3 + $0x189] sm:$0xff] }
 0x38d   : > { %4095 = vst.msk [vmem:[#allocation5 + $0xcc] sm:$0xf] %vm4077_vm7, %v4016_v47  ;;  %4288 = vrot.lane.b32.xlu1 %v13494_v56, %s11480_s28  ;;  %v5673_v13 = vpop.f32.mrf.mxu1 }
 0x38e   : > { %v5796_v9 = vmax.f32 %v5672_v4, 0.0  ;;  %4608 = vst.msk [vmem:[#allocation5 + $0xc0] sm:$0xf] %vm4591_vm9, %v4528_v17  ;;  %4801 = vrot.lane.b32.xlu0 %v10635_v58, %s11482_s25  ;;  %v4909_v17 = vld [vmem:[#allocation3 + $0x171] sm:$0xff] }
 0x38f   : > { %v4273_v18 = vpop.permute.xlu1 %4272 }
 0x390   : > { %5871 = vst.msk [vmem:[#allocation4 + $0x21] sm:$0xff] %vm5827_vm3, %v5796_v9  ;;  %v4786_v19 = vpop.permute.xlu0 %4785 }
 0x391   : > { %4352 = vst.msk [vmem:[#allocation5 + $0xcc] sm:$0xf] %vm4334_vm8, %v4273_v18  ;;  %4545 = vrot.lane.b32.xlu1 %v13387_v34, %s11481_s17 }
 0x392   : > { %4866 = vst.msk [vmem:[#allocation5 + $0xc0] sm:$0xf] %vm4849_vm10, %v4786_v19  ;;  %5058 = vrot.lane.b32.xlu0 %v13550_v32, %s11483_s29 }
 0x393   : > { %v4530_v24 = vpop.permute.xlu1 %4529  ;;  %v6609_v54 = vld [vmem:[#allocation4 + $0x18] sm:$0xff] }
 0x394   : > { %v6097_v27 = vld [vmem:[#allocation4 + $0x19] sm:$0xff]  ;;  %4609 = vst.msk [vmem:[#allocation5 + $0xcc] sm:$0xf] %vm4591_vm9, %v4530_v24  ;;  %v13556_v55 = vpack.c.bf16 %v6609_v54, %v6609_v54  ;;  %v5043_v59 = vpop.permute.xlu0 %5042  ;;  %v13632_v24 = vpack.c.bf16 %v4909_v17, %v4909_v17 }
 0x395   : > { %v13558_v33 = vpack.c.bf16 %v6097_v27, %v6097_v27  ;;  %4803 = vrot.lane.b32.xlu1 %v10636_v26, %s11482_s25  ;;  %5123 = vst.msk [vmem:[#allocation5 + $0xc0] sm:$0xf] %vm5106_vm11, %v5043_v59 }
 0x396   : > { %6065 = vst.msk [vmem:[#allocation5 + $0x18] sm:$0xf] %vm6062_vm12, %v13556_v55  ;;  %3519 = vrot.lane.b32.xlu0 %v13480_v36, %s11477_s16 }
 0x397   : > { %7026 = vst.msk [vmem:[#allocation5 + $0x4] sm:$0xf] %vm6062_vm12, %v13558_v33  ;;  %v4788_v29 = vpop.permute.xlu1 %4787  ;;  %v6610_v37 = vld [vmem:[#allocation4 + $0x20] sm:$0xff] }
 0x398   : > { %4867 = vst.msk [vmem:[#allocation5 + $0xcc] sm:$0xf] %vm4849_vm10, %v4788_v29  ;;  %v13571_v43 = vpack.c.bf16 %v6610_v37, %v6610_v37  ;;  %v6098_v45 = vld [vmem:[#allocation4 + $0x21] sm:$0xff]  ;;  %v3504_v46 = vpop.permute.xlu0 %3503 }
 0x399   : > { %5060 = vrot.lane.b32.xlu1 %v13568_v14, %s11483_s29  ;;  %v13575_v38 = vpack.c.bf16 %v6098_v45, %v6098_v45  ;;  %3582 = vst.msk [vmem:[#allocation5 + $0xd8] sm:$0xf] %vm3563_vm4, %v3504_v46 }
 0x39a   : > { %6066 = vst.msk [vmem:[#allocation5 + $0x24] sm:$0xf] %vm6062_vm12, %v13571_v43  ;;  %3776 = vrot.lane.b32.xlu0 %v13385_v42, %s11478_s24 }
 0x39b   : > { %v5045_v36 = vpop.permute.xlu1 %5044  ;;  %7027 = vst.msk [vmem:[#allocation5 + $0x10] sm:$0xf] %vm6062_vm12, %v13575_v38 }
 0x39c   : > { %5124 = vst.msk [vmem:[#allocation5 + $0xcc] sm:$0xf] %vm5106_vm11, %v5045_v36  ;;  %v3761_v50 = vpop.permute.xlu0 %3760 }
 0x39d   : > { %3521 = vrot.lane.b32.xlu1 %v13494_v56, %s11477_s16  ;;  %3839 = vst.msk [vmem:[#allocation5 + $0xd8] sm:$0xf] %vm3820_vm6, %v3761_v50  ;;  %v5347_v56 = vld [vmem:[#allocation5 + $0xc0] sm:$0xff] }
 0x39e   : > { %4033 = vrot.lane.b32.xlu0 %v10635_v58, %s11479_s23 }
 0x39f   : > { %v3506_v8 = vpop.permute.xlu1 %3505 }
 0x3a0   : > { %3583 = vst.msk [vmem:[#allocation5 + $0xe4] sm:$0xf] %vm3563_vm4, %v3506_v8  ;;  %v4018_v42 = vpop.permute.xlu0 %4017  ;;  %v11315_v8 = vld [vmem:[#allocation5 + $0xdc] ss:$12 sps:$4 sm:$0xff]  }
 0x3a1   : > { %3778 = vrot.lane.b32.xlu1 %v13387_v34, %s11478_s24  ;;  %4096 = vst.msk [vmem:[#allocation5 + $0xd8] sm:$0xf] %vm4077_vm7, %v4018_v42 }
 0x3a2   : > { %4290 = vrot.lane.b32.xlu0 %v13550_v32, %s11480_s28 }
 0x3a3   : > { %v5676_v44 = vpop.f32.mrf.mxu1  ;;  %v3763_v52 = vpop.permute.xlu1 %3762  ;;  %v5348_v57 = vld [vmem:[#allocation5 + $0xcc] sm:$0xff] }
 0x3a4   : > { %v5677_v21 = vadd.f32 %v13527_v16, %v5676_v44  ;;  %3840 = vst.msk [vmem:[#allocation5 + $0xe4] sm:$0xf] %vm3820_vm6, %v3763_v52  ;;  %v9712_v48 = vcombine.low %v5347_v56, %v5348_v57  ;;  %v4275_v34 = vpop.permute.xlu0 %4274  ;;  %v4653_v56 = vld [vmem:[#allocation3 + $0x180] sm:$0xff] }
 0x3a5   : > { %v5678_v1 = vpop.f32.mrf.mxu1  ;;  %4035 = vrot.lane.b32.xlu1 %v10636_v26, %s11479_s23  ;;  %4353 = vst.msk [vmem:[#allocation5 + $0xd8] sm:$0xf] %vm4334_vm8, %v4275_v34  ;;  %v10639_v34 = vpack.c.bf16 %v4653_v56, %v4653_v56 }
 0x3a6   : > { %v5797_v41 = vmax.f32 %v5677_v21, 0.0  ;;  %5731 = vmatmul.mubr.bf16.gmra.mxu1 %v9712_v48  ;;  %4547 = vrot.lane.b32.xlu0 %v13371_v25, %s11481_s17 }
 0x3a7   : > { %v5679_v62 = vpop.f32.mrf.mxu1  ;;  %v4020_v39 = vpop.permute.xlu1 %4019  ;;  %9746 = vmatprep.mubr.msk.bf16.mxu1 %vm3071_vm5, %v11315_v8 }
 0x3a8   : > { %5872 = vst.msk [vmem:[#allocation4 + $0x31] sm:$0xff] %vm5827_vm3, %v5797_v41  ;;  %v5680_v51 = vadd.f32 %v13527_v16, %v5679_v62  ;;  %v4532_v35 = vpop.permute.xlu0 %4531  ;;  %v4910_v62 = vld [vmem:[#allocation3 + $0x181] sm:$0xff] }
 0x3a9   : > { %4097 = vst.msk [vmem:[#allocation5 + $0xe4] sm:$0xf] %vm4077_vm7, %v4020_v39  ;;  %v5681_v2 = vpop.f32.mrf.mxu1  ;;  %4292 = vrot.lane.b32.xlu1 %v13568_v14, %s11480_s28  ;;  %v4654_v39 = vld [vmem:[#allocation3 + $0x188] sm:$0xff] }
 0x3aa   : > { %v5798_v30 = vmax.f32 %v5680_v51, 0.0  ;;  %4610 = vst.msk [vmem:[#allocation5 + $0xd8] sm:$0xf] %vm4591_vm9, %v4532_v35  ;;  %4805 = vrot.lane.b32.xlu0 %v10637_v20, %s11482_s25  ;;  %v10671_v2 = vpack.c.bf16 %v4910_v62, %v4910_v62 }
 0x3ab   : > { %v4277_v31 = vpop.permute.xlu1 %4276 }
 0x3ac   : > { %5873 = vst.msk [vmem:[#allocation4 + $0x39] sm:$0xff] %vm5827_vm3, %v5798_v30  ;;  %v4790_v61 = vpop.permute.xlu0 %4789 }
 0x3ad   : > { %4354 = vst.msk [vmem:[#allocation5 + $0xe4] sm:$0xf] %vm4334_vm8, %v4277_v31  ;;  %4549 = vrot.lane.b32.xlu1 %v13373_v22, %s11481_s17 }
 0x3ae   : > { %4868 = vst.msk [vmem:[#allocation5 + $0xd8] sm:$0xf] %vm4849_vm10, %v4790_v61  ;;  %5062 = vrot.lane.b32.xlu0 %v13613_v10, %s11483_s29 }
 0x3af   : > { %v7571_v11 = vld [vmem:[#allocation4 + $0x31] sm:$0xff]  ;;  %v4534_v47 = vpop.permute.xlu1 %4533 }
 0x3b0   : > { %v5906_v40 = vld [vmem:[#allocation4 + $0x30] sm:$0xff]  ;;  %v13618_v4 = vpack.c.bf16 %v7571_v11, %v7571_v11  ;;  %4611 = vst.msk [vmem:[#allocation5 + $0xe4] sm:$0xf] %vm4591_vm9, %v4534_v47  ;;  %v5047_v58 = vpop.permute.xlu0 %5046 }
 0x3b1   : > { %v10711_v13 = vpack.c.bf16 %v5906_v40, %v5906_v40  ;;  %4807 = vrot.lane.b32.xlu1 %v10638_v12, %s11482_s25  ;;  %5125 = vst.msk [vmem:[#allocation5 + $0xd8] sm:$0xf] %vm5106_vm11, %v5047_v58  ;;  %v10672_v58 = vpack.c.bf16 %v4911_v15, %v4911_v15 }
 0x3b2   : > { %7028 = vst.msk [vmem:[#allocation5 + $0x1c] sm:$0xf] %vm6062_vm12, %v13618_v4  ;;  %3523 = vrot.lane.b32.xlu0 %v13550_v32, %s11477_s16 }
 0x3b3   : > { %6067 = vst.msk [vmem:[#allocation5 + $0x30] sm:$0xf] %vm6062_vm12, %v10711_v13  ;;  %v7827_v9 = vld [vmem:[#allocation4 + $0x32] sm:$0xff]  ;;  %v7828_v5 = vld [vmem:[#allocation4 + $0x3a] sm:$0xff]  ;;  %v4792_v19 = vpop.permute.xlu1 %4791 }
 0x3b4   : > { %v13626_v18 = vpack.c.bf16 %v7827_v9, %v7827_v9  ;;  %v13628_v3 = vpack.c.bf16 %v7828_v5, %v7828_v5  ;;  %v6869_v26 = vld [vmem:[#allocation4 + $0x39] sm:$0xff]  ;;  %4869 = vst.msk [vmem:[#allocation5 + $0xe4] sm:$0xf] %vm4849_vm10, %v4792_v19  ;;  %v3508_v59 = vpop.permute.xlu0 %3507 }
 0x3b5   : > { %v5907_v54 = vld [vmem:[#allocation4 + $0x38] sm:$0xff]  ;;  %v10838_v27 = vpack.c.bf16 %v6869_v26, %v6869_v26  ;;  %5064 = vrot.lane.b32.xlu1 %v13632_v24, %s11483_s29  ;;  %3584 = vst.msk [vmem:[#allocation5 + $0xf0] sm:$0xf] %vm3563_vm4, %v3508_v59 }
 0x3b6   : > { %v10712_v6 = vpack.c.bf16 %v5907_v54, %v5907_v54  ;;  %7987 = vst.msk [vmem:[#allocation5 + $0x8] sm:$0xf] %vm6062_vm12, %v13626_v18  ;;  %7988 = vst.msk [vmem:[#allocation5 + $0x14] sm:$0xf] %vm6062_vm12, %v13628_v3  ;;  %3780 = vrot.lane.b32.xlu0 %v13371_v25, %s11478_s24 }
 0x3b7   : > { %7029 = vst.msk [vmem:[#allocation5 + $0x28] sm:$0xf] %vm6062_vm12, %v10838_v27  ;;  %v5049_v32 = vpop.permute.xlu1 %5048 }
 0x3b8   : > { %6068 = vst.msk [vmem:[#allocation5 + $0x3c] sm:$0xf] %vm6062_vm12, %v10712_v6  ;;  %v3765_v29 = vpop.permute.xlu0 %3764  ;;  %v5349_v36 = vld [vmem:[#allocation5 + $0xd8] sm:$0xff] }
 0x3b9   : > { %5126 = vst.msk [vmem:[#allocation5 + $0xe4] sm:$0xf] %vm5106_vm11, %v5049_v32  ;;  %3525 = vrot.lane.b32.xlu1 %v13568_v14, %s11477_s16 }
 0x3ba   : > { %3841 = vst.msk [vmem:[#allocation5 + $0xf0] sm:$0xf] %vm3820_vm6, %v3765_v29  ;;  %4037 = vrot.lane.b32.xlu0 %v10637_v20, %s11479_s23  ;;  %v10640_v20 = vpack.c.bf16 %v4654_v39, %v4654_v39  ;;  %v11328_v39 = vld [vmem:[%s15073_s5 + $0x38] sm:$0xff]  }
 0x3bb   : > { %v3510_v37 = vpop.permute.xlu1 %3509 }
 0x3bc   : > { %3585 = vst.msk [vmem:[#allocation5 + $0xfc] sm:$0xf] %vm3563_vm4, %v3510_v37  ;;  %v4022_v45 = vpop.permute.xlu0 %4021 }
 0x3bd   : > { %3782 = vrot.lane.b32.xlu1 %v13373_v22, %s11478_s24  ;;  %4098 = vst.msk [vmem:[#allocation5 + $0xf0] sm:$0xf] %vm4077_vm7, %v4022_v45  ;;  %v11317_v45 = vld [vmem:[#allocation5 + $0xf4] ss:$12 sps:$4 sm:$0xff]  }
 0x3be   : > { %v5684_v25 = vpop.f32.mrf.mxu1  ;;  %4294 = vrot.lane.b32.xlu0 %v13613_v10, %s11480_s28 }
 0x3bf   : > { %v3767_v46 = vpop.permute.xlu1 %3766  ;;  %v5685_v14 = vadd.f32 %v13527_v16, %v5684_v25 }
 0x3c0   : > { %v5350_v50 = vld [vmem:[#allocation5 + $0xe4] sm:$0xff]  ;;  %3842 = vst.msk [vmem:[#allocation5 + $0xfc] sm:$0xf] %vm3820_vm6, %v3767_v46  ;;  %v5686_v42 = vpop.f32.mrf.mxu1  ;;  %v4279_v22 = vpop.permute.xlu0 %4278 }
 0x3c1   : > { %v9714_v44 = vcombine.low %v5349_v36, %v5350_v50  ;;  %v5799_v52 = vmax.f32 %v5685_v14, 0.0  ;;  %4039 = vrot.lane.b32.xlu1 %v10638_v12, %s11479_s23  ;;  %4355 = vst.msk [vmem:[#allocation5 + $0xf0] sm:$0xf] %vm4334_vm8, %v4279_v22  ;;  %v4655_v14 = vld [vmem:[#allocation3 + $0x198] sm:$0xff] }
 0x3c2   : > { %v5687_v21 = vpop.f32.mrf.mxu1  ;;  %4551 = vrot.lane.b32.xlu0 %v13502_v7, %s11481_s17  ;;  %v4912_v22 = vld [vmem:[#allocation3 + $0x199] sm:$0xff] }
 0x3c3   : > { %5739 = vmatmul.mubr.bf16.gmra.mxu1 %v9714_v44  ;;  %5874 = vst.msk [vmem:[#allocation4 + $0x49] sm:$0xff] %vm5827_vm3, %v5799_v52  ;;  %v4024_v57 = vpop.permute.xlu1 %4023  ;;  %v5688_v28 = vadd.f32 %v13527_v16, %v5687_v21  ;;  %v10641_v44 = vpack.c.bf16 %v4655_v14, %v4655_v14  ;;  %v10673_v62 = vpack.c.bf16 %v4912_v22, %v4912_v22 }
 0x3c4   : > { %4099 = vst.msk [vmem:[#allocation5 + $0xfc] sm:$0xf] %vm4077_vm7, %v4024_v57  ;;  %v5689_v1 = vpop.f32.mrf.mxu1  ;;  %v4536_v41 = vpop.permute.xlu0 %4535  ;;  %9747 = vmatprep.mubr.msk.bf16.mxu1 %vm3071_vm5, %v11317_v45  ;;  %v5169_v57 = vld [vmem:[#allocation3 + $0x19a] sm:$0xff] }
 0x3c5   : > { %v5800_v48 = vmax.f32 %v5688_v28, 0.0  ;;  %4296 = vrot.lane.b32.xlu1 %v13632_v24, %s11480_s28  ;;  %4612 = vst.msk [vmem:[#allocation5 + $0xf0] sm:$0xf] %vm4591_vm9, %v4536_v41  ;;  %v5170_v28 = vld [vmem:[#allocation3 + $0x1a2] sm:$0xff] }
 0x3c6   : > { %4809 = vrot.lane.b32.xlu0 %v10639_v34, %s11482_s25  ;;  %v4656_v1 = vld [vmem:[#allocation3 + $0x1a0] sm:$0xff]  ;;  %v10706_v41 = vpack.c.bf16 %v5170_v28, %v5170_v28 }
 0x3c7   : > { %5875 = vst.msk [vmem:[#allocation4 + $0x51] sm:$0xff] %vm5827_vm3, %v5800_v48  ;;  %v4281_v63 = vpop.permute.xlu1 %4280  ;;  %v10705_v48 = vpack.c.bf16 %v5169_v57, %v5169_v57 }
 0x3c8   : > { %4356 = vst.msk [vmem:[#allocation5 + $0xfc] sm:$0xf] %vm4334_vm8, %v4281_v63  ;;  %v4794_v51 = vpop.permute.xlu0 %4793  ;;  %v6095_v63 = vld [vmem:[#allocation4 + $0x1] sm:$0xff] }
 0x3c9   : > { %4553 = vrot.lane.b32.xlu1 %v13504_v23, %s11481_s17  ;;  %4870 = vst.msk [vmem:[#allocation5 + $0xf0] sm:$0xf] %vm4849_vm10, %v4794_v51 }
 0x3ca   : > { %v6870_v30 = vld [vmem:[#allocation4 + $0x49] sm:$0xff]  ;;  %5066 = vrot.lane.b32.xlu0 %v10671_v2, %s11483_s29  ;;  %5329 = vst.msk [vmem:[#allocation5 + $0x16c] sm:$0xf] %vm3306_vm15, %v10705_v48  ;;  %5330 = vst.msk [vmem:[#allocation5 + $0x178] sm:$0xf] %vm3306_vm15, %v10706_v41  ;;  %vm6319_vm15 = vcmask 519424  }
 0x3cb   : > { %v4538_v35 = vpop.permute.xlu1 %4537  ;;  %v10839_v60 = vpack.c.bf16 %v6870_v30, %v6870_v30  ;;  %v5908_v31 = vld [vmem:[#allocation4 + $0x48] sm:$0xff]  ;;  %v4913_v30 = vld [vmem:[#allocation3 + $0x1a1] sm:$0xff] }
 0x3cc   : > { %4613 = vst.msk [vmem:[#allocation5 + $0xfc] sm:$0xf] %vm4591_vm9, %v4538_v35  ;;  %v10713_v61 = vpack.c.bf16 %v5908_v31, %v5908_v31  ;;  %v5051_v11 = vpop.permute.xlu0 %5050  ;;  %v11329_v35 = vld [vmem:[%s15073_s5 + $0x70] sm:$0xff]  }
 0x3cd   : > { %4811 = vrot.lane.b32.xlu1 %v10640_v20, %s11482_s25  ;;  %7030 = vst.msk [vmem:[#allocation5 + $0x34] sm:$0xf] %vm6062_vm12, %v10839_v60  ;;  %v10739_v60 = vpack.c.bf16 %v6095_v63, %v6095_v63 }
 0x3ce   : > { %v7829_v40 = vld [vmem:[#allocation4 + $0x4a] sm:$0xff]  ;;  %v7830_v47 = vld [vmem:[#allocation4 + $0x52] sm:$0xff]  ;;  %5127 = vst.msk [vmem:[#allocation5 + $0xf0] sm:$0xf] %vm5106_vm11, %v5051_v11  ;;  %3527 = vrot.lane.b32.xlu0 %v13613_v10, %s11477_s16 }
 0x3cf   : > { %6069 = vst.msk [vmem:[#allocation5 + $0x48] sm:$0xf] %vm6062_vm12, %v10713_v61  ;;  %v13682_v12 = vpack.c.bf16 %v7829_v40, %v7829_v40  ;;  %v13684_v13 = vpack.c.bf16 %v7830_v47, %v7830_v47  ;;  %v4796_v17 = vpop.permute.xlu1 %4795  ;;  %v6871_v9 = vld [vmem:[#allocation4 + $0x51] sm:$0xff]  ;;  %v10674_v40 = vpack.c.bf16 %v4913_v30, %v4913_v30  ;;  %v6096_v47 = vld [vmem:[#allocation4 + $0x9] sm:$0xff] }
 0x3d0   : > { %v5909_v5 = vld [vmem:[#allocation4 + $0x50] sm:$0xff]  ;;  %4871 = vst.msk [vmem:[#allocation5 + $0xfc] sm:$0xf] %vm4849_vm10, %v4796_v17  ;;  %v10840_v19 = vpack.c.bf16 %v6871_v9, %v6871_v9  ;;  %v3512_v54 = vpop.permute.xlu0 %3511  ;;  %v7316_v30 = vld [vmem:[#allocation4 + $0x38] sm:$0xff] }
 0x3d1   : > { %v10714_v26 = vpack.c.bf16 %v5909_v5, %v5909_v5  ;;  %7989 = vst.msk [vmem:[#allocation5 + $0x20] sm:$0xf] %vm6062_vm12, %v13682_v12  ;;  %7990 = vst.msk [vmem:[#allocation5 + $0x2c] sm:$0xf] %vm6062_vm12, %v13684_v13  ;;  %5068 = vrot.lane.b32.xlu1 %v10672_v58, %s11483_s29  ;;  %v11330_v17 = vld [vmem:[%s15073_s5 + $0x30] sm:$0xff]   ;;  %v7058_v5 = vld [vmem:[#allocation4 + $0x1a] sm:$0xff] }
 0x3d2   : > { %3586 = vst.msk [vmem:[#allocation5 + $0x108] sm:$0xf] %vm3563_vm4, %v3512_v54  ;;  %3784 = vrot.lane.b32.xlu0 %v13502_v7, %s11478_s24 }
 0x3d3   : > { %7031 = vst.msk [vmem:[#allocation5 + $0x40] sm:$0xf] %vm6062_vm12, %v10840_v19  ;;  %6070 = vst.msk [vmem:[#allocation5 + $0x54] sm:$0xf] %vm6062_vm12, %v10714_v26  ;;  %v5053_v10 = vpop.permute.xlu1 %5052 }
 0x3d4   : > { %5128 = vst.msk [vmem:[#allocation5 + $0xfc] sm:$0xf] %vm5106_vm11, %v5053_v10  ;;  %v3769_v27 = vpop.permute.xlu0 %3768  ;;  %v11333_v10 = vld [vmem:[%s15073_s5 + $0x68] sm:$0xff]  }
 0x3d5   : > { %3529 = vrot.lane.b32.xlu1 %v13632_v24, %s11477_s16  ;;  %3843 = vst.msk [vmem:[#allocation5 + $0x108] sm:$0xf] %vm3820_vm6, %v3769_v27  ;;  %v5351_v29 = vld [vmem:[#allocation5 + $0xf0] sm:$0xff]  ;;  %v13758_v27 = vld [vmem:[%s15073_s5 + $0x88] sm:$0xff]   ;;  %s11408_s16 = sshll.u32 %s11485_s26, 4  ;;  %s11409_s16 = int_to_ptr.vmem [resolvable:$false] %s11408_s16 }
 0x3d6   : > { %4041 = vrot.lane.b32.xlu0 %v10639_v34, %s11479_s23  ;;  %11226 = vmatprep.subr.bf16.mxu1 %v13758_v27  ;;  %s11410_s21 = scalar_lea.vmem %s11409_s16, 32 }
 0x3d7   : > { %v3514_v6 = vpop.permute.xlu1 %3513  ;;  %11228 = vmatpush3.bf16.msra.mxu1 %v13758_v27 }
 0x3d8   : > { %3587 = vst.msk [vmem:[#allocation5 + $0x114] sm:$0xf] %vm3563_vm4, %v3514_v6  ;;  %v4026_v59 = vpop.permute.xlu0 %4025  ;;  %v10740_v6 = vpack.c.bf16 %v6096_v47, %v6096_v47 }
 0x3d9   : > { %3786 = vrot.lane.b32.xlu1 %v13504_v23, %s11478_s24  ;;  %4100 = vst.msk [vmem:[#allocation5 + $0x108] sm:$0xf] %vm4077_vm7, %v4026_v59  ;;  %v6352_v59 = vld [vmem:[#allocation4 + $0x2] sm:$0xff] }
 0x3da   : > { %4298 = vrot.lane.b32.xlu0 %v10671_v2, %s11480_s28  ;;  %v10642_v2 = vpack.c.bf16 %v4656_v1, %v4656_v1  ;;  %v10771_v14 = vpack.c.bf16 %v6352_v59, %v6352_v59  ;;  %v11340_v1 = vld [vmem:[%s15073_s5 + $0x58] sm:$0xff]  }
 0x3db   : > { %v5692_v7 = vpop.f32.mrf.mxu1  ;;  %v3771_v32 = vpop.permute.xlu1 %3770  ;;  %v5352_v37 = vld [vmem:[#allocation5 + $0xfc] sm:$0xff] }
 0x3dc   : > { %v5693_v24 = vadd.f32 %v13527_v16, %v5692_v7  ;;  %3844 = vst.msk [vmem:[#allocation5 + $0x114] sm:$0xf] %vm3820_vm6, %v3771_v32  ;;  %v9716_v46 = vcombine.low %v5351_v29, %v5352_v37  ;;  %v4283_v23 = vpop.permute.xlu0 %4282  ;;  %v13766_v29 = vpack.c.bf16 %v7058_v5, %v7058_v5  ;;  %v11335_v37 = vld [vmem:[%s15073_s5 + $0x28] sm:$0xff]  }
 0x3dd   : > { %v5694_v25 = vpop.f32.mrf.mxu1  ;;  %4043 = vrot.lane.b32.xlu1 %v10640_v20, %s11479_s23  ;;  %4357 = vst.msk [vmem:[#allocation5 + $0x108] sm:$0xf] %vm4334_vm8, %v4283_v23  ;;  %v11337_v23 = vld [vmem:[%s15073_s5 + $0x60] sm:$0xff]   ;;  %s323_s23 = sand.u32 1, %s11456_s10  }
 0x3de   : > { %v5801_v36 = vmax.f32 %v5693_v24, 0.0  ;;  %5747 = vmatmul.mubr.bf16.gmra.mxu1 %v9716_v46  ;;  %4555 = vrot.lane.b32.xlu0 %v13488_v53, %s11481_s17  ;;  %v11327_v53 = vld [vmem:[%s15073_s5 + $0x78] sm:$0xff]   ;;  %s324_s22 = scalar_lea.vmem [#allocation6], %s323_s23 }
 0x3df   : > { %v5695_v50 = vpop.f32.mrf.mxu1  ;;  %v4028_v8 = vpop.permute.xlu1 %4027  ;;  %11013 = vmatprep.subr.bf16.mxu0 %v11327_v53  ;;  %v11342_v53 = vld [vmem:[%s15073_s5 + $0x18] sm:$0xff]  }
 0x3e0   : > { %5876 = vst.msk [vmem:[#allocation4 + $0x61] sm:$0xff] %vm5827_vm3, %v5801_v36  ;;  %v5696_v42 = vadd.f32 %v13527_v16, %v5695_v50  ;;  %v4540_v56 = vpop.permute.xlu0 %4539  ;;  %11014 = vmatpush3.bf16.msra.mxu0 %v11328_v39  ;;  %v7059_v36 = vld [vmem:[#allocation4 + $0x22] sm:$0xff] }
 0x3e1   : > { %4101 = vst.msk [vmem:[#allocation5 + $0x114] sm:$0xf] %vm4077_vm7, %v4028_v8  ;;  %v5697_v52 = vpop.f32.mrf.mxu1  ;;  %4300 = vrot.lane.b32.xlu1 %v10672_v58, %s11480_s28  ;;  %11015 = vmatprep.subr.bf16.mxu0 %v11329_v35  ;;  %v13785_v50 = vld [vmem:[%s15073_s5 + $0x80] sm:$0xff]   ;;  %v11319_v39 = vld [vmem:[#allocation5 + $0x10c] ss:$12 sps:$4 sm:$0xff]   ;;  %v11344_v35 = vld [vmem:[%s15073_s5 + $0x50] sm:$0xff]  }
 0x3e2   : > { %v5802_v21 = vmax.f32 %v5696_v42, 0.0  ;;  %4614 = vst.msk [vmem:[#allocation5 + $0x108] sm:$0xf] %vm4591_vm9, %v4540_v56  ;;  %4813 = vrot.lane.b32.xlu0 %v10641_v44, %s11482_s25  ;;  %v11339_v42 = vld [vmem:[%s15073_s5 + $0x20] sm:$0xff]   ;;  %v7315_v44 = vld [vmem:[#allocation4 + $0x30] sm:$0xff]  ;;  %11227 = vmatprep.subr.bf16.mxu1 %v13785_v50 }
 0x3e3   : > { %v4285_v34 = vpop.permute.xlu1 %4284  ;;  %v6353_v52 = vld [vmem:[#allocation4 + $0xa] sm:$0xff]  ;;  %11229 = vmatpush3.bf16.msra.mxu1 %v13785_v50  ;;  %v13800_v57 = vpack.c.bf16 %v7315_v44, %v7315_v44  ;;  %9748 = vmatprep.mubr.msk.bf16.mxu1 %vm3071_vm5, %v11319_v39 }
 0x3e4   : > { %5877 = vst.msk [vmem:[#allocation4 + $0x69] sm:$0xff] %vm5827_vm3, %v5802_v21  ;;  %v4798_v51 = vpop.permute.xlu0 %4797  ;;  %11016 = vmatpush3.bf16.msra.mxu0 %v11330_v17  ;;  %v13794_v21 = vpack.c.bf16 %v7059_v36, %v7059_v36  ;;  %v10772_v28 = vpack.c.bf16 %v6353_v52, %v6353_v52  ;;  %v11348_v17 = vld [vmem:[%s15073_s5 + $0x8] sm:$0xff]  }
 0x3e5   : > { %4358 = vst.msk [vmem:[#allocation5 + $0x114] sm:$0xf] %vm4334_vm8, %v4285_v34  ;;  %4557 = vrot.lane.b32.xlu1 %v13490_v49, %s11481_s17  ;;  %11017 = vmatprep.subr.bf16.mxu0 %v11333_v10  ;;  %v11351_v10 = vld [vmem:[%s15073_s5] sm:$0xff]   ;;  %v7317_v52 = vld [vmem:[#allocation4 + $0x48] sm:$0xff]  ;;  %s9011_s17 = scalar_lea.sflag [#allocation7], %s323_s23 }
 0x3e6   : > { %4872 = vst.msk [vmem:[#allocation5 + $0x108] sm:$0xf] %vm4849_vm10, %v4798_v51  ;;  %5070 = vrot.lane.b32.xlu0 %v10673_v62, %s11483_s29 }
 0x3e7   : > { %v4542_v20 = vpop.permute.xlu1 %4541  ;;  %v6872_v31 = vld [vmem:[#allocation4 + $0x61] sm:$0xff] }
 0x3e8   : > { %v5910_v15 = vld [vmem:[#allocation4 + $0x60] sm:$0xff]  ;;  %4615 = vst.msk [vmem:[#allocation5 + $0x114] sm:$0xf] %vm4591_vm9, %v4542_v20  ;;  %v10841_v49 = vpack.c.bf16 %v6872_v31, %v6872_v31  ;;  %v5055_v11 = vpop.permute.xlu0 %5054  ;;  %11018 = vmatpush3.bf16.msra.mxu0 %v11335_v37  ;;  %v11345_v31 = vld [vmem:[%s15073_s5 + $0x10] sm:$0xff]  }
 0x3e9   : > { %v10715_v61 = vpack.c.bf16 %v5910_v15, %v5910_v15  ;;  %4815 = vrot.lane.b32.xlu1 %v10642_v2, %s11482_s25  ;;  %5129 = vst.msk [vmem:[#allocation5 + $0x108] sm:$0xf] %vm5106_vm11, %v5055_v11  ;;  %11019 = vmatprep.subr.bf16.mxu0 %v11337_v23 }
 0x3ea   : > { %7032 = vst.msk [vmem:[#allocation5 + $0x4c] sm:$0xf] %vm6062_vm12, %v10841_v49  ;;  %6223 = vrot.lane.b32.xlu0 %v10739_v60, %s11478_s24  ;;  %v11346_v49 = vld [vmem:[%s15073_s5 + $0x48] sm:$0xff]  }
 0x3eb   : > { %v7831_v58 = vld [vmem:[#allocation4 + $0x62] sm:$0xff]  ;;  %v7832_v9 = vld [vmem:[#allocation4 + $0x6a] sm:$0xff]  ;;  %6071 = vst.msk [vmem:[#allocation5 + $0x60] sm:$0xf] %vm6062_vm12, %v10715_v61  ;;  %v4800_v54 = vpop.permute.xlu1 %4799 }
 0x3ec   : > { %v13747_v19 = vpack.c.bf16 %v7831_v58, %v7831_v58  ;;  %v13749_v26 = vpack.c.bf16 %v7832_v9, %v7832_v9  ;;  %4873 = vst.msk [vmem:[#allocation5 + $0x114] sm:$0xf] %vm4849_vm10, %v4800_v54  ;;  %v6873_v7 = vld [vmem:[#allocation4 + $0x69] sm:$0xff]  ;;  %v3516_v24 = vpop.permute.xlu0 %3515  ;;  %11020 = vmatpush3.bf16.msra.mxu0 %v11339_v42  ;;  %v7572_v54 = vld [vmem:[#allocation4 + $0x39] sm:$0xff] }
 0x3ed   : > { %v5911_v32 = vld [vmem:[#allocation4 + $0x68] sm:$0xff]  ;;  %5072 = vrot.lane.b32.xlu1 %v10674_v40, %s11483_s29  ;;  %v10842_v45 = vpack.c.bf16 %v6873_v7, %v6873_v7  ;;  %3588 = vst.msk [vmem:[#allocation5 + $0x120] sm:$0xf] %vm3563_vm4, %v3516_v24  ;;  %11021 = vmatprep.subr.bf16.mxu0 %v11340_v1  ;;  %v13829_v40 = vpack.c.bf16 %v7316_v30, %v7316_v30  ;;  %v7318_v1 = vld [vmem:[#allocation4 + $0x50] sm:$0xff]  ;;  %s9023_s29 = sshll.u32 %s324_s22, 4  ;;  %s15029_s29 = int_to_ptr.vmem [resolvable:$true] %s9023_s29 }
 0x3ee   : > { %7991 = vst.msk [vmem:[#allocation5 + $0x38] sm:$0xf] %vm6062_vm12, %v13747_v19  ;;  %7992 = vst.msk [vmem:[#allocation5 + $0x44] sm:$0xf] %vm6062_vm12, %v13749_v26  ;;  %v10716_v25 = vpack.c.bf16 %v5911_v32, %v5911_v32  ;;  %7186 = vrot.lane.b32.xlu0 %v13766_v29, %s11478_s24  ;;  %v13853_v32 = vpack.c.bf16 %v7572_v54, %v7572_v54  ;;  %s11404_s13 = scalar_lea.vmem %s15029_s29, 16  ;;  %p11411_p0 = scmp.lt.s32.totalorder %s15029_s29, %s11409_s16 }
 0x3ef   : > { %v5057_v46 = vpop.permute.xlu1 %5056  ;;  %7033 = vst.msk [vmem:[#allocation5 + $0x58] sm:$0xf] %vm6062_vm12, %v10842_v45  ;;  %p11405_p11 = scmp.ne.s32.totalorder %s15029_s29, %s11404_s13  ;;  %p11412_p1 = scmp.lt.s32.totalorder %s11410_s21, %s11404_s13 }
 0x3f0   : > { %6072 = vst.msk [vmem:[#allocation5 + $0x6c] sm:$0xf] %vm6062_vm12, %v10716_v25  ;;  %v3773_v8 = vpop.permute.xlu0 %3772  ;;  %v5353_v62 = vld [vmem:[#allocation5 + $0x108] sm:$0xff]  ;;  %11022 = vmatpush3.bf16.msra.mxu0 %v11342_v53 }
 0x3f1   : > { %5130 = vst.msk [vmem:[#allocation5 + $0x114] sm:$0xf] %vm5106_vm11, %v5057_v46  ;;  %6225 = vrot.lane.b32.xlu1 %v10740_v6, %s11478_s24  ;;  %11023 = vmatprep.subr.bf16.mxu0 %v11344_v35  ;;  %p11406_p12 = pnand %p11405_p11, %p11574_p5  ;;  %p11413_p2 = por %p11412_p1, %p11411_p0 }
 0x3f2   : > { %3845 = vst.msk [vmem:[#allocation5 + $0x120] sm:$0xf] %vm3820_vm6, %v3773_v8  ;;  %6480 = vrot.lane.b32.xlu0 %v10771_v14, %s11480_s28 }
 0x3f3   : > { %v3518_v22 = vpop.permute.xlu1 %3517  ;;  %p11407_p13 = pneg %p11406_p12 }
 0x3f4   : > { %3589 = vst.msk [vmem:[#allocation5 + $0x12c] sm:$0xf] %vm3563_vm4, %v3518_v22  ;;  %v4030_v56 = vpop.permute.xlu0 %4029  ;;  %11024 = vmatpush3.bf16.msra.mxu0 %v11345_v31 }
 0x3f5   : > { %7188 = vrot.lane.b32.xlu1 %v13794_v21, %s11478_s24  ;;  %4102 = vst.msk [vmem:[#allocation5 + $0x120] sm:$0xf] %vm4077_vm7, %v4030_v56  ;;  %11025 = vmatprep.subr.bf16.mxu0 %v11346_v49  ;;  %v7574_v49 = vld [vmem:[#allocation4 + $0x51] sm:$0xff]  ;;  %p11414_p3 = pnand %p11413_p2, %p11407_p13 }
 0x3f6   : > { %v5700_v48 = vpop.f32.mrf.mxu1  ;;  %7443 = vrot.lane.b32.xlu0 %v13800_v57, %s11480_s28 }
 0x3f7   : > { %v3775_v41 = vpop.permute.xlu1 %3774  ;;  %v5701_v34 = vadd.f32 %v13527_v16, %v5700_v48  ;;  %v7573_v48 = vld [vmem:[#allocation4 + $0x49] sm:$0xff] }
 0x3f8   : > { %v5354_v63 = vld [vmem:[#allocation5 + $0x114] sm:$0xff]  ;;  %3846 = vst.msk [vmem:[#allocation5 + $0x12c] sm:$0xf] %vm3820_vm6, %v3775_v41  ;;  %v5702_v51 = vpop.f32.mrf.mxu1  ;;  %v4287_v60 = vpop.permute.xlu0 %4286  ;;  %11026 = vmatpush3.bf16.msra.mxu0 %v11348_v17 }
 0x3f9   : > { %v9718_v2 = vcombine.low %v5353_v62, %v5354_v63  ;;  %v5803_v20 = vmax.f32 %v5701_v34, 0.0  ;;  %6482 = vrot.lane.b32.xlu1 %v10772_v28, %s11480_s28  ;;  %4359 = vst.msk [vmem:[#allocation5 + $0x120] sm:$0xf] %vm4334_vm8, %v4287_v60  ;;  %v13883_v28 = vpack.c.bf16 %v7317_v52, %v7317_v52  ;;  %v13895_v62 = vpack.c.bf16 %v7318_v1, %v7318_v1  ;;  %v11321_v51 = vld [vmem:[#allocation5 + $0x124] ss:$12 sps:$4 sm:$0xff]  }
 0x3fa   : > { %v5703_v15 = vpop.f32.mrf.mxu1  ;;  %6737 = vrot.lane.b32.xlu0 %v13556_v55, %s11482_s25  ;;  %v11350_v55 = vld [vmem:[%s15073_s5 + $0x40] sm:$0xff]  }
 0x3fb   : > { %5755 = vmatmul.mubr.bf16.gmra.mxu1 %v9718_v2  ;;  %5878 = vst.msk [vmem:[#allocation4 + $0x79] sm:$0xff] %vm5827_vm3, %v5803_v20  ;;  %v4032_v61 = vpop.permute.xlu1 %4031  ;;  %v5704_v11 = vadd.f32 %v13527_v16, %v5703_v15  ;;  %11027 = vmatprep.subr.bf16.mxu0 %v11350_v55  ;;  %v13901_v20 = vpack.c.bf16 %v7573_v48, %v7573_v48 }
 0x3fc   : > { %4103 = vst.msk [vmem:[#allocation5 + $0x12c] sm:$0xf] %vm4077_vm7, %v4032_v61  ;;  %v5705_v47 = vpop.f32.mrf.mxu1  ;;  %v4544_v9 = vpop.permute.xlu0 %4543  ;;  %11028 = vmatpush3.bf16.msra.mxu0 %v11351_v10  ;;  %9749 = vmatprep.mubr.msk.bf16.mxu1 %vm3071_vm5, %v11321_v51 }
 0x3fd   : > { %v5804_v58 = vmax.f32 %v5704_v11, 0.0  ;;  %7445 = vrot.lane.b32.xlu1 %v13829_v40, %s11480_s28  ;;  %4616 = vst.msk [vmem:[#allocation5 + $0x120] sm:$0xf] %vm4591_vm9, %v4544_v9  ;;  %11182 = vmatprep.subr.bf16.mxu0 %v13758_v27 }
 0x3fe   : > { %7699 = vrot.lane.b32.xlu0 %v13618_v4, %s11482_s25 }
 0x3ff   : > { %5879 = vst.msk [vmem:[#allocation4 + $0x81] sm:$0xff] %vm5827_vm3, %v5804_v58  ;;  %v4289_v5 = vpop.permute.xlu1 %4288 }
 0x400   : > { %4360 = vst.msk [vmem:[#allocation5 + $0x12c] sm:$0xf] %vm4334_vm8, %v4289_v5  ;;  %v4802_v6 = vpop.permute.xlu0 %4801 }
 0x401   : > { %6739 = vrot.lane.b32.xlu1 %v13571_v43, %s11482_s25  ;;  %4874 = vst.msk [vmem:[#allocation5 + $0x120] sm:$0xf] %vm4849_vm10, %v4802_v6  ;;  %v7319_v6 = vld [vmem:[#allocation4 + $0x60] sm:$0xff] }
 0x402   : > { %v6874_v59 = vld [vmem:[#allocation4 + $0x79] sm:$0xff]  ;;  %6227 = vrot.lane.b32.xlu0 %v13558_v33, %s11478_s24 }
 0x403   : > { %v4546_v7 = vpop.permute.xlu1 %4545  ;;  %v10843_v24 = vpack.c.bf16 %v6874_v59, %v6874_v59  ;;  %v5912_v37 = vld [vmem:[#allocation4 + $0x78] sm:$0xff] }
 0x404   : > { %4617 = vst.msk [vmem:[#allocation5 + $0x12c] sm:$0xf] %vm4591_vm9, %v4546_v7  ;;  %v10717_v45 = vpack.c.bf16 %v5912_v37, %v5912_v37  ;;  %v5059_v25 = vpop.permute.xlu0 %5058 }
 0x405   : > { %7701 = vrot.lane.b32.xlu1 %v13853_v32, %s11482_s25  ;;  %7034 = vst.msk [vmem:[#allocation5 + $0x64] sm:$0xf] %vm6062_vm12, %v10843_v24 }
 0x406   : > { %v7833_v43 = vld [vmem:[#allocation4 + $0x7a] sm:$0xff]  ;;  %v7834_v46 = vld [vmem:[#allocation4 + $0x82] sm:$0xff]  ;;  %5131 = vst.msk [vmem:[#allocation5 + $0x120] sm:$0xf] %vm5106_vm11, %v5059_v25  ;;  %7190 = vrot.lane.b32.xlu0 %v13626_v18, %s11478_s24 }
 0x407   : > { %6073 = vst.msk [vmem:[#allocation5 + $0x78] sm:$0xf] %vm6062_vm12, %v10717_v45  ;;  %v13862_v33 = vpack.c.bf16 %v7833_v43, %v7833_v43  ;;  %v13864_v14 = vpack.c.bf16 %v7834_v46, %v7834_v46  ;;  %v4804_v36 = vpop.permute.xlu1 %4803  ;;  %v6875_v23 = vld [vmem:[#allocation4 + $0x81] sm:$0xff]  ;;  %v13942_v43 = vpack.c.bf16 %v7319_v6, %v7319_v6 }
 0x408   : > { %v5913_v8 = vld [vmem:[#allocation4 + $0x80] sm:$0xff]  ;;  %4875 = vst.msk [vmem:[#allocation5 + $0x12c] sm:$0xf] %vm4849_vm10, %v4804_v36  ;;  %v10844_v42 = vpack.c.bf16 %v6875_v23, %v6875_v23  ;;  %v3520_v44 = vpop.permute.xlu0 %3519  ;;  %v7320_v36 = vld [vmem:[#allocation4 + $0x68] sm:$0xff] }
 0x409   : > { %v10718_v27 = vpack.c.bf16 %v5913_v8, %v5913_v8  ;;  %7993 = vst.msk [vmem:[#allocation5 + $0x50] sm:$0xf] %vm6062_vm12, %v13862_v33  ;;  %7994 = vst.msk [vmem:[#allocation5 + $0x5c] sm:$0xf] %vm6062_vm12, %v13864_v14  ;;  %6229 = vrot.lane.b32.xlu1 %v13575_v38, %s11478_s24  ;;  %v7575_v8 = vld [vmem:[#allocation4 + $0x61] sm:$0xff] }
 0x40a   : > { %3590 = vst.msk [vmem:[#allocation5 + $0x138] sm:$0xf] %vm3563_vm4, %v3520_v44  ;;  %6484 = vrot.lane.b32.xlu0 %v13766_v29, %s11480_s28  ;;  %v13960_v52 = vpack.c.bf16 %v7575_v8, %v7575_v8 }
 0x40b   : > { %7035 = vst.msk [vmem:[#allocation5 + $0x70] sm:$0xf] %vm6062_vm12, %v10844_v42  ;;  %6074 = vst.msk [vmem:[#allocation5 + $0x84] sm:$0xf] %vm6062_vm12, %v10718_v27  ;;  %v5061_v22 = vpop.permute.xlu1 %5060  ;;  %v13955_v27 = vpack.c.bf16 %v7320_v36, %v7320_v36 }
 0x40c   : > { %5132 = vst.msk [vmem:[#allocation5 + $0x12c] sm:$0xf] %vm5106_vm11, %v5061_v22  ;;  %v3777_v56 = vpop.permute.xlu0 %3776 }
 0x40d   : > { %7192 = vrot.lane.b32.xlu1 %v13628_v3, %s11478_s24  ;;  %3847 = vst.msk [vmem:[#allocation5 + $0x138] sm:$0xf] %vm3820_vm6, %v3777_v56  ;;  %v5355_v63 = vld [vmem:[#allocation5 + $0x120] sm:$0xff]  ;;  %v13966_v56 = vld [vmem:[%s15072_s4] ss:$0 sm:$0xff] }
 0x40e   : > { %7447 = vrot.lane.b32.xlu0 %v13883_v28, %s11480_s28 }
 0x40f   : > { %v3522_v38 = vpop.permute.xlu1 %3521 }
 0x410   : > { %3591 = vst.msk [vmem:[#allocation5 + $0x144] sm:$0xf] %vm3563_vm4, %v3522_v38  ;;  %v4034_v53 = vpop.permute.xlu0 %4033 }
 0x411   : > { %6486 = vrot.lane.b32.xlu1 %v13794_v21, %s11480_s28  ;;  %4104 = vst.msk [vmem:[#allocation5 + $0x138] sm:$0xf] %vm4077_vm7, %v4034_v53  ;;  %v11323_v53 = vld [vmem:[#allocation5 + $0x13c] ss:$12 sps:$4 sm:$0xff]  }
 0x412   : > { %6741 = vrot.lane.b32.xlu0 %v13800_v57, %s11482_s25 }
 0x413   : > { %v3779_v41 = vpop.permute.xlu1 %3778  ;;  %v5356_v39 = vld [vmem:[#allocation5 + $0x12c] sm:$0xff] }
 0x414   : > { %v5708_v29 = vpop.f32.mrf.mxu1  ;;  %3848 = vst.msk [vmem:[#allocation5 + $0x144] sm:$0xf] %vm3820_vm6, %v3779_v41  ;;  %v9720_v30 = vcombine.low %v5355_v63, %v5356_v39  ;;  %v4291_v35 = vpop.permute.xlu0 %4290  ;;  %v7576_v41 = vld [vmem:[#allocation4 + $0x69] sm:$0xff] }
 0x415   : > { %v5709_v34 = vadd.f32 %v13527_v16, %v5708_v29  ;;  %7449 = vrot.lane.b32.xlu1 %v13895_v62, %s11480_s28  ;;  %4361 = vst.msk [vmem:[#allocation5 + $0x138] sm:$0xf] %vm4334_vm8, %v4291_v35 }
 0x416   : > { %v5710_v2 = vpop.f32.mrf.mxu1  ;;  %5763 = vmatmul.mubr.bf16.gmra.mxu1 %v9720_v30  ;;  %7703 = vrot.lane.b32.xlu0 %v13901_v20, %s11482_s25  ;;  %v13980_v30 = vpack.c.bf16 %v7576_v41, %v7576_v41 }
 0x417   : > { %v5805_v21 = vmax.f32 %v5709_v34, 0.0  ;;  %v4036_v60 = vpop.permute.xlu1 %4035  ;;  %9750 = vmatprep.mubr.msk.bf16.mxu1 %vm3071_vm5, %v11323_v53 }
 0x418   : > { %v5711_v57 = vpop.f32.mrf.mxu1  ;;  %4105 = vst.msk [vmem:[#allocation5 + $0x144] sm:$0xf] %vm4077_vm7, %v4036_v60  ;;  %v4548_v11 = vpop.permute.xlu0 %4547  ;;  %v7321_v60 = vld [vmem:[#allocation4 + $0x78] sm:$0xff] }
 0x419   : > { %5880 = vst.msk [vmem:[#allocation4 + $0x91] sm:$0xff] %vm5827_vm3, %v5805_v21  ;;  %v5712_v31 = vadd.f32 %v13527_v16, %v5711_v57  ;;  %6743 = vrot.lane.b32.xlu1 %v13829_v40, %s11482_s25  ;;  %v13915_v16 = vpack.c.bf16 %v7574_v49, %v7574_v49 }
 0x41a   : > { %v5713_v15 = vpop.f32.mrf.mxu1  ;;  %4618 = vst.msk [vmem:[#allocation5 + $0x138] sm:$0xf] %vm4591_vm9, %v4548_v11  ;;  %6231 = vrot.lane.b32.xlu0 %v13618_v4, %s11478_s24 }
 0x41b   : > { %v5806_v61 = vmax.f32 %v5712_v31, 0.0  ;;  %v4293_v47 = vpop.permute.xlu1 %4292 }
 0x41c   : > { %4362 = vst.msk [vmem:[#allocation5 + $0x144] sm:$0xf] %vm4334_vm8, %v4293_v47  ;;  %v4806_v17 = vpop.permute.xlu0 %4805 }
 0x41d   : > { %5881 = vst.msk [vmem:[#allocation4 + $0x99] sm:$0xff] %vm5827_vm3, %v5806_v61  ;;  %7705 = vrot.lane.b32.xlu1 %v13915_v16, %s11482_s25 }
 0x41e   : > { %4876 = vst.msk [vmem:[#allocation5 + $0x138] sm:$0xf] %vm4849_vm10, %v4806_v17  ;;  %7194 = vrot.lane.b32.xlu0 %v13682_v12, %s11478_s24  ;;  %v14000_v17 = vpack.c.bf16 %v7321_v60, %v7321_v60 }
 0x41f   : > { %v4550_v40 = vpop.permute.xlu1 %4549 }
 0x420   : > { %v6876_v58 = vld [vmem:[#allocation4 + $0x91] sm:$0xff]  ;;  %4619 = vst.msk [vmem:[#allocation5 + $0x144] sm:$0xf] %vm4591_vm9, %v4550_v40  ;;  %v5063_v5 = vpop.permute.xlu0 %5062 }
 0x421   : > { %v10845_v9 = vpack.c.bf16 %v6876_v58, %v6876_v58  ;;  %v5914_v55 = vld [vmem:[#allocation4 + $0x90] sm:$0xff]  ;;  %6233 = vrot.lane.b32.xlu1 %v13853_v32, %s11478_s24  ;;  %5133 = vst.msk [vmem:[#allocation5 + $0x138] sm:$0xf] %vm5106_vm11, %v5063_v5  ;;  %v7322_v5 = vld [vmem:[#allocation4 + $0x80] sm:$0xff] }
 0x422   : > { %v10719_v4 = vpack.c.bf16 %v5914_v55, %v5914_v55  ;;  %6488 = vrot.lane.b32.xlu0 %v13626_v18, %s11480_s28 }
 0x423   : > { %7036 = vst.msk [vmem:[#allocation5 + $0x7c] sm:$0xf] %vm6062_vm12, %v10845_v9  ;;  %v4808_v24 = vpop.permute.xlu1 %4807 }
 0x424   : > { %v7835_v54 = vld [vmem:[#allocation4 + $0x92] sm:$0xff]  ;;  %v7836_v10 = vld [vmem:[#allocation4 + $0x9a] sm:$0xff]  ;;  %6075 = vst.msk [vmem:[#allocation5 + $0x90] sm:$0xf] %vm6062_vm12, %v10719_v4  ;;  %v3524_v25 = vpop.permute.xlu0 %3523 }
 0x425   : > { %v13929_v59 = vpack.c.bf16 %v7835_v54, %v7835_v54  ;;  %v13931_v7 = vpack.c.bf16 %v7836_v10, %v7836_v10  ;;  %v6877_v37 = vld [vmem:[#allocation4 + $0x99] sm:$0xff]  ;;  %4877 = vst.msk [vmem:[#allocation5 + $0x144] sm:$0xf] %vm4849_vm10, %v4808_v24  ;;  %7196 = vrot.lane.b32.xlu1 %v13684_v13, %s11478_s24 }
 0x426   : > { %v10846_v32 = vpack.c.bf16 %v6877_v37, %v6877_v37  ;;  %v5915_v45 = vld [vmem:[#allocation4 + $0x98] sm:$0xff]  ;;  %3592 = vst.msk [vmem:[#allocation5 + $0x150] sm:$0xf] %vm3563_vm4, %v3524_v25  ;;  %7451 = vrot.lane.b32.xlu0 %v13942_v43, %s11480_s28 }
 0x427   : > { %7995 = vst.msk [vmem:[#allocation5 + $0x68] sm:$0xf] %vm6062_vm12, %v13929_v59  ;;  %7996 = vst.msk [vmem:[#allocation5 + $0x74] sm:$0xf] %vm6062_vm12, %v13931_v7  ;;  %v10720_v46 = vpack.c.bf16 %v5915_v45, %v5915_v45  ;;  %v5065_v18 = vpop.permute.xlu1 %5064  ;;  %v7577_v24 = vld [vmem:[#allocation4 + $0x79] sm:$0xff] }
 0x428   : > { %7037 = vst.msk [vmem:[#allocation5 + $0x88] sm:$0xf] %vm6062_vm12, %v10846_v32  ;;  %v3781_v23 = vpop.permute.xlu0 %3780  ;;  %v5357_v38 = vld [vmem:[#allocation5 + $0x138] sm:$0xff]  ;;  %v14027_v32 = vpack.c.bf16 %v7322_v5, %v7322_v5  ;;  %v7580_v5 = vld [vmem:[#allocation4 + $0x99] sm:$0xff] }
 0x429   : > { %6076 = vst.msk [vmem:[#allocation5 + $0x9c] sm:$0xf] %vm6062_vm12, %v10720_v46  ;;  %6490 = vrot.lane.b32.xlu1 %v13628_v3, %s11480_s28  ;;  %v7578_v46 = vld [vmem:[#allocation4 + $0x81] sm:$0xff] }
 0x42a   : > { %5134 = vst.msk [vmem:[#allocation5 + $0x144] sm:$0xf] %vm5106_vm11, %v5065_v18  ;;  %6745 = vrot.lane.b32.xlu0 %v13883_v28, %s11482_s25  ;;  %v14044_v8 = vpack.c.bf16 %v7578_v46, %v7578_v46 }
 0x42b   : > { %3849 = vst.msk [vmem:[#allocation5 + $0x150] sm:$0xf] %vm3820_vm6, %v3781_v23  ;;  %v3526_v42 = vpop.permute.xlu1 %3525 }
 0x42c   : > { %3593 = vst.msk [vmem:[#allocation5 + $0x15c] sm:$0xf] %vm3563_vm4, %v3526_v42  ;;  %v4038_v44 = vpop.permute.xlu0 %4037 }
 0x42d   : > { %7453 = vrot.lane.b32.xlu1 %v13955_v27, %s11480_s28  ;;  %4106 = vst.msk [vmem:[#allocation5 + $0x150] sm:$0xf] %vm4077_vm7, %v4038_v44 }
 0x42e   : > { %v5716_v3 = vpop.f32.mrf.mxu1  ;;  %7707 = vrot.lane.b32.xlu0 %v13960_v52, %s11482_s25 }
 0x42f   : > { %v3783_v22 = vpop.permute.xlu1 %3782  ;;  %v5717_v28 = vadd.f32 %v13966_v56, %v5716_v3  ;;  %v11325_v3 = vld [vmem:[#allocation5 + $0x154] ss:$12 sps:$4 sm:$0xff]  }
 0x430   : > { %3850 = vst.msk [vmem:[#allocation5 + $0x15c] sm:$0xf] %vm3820_vm6, %v3783_v22  ;;  %v5718_v29 = vpop.f32.mrf.mxu1  ;;  %v4295_v63 = vpop.permute.xlu0 %4294 }
 0x431   : > { %v5358_v1 = vld [vmem:[#allocation5 + $0x144] sm:$0xff]  ;;  %v5807_v34 = vmax.f32 %v5717_v28, 0.0  ;;  %6747 = vrot.lane.b32.xlu1 %v13895_v62, %s11482_s25  ;;  %4363 = vst.msk [vmem:[#allocation5 + $0x150] sm:$0xf] %vm4334_vm8, %v4295_v63 }
 0x432   : > { %v9722_v48 = vcombine.low %v5357_v38, %v5358_v1  ;;  %v5719_v39 = vpop.f32.mrf.mxu1  ;;  %6235 = vrot.lane.b32.xlu0 %v13901_v20, %s11478_s24 }
 0x433   : > { %5882 = vst.msk [vmem:[#allocation4 + $0xa9] sm:$0xff] %vm5827_vm3, %v5807_v34  ;;  %v4040_v51 = vpop.permute.xlu1 %4039  ;;  %v5720_v2 = vadd.f32 %v13966_v56, %v5719_v39  ;;  %v7323_v34 = vld [vmem:[#allocation4 + $0x90] sm:$0xff] }
 0x434   : > { %5771 = vmatmul.mubr.bf16.gmra.mxu1 %v9722_v48  ;;  %4107 = vst.msk [vmem:[#allocation5 + $0x15c] sm:$0xf] %vm4077_vm7, %v4040_v51  ;;  %v5721_v21 = vpop.f32.mrf.mxu1  ;;  %v4552_v35 = vpop.permute.xlu0 %4551  ;;  %v14065_v51 = vpack.c.bf16 %v7323_v34, %v7323_v34 }
 0x435   : > { %v5808_v62 = vmax.f32 %v5720_v2, 0.0  ;;  %7709 = vrot.lane.b32.xlu1 %v13980_v30, %s11482_s25  ;;  %4620 = vst.msk [vmem:[#allocation5 + $0x150] sm:$0xf] %vm4591_vm9, %v4552_v35  ;;  %9751 = vmatprep.mubr.msk.bf16.mxu1 %vm3071_vm5, %v11325_v3 }
 0x436   : > { %7198 = vrot.lane.b32.xlu0 %v13747_v19, %s11478_s24 }
 0x437   : > { %5883 = vst.msk [vmem:[#allocation4 + $0xb1] sm:$0xff] %vm5827_vm3, %v5808_v62  ;;  %v4297_v57 = vpop.permute.xlu1 %4296 }
 0x438   : > { %4364 = vst.msk [vmem:[#allocation5 + $0x15c] sm:$0xf] %vm4334_vm8, %v4297_v57  ;;  %v4810_v20 = vpop.permute.xlu0 %4809 }
 0x439   : > { %6237 = vrot.lane.b32.xlu1 %v13915_v16, %s11478_s24  ;;  %4878 = vst.msk [vmem:[#allocation5 + $0x150] sm:$0xf] %vm4849_vm10, %v4810_v20 }
 0x43a   : > { %v7581_v31 = vld [vmem:[#allocation4 + $0xa9] sm:$0xff]  ;;  %6492 = vrot.lane.b32.xlu0 %v13682_v12, %s11480_s28 }
 0x43b   : > { %v5916_v15 = vld [vmem:[#allocation4 + $0xa8] sm:$0xff]  ;;  %v4554_v49 = vpop.permute.xlu1 %4553  ;;  %v13995_v61 = vpack.c.bf16 %v7581_v31, %v7581_v31  ;;  %v7579_v31 = vld [vmem:[#allocation4 + $0x91] sm:$0xff] }
 0x43c   : > { %v10721_v11 = vpack.c.bf16 %v5916_v15, %v5916_v15  ;;  %4621 = vst.msk [vmem:[#allocation5 + $0x15c] sm:$0xf] %vm4591_vm9, %v4554_v49  ;;  %v5067_v47 = vpop.permute.xlu0 %5066 }
 0x43d   : > { %7200 = vrot.lane.b32.xlu1 %v13749_v26, %s11478_s24  ;;  %7038 = vst.msk [vmem:[#allocation5 + $0x94] sm:$0xf] %vm6062_vm12, %v13995_v61 }
 0x43e   : > { %6077 = vst.msk [vmem:[#allocation5 + $0xa8] sm:$0xf] %vm6062_vm12, %v10721_v11  ;;  %v7837_v16 = vld [vmem:[#allocation4 + $0xaa] sm:$0xff]  ;;  %v7838_v58 = vld [vmem:[#allocation4 + $0xb2] sm:$0xff]  ;;  %7455 = vrot.lane.b32.xlu0 %v14000_v17, %s11480_s28 }
 0x43f   : > { %5135 = vst.msk [vmem:[#allocation5 + $0x150] sm:$0xf] %vm5106_vm11, %v5067_v47  ;;  %v14006_v12 = vpack.c.bf16 %v7837_v16, %v7837_v16  ;;  %v14008_v40 = vpack.c.bf16 %v7838_v58, %v7838_v58  ;;  %v4812_v9 = vpop.permute.xlu1 %4811  ;;  %v7582_v55 = vld [vmem:[#allocation4 + $0xb1] sm:$0xff] }
 0x440   : > { %v5917_v4 = vld [vmem:[#allocation4 + $0xb0] sm:$0xff]  ;;  %4879 = vst.msk [vmem:[#allocation5 + $0x15c] sm:$0xf] %vm4849_vm10, %v4812_v9  ;;  %v14013_v54 = vpack.c.bf16 %v7582_v55, %v7582_v55  ;;  %v3528_v6 = vpop.permute.xlu0 %3527 }
 0x441   : > { %v10722_v10 = vpack.c.bf16 %v5917_v4, %v5917_v4  ;;  %7997 = vst.msk [vmem:[#allocation5 + $0x80] sm:$0xf] %vm6062_vm12, %v14006_v12  ;;  %7998 = vst.msk [vmem:[#allocation5 + $0x8c] sm:$0xf] %vm6062_vm12, %v14008_v40  ;;  %6494 = vrot.lane.b32.xlu1 %v13684_v13, %s11480_s28  ;;  %v14032_v13 = vpack.c.bf16 %v7577_v24, %v7577_v24  ;;  %v14110_v24 = vpack.c.bf16 %v7580_v5, %v7580_v5 }
 0x442   : > { %3594 = vst.msk [vmem:[#allocation5 + $0x168] sm:$0xf] %vm3563_vm4, %v3528_v6  ;;  %6749 = vrot.lane.b32.xlu0 %v13942_v43, %s11482_s25 }
 0x443   : > { %7039 = vst.msk [vmem:[#allocation5 + $0xa0] sm:$0xf] %vm6062_vm12, %v14013_v54  ;;  %6078 = vst.msk [vmem:[#allocation5 + $0xb4] sm:$0xf] %vm6062_vm12, %v10722_v10  ;;  %v5069_v37 = vpop.permute.xlu1 %5068 }
 0x444   : > { %5136 = vst.msk [vmem:[#allocation5 + $0x15c] sm:$0xf] %vm5106_vm11, %v5069_v37  ;;  %v3785_v45 = vpop.permute.xlu0 %3784 }
 0x445   : > { %7457 = vrot.lane.b32.xlu1 %v14027_v32, %s11480_s28  ;;  %3851 = vst.msk [vmem:[#allocation5 + $0x168] sm:$0xf] %vm3820_vm6, %v3785_v45 }
 0x446   : > { %7711 = vrot.lane.b32.xlu0 %v14032_v13, %s11482_s25  ;;  %v5359_v42 = vld [vmem:[#allocation5 + $0x150] sm:$0xff] }
 0x447   : > { %v3530_v25 = vpop.permute.xlu1 %3529 }
 0x448   : > { %3595 = vst.msk [vmem:[#allocation5 + $0x174] sm:$0xf] %vm3563_vm4, %v3530_v25  ;;  %v4042_v43 = vpop.permute.xlu0 %4041 }
 0x449   : > { %6751 = vrot.lane.b32.xlu1 %v13955_v27, %s11482_s25  ;;  %4108 = vst.msk [vmem:[#allocation5 + $0x168] sm:$0xf] %vm4077_vm7, %v4042_v43  ;;  %v11331_v43 = vld [vmem:[#allocation5 + $0x16c] ss:$12 sps:$4 sm:$0xff]  }
 0x44a   : > { %6239 = vrot.lane.b32.xlu0 %v13960_v52, %s11478_s24 }
 0x44b   : > { %v5724_v18 = vpop.f32.mrf.mxu1  ;;  %v3787_v36 = vpop.permute.xlu1 %3786  ;;  %v5360_v44 = vld [vmem:[#allocation5 + $0x15c] sm:$0xff] }
 0x44c   : > { %v5725_v23 = vadd.f32 %v13966_v56, %v5724_v18  ;;  %3852 = vst.msk [vmem:[#allocation5 + $0x174] sm:$0xf] %vm3820_vm6, %v3787_v36  ;;  %v9724_v28 = vcombine.low %v5359_v42, %v5360_v44  ;;  %v4299_v27 = vpop.permute.xlu0 %4298  ;;  %v11336_v44 = vld [vmem:[#allocation5 + $0x38] ss:$12 sps:$4 sm:$0xff]  }
 0x44d   : > { %v5726_v22 = vpop.f32.mrf.mxu1  ;;  %7713 = vrot.lane.b32.xlu1 %v14044_v8, %s11482_s25  ;;  %4365 = vst.msk [vmem:[#allocation5 + $0x168] sm:$0xf] %vm4334_vm8, %v4299_v27 }
 0x44e   : > { %v5809_v38 = vmax.f32 %v5725_v23, 0.0  ;;  %5779 = vmatmul.mubr.bf16.gmra.mxu1 %v9724_v28  ;;  %7202 = vrot.lane.b32.xlu0 %v13862_v33, %s11478_s24  ;;  %v7325_v22 = vld [vmem:[#allocation4 + $0xa8] sm:$0xff] }
 0x44f   : > { %v5727_v1 = vpop.f32.mrf.mxu1  ;;  %v4044_v52 = vpop.permute.xlu1 %4043  ;;  %9752 = vmatprep.mubr.msk.bf16.mxu1 %vm3071_vm5, %v11331_v43  ;;  %vm11484_vm5 = vmmov 0  }
 0x450   : > { %5884 = vst.msk [vmem:[#allocation4 + $0xc1] sm:$0xff] %vm5827_vm3, %v5809_v38  ;;  %v5728_v53 = vadd.f32 %v13966_v56, %v5727_v1  ;;  %v4556_v41 = vpop.permute.xlu0 %4555 }
 0x451   : > { %4109 = vst.msk [vmem:[#allocation5 + $0x174] sm:$0xf] %vm4077_vm7, %v4044_v52  ;;  %v5729_v29 = vpop.f32.mrf.mxu1  ;;  %6241 = vrot.lane.b32.xlu1 %v13980_v30, %s11478_s24  ;;  %v14132_v52 = vpack.c.bf16 %v7325_v22, %v7325_v22 }
 0x452   : > { %v5810_v48 = vmax.f32 %v5728_v53, 0.0  ;;  %4622 = vst.msk [vmem:[#allocation5 + $0x168] sm:$0xf] %vm4591_vm9, %v4556_v41  ;;  %6496 = vrot.lane.b32.xlu0 %v13747_v19, %s11480_s28  ;;  %v7324_v19 = vld [vmem:[#allocation4 + $0x98] sm:$0xff]  ;;  %v7326_v29 = vld [vmem:[#allocation4 + $0xb0] sm:$0xff] }
 0x453   : > { %v4301_v63 = vpop.permute.xlu1 %4300  ;;  %v14085_v47 = vpack.c.bf16 %v7324_v19, %v7324_v19  ;;  %v11343_v41 = vld [vmem:[#allocation5 + $0x68] ss:$12 sps:$4 sm:$0xff]  }
 0x454   : > { %5885 = vst.msk [vmem:[#allocation4 + $0xc9] sm:$0xff] %vm5827_vm3, %v5810_v48  ;;  %v4814_v39 = vpop.permute.xlu0 %4813 }
 0x455   : > { %4366 = vst.msk [vmem:[#allocation5 + $0x174] sm:$0xf] %vm4334_vm8, %v4301_v63  ;;  %7204 = vrot.lane.b32.xlu1 %v13864_v14, %s11478_s24 }
 0x456   : > { %4880 = vst.msk [vmem:[#allocation5 + $0x168] sm:$0xf] %vm4849_vm10, %v4814_v39  ;;  %7459 = vrot.lane.b32.xlu0 %v14065_v51, %s11480_s28  ;;  %v14146_v39 = vpack.c.bf16 %v7326_v29, %v7326_v29 }
 0x457   : > { %v7583_v2 = vld [vmem:[#allocation4 + $0xc1] sm:$0xff]  ;;  %v4558_v21 = vpop.permute.xlu1 %4557 }
 0x458   : > { %v5918_v30 = vld [vmem:[#allocation4 + $0xc0] sm:$0xff]  ;;  %v14070_v62 = vpack.c.bf16 %v7583_v2, %v7583_v2  ;;  %4623 = vst.msk [vmem:[#allocation5 + $0x174] sm:$0xf] %vm4591_vm9, %v4558_v21  ;;  %v5071_v57 = vpop.permute.xlu0 %5070 }
 0x459   : > { %v10723_v35 = vpack.c.bf16 %v5918_v30, %v5918_v30  ;;  %6498 = vrot.lane.b32.xlu1 %v13749_v26, %s11480_s28  ;;  %5137 = vst.msk [vmem:[#allocation5 + $0x168] sm:$0xf] %vm5106_vm11, %v5071_v57 }
 0x45a   : > { %7040 = vst.msk [vmem:[#allocation5 + $0xac] sm:$0xf] %vm6062_vm12, %v14070_v62  ;;  %6753 = vrot.lane.b32.xlu0 %v14000_v17, %s11482_s25  ;;  %v14096_v17 = vpack.c.bf16 %v7579_v31, %v7579_v31  ;;  %v11347_v31 = vld [vmem:[#allocation5 + $0x80] ss:$12 sps:$4 sm:$0xff]  }
 0x45b   : > { %6079 = vst.msk [vmem:[#allocation5 + $0xc0] sm:$0xf] %vm6062_vm12, %v10723_v35  ;;  %v7839_v20 = vld [vmem:[#allocation4 + $0xc2] sm:$0xff]  ;;  %v7840_v60 = vld [vmem:[#allocation4 + $0xca] sm:$0xff]  ;;  %v4816_v11 = vpop.permute.xlu1 %4815 }
 0x45c   : > { %v14079_v15 = vpack.c.bf16 %v7839_v20, %v7839_v20  ;;  %v14081_v49 = vpack.c.bf16 %v7840_v60, %v7840_v60  ;;  %v7584_v26 = vld [vmem:[#allocation4 + $0xc9] sm:$0xff]  ;;  %4881 = vst.msk [vmem:[#allocation5 + $0x174] sm:$0xf] %vm4849_vm10, %v4816_v11  ;;  %v6224_v55 = vpop.permute.xlu0 %6223 }
 0x45d   : > { %v5919_v16 = vld [vmem:[#allocation4 + $0xc8] sm:$0xff]  ;;  %v14088_v58 = vpack.c.bf16 %v7584_v26, %v7584_v26  ;;  %7461 = vrot.lane.b32.xlu1 %v14085_v47, %s11480_s28  ;;  %6320 = vst.msk [vmem:[#allocation5] sm:$0xf] %vm6319_vm15, %v6224_v55 }
 0x45e   : > { %v10724_v9 = vpack.c.bf16 %v5919_v16, %v5919_v16  ;;  %7999 = vst.msk [vmem:[#allocation5 + $0x98] sm:$0xf] %vm6062_vm12, %v14079_v15  ;;  %8000 = vst.msk [vmem:[#allocation5 + $0xa4] sm:$0xf] %vm6062_vm12, %v14081_v49  ;;  %7715 = vrot.lane.b32.xlu0 %v14096_v17, %s11482_s25  ;;  %v7328_v22 = vld [vmem:[#allocation4 + $0xc8] sm:$0xff] }
 0x45f   : > { %7041 = vst.msk [vmem:[#allocation5 + $0xb8] sm:$0xf] %vm6062_vm12, %v14088_v58  ;;  %v5073_v4 = vpop.permute.xlu1 %5072 }
 0x460   : > { %6080 = vst.msk [vmem:[#allocation5 + $0xcc] sm:$0xf] %vm6062_vm12, %v10724_v9  ;;  %v7187_v10 = vpop.permute.xlu0 %7186  ;;  %v5361_v45 = vld [vmem:[#allocation5 + $0x168] sm:$0xff] }
 0x461   : > { %5138 = vst.msk [vmem:[#allocation5 + $0x174] sm:$0xf] %vm5106_vm11, %v5073_v4  ;;  %6755 = vrot.lane.b32.xlu1 %v14027_v32, %s11482_s25 }
 0x462   : > { %7282 = vst.msk [vmem:[#allocation5 + $0x4] sm:$0xf] %vm6319_vm15, %v7187_v10  ;;  %6243 = vrot.lane.b32.xlu0 %v14032_v13, %s11478_s24 }
 0x463   : > { %v6226_v6 = vpop.permute.xlu1 %6225 }
 0x464   : > { %6321 = vst.msk [vmem:[#allocation5 + $0xc] sm:$0xf] %vm6319_vm15, %v6226_v6  ;;  %v6481_v37 = vpop.permute.xlu0 %6480 }
 0x465   : > { %7717 = vrot.lane.b32.xlu1 %v14110_v24, %s11482_s25  ;;  %6577 = vst.msk [vmem:[#allocation5] sm:$0xf] %vm6576_vm1, %v6481_v37  ;;  %v11349_v9 = vld [vmem:[#allocation5 + $0x98] ss:$12 sps:$4 sm:$0xff]  }
 0x466   : > { %v5732_v25 = vpop.f32.mrf.mxu1  ;;  %7206 = vrot.lane.b32.xlu0 %v13929_v59, %s11478_s24 }
 0x467   : > { %v7189_v32 = vpop.permute.xlu1 %7188  ;;  %v5733_v46 = vadd.f32 %v13966_v56, %v5732_v25 }
 0x468   : > { %v5362_v13 = vld [vmem:[#allocation5 + $0x174] sm:$0xff]  ;;  %7283 = vst.msk [vmem:[#allocation5 + $0x10] sm:$0xf] %vm6319_vm15, %v7189_v32  ;;  %v5734_v18 = vpop.f32.mrf.mxu1  ;;  %v7444_v42 = vpop.permute.xlu0 %7443 }
 0x469   : > { %v9726_v36 = vcombine.low %v5361_v45, %v5362_v13  ;;  %v5811_v23 = vmax.f32 %v5733_v46, 0.0  ;;  %6245 = vrot.lane.b32.xlu1 %v14044_v8, %s11478_s24  ;;  %7539 = vst.msk [vmem:[#allocation5 + $0x4] sm:$0xf] %vm6576_vm1, %v7444_v42  ;;  %v7327_v45 = vld [vmem:[#allocation4 + $0xc0] sm:$0xff]  ;;  %v11402_v46 = vld [vmem:[%s15073_s5 + $0x88] sm:$0xff]  }
 0x46a   : > { %v5735_v3 = vpop.f32.mrf.mxu1  ;;  %6500 = vrot.lane.b32.xlu0 %v13862_v33, %s11480_s28  ;;  %v11341_v33 = vld [vmem:[#allocation5 + $0x50] ss:$12 sps:$4 sm:$0xff]  }
 0x46b   : > { %5787 = vmatmul.mubr.bf16.gmra.mxu1 %v9726_v36  ;;  %5886 = vst.msk [vmem:[#allocation4 + $0xd9] sm:$0xff] %vm5827_vm3, %v5811_v23  ;;  %v6483_v28 = vpop.permute.xlu1 %6482  ;;  %v5736_v38 = vadd.f32 %v13966_v56, %v5735_v3  ;;  %v6365_v13 = vld [vmem:[#allocation4 + $0x9a] sm:$0xff]  ;;  %v14201_v36 = vpack.c.bf16 %v7327_v45, %v7327_v45 }
 0x46c   : > { %11190 = vmatprep.mubr.msk.bf16.mxu1 %vm5827_vm3, %v11336_v44  ;;  %6578 = vst.msk [vmem:[#allocation5 + $0xc] sm:$0xf] %vm6576_vm1, %v6483_v28  ;;  %v5737_v8 = vpop.f32.mrf.mxu1  ;;  %v6738_v1 = vpop.permute.xlu0 %6737  ;;  %v10784_v44 = vpack.c.bf16 %v6365_v13, %v6365_v13 }
 0x46d   : > { %v5812_v27 = vmax.f32 %v5736_v38, 0.0  ;;  %7208 = vrot.lane.b32.xlu1 %v13931_v7, %s11478_s24  ;;  %6834 = vst.msk [vmem:[#allocation5] sm:$0xf] %vm6833_vm2, %v6738_v1 }
 0x46e   : > { %7463 = vrot.lane.b32.xlu0 %v14132_v52, %s11480_s28 }
 0x46f   : > { %5887 = vst.msk [vmem:[#allocation4 + $0xe1] sm:$0xff] %vm5827_vm3, %v5812_v27  ;;  %v7446_v53 = vpop.permute.xlu1 %7445  ;;  %v14216_v27 = vpack.c.bf16 %v7328_v22, %v7328_v22 }
 0x470   : > { %7540 = vst.msk [vmem:[#allocation5 + $0x10] sm:$0xf] %vm6576_vm1, %v7446_v53  ;;  %v7700_v48 = vpop.permute.xlu0 %7699 }
 0x471   : > { %6502 = vrot.lane.b32.xlu1 %v13864_v14, %s11480_s28  ;;  %7795 = vst.msk [vmem:[#allocation5 + $0x4] sm:$0xf] %vm6833_vm2, %v7700_v48 }
 0x472   : > { %v7585_v7 = vld [vmem:[#allocation4 + $0xd9] sm:$0xff]  ;;  %6757 = vrot.lane.b32.xlu0 %v14065_v51, %s11482_s25 }
 0x473   : > { %11191 = vmatmul.mubr.msk.bf16.vlgmr.msra.gmra.mxu1 %vm5827_vm3, %v11341_v33  ;;  %v5920_v34 = vld [vmem:[#allocation4 + $0xd8] sm:$0xff]  ;;  %v6740_v63 = vpop.permute.xlu1 %6739  ;;  %v14148_v2 = vpack.c.bf16 %v7585_v7, %v7585_v7 }
 0x474   : > { %11194 = vmatprep.mubr.msk.bf16.mxu1 %vm5827_vm3, %v11343_v41  ;;  %v10725_v30 = vpack.c.bf16 %v5920_v34, %v5920_v34  ;;  %6835 = vst.msk [vmem:[#allocation5 + $0xc] sm:$0xf] %vm6833_vm2, %v6740_v63  ;;  %v6228_v14 = vpop.permute.xlu0 %6227 }
 0x475   : > { %7465 = vrot.lane.b32.xlu1 %v14146_v39, %s11480_s28  ;;  %7042 = vst.msk [vmem:[#allocation5 + $0xc4] sm:$0xf] %vm6062_vm12, %v14148_v2 }
 0x476   : > { %6081 = vst.msk [vmem:[#allocation5 + $0xd8] sm:$0xf] %vm6062_vm12, %v10725_v30  ;;  %v7841_v21 = vld [vmem:[#allocation4 + $0xda] sm:$0xff]  ;;  %v7842_v51 = vld [vmem:[#allocation4 + $0xe2] sm:$0xff]  ;;  %7719 = vrot.lane.b32.xlu0 %v13995_v61, %s11482_s25 }
 0x477   : > { %6322 = vst.msk [vmem:[#allocation5 + $0x18] sm:$0xf] %vm6319_vm15, %v6228_v14  ;;  %v14157_v35 = vpack.c.bf16 %v7841_v21, %v7841_v21  ;;  %v14159_v19 = vpack.c.bf16 %v7842_v51, %v7842_v51  ;;  %v7702_v57 = vpop.permute.xlu1 %7701  ;;  %v7586_v20 = vld [vmem:[#allocation4 + $0xe1] sm:$0xff] }
 0x478   : > { %v5921_v60 = vld [vmem:[#allocation4 + $0xe0] sm:$0xff]  ;;  %7796 = vst.msk [vmem:[#allocation5 + $0x10] sm:$0xf] %vm6833_vm2, %v7702_v57  ;;  %v14164_v11 = vpack.c.bf16 %v7586_v20, %v7586_v20  ;;  %v7191_v16 = vpop.permute.xlu0 %7190 }
 0x479   : > { %v10726_v26 = vpack.c.bf16 %v5921_v60, %v5921_v60  ;;  %8001 = vst.msk [vmem:[#allocation5 + $0xb0] sm:$0xf] %vm6062_vm12, %v14157_v35  ;;  %8002 = vst.msk [vmem:[#allocation5 + $0xbc] sm:$0xf] %vm6062_vm12, %v14159_v19  ;;  %6759 = vrot.lane.b32.xlu1 %v14085_v47, %s11482_s25 }
 0x47a   : > { %7284 = vst.msk [vmem:[#allocation5 + $0x1c] sm:$0xf] %vm6319_vm15, %v7191_v16  ;;  %6247 = vrot.lane.b32.xlu0 %v14096_v17, %s11478_s24 }
 0x47b   : > { %11195 = vmatmul.mubr.msk.bf16.gmra.mxu1 %vm5827_vm3, %v11347_v31  ;;  %7043 = vst.msk [vmem:[#allocation5 + $0xd0] sm:$0xf] %vm6062_vm12, %v14164_v11  ;;  %6082 = vst.msk [vmem:[#allocation5 + $0xe4] sm:$0xf] %vm6062_vm12, %v10726_v26  ;;  %v6230_v55 = vpop.permute.xlu1 %6229  ;;  %v11352_v5 = vld [vmem:[#allocation5] ss:$12 sps:$4 sm:$0xff]  }
 0x47c   : > { %11198 = vmatprep.mubr.msk.bf16.mxu1 %vm5827_vm3, %v11349_v9  ;;  %6323 = vst.msk [vmem:[#allocation5 + $0x24] sm:$0xf] %vm6319_vm15, %v6230_v55  ;;  %v6485_v4 = vpop.permute.xlu0 %6484  ;;  %v7329_v9 = vld [vmem:[#allocation4 + $0xd8] sm:$0xff] }
 0x47d   : > { %7721 = vrot.lane.b32.xlu1 %v14013_v54, %s11482_s25  ;;  %6579 = vst.msk [vmem:[#allocation5 + $0x18] sm:$0xf] %vm6576_vm1, %v6485_v4 }
 0x47e   : > { %7210 = vrot.lane.b32.xlu0 %v14006_v12, %s11478_s24 }
 0x47f   : > { %v7193_v47 = vpop.permute.xlu1 %7192  ;;  %v11354_v10 = vld [vmem:[#allocation5 + $0x4] ss:$12 sps:$4 sm:$0xff]  }
 0x480   : > { %7285 = vst.msk [vmem:[#allocation5 + $0x28] sm:$0xf] %vm6319_vm15, %v7193_v47  ;;  %v11355_v6 = vld [vmem:[#allocation5 + $0xb0] ss:$12 sps:$4 sm:$0xff]   ;;  %v7448_v17 = vpop.permute.xlu0 %7447  ;;  %8554 = vmatprep.mubr.bf16.mxu0 %v11354_v10 }
 0x481   : > { %6249 = vrot.lane.b32.xlu1 %v14110_v24, %s11478_s24  ;;  %7541 = vst.msk [vmem:[#allocation5 + $0x1c] sm:$0xf] %vm6576_vm1, %v7448_v17  ;;  %8555 = vmatmul.mubr.bf16.vlgmr.msra.gmra.mxu0 %v11352_v5  ;;  %v14263_v5 = vpack.c.bf16 %v7329_v9, %v7329_v9  ;;  %v7330_v17 = vld [vmem:[#allocation4 + $0xe0] sm:$0xff] }
 0x482   : > { %6504 = vrot.lane.b32.xlu0 %v13929_v59, %s11480_s28  ;;  %11183 = vmatpush3.bf16.msra.mxu0 %v11402_v46 }
 0x483   : > { %v5740_v37 = vpop.f32.mrf.mxu1  ;;  %11199 = vmatmul.mubr.msk.bf16.gmra.mxu1 %vm5827_vm3, %v11355_v6  ;;  %v6487_v32 = vpop.permute.xlu1 %6486  ;;  %11184 = vmatprep.subr.bf16.mxu0 %v13785_v50 }
 0x484   : > { %v5741_v25 = vadd.f32 %v13966_v56, %v5740_v37  ;;  %6580 = vst.msk [vmem:[#allocation5 + $0x24] sm:$0xf] %vm6576_vm1, %v6487_v32  ;;  %v6742_v18 = vpop.permute.xlu0 %6741 }
 0x485   : > { %v5742_v24 = vpop.f32.mrf.mxu1  ;;  %7212 = vrot.lane.b32.xlu1 %v14008_v40, %s11478_s24  ;;  %6836 = vst.msk [vmem:[#allocation5 + $0x18] sm:$0xf] %vm6833_vm2, %v6742_v18 }
 0x486   : > { %v5813_v43 = vmax.f32 %v5741_v25, 0.0  ;;  %7467 = vrot.lane.b32.xlu0 %v14201_v36, %s11480_s28  ;;  %11185 = vmatpush3.bf16.msra.mxu0 %v13785_v50  ;;  %v14278_v24 = vpack.c.bf16 %v7330_v17, %v7330_v17 }
 0x487   : > { %v5743_v59 = vpop.f32.mrf.mxu1  ;;  %v7450_v42 = vpop.permute.xlu1 %7449  ;;  %11218 = vmatprep.subr.bf16.mxu0 %v11466_v0 }
 0x488   : > { %5888 = vst.msk [vmem:[#allocation4 + $0xf1] sm:$0xff] %vm5827_vm3, %v5813_v43  ;;  %v5744_v23 = vadd.f32 %v13966_v56, %v5743_v59  ;;  %v7704_v38 = vpop.permute.xlu0 %7703 }
 0x489   : > { %7542 = vst.msk [vmem:[#allocation5 + $0x28] sm:$0xf] %vm6576_vm1, %v7450_v42  ;;  %v5745_v3 = vpop.f32.mrf.mxu1  ;;  %6506 = vrot.lane.b32.xlu1 %v10784_v44, %s11480_s28 }
 0x48a   : > { %v5814_v28 = vmax.f32 %v5744_v23, 0.0  ;;  %7797 = vst.msk [vmem:[#allocation5 + $0x1c] sm:$0xf] %vm6833_vm2, %v7704_v38  ;;  %6761 = vrot.lane.b32.xlu0 %v14132_v52, %s11482_s25 }
 0x48b   : > { %v6744_v8 = vpop.permute.xlu1 %6743 }
 0x48c   : > { %5889 = vst.msk [vmem:[#allocation4 + $0xf9] sm:$0xff] %vm5827_vm3, %v5814_v28  ;;  %v6232_v50 = vpop.permute.xlu0 %6231 }
 0x48d   : > { %6837 = vst.msk [vmem:[#allocation5 + $0x24] sm:$0xf] %vm6833_vm2, %v6744_v8  ;;  %7469 = vrot.lane.b32.xlu1 %v14216_v27, %s11480_s28 }
 0x48e   : > { %6324 = vst.msk [vmem:[#allocation5 + $0x30] sm:$0xf] %vm6319_vm15, %v6232_v50  ;;  %7723 = vrot.lane.b32.xlu0 %v14070_v62, %s11482_s25 }
 0x48f   : > { %v7587_v1 = vld [vmem:[#allocation4 + $0xf1] sm:$0xff]  ;;  %v7706_v33 = vpop.permute.xlu1 %7705 }
 0x490   : > { %v5922_v53 = vld [vmem:[#allocation4 + $0xf0] sm:$0xff]  ;;  %v14224_v29 = vpack.c.bf16 %v7587_v1, %v7587_v1  ;;  %7798 = vst.msk [vmem:[#allocation5 + $0x28] sm:$0xf] %vm6833_vm2, %v7706_v33  ;;  %v7195_v52 = vpop.permute.xlu0 %7194 }
 0x491   : > { %v10727_v48 = vpack.c.bf16 %v5922_v53, %v5922_v53  ;;  %6763 = vrot.lane.b32.xlu1 %v14146_v39, %s11482_s25  ;;  %7286 = vst.msk [vmem:[#allocation5 + $0x34] sm:$0xf] %vm6319_vm15, %v7195_v52  ;;  %v8023_v20 = vld [vmem:[#allocation5 + $0x18] sm:$0xff] }
 0x492   : > { %7044 = vst.msk [vmem:[#allocation5 + $0xdc] sm:$0xf] %vm6062_vm12, %v14224_v29  ;;  %6251 = vrot.lane.b32.xlu0 %v13995_v61, %s11478_s24 }
 0x493   : > { %6083 = vst.msk [vmem:[#allocation5 + $0xf0] sm:$0xf] %vm6062_vm12, %v10727_v48  ;;  %v7843_v41 = vld [vmem:[#allocation4 + $0xf2] sm:$0xff]  ;;  %v7844_v7 = vld [vmem:[#allocation4 + $0xfa] sm:$0xff]  ;;  %v6234_v30 = vpop.permute.xlu1 %6233 }
 0x494   : > { %v14233_v34 = vpack.c.bf16 %v7843_v41, %v7843_v41  ;;  %v14235_v63 = vpack.c.bf16 %v7844_v7, %v7844_v7  ;;  %v7588_v14 = vld [vmem:[#allocation4 + $0xf9] sm:$0xff]  ;;  %6325 = vst.msk [vmem:[#allocation5 + $0x3c] sm:$0xf] %vm6319_vm15, %v6234_v30  ;;  %v6489_v57 = vpop.permute.xlu0 %6488 }
 0x495   : > { %v5923_v39 = vld [vmem:[#allocation4 + $0xf8] sm:$0xff]  ;;  %v14240_v21 = vpack.c.bf16 %v7588_v14, %v7588_v14  ;;  %7725 = vrot.lane.b32.xlu1 %v14088_v58, %s11482_s25  ;;  %6581 = vst.msk [vmem:[#allocation5 + $0x30] sm:$0xf] %vm6576_vm1, %v6489_v57  ;;  %v7331_v14 = vld [vmem:[#allocation4 + $0xf0] sm:$0xff] }
 0x496   : > { %v10728_v51 = vpack.c.bf16 %v5923_v39, %v5923_v39  ;;  %8003 = vst.msk [vmem:[#allocation5 + $0xc8] sm:$0xf] %vm6062_vm12, %v14233_v34  ;;  %8004 = vst.msk [vmem:[#allocation5 + $0xd4] sm:$0xf] %vm6062_vm12, %v14235_v63  ;;  %7214 = vrot.lane.b32.xlu0 %v14079_v15, %s11478_s24 }
 0x497   : > { %7045 = vst.msk [vmem:[#allocation5 + $0xe8] sm:$0xf] %vm6062_vm12, %v14240_v21  ;;  %v7197_v61 = vpop.permute.xlu1 %7196  ;;  %v8025_v60 = vld [vmem:[#allocation5 + $0x24] sm:$0xff] }
 0x498   : > { %6084 = vst.msk [vmem:[#allocation5 + $0xfc] sm:$0xf] %vm6062_vm12, %v10728_v51  ;;  %v11356_v31 = vld [vmem:[#allocation5 + $0x1c] ss:$12 sps:$4 sm:$0xff]   ;;  %v10045_v26 = vcombine.low %v8023_v20, %v8025_v60  ;;  %v7452_v16 = vpop.permute.xlu0 %7451  ;;  %v14326_v51 = vpack.c.bf16 %v7331_v14, %v7331_v14 }
 0x499   : > { %7287 = vst.msk [vmem:[#allocation5 + $0x40] sm:$0xf] %vm6319_vm15, %v7197_v61  ;;  %6253 = vrot.lane.b32.xlu1 %v14013_v54, %s11478_s24  ;;  %8562 = vmatprep.mubr.bf16.mxu0 %v11356_v31  ;;  %v7332_v61 = vld [vmem:[#allocation4 + $0xf8] sm:$0xff] }
 0x49a   : > { %7543 = vst.msk [vmem:[#allocation5 + $0x34] sm:$0xf] %vm6576_vm1, %v7452_v16  ;;  %8563 = vmatmul.mubr.bf16.gmra.mxu0 %v10045_v26  ;;  %6508 = vrot.lane.b32.xlu0 %v14006_v12, %s11480_s28  ;;  %v14339_v16 = vpack.c.bf16 %v7332_v61, %v7332_v61 }
 0x49b   : > { %v6491_v55 = vpop.permute.xlu1 %6490 }
 0x49c   : > { %6582 = vst.msk [vmem:[#allocation5 + $0x3c] sm:$0xf] %vm6576_vm1, %v6491_v55  ;;  %v6746_v47 = vpop.permute.xlu0 %6745 }
 0x49d   : > { %v11358_v4 = vld [vmem:[#allocation5 + $0xc8] ss:$12 sps:$4 sm:$0xff]   ;;  %7216 = vrot.lane.b32.xlu1 %v14081_v49, %s11478_s24  ;;  %6838 = vst.msk [vmem:[#allocation5 + $0x30] sm:$0xf] %vm6833_vm2, %v6746_v47 }
 0x49e   : > { %v5748_v54 = vpop.f32.mrf.mxu1  ;;  %11202 = vmatprep.mubr.msk.bf16.mxu1 %vm5827_vm3, %v11358_v4  ;;  %7471 = vrot.lane.b32.xlu0 %v14263_v5, %s11480_s28 }
 0x49f   : > { %v5749_v10 = vadd.f32 %v13966_v56, %v5748_v54  ;;  %v7454_v6 = vpop.permute.xlu1 %7453 }
 0x4a0   : > { %7544 = vst.msk [vmem:[#allocation5 + $0x40] sm:$0xf] %vm6576_vm1, %v7454_v6  ;;  %v5750_v12 = vpop.f32.mrf.mxu1  ;;  %v7708_v45 = vpop.permute.xlu0 %7707 }
 0x4a1   : > { %v5815_v37 = vmax.f32 %v5749_v10, 0.0  ;;  %6510 = vrot.lane.b32.xlu1 %v14008_v40, %s11480_s28  ;;  %7799 = vst.msk [vmem:[#allocation5 + $0x34] sm:$0xf] %vm6833_vm2, %v7708_v45 }
 0x4a2   : > { %v5751_v25 = vpop.f32.mrf.mxu1  ;;  %6765 = vrot.lane.b32.xlu0 %v14201_v36, %s11482_s25 }
 0x4a3   : > { %5890 = vst.msk [vmem:[#allocation4 + $0x109] sm:$0xff] %vm5827_vm3, %v5815_v37  ;;  %v5752_v32 = vadd.f32 %v13966_v56, %v5751_v25  ;;  %v6748_v46 = vpop.permute.xlu1 %6747 }
 0x4a4   : > { %6839 = vst.msk [vmem:[#allocation5 + $0x3c] sm:$0xf] %vm6833_vm2, %v6748_v46  ;;  %v5753_v13 = vpop.f32.mrf.mxu1  ;;  %v6236_v40 = vpop.permute.xlu0 %6235 }
 0x4a5   : > { %v5816_v43 = vmax.f32 %v5752_v32, 0.0  ;;  %7473 = vrot.lane.b32.xlu1 %v14278_v24, %s11480_s28  ;;  %6326 = vst.msk [vmem:[#allocation5 + $0x48] sm:$0xf] %vm6319_vm15, %v6236_v40 }
 0x4a6   : > { %7727 = vrot.lane.b32.xlu0 %v14148_v2, %s11482_s25 }
 0x4a7   : > { %5891 = vst.msk [vmem:[#allocation4 + $0x111] sm:$0xff] %vm5827_vm3, %v5816_v43  ;;  %v7710_v18 = vpop.permute.xlu1 %7709 }
 0x4a8   : > { %7800 = vst.msk [vmem:[#allocation5 + $0x40] sm:$0xf] %vm6833_vm2, %v7710_v18  ;;  %v7199_v36 = vpop.permute.xlu0 %7198  ;;  %v8027_v8 = vld [vmem:[#allocation5 + $0x30] sm:$0xff] }
 0x4a9   : > { %6767 = vrot.lane.b32.xlu1 %v14216_v27, %s11482_s25  ;;  %7288 = vst.msk [vmem:[#allocation5 + $0x4c] sm:$0xf] %vm6319_vm15, %v7199_v36 }
 0x4aa   : > { %v7589_v59 = vld [vmem:[#allocation4 + $0x109] sm:$0xff]  ;;  %6255 = vrot.lane.b32.xlu0 %v14070_v62, %s11478_s24 }
 0x4ab   : > { %v5924_v23 = vld [vmem:[#allocation4 + $0x108] sm:$0xff]  ;;  %v6238_v42 = vpop.permute.xlu1 %6237  ;;  %v14293_v44 = vpack.c.bf16 %v7589_v59, %v7589_v59 }
 0x4ac   : > { %v10729_v3 = vpack.c.bf16 %v5924_v23, %v5924_v23  ;;  %6327 = vst.msk [vmem:[#allocation5 + $0x54] sm:$0xf] %vm6319_vm15, %v6238_v42  ;;  %v6493_v22 = vpop.permute.xlu0 %6492  ;;  %v7333_v36 = vld [vmem:[#allocation4 + $0x108] sm:$0xff] }
 0x4ad   : > { %7729 = vrot.lane.b32.xlu1 %v14164_v11, %s11482_s25  ;;  %7046 = vst.msk [vmem:[#allocation5 + $0xf4] sm:$0xf] %vm6062_vm12, %v14293_v44 }
 0x4ae   : > { %6085 = vst.msk [vmem:[#allocation5 + $0x108] sm:$0xf] %vm6062_vm12, %v10729_v3  ;;  %v7845_v28 = vld [vmem:[#allocation4 + $0x10a] sm:$0xff]  ;;  %v7846_v38 = vld [vmem:[#allocation4 + $0x112] sm:$0xff]  ;;  %7218 = vrot.lane.b32.xlu0 %v14157_v35, %s11478_s24 }
 0x4af   : > { %6583 = vst.msk [vmem:[#allocation5 + $0x48] sm:$0xf] %vm6576_vm1, %v6493_v22  ;;  %v14302_v62 = vpack.c.bf16 %v7845_v28, %v7845_v28  ;;  %v14304_v27 = vpack.c.bf16 %v7846_v38, %v7846_v38  ;;  %v7201_v50 = vpop.permute.xlu1 %7200  ;;  %v8029_v1 = vld [vmem:[#allocation5 + $0x3c] sm:$0xff] }
 0x4b0   : > { %v11359_v53 = vld [vmem:[#allocation5 + $0x34] ss:$12 sps:$4 sm:$0xff]   ;;  %7289 = vst.msk [vmem:[#allocation5 + $0x58] sm:$0xf] %vm6319_vm15, %v7201_v50  ;;  %v10048_v48 = vcombine.low %v8027_v8, %v8029_v1  ;;  %v7456_v7 = vpop.permute.xlu0 %7455  ;;  %v14386_v8 = vpack.c.bf16 %v7333_v36, %v7333_v36 }
 0x4b1   : > { %v7590_v33 = vld [vmem:[#allocation4 + $0x111] sm:$0xff]  ;;  %8005 = vst.msk [vmem:[#allocation5 + $0xe0] sm:$0xf] %vm6062_vm12, %v14302_v62  ;;  %8006 = vst.msk [vmem:[#allocation5 + $0xec] sm:$0xf] %vm6062_vm12, %v14304_v27  ;;  %6257 = vrot.lane.b32.xlu1 %v14088_v58, %s11478_s24  ;;  %8570 = vmatprep.mubr.bf16.mxu0 %v11359_v53 }
 0x4b2   : > { %v14309_v52 = vpack.c.bf16 %v7590_v33, %v7590_v33  ;;  %v5925_v41 = vld [vmem:[#allocation4 + $0x110] sm:$0xff]  ;;  %7545 = vst.msk [vmem:[#allocation5 + $0x4c] sm:$0xf] %vm6576_vm1, %v7456_v7  ;;  %8571 = vmatmul.mubr.bf16.gmra.mxu0 %v10048_v48  ;;  %6512 = vrot.lane.b32.xlu0 %v14079_v15, %s11480_s28 }
 0x4b3   : > { %v10730_v30 = vpack.c.bf16 %v5925_v41, %v5925_v41  ;;  %v6495_v39 = vpop.permute.xlu1 %6494  ;;  %v7334_v50 = vld [vmem:[#allocation4 + $0x110] sm:$0xff] }
 0x4b4   : > { %7047 = vst.msk [vmem:[#allocation5 + $0x100] sm:$0xf] %vm6062_vm12, %v14309_v52  ;;  %v6750_v58 = vpop.permute.xlu0 %6749  ;;  %v14400_v33 = vpack.c.bf16 %v7334_v50, %v7334_v50 }
 0x4b5   : > { %6086 = vst.msk [vmem:[#allocation5 + $0x114] sm:$0xf] %vm6062_vm12, %v10730_v30  ;;  %7220 = vrot.lane.b32.xlu1 %v14159_v19, %s11478_s24 }
 0x4b6   : > { %6584 = vst.msk [vmem:[#allocation5 + $0x54] sm:$0xf] %vm6576_vm1, %v6495_v39  ;;  %7475 = vrot.lane.b32.xlu0 %v14326_v51, %s11480_s28 }
 0x4b7   : > { %6840 = vst.msk [vmem:[#allocation5 + $0x48] sm:$0xf] %vm6833_vm2, %v6750_v58  ;;  %v7458_v57 = vpop.permute.xlu1 %7457 }
 0x4b8   : > { %7546 = vst.msk [vmem:[#allocation5 + $0x58] sm:$0xf] %vm6576_vm1, %v7458_v57  ;;  %v11361_v15 = vld [vmem:[#allocation5 + $0xe0] ss:$12 sps:$4 sm:$0xff]   ;;  %v7712_v20 = vpop.permute.xlu0 %7711 }
 0x4b9   : > { %6514 = vrot.lane.b32.xlu1 %v14081_v49, %s11480_s28  ;;  %7801 = vst.msk [vmem:[#allocation5 + $0x4c] sm:$0xf] %vm6833_vm2, %v7712_v20  ;;  %11203 = vmatmul.mubr.msk.bf16.gmra.mxu1 %vm5827_vm3, %v11361_v15 }
 0x4ba   : > { %6769 = vrot.lane.b32.xlu0 %v14263_v5, %s11482_s25 }
 0x4bb   : > { %v5756_v60 = vpop.f32.mrf.mxu1  ;;  %v6752_v26 = vpop.permute.xlu1 %6751 }
 0x4bc   : > { %v5757_v31 = vadd.f32 %v13966_v56, %v5756_v60  ;;  %6841 = vst.msk [vmem:[#allocation5 + $0x54] sm:$0xf] %vm6833_vm2, %v6752_v26  ;;  %v6240_v49 = vpop.permute.xlu0 %6239 }
 0x4bd   : > { %v5758_v9 = vpop.f32.mrf.mxu1  ;;  %7477 = vrot.lane.b32.xlu1 %v14339_v16, %s11480_s28  ;;  %6328 = vst.msk [vmem:[#allocation5 + $0x60] sm:$0xf] %vm6319_vm15, %v6240_v49 }
 0x4be   : > { %v5817_v55 = vmax.f32 %v5757_v31, 0.0  ;;  %7731 = vrot.lane.b32.xlu0 %v14224_v29, %s11482_s25 }
 0x4bf   : > { %v5759_v4 = vpop.f32.mrf.mxu1  ;;  %v7714_v54 = vpop.permute.xlu1 %7713 }
 0x4c0   : > { %5892 = vst.msk [vmem:[#allocation4 + $0x121] sm:$0xff] %vm5827_vm3, %v5817_v55  ;;  %v5760_v47 = vadd.f32 %v13966_v56, %v5759_v4  ;;  %v7203_v6 = vpop.permute.xlu0 %7202  ;;  %v8031_v25 = vld [vmem:[#allocation5 + $0x48] sm:$0xff] }
 0x4c1   : > { %7802 = vst.msk [vmem:[#allocation5 + $0x58] sm:$0xf] %vm6833_vm2, %v7714_v54  ;;  %v5761_v5 = vpop.f32.mrf.mxu1  ;;  %6771 = vrot.lane.b32.xlu1 %v14278_v24, %s11482_s25 }
 0x4c2   : > { %v5818_v10 = vmax.f32 %v5760_v47, 0.0  ;;  %7290 = vst.msk [vmem:[#allocation5 + $0x64] sm:$0xf] %vm6319_vm15, %v7203_v6  ;;  %6259 = vrot.lane.b32.xlu0 %v14148_v2, %s11478_s24 }
 0x4c3   : > { %v6242_v12 = vpop.permute.xlu1 %6241 }
 0x4c4   : > { %5893 = vst.msk [vmem:[#allocation4 + $0x129] sm:$0xff] %vm5827_vm3, %v5818_v10  ;;  %v6497_v56 = vpop.permute.xlu0 %6496 }
 0x4c5   : > { %6329 = vst.msk [vmem:[#allocation5 + $0x6c] sm:$0xf] %vm6319_vm15, %v6242_v12  ;;  %7733 = vrot.lane.b32.xlu1 %v14240_v21, %s11482_s25 }
 0x4c6   : > { %6585 = vst.msk [vmem:[#allocation5 + $0x60] sm:$0xf] %vm6576_vm1, %v6497_v56  ;;  %7222 = vrot.lane.b32.xlu0 %v14233_v34, %s11478_s24 }
 0x4c7   : > { %v7591_v17 = vld [vmem:[#allocation4 + $0x121] sm:$0xff]  ;;  %v7205_v45 = vpop.permute.xlu1 %7204 }
 0x4c8   : > { %v5926_v37 = vld [vmem:[#allocation4 + $0x120] sm:$0xff]  ;;  %v11362_v46 = vld [vmem:[#allocation5 + $0x4c] ss:$12 sps:$4 sm:$0xff]   ;;  %v14362_v24 = vpack.c.bf16 %v7591_v17, %v7591_v17  ;;  %7291 = vst.msk [vmem:[#allocation5 + $0x70] sm:$0xf] %vm6319_vm15, %v7205_v45  ;;  %v7460_v43 = vpop.permute.xlu0 %7459 }
 0x4c9   : > { %v8033_v32 = vld [vmem:[#allocation5 + $0x54] sm:$0xff]  ;;  %v10731_v2 = vpack.c.bf16 %v5926_v37, %v5926_v37  ;;  %6261 = vrot.lane.b32.xlu1 %v14164_v11, %s11478_s24  ;;  %8578 = vmatprep.mubr.bf16.mxu0 %v11362_v46  ;;  %7547 = vst.msk [vmem:[#allocation5 + $0x64] sm:$0xf] %vm6576_vm1, %v7460_v43 }
 0x4ca   : > { %v10051_v13 = vcombine.low %v8031_v25, %v8033_v32  ;;  %7048 = vst.msk [vmem:[#allocation5 + $0x10c] sm:$0xf] %vm6062_vm12, %v14362_v24  ;;  %6516 = vrot.lane.b32.xlu0 %v14157_v35, %s11480_s28  ;;  %v7335_v4 = vld [vmem:[#allocation4 + $0x120] sm:$0xff] }
 0x4cb   : > { %6087 = vst.msk [vmem:[#allocation5 + $0x120] sm:$0xf] %vm6062_vm12, %v10731_v2  ;;  %v7847_v40 = vld [vmem:[#allocation4 + $0x122] sm:$0xff]  ;;  %v7848_v18 = vld [vmem:[#allocation4 + $0x12a] sm:$0xff]  ;;  %v6499_v42 = vpop.permute.xlu1 %6498  ;;  %v14441_v12 = vpack.c.bf16 %v7335_v4, %v7335_v4 }
 0x4cc   : > { %8579 = vmatmul.mubr.bf16.gmra.mxu0 %v10051_v13  ;;  %v14371_v59 = vpack.c.bf16 %v7847_v40, %v7847_v40  ;;  %v14373_v23 = vpack.c.bf16 %v7848_v18, %v7848_v18  ;;  %v7592_v11 = vld [vmem:[#allocation4 + $0x129] sm:$0xff]  ;;  %6586 = vst.msk [vmem:[#allocation5 + $0x6c] sm:$0xf] %vm6576_vm1, %v6499_v42  ;;  %v6754_v38 = vpop.permute.xlu0 %6753 }
 0x4cd   : > { %v5927_v3 = vld [vmem:[#allocation4 + $0x128] sm:$0xff]  ;;  %v14378_v22 = vpack.c.bf16 %v7592_v11, %v7592_v11  ;;  %7224 = vrot.lane.b32.xlu1 %v14235_v63, %s11478_s24  ;;  %6842 = vst.msk [vmem:[#allocation5 + $0x60] sm:$0xf] %vm6833_vm2, %v6754_v38 }
 0x4ce   : > { %v10732_v28 = vpack.c.bf16 %v5927_v3, %v5927_v3  ;;  %8007 = vst.msk [vmem:[#allocation5 + $0xf8] sm:$0xf] %vm6062_vm12, %v14371_v59  ;;  %8008 = vst.msk [vmem:[#allocation5 + $0x104] sm:$0xf] %vm6062_vm12, %v14373_v23  ;;  %7479 = vrot.lane.b32.xlu0 %v14386_v8, %s11480_s28  ;;  %v7336_v46 = vld [vmem:[#allocation4 + $0x128] sm:$0xff] }
 0x4cf   : > { %7049 = vst.msk [vmem:[#allocation5 + $0x118] sm:$0xf] %vm6062_vm12, %v14378_v22  ;;  %v7462_v35 = vpop.permute.xlu1 %7461  ;;  %v14468_v18 = vpack.c.bf16 %v7336_v46, %v7336_v46 }
 0x4d0   : > { %6088 = vst.msk [vmem:[#allocation5 + $0x12c] sm:$0xf] %vm6062_vm12, %v10732_v28  ;;  %v7716_v1 = vpop.permute.xlu0 %7715 }
 0x4d1   : > { %7548 = vst.msk [vmem:[#allocation5 + $0x70] sm:$0xf] %vm6576_vm1, %v7462_v35  ;;  %6518 = vrot.lane.b32.xlu1 %v14159_v19, %s11480_s28  ;;  %v14410_v19 = vld [vmem:[%s15072_s4] ss:$0 sm:$0xff] }
 0x4d2   : > { %7803 = vst.msk [vmem:[#allocation5 + $0x64] sm:$0xf] %vm6833_vm2, %v7716_v1  ;;  %6773 = vrot.lane.b32.xlu0 %v14326_v51, %s11482_s25 }
 0x4d3   : > { %v6756_v53 = vpop.permute.xlu1 %6755 }
 0x4d4   : > { %6843 = vst.msk [vmem:[#allocation5 + $0x6c] sm:$0xf] %vm6833_vm2, %v6756_v53  ;;  %v6244_v41 = vpop.permute.xlu0 %6243 }
 0x4d5   : > { %v11364_v48 = vld [vmem:[#allocation5 + $0xf8] ss:$12 sps:$4 sm:$0xff]   ;;  %7481 = vrot.lane.b32.xlu1 %v14400_v33, %s11480_s28  ;;  %6330 = vst.msk [vmem:[#allocation5 + $0x78] sm:$0xf] %vm6319_vm15, %v6244_v41 }
 0x4d6   : > { %v5764_v7 = vpop.f32.mrf.mxu1  ;;  %11206 = vmatprep.mubr.msk.bf16.mxu1 %vm5827_vm3, %v11364_v48  ;;  %7735 = vrot.lane.b32.xlu0 %v14293_v44, %s11482_s25 }
 0x4d7   : > { %v5765_v30 = vadd.f32 %v14410_v19, %v5764_v7  ;;  %v7718_v14 = vpop.permute.xlu1 %7717 }
 0x4d8   : > { %7804 = vst.msk [vmem:[#allocation5 + $0x70] sm:$0xf] %vm6833_vm2, %v7718_v14  ;;  %v5766_v39 = vpop.f32.mrf.mxu1  ;;  %v7207_v51 = vpop.permute.xlu0 %7206 }
 0x4d9   : > { %v5819_v58 = vmax.f32 %v5765_v30, 0.0  ;;  %6775 = vrot.lane.b32.xlu1 %v14339_v16, %s11482_s25  ;;  %7292 = vst.msk [vmem:[#allocation5 + $0x7c] sm:$0xf] %vm6319_vm15, %v7207_v51  ;;  %v8035_v16 = vld [vmem:[#allocation5 + $0x60] sm:$0xff] }
 0x4da   : > { %v5767_v57 = vpop.f32.mrf.mxu1  ;;  %6263 = vrot.lane.b32.xlu0 %v14224_v29, %s11478_s24 }
 0x4db   : > { %5894 = vst.msk [vmem:[#allocation4 + $0x139] sm:$0xff] %vm5827_vm3, %v5819_v58  ;;  %v5768_v61 = vadd.f32 %v14410_v19, %v5767_v57  ;;  %v6246_v15 = vpop.permute.xlu1 %6245 }
 0x4dc   : > { %6331 = vst.msk [vmem:[#allocation5 + $0x84] sm:$0xf] %vm6319_vm15, %v6246_v15  ;;  %v5769_v20 = vpop.f32.mrf.mxu1  ;;  %v6501_v31 = vpop.permute.xlu0 %6500 }
 0x4dd   : > { %v5820_v60 = vmax.f32 %v5768_v61, 0.0  ;;  %7737 = vrot.lane.b32.xlu1 %v14309_v52, %s11482_s25  ;;  %6587 = vst.msk [vmem:[#allocation5 + $0x78] sm:$0xf] %vm6576_vm1, %v6501_v31 }
 0x4de   : > { %7226 = vrot.lane.b32.xlu0 %v14302_v62, %s11478_s24 }
 0x4df   : > { %5895 = vst.msk [vmem:[#allocation4 + $0x141] sm:$0xff] %vm5827_vm3, %v5820_v60  ;;  %v7209_v26 = vpop.permute.xlu1 %7208  ;;  %v8037_v9 = vld [vmem:[#allocation5 + $0x6c] sm:$0xff] }
 0x4e0   : > { %v11365_v55 = vld [vmem:[#allocation5 + $0x64] ss:$12 sps:$4 sm:$0xff]   ;;  %7293 = vst.msk [vmem:[#allocation5 + $0x88] sm:$0xf] %vm6319_vm15, %v7209_v26  ;;  %v10054_v29 = vcombine.low %v8035_v16, %v8037_v9  ;;  %v7464_v49 = vpop.permute.xlu0 %7463 }
 0x4e1   : > { %6265 = vrot.lane.b32.xlu1 %v14240_v21, %s11478_s24  ;;  %8586 = vmatprep.mubr.bf16.mxu0 %v11365_v55  ;;  %7549 = vst.msk [vmem:[#allocation5 + $0x7c] sm:$0xf] %vm6576_vm1, %v7464_v49 }
 0x4e2   : > { %8587 = vmatmul.mubr.bf16.gmra.mxu0 %v10054_v29  ;;  %v7593_v47 = vld [vmem:[#allocation4 + $0x139] sm:$0xff]  ;;  %6520 = vrot.lane.b32.xlu0 %v14233_v34, %s11480_s28 }
 0x4e3   : > { %v5928_v54 = vld [vmem:[#allocation4 + $0x138] sm:$0xff]  ;;  %v6503_v5 = vpop.permute.xlu1 %6502  ;;  %v14436_v10 = vpack.c.bf16 %v7593_v47, %v7593_v47 }
 0x4e4   : > { %v10733_v6 = vpack.c.bf16 %v5928_v54, %v5928_v54  ;;  %6588 = vst.msk [vmem:[#allocation5 + $0x84] sm:$0xf] %vm6576_vm1, %v6503_v5  ;;  %v6758_v21 = vpop.permute.xlu0 %6757  ;;  %v7337_v58 = vld [vmem:[#allocation4 + $0x138] sm:$0xff] }
 0x4e5   : > { %7228 = vrot.lane.b32.xlu1 %v14304_v27, %s11478_s24  ;;  %7050 = vst.msk [vmem:[#allocation5 + $0x124] sm:$0xf] %vm6062_vm12, %v14436_v10  ;;  %v14502_v61 = vpack.c.bf16 %v7337_v58, %v7337_v58 }
 0x4e6   : > { %6089 = vst.msk [vmem:[#allocation5 + $0x138] sm:$0xf] %vm6062_vm12, %v10733_v6  ;;  %v7849_v56 = vld [vmem:[#allocation4 + $0x13a] sm:$0xff]  ;;  %v7850_v17 = vld [vmem:[#allocation4 + $0x142] sm:$0xff]  ;;  %7483 = vrot.lane.b32.xlu0 %v14441_v12, %s11480_s28 }
 0x4e7   : > { %6844 = vst.msk [vmem:[#allocation5 + $0x78] sm:$0xf] %vm6833_vm2, %v6758_v21  ;;  %v14447_v34 = vpack.c.bf16 %v7849_v56, %v7849_v56  ;;  %v14449_v37 = vpack.c.bf16 %v7850_v17, %v7850_v17  ;;  %v7466_v45 = vpop.permute.xlu1 %7465  ;;  %v7594_v25 = vld [vmem:[#allocation4 + $0x141] sm:$0xff] }
 0x4e8   : > { %v5929_v32 = vld [vmem:[#allocation4 + $0x140] sm:$0xff]  ;;  %7550 = vst.msk [vmem:[#allocation5 + $0x88] sm:$0xf] %vm6576_vm1, %v7466_v45  ;;  %v14454_v2 = vpack.c.bf16 %v7594_v25, %v7594_v25  ;;  %v7720_v43 = vpop.permute.xlu0 %7719 }
 0x4e9   : > { %v10734_v13 = vpack.c.bf16 %v5929_v32, %v5929_v32  ;;  %8009 = vst.msk [vmem:[#allocation5 + $0x110] sm:$0xf] %vm6062_vm12, %v14447_v34  ;;  %8010 = vst.msk [vmem:[#allocation5 + $0x11c] sm:$0xf] %vm6062_vm12, %v14449_v37  ;;  %6522 = vrot.lane.b32.xlu1 %v14235_v63, %s11480_s28 }
 0x4ea   : > { %7805 = vst.msk [vmem:[#allocation5 + $0x7c] sm:$0xf] %vm6833_vm2, %v7720_v43  ;;  %6777 = vrot.lane.b32.xlu0 %v14386_v8, %s11482_s25 }
 0x4eb   : > { %7051 = vst.msk [vmem:[#allocation5 + $0x130] sm:$0xf] %vm6062_vm12, %v14454_v2  ;;  %6090 = vst.msk [vmem:[#allocation5 + $0x144] sm:$0xf] %vm6062_vm12, %v10734_v13  ;;  %v6760_v40 = vpop.permute.xlu1 %6759 }
 0x4ec   : > { %6845 = vst.msk [vmem:[#allocation5 + $0x84] sm:$0xf] %vm6833_vm2, %v6760_v40  ;;  %v6248_v63 = vpop.permute.xlu0 %6247 }
 0x4ed   : > { %7485 = vrot.lane.b32.xlu1 %v14468_v18, %s11480_s28  ;;  %6332 = vst.msk [vmem:[#allocation5 + $0x90] sm:$0xf] %vm6319_vm15, %v6248_v63 }
 0x4ee   : > { %7739 = vrot.lane.b32.xlu0 %v14362_v24, %s11482_s25 }
 0x4ef   : > { %v7722_v36 = vpop.permute.xlu1 %7721 }
 0x4f0   : > { %7806 = vst.msk [vmem:[#allocation5 + $0x88] sm:$0xf] %vm6833_vm2, %v7722_v36  ;;  %v11367_v42 = vld [vmem:[#allocation5 + $0x110] ss:$12 sps:$4 sm:$0xff]   ;;  %v7211_v11 = vpop.permute.xlu0 %7210 }
 0x4f1   : > { %6779 = vrot.lane.b32.xlu1 %v14400_v33, %s11482_s25  ;;  %7294 = vst.msk [vmem:[#allocation5 + $0x94] sm:$0xf] %vm6319_vm15, %v7211_v11  ;;  %11207 = vmatmul.mubr.msk.bf16.gmra.mxu1 %vm5827_vm3, %v11367_v42 }
 0x4f2   : > { %6267 = vrot.lane.b32.xlu0 %v14293_v44, %s11478_s24  ;;  %v8039_v44 = vld [vmem:[#allocation5 + $0x78] sm:$0xff] }
 0x4f3   : > { %v6250_v38 = vpop.permute.xlu1 %6249 }
 0x4f4   : > { %v5772_v3 = vpop.f32.mrf.mxu1  ;;  %6333 = vst.msk [vmem:[#allocation5 + $0x9c] sm:$0xf] %vm6319_vm15, %v6250_v38  ;;  %v6505_v50 = vpop.permute.xlu0 %6504 }
 0x4f5   : > { %v5773_v28 = vadd.f32 %v14410_v19, %v5772_v3  ;;  %7741 = vrot.lane.b32.xlu1 %v14378_v22, %s11482_s25  ;;  %6589 = vst.msk [vmem:[#allocation5 + $0x90] sm:$0xf] %vm6576_vm1, %v6505_v50 }
 0x4f6   : > { %v5774_v8 = vpop.f32.mrf.mxu1  ;;  %7230 = vrot.lane.b32.xlu0 %v14371_v59, %s11478_s24 }
 0x4f7   : > { %v5821_v35 = vmax.f32 %v5773_v28, 0.0  ;;  %v7213_v33 = vpop.permute.xlu1 %7212  ;;  %v8041_v48 = vld [vmem:[#allocation5 + $0x84] sm:$0xff] }
 0x4f8   : > { %v5775_v1 = vpop.f32.mrf.mxu1  ;;  %v11368_v41 = vld [vmem:[#allocation5 + $0x7c] ss:$12 sps:$4 sm:$0xff]   ;;  %7295 = vst.msk [vmem:[#allocation5 + $0xa0] sm:$0xf] %vm6319_vm15, %v7213_v33  ;;  %v10057_v30 = vcombine.low %v8039_v44, %v8041_v48  ;;  %v7468_v39 = vpop.permute.xlu0 %7467 }
 0x4f9   : > { %5896 = vst.msk [vmem:[#allocation4 + $0x151] sm:$0xff] %vm5827_vm3, %v5821_v35  ;;  %v5776_v53 = vadd.f32 %v14410_v19, %v5775_v1  ;;  %6269 = vrot.lane.b32.xlu1 %v14309_v52, %s11478_s24  ;;  %8594 = vmatprep.mubr.bf16.mxu0 %v11368_v41 }
 0x4fa   : > { %v5777_v7 = vpop.f32.mrf.mxu1  ;;  %7551 = vst.msk [vmem:[#allocation5 + $0x94] sm:$0xf] %vm6576_vm1, %v7468_v39  ;;  %8595 = vmatmul.mubr.bf16.gmra.mxu0 %v10057_v30  ;;  %6524 = vrot.lane.b32.xlu0 %v14302_v62, %s11480_s28  ;;  %v7338_v62 = vld [vmem:[#allocation4 + $0x140] sm:$0xff] }
 0x4fb   : > { %v5822_v14 = vmax.f32 %v5776_v53, 0.0  ;;  %v6507_v51 = vpop.permute.xlu1 %6506 }
 0x4fc   : > { %6590 = vst.msk [vmem:[#allocation5 + $0x9c] sm:$0xf] %vm6576_vm1, %v6507_v51  ;;  %v6762_v57 = vpop.permute.xlu0 %6761 }
 0x4fd   : > { %5897 = vst.msk [vmem:[#allocation4 + $0x159] sm:$0xff] %vm5827_vm3, %v5822_v14  ;;  %7232 = vrot.lane.b32.xlu1 %v14373_v23, %s11478_s24 }
 0x4fe   : > { %6846 = vst.msk [vmem:[#allocation5 + $0x90] sm:$0xf] %vm6833_vm2, %v6762_v57  ;;  %7487 = vrot.lane.b32.xlu0 %v14502_v61, %s11480_s28 }
 0x4ff   : > { %v7470_v20 = vpop.permute.xlu1 %7469 }
 0x500   : > { %v7339_v52 = vld [vmem:[#allocation4 + $0x150] sm:$0xff]  ;;  %7552 = vst.msk [vmem:[#allocation5 + $0xa0] sm:$0xf] %vm6576_vm1, %v7470_v20  ;;  %v7724_v26 = vpop.permute.xlu0 %7723 }
 0x501   : > { %v7595_v15 = vld [vmem:[#allocation4 + $0x151] sm:$0xff]  ;;  %v14507_v60 = vpack.c.bf16 %v7339_v52, %v7339_v52  ;;  %6526 = vrot.lane.b32.xlu1 %v14304_v27, %s11480_s28  ;;  %7807 = vst.msk [vmem:[#allocation5 + $0x94] sm:$0xf] %vm6833_vm2, %v7724_v26  ;;  %v14525_v27 = vpack.c.bf16 %v7338_v62, %v7338_v62 }
 0x502   : > { %v14509_v31 = vpack.c.bf16 %v7595_v15, %v7595_v15  ;;  %6781 = vrot.lane.b32.xlu0 %v14441_v12, %s11482_s25 }
 0x503   : > { %6091 = vst.msk [vmem:[#allocation5 + $0x150] sm:$0xf] %vm6062_vm12, %v14507_v60  ;;  %v6764_v4 = vpop.permute.xlu1 %6763 }
 0x504   : > { %7052 = vst.msk [vmem:[#allocation5 + $0x13c] sm:$0xf] %vm6062_vm12, %v14509_v31  ;;  %v7851_v16 = vld [vmem:[#allocation4 + $0x152] sm:$0xff]  ;;  %v7852_v9 = vld [vmem:[#allocation4 + $0x15a] sm:$0xff]  ;;  %v6252_v6 = vpop.permute.xlu0 %6251 }
 0x505   : > { %v7340_v55 = vld [vmem:[#allocation4 + $0x158] sm:$0xff]  ;;  %v14519_v29 = vpack.c.bf16 %v7851_v16, %v7851_v16  ;;  %v14521_v49 = vpack.c.bf16 %v7852_v9, %v7852_v9  ;;  %6847 = vst.msk [vmem:[#allocation5 + $0x9c] sm:$0xf] %vm6833_vm2, %v6764_v4  ;;  %7489 = vrot.lane.b32.xlu1 %v14525_v27, %s11480_s28 }
 0x506   : > { %v14527_v47 = vpack.c.bf16 %v7340_v55, %v7340_v55  ;;  %v7596_v54 = vld [vmem:[#allocation4 + $0x159] sm:$0xff]  ;;  %6334 = vst.msk [vmem:[#allocation5 + $0xa8] sm:$0xf] %vm6319_vm15, %v6252_v6  ;;  %7743 = vrot.lane.b32.xlu0 %v14436_v10, %s11482_s25 }
 0x507   : > { %v14530_v5 = vpack.c.bf16 %v7596_v54, %v7596_v54  ;;  %8011 = vst.msk [vmem:[#allocation5 + $0x128] sm:$0xf] %vm6062_vm12, %v14519_v29  ;;  %8012 = vst.msk [vmem:[#allocation5 + $0x134] sm:$0xf] %vm6062_vm12, %v14521_v49  ;;  %v7726_v21 = vpop.permute.xlu1 %7725 }
 0x508   : > { %6092 = vst.msk [vmem:[#allocation5 + $0x15c] sm:$0xf] %vm6062_vm12, %v14527_v47  ;;  %v7215_v12 = vpop.permute.xlu0 %7214  ;;  %v8043_v13 = vld [vmem:[#allocation5 + $0x90] sm:$0xff] }
 0x509   : > { %7053 = vst.msk [vmem:[#allocation5 + $0x148] sm:$0xf] %vm6062_vm12, %v14530_v5  ;;  %6783 = vrot.lane.b32.xlu1 %v14468_v18, %s11482_s25 }
 0x50a   : > { %7808 = vst.msk [vmem:[#allocation5 + $0xa0] sm:$0xf] %vm6833_vm2, %v7726_v21  ;;  %6271 = vrot.lane.b32.xlu0 %v14362_v24, %s11478_s24 }
 0x50b   : > { %7296 = vst.msk [vmem:[#allocation5 + $0xac] sm:$0xf] %vm6319_vm15, %v7215_v12  ;;  %v6254_v56 = vpop.permute.xlu1 %6253 }
 0x50c   : > { %6335 = vst.msk [vmem:[#allocation5 + $0xb4] sm:$0xf] %vm6319_vm15, %v6254_v56  ;;  %v6509_v45 = vpop.permute.xlu0 %6508 }
 0x50d   : > { %7745 = vrot.lane.b32.xlu1 %v14454_v2, %s11482_s25  ;;  %6591 = vst.msk [vmem:[#allocation5 + $0xa8] sm:$0xf] %vm6576_vm1, %v6509_v45 }
 0x50e   : > { %v11370_v17 = vld [vmem:[#allocation5 + $0x128] ss:$12 sps:$4 sm:$0xff]   ;;  %v5780_v25 = vpop.f32.mrf.mxu1  ;;  %7234 = vrot.lane.b32.xlu0 %v14447_v34, %s11478_s24 }
 0x50f   : > { %11210 = vmatprep.mubr.msk.bf16.mxu1 %vm5827_vm3, %v11370_v17  ;;  %v5781_v32 = vadd.f32 %v14410_v19, %v5780_v25  ;;  %v7217_v46 = vpop.permute.xlu1 %7216 }
 0x510   : > { %7297 = vst.msk [vmem:[#allocation5 + $0xb8] sm:$0xf] %vm6319_vm15, %v7217_v46  ;;  %v5782_v40 = vpop.f32.mrf.mxu1  ;;  %v7472_v36 = vpop.permute.xlu0 %7471 }
 0x511   : > { %v8045_v24 = vld [vmem:[#allocation5 + $0x9c] sm:$0xff]  ;;  %v5823_v63 = vmax.f32 %v5781_v32, 0.0  ;;  %6273 = vrot.lane.b32.xlu1 %v14378_v22, %s11478_s24  ;;  %7553 = vst.msk [vmem:[#allocation5 + $0xac] sm:$0xf] %vm6576_vm1, %v7472_v36 }
 0x512   : > { %v11371_v43 = vld [vmem:[#allocation5 + $0x94] ss:$12 sps:$4 sm:$0xff]   ;;  %v10060_v18 = vcombine.low %v8043_v13, %v8045_v24  ;;  %v5783_v42 = vpop.f32.mrf.mxu1  ;;  %6528 = vrot.lane.b32.xlu0 %v14371_v59, %s11480_s28 }
 0x513   : > { %8602 = vmatprep.mubr.bf16.mxu0 %v11371_v43  ;;  %5898 = vst.msk [vmem:[#allocation4 + $0x169] sm:$0xff] %vm5827_vm3, %v5823_v63  ;;  %v5784_v11 = vadd.f32 %v14410_v19, %v5783_v42  ;;  %v6511_v3 = vpop.permute.xlu1 %6510 }
 0x514   : > { %8603 = vmatmul.mubr.bf16.gmra.mxu0 %v10060_v18  ;;  %6592 = vst.msk [vmem:[#allocation5 + $0xb4] sm:$0xf] %vm6576_vm1, %v6511_v3  ;;  %v5785_v28 = vpop.f32.mrf.mxu1  ;;  %v6766_v22 = vpop.permute.xlu0 %6765 }
 0x515   : > { %v5824_v38 = vmax.f32 %v5784_v11, 0.0  ;;  %7236 = vrot.lane.b32.xlu1 %v14449_v37, %s11478_s24  ;;  %6848 = vst.msk [vmem:[#allocation5 + $0xa8] sm:$0xf] %vm6833_vm2, %v6766_v22 }
 0x516   : > { %7491 = vrot.lane.b32.xlu0 %v14507_v60, %s11480_s28 }
 0x517   : > { %5899 = vst.msk [vmem:[#allocation4 + $0x171] sm:$0xff] %vm5827_vm3, %v5824_v38  ;;  %v7474_v8 = vpop.permute.xlu1 %7473 }
 0x518   : > { %7554 = vst.msk [vmem:[#allocation5 + $0xb8] sm:$0xf] %vm6576_vm1, %v7474_v8  ;;  %v7728_v59 = vpop.permute.xlu0 %7727 }
 0x519   : > { %6530 = vrot.lane.b32.xlu1 %v14373_v23, %s11480_s28  ;;  %7809 = vst.msk [vmem:[#allocation5 + $0xac] sm:$0xf] %vm6833_vm2, %v7728_v59 }
 0x51a   : > { %v7341_v35 = vld [vmem:[#allocation4 + $0x168] sm:$0xff]  ;;  %6785 = vrot.lane.b32.xlu0 %v14502_v61, %s11482_s25 }
 0x51b   : > { %v7597_v50 = vld [vmem:[#allocation4 + $0x169] sm:$0xff]  ;;  %v6768_v1 = vpop.permute.xlu1 %6767  ;;  %v14580_v53 = vpack.c.bf16 %v7341_v35, %v7341_v35 }
 0x51c   : > { %v14582_v33 = vpack.c.bf16 %v7597_v50, %v7597_v50  ;;  %6849 = vst.msk [vmem:[#allocation5 + $0xb4] sm:$0xf] %vm6833_vm2, %v6768_v1  ;;  %v6256_v44 = vpop.permute.xlu0 %6255 }
 0x51d   : > { %7493 = vrot.lane.b32.xlu1 %v14527_v47, %s11480_s28  ;;  %6093 = vst.msk [vmem:[#allocation5 + $0x168] sm:$0xf] %vm6062_vm12, %v14580_v53 }
 0x51e   : > { %7054 = vst.msk [vmem:[#allocation5 + $0x154] sm:$0xf] %vm6062_vm12, %v14582_v33  ;;  %v7853_v23 = vld [vmem:[#allocation4 + $0x16a] sm:$0xff]  ;;  %v7854_v48 = vld [vmem:[#allocation4 + $0x172] sm:$0xff]  ;;  %7747 = vrot.lane.b32.xlu0 %v14509_v31, %s11482_s25 }
 0x51f   : > { %6336 = vst.msk [vmem:[#allocation5 + $0xc0] sm:$0xf] %vm6319_vm15, %v6256_v44  ;;  %v7342_v41 = vld [vmem:[#allocation4 + $0x170] sm:$0xff]  ;;  %v14592_v7 = vpack.c.bf16 %v7853_v23, %v7853_v23  ;;  %v14594_v30 = vpack.c.bf16 %v7854_v48, %v7854_v48  ;;  %v7730_v14 = vpop.permute.xlu1 %7729 }
 0x520   : > { %v14598_v39 = vpack.c.bf16 %v7342_v41, %v7342_v41  ;;  %v7598_v58 = vld [vmem:[#allocation4 + $0x171] sm:$0xff]  ;;  %7810 = vst.msk [vmem:[#allocation5 + $0xb8] sm:$0xf] %vm6833_vm2, %v7730_v14  ;;  %v7219_v57 = vpop.permute.xlu0 %7218 }
 0x521   : > { %v14601_v51 = vpack.c.bf16 %v7598_v58, %v7598_v58  ;;  %8013 = vst.msk [vmem:[#allocation5 + $0x140] sm:$0xf] %vm6062_vm12, %v14592_v7  ;;  %8014 = vst.msk [vmem:[#allocation5 + $0x14c] sm:$0xf] %vm6062_vm12, %v14594_v30  ;;  %6787 = vrot.lane.b32.xlu1 %v14525_v27, %s11482_s25  ;;  %v8047_v20 = vld [vmem:[#allocation5 + $0xa8] sm:$0xff] }
 0x522   : > { %6094 = vst.msk [vmem:[#allocation5 + $0x174] sm:$0xf] %vm6062_vm12, %v14598_v39  ;;  %6275 = vrot.lane.b32.xlu0 %v14436_v10, %s11478_s24 }
 0x523   : > { %7298 = vst.msk [vmem:[#allocation5 + $0xc4] sm:$0xf] %vm6319_vm15, %v7219_v57  ;;  %v6258_v61 = vpop.permute.xlu1 %6257 }
 0x524   : > { %7055 = vst.msk [vmem:[#allocation5 + $0x160] sm:$0xf] %vm6062_vm12, %v14601_v51  ;;  %v6513_v52 = vpop.permute.xlu0 %6512 }
 0x525   : > { %6337 = vst.msk [vmem:[#allocation5 + $0xcc] sm:$0xf] %vm6319_vm15, %v6258_v61  ;;  %7749 = vrot.lane.b32.xlu1 %v14530_v5, %s11482_s25 }
 0x526   : > { %6593 = vst.msk [vmem:[#allocation5 + $0xc0] sm:$0xf] %vm6576_vm1, %v6513_v52  ;;  %7238 = vrot.lane.b32.xlu0 %v14519_v29, %s11478_s24 }
 0x527   : > { %v7221_v15 = vpop.permute.xlu1 %7220  ;;  %v8049_v62 = vld [vmem:[#allocation5 + $0xb4] sm:$0xff] }
 0x528   : > { %v11373_v26 = vld [vmem:[#allocation5 + $0xac] ss:$12 sps:$4 sm:$0xff]   ;;  %7299 = vst.msk [vmem:[#allocation5 + $0xd0] sm:$0xf] %vm6319_vm15, %v7221_v15  ;;  %v10063_v16 = vcombine.low %v8047_v20, %v8049_v62  ;;  %v7476_v10 = vpop.permute.xlu0 %7475 }
 0x529   : > { %v11375_v9 = vld [vmem:[#allocation5 + $0x140] ss:$12 sps:$4 sm:$0xff]   ;;  %6277 = vrot.lane.b32.xlu1 %v14454_v2, %s11478_s24  ;;  %8610 = vmatprep.mubr.bf16.mxu0 %v11373_v26  ;;  %7555 = vst.msk [vmem:[#allocation5 + $0xc4] sm:$0xf] %vm6576_vm1, %v7476_v10  ;;  %v7858_v20 = vld [vmem:[#allocation4 + $0x1a2] sm:$0xff] }
 0x52a   : > { %8611 = vmatmul.mubr.bf16.gmra.mxu0 %v10063_v16  ;;  %11211 = vmatmul.mubr.msk.bf16.gmra.mxu1 %vm5827_vm3, %v11375_v9  ;;  %v7857_v15 = vld [vmem:[#allocation4 + $0x19a] sm:$0xff]  ;;  %v10994_v26 = vpack.c.bf16 %v7858_v20, %v7858_v20 }
 0x52b   : > { %v5788_v55 = vpop.f32.mrf.mxu1  ;;  %v6515_v27 = vpop.permute.xlu1 %6514  ;;  %6532 = vrot.lane.b32.xlu0 %v14447_v34, %s11480_s28  ;;  %v10993_v62 = vpack.c.bf16 %v7857_v15, %v7857_v15 }
 0x52c   : > { %v5789_v4 = vadd.f32 %v14410_v19, %v5788_v55  ;;  %6594 = vst.msk [vmem:[#allocation5 + $0xcc] sm:$0xf] %vm6576_vm1, %v6515_v27  ;;  %v6770_v2 = vpop.permute.xlu0 %6769 }
 0x52d   : > { %v5790_v54 = vpop.f32.mrf.mxu1  ;;  %7240 = vrot.lane.b32.xlu1 %v14521_v49, %s11478_s24  ;;  %6850 = vst.msk [vmem:[#allocation5 + $0xc0] sm:$0xf] %vm6833_vm2, %v6770_v2 }
 0x52e   : > { %v5825_v6 = vmax.f32 %v5789_v4, 0.0  ;;  %8017 = vst.msk [vmem:[#allocation5 + $0x170] sm:$0xf] %vm6062_vm12, %v10993_v62  ;;  %8018 = vst.msk [vmem:[#allocation5 + $0x17c] sm:$0xf] %vm6062_vm12, %v10994_v26 }
 0x52f   : > { %v5791_v21 = vpop.f32.mrf.mxu1  ;;  %v7478_v56 = vpop.permute.xlu1 %7477  ;;  %7495 = vrot.lane.b32.xlu0 %v14580_v53, %s11480_s28 }
 0x530   : > { %5900 = vst.msk [vmem:[#allocation4 + $0x181] sm:$0xff] %vm5827_vm3, %v5825_v6  ;;  %v5792_v12 = vadd.f32 %v14410_v19, %v5791_v21  ;;  %v7732_v45 = vpop.permute.xlu0 %7731 }
 0x531   : > { %7556 = vst.msk [vmem:[#allocation5 + $0xd0] sm:$0xf] %vm6576_vm1, %v7478_v56  ;;  %v5793_v34 = vpop.f32.mrf.mxu1  ;;  %6534 = vrot.lane.b32.xlu1 %v14449_v37, %s11480_s28 }
 0x532   : > { %v5826_v17 = vmax.f32 %v5792_v12, 0.0  ;;  %7811 = vst.msk [vmem:[#allocation5 + $0xc4] sm:$0xf] %vm6833_vm2, %v7732_v45  ;;  %v7346_v45 = vld [vmem:[#allocation4 + $0x1a0] sm:$0xff] }
 0x533   : > { %v6772_v25 = vpop.permute.xlu1 %6771  ;;  %6789 = vrot.lane.b32.xlu0 %v14507_v60, %s11482_s25 }
 0x534   : > { %5901 = vst.msk [vmem:[#allocation4 + $0x189] sm:$0xff] %vm5827_vm3, %v5826_v17  ;;  %v6260_v19 = vpop.permute.xlu0 %6259 }
 0x535   : > { %6851 = vst.msk [vmem:[#allocation5 + $0xcc] sm:$0xf] %vm6833_vm2, %v6772_v25  ;;  %7497 = vrot.lane.b32.xlu1 %v14598_v39, %s11480_s28 }
 0x536   : > { %6338 = vst.msk [vmem:[#allocation5 + $0xd8] sm:$0xf] %vm6319_vm15, %v6260_v19  ;;  %v7601_v19 = vld [vmem:[#allocation4 + $0x199] sm:$0xff] }
 0x537   : > { %v7599_v32 = vld [vmem:[#allocation4 + $0x181] sm:$0xff]  ;;  %v7734_v46 = vpop.permute.xlu1 %7733  ;;  %7751 = vrot.lane.b32.xlu0 %v14582_v33, %s11482_s25 }
 0x538   : > { %v14651_v37 = vpack.c.bf16 %v7599_v32, %v7599_v32  ;;  %7812 = vst.msk [vmem:[#allocation5 + $0xd0] sm:$0xf] %vm6833_vm2, %v7734_v46  ;;  %v7223_v60 = vpop.permute.xlu0 %7222  ;;  %v7343_v8 = vld [vmem:[#allocation4 + $0x180] sm:$0xff] }
 0x539   : > { %6791 = vrot.lane.b32.xlu1 %v14527_v47, %s11482_s25  ;;  %7300 = vst.msk [vmem:[#allocation5 + $0xdc] sm:$0xf] %vm6319_vm15, %v7223_v60  ;;  %v8051_v42 = vld [vmem:[#allocation5 + $0xc0] sm:$0xff]  ;;  %v14690_v44 = vpack.c.bf16 %v7343_v8, %v7343_v8 }
 0x53a   : > { %7056 = vst.msk [vmem:[#allocation5 + $0x16c] sm:$0xf] %vm6062_vm12, %v14651_v37 }
 0x53b   : > { %v7855_v13 = vld [vmem:[#allocation4 + $0x182] sm:$0xff]  ;;  %v7856_v24 = vld [vmem:[#allocation4 + $0x18a] sm:$0xff]  ;;  %v6262_v18 = vpop.permute.xlu1 %6261  ;;  %6279 = vrot.lane.b32.xlu0 %v14509_v31, %s11478_s24 }
 0x53c   : > { %v14659_v43 = vpack.c.bf16 %v7855_v13, %v7855_v13  ;;  %v14661_v40 = vpack.c.bf16 %v7856_v24, %v7856_v24  ;;  %v7600_v63 = vld [vmem:[#allocation4 + $0x189] sm:$0xff]  ;;  %6339 = vst.msk [vmem:[#allocation5 + $0xe4] sm:$0xf] %vm6319_vm15, %v6262_v18  ;;  %v6517_v36 = vpop.permute.xlu0 %6516  ;;  %v10961_v13 = vpack.c.bf16 %v7601_v19, %v7601_v19 }
 0x53d   : > { %v14666_v47 = vpack.c.bf16 %v7600_v63, %v7600_v63  ;;  %7753 = vrot.lane.b32.xlu1 %v14601_v51, %s11482_s25  ;;  %6595 = vst.msk [vmem:[#allocation5 + $0xd8] sm:$0xf] %vm6576_vm1, %v6517_v36  ;;  %v7344_v41 = vld [vmem:[#allocation4 + $0x188] sm:$0xff] }
 0x53e   : > { %8015 = vst.msk [vmem:[#allocation5 + $0x158] sm:$0xf] %vm6062_vm12, %v14659_v43  ;;  %8016 = vst.msk [vmem:[#allocation5 + $0x164] sm:$0xf] %vm6062_vm12, %v14661_v40  ;;  %v14704_v61 = vpack.c.bf16 %v7344_v41, %v7344_v41 }
 0x53f   : > { %7057 = vst.msk [vmem:[#allocation5 + $0x178] sm:$0xf] %vm6062_vm12, %v14666_v47  ;;  %v7225_v31 = vpop.permute.xlu1 %7224  ;;  %7242 = vrot.lane.b32.xlu0 %v14592_v7, %s11478_s24  ;;  %v8053_v11 = vld [vmem:[#allocation5 + $0xcc] sm:$0xff] }
 0x540   : > { %v11376_v3 = vld [vmem:[#allocation5 + $0xc4] ss:$12 sps:$4 sm:$0xff]   ;;  %7301 = vst.msk [vmem:[#allocation5 + $0xe8] sm:$0xf] %vm6319_vm15, %v7225_v31  ;;  %v10066_v28 = vcombine.low %v8051_v42, %v8053_v11  ;;  %v7480_v38 = vpop.permute.xlu0 %7479 }
 0x541   : > { %6281 = vrot.lane.b32.xlu1 %v14530_v5, %s11478_s24  ;;  %8618 = vmatprep.mubr.bf16.mxu0 %v11376_v3  ;;  %7557 = vst.msk [vmem:[#allocation5 + $0xdc] sm:$0xf] %vm6576_vm1, %v7480_v38  ;;  %v11029_v22 = vpop.f32.mrf.mxu0 }
 0x542   : > { %8619 = vmatmul.mubr.bf16.gmra.mxu0 %v10066_v28 }
 0x543   : > { %v6519_v59 = vpop.permute.xlu1 %6518  ;;  %6536 = vrot.lane.b32.xlu0 %v14519_v29, %s11480_s28  ;;  %v11030_v35 = vpop.f32.mrf.mxu0 }
 0x544   : > { %6596 = vst.msk [vmem:[#allocation5 + $0xe4] sm:$0xf] %vm6576_vm1, %v6519_v59  ;;  %v14686_v1 = vadd.f32 %v11030_v35, %v11029_v22  ;;  %v6774_v5 = vpop.permute.xlu0 %6773 }
 0x545   : > { %v11378_v50 = vld [vmem:[#allocation5 + $0x158] ss:$12 sps:$4 sm:$0xff]   ;;  %7244 = vrot.lane.b32.xlu1 %v14594_v30, %s11478_s24  ;;  %6852 = vst.msk [vmem:[#allocation5 + $0xd8] sm:$0xf] %vm6833_vm2, %v6774_v5  ;;  %v11032_v23 = vpop.f32.mrf.mxu0 }
 0x546   : > { %11214 = vmatprep.mubr.msk.bf16.mxu1 %vm5827_vm3, %v11378_v50 }
 0x547   : > { %v7482_v48 = vpop.permute.xlu1 %7481  ;;  %7499 = vrot.lane.b32.xlu0 %v14690_v44, %s11480_s28  ;;  %v11033_v29 = vpop.f32.mrf.mxu0 }
 0x548   : > { %7558 = vst.msk [vmem:[#allocation5 + $0xe8] sm:$0xf] %vm6576_vm1, %v7482_v48  ;;  %v14697_v14 = vadd.f32 %v11033_v29, %v11032_v23  ;;  %v7736_v58 = vpop.permute.xlu0 %7735 }
 0x549   : > { %6538 = vrot.lane.b32.xlu1 %v14521_v49, %s11480_s28  ;;  %7813 = vst.msk [vmem:[#allocation5 + $0xdc] sm:$0xf] %vm6833_vm2, %v7736_v58 }
 0x54b   : > { %v6776_v57 = vpop.permute.xlu1 %6775  ;;  %6793 = vrot.lane.b32.xlu0 %v14580_v53, %s11482_s25 }
 0x54c   : > { %6853 = vst.msk [vmem:[#allocation5 + $0xe4] sm:$0xf] %vm6833_vm2, %v6776_v57  ;;  %v6264_v52 = vpop.permute.xlu0 %6263 }
 0x54d   : > { %7501 = vrot.lane.b32.xlu1 %v14704_v61, %s11480_s28  ;;  %6340 = vst.msk [vmem:[#allocation5 + $0xf0] sm:$0xf] %vm6319_vm15, %v6264_v52 }
 0x54f   : > { %v7738_v49 = vpop.permute.xlu1 %7737  ;;  %7755 = vrot.lane.b32.xlu0 %v14651_v37, %s11482_s25  ;;  %v10930_v37 = vpack.c.bf16 %v7346_v45, %v7346_v45 }
 0x550   : > { %7814 = vst.msk [vmem:[#allocation5 + $0xe8] sm:$0xf] %vm6833_vm2, %v7738_v49  ;;  %v7227_v53 = vpop.permute.xlu0 %7226  ;;  %v8055_v55 = vld [vmem:[#allocation5 + $0xd8] sm:$0xff] }
 0x551   : > { %6795 = vrot.lane.b32.xlu1 %v14598_v39, %s11482_s25  ;;  %7302 = vst.msk [vmem:[#allocation5 + $0xf4] sm:$0xf] %vm6319_vm15, %v7227_v53  ;;  %v7345_v39 = vld [vmem:[#allocation4 + $0x198] sm:$0xff] }
 0x552   : > { %v10929_v12 = vpack.c.bf16 %v7345_v39, %v7345_v39 }
 0x553   : > { %v6266_v16 = vpop.permute.xlu1 %6265  ;;  %6283 = vrot.lane.b32.xlu0 %v14582_v33, %s11478_s24  ;;  %v11391_v33 = vld [vmem:[#allocation5 + $0x170] ss:$12 sps:$4 sm:$0xff]  }
 0x554   : > { %6341 = vst.msk [vmem:[#allocation5 + $0xfc] sm:$0xf] %vm6319_vm15, %v6266_v16  ;;  %v6521_v9 = vpop.permute.xlu0 %6520  ;;  %11215 = vmatmul.mubr.msk.bf16.gmra.mxu1 %vm5827_vm3, %v11391_v33 }
 0x555   : > { %7757 = vrot.lane.b32.xlu1 %v14666_v47, %s11482_s25  ;;  %6597 = vst.msk [vmem:[#allocation5 + $0xf0] sm:$0xf] %vm6576_vm1, %v6521_v9 }
 0x557   : > { %v7229_v10 = vpop.permute.xlu1 %7228  ;;  %7246 = vrot.lane.b32.xlu0 %v14659_v43, %s11478_s24  ;;  %v8057_v4 = vld [vmem:[#allocation5 + $0xe4] sm:$0xff]  ;;  %v7602_v43 = vld [vmem:[#allocation4 + $0x1a1] sm:$0xff] }
 0x558   : > { %v11379_v27 = vld [vmem:[#allocation5 + $0xdc] ss:$12 sps:$4 sm:$0xff]   ;;  %7303 = vst.msk [vmem:[#allocation5 + $0x100] sm:$0xf] %vm6319_vm15, %v7229_v10  ;;  %v10069_v54 = vcombine.low %v8055_v55, %v8057_v4  ;;  %v7484_v6 = vpop.permute.xlu0 %7483  ;;  %v10962_v18 = vpack.c.bf16 %v7602_v43, %v7602_v43 }
 0x559   : > { %6285 = vrot.lane.b32.xlu1 %v14601_v51, %s11478_s24  ;;  %8626 = vmatprep.mubr.bf16.mxu0 %v11379_v27  ;;  %7559 = vst.msk [vmem:[#allocation5 + $0xf4] sm:$0xf] %vm6576_vm1, %v7484_v6 }
 0x55a   : > { %v11035_v2 = vpop.f32.mrf.mxu0  ;;  %8627 = vmatmul.mubr.bf16.gmra.mxu0 %v10069_v54 }
 0x55b   : > { %v6523_v21 = vpop.permute.xlu1 %6522  ;;  %6540 = vrot.lane.b32.xlu0 %v14592_v7, %s11480_s28 }
 0x55c   : > { %6598 = vst.msk [vmem:[#allocation5 + $0xfc] sm:$0xf] %vm6576_vm1, %v6523_v21  ;;  %v11036_v56 = vpop.f32.mrf.mxu0  ;;  %v6778_v34 = vpop.permute.xlu0 %6777 }
 0x55d   : > { %7248 = vrot.lane.b32.xlu1 %v14661_v40, %s11478_s24  ;;  %v14736_v51 = vadd.f32 %v11036_v56, %v11035_v2  ;;  %6854 = vst.msk [vmem:[#allocation5 + $0xf0] sm:$0xf] %vm6833_vm2, %v6778_v34 }
 0x55e   : > { %v11038_v17 = vpop.f32.mrf.mxu0 }
 0x55f   : > { %v7486_v25 = vpop.permute.xlu1 %7485  ;;  %7503 = vrot.lane.b32.xlu0 %v10929_v12, %s11480_s28 }
 0x560   : > { %7560 = vst.msk [vmem:[#allocation5 + $0x100] sm:$0xf] %vm6576_vm1, %v7486_v25  ;;  %v11039_v7 = vpop.f32.mrf.mxu0  ;;  %v7740_v46 = vpop.permute.xlu0 %7739 }
 0x561   : > { %6542 = vrot.lane.b32.xlu1 %v14594_v30, %s11480_s28  ;;  %v14743_v32 = vadd.f32 %v11039_v7, %v11038_v17  ;;  %7815 = vst.msk [vmem:[#allocation5 + $0xf4] sm:$0xf] %vm6833_vm2, %v7740_v46 }
 0x563   : > { %v6780_v60 = vpop.permute.xlu1 %6779  ;;  %6797 = vrot.lane.b32.xlu0 %v14690_v44, %s11482_s25 }
 0x564   : > { %6855 = vst.msk [vmem:[#allocation5 + $0xfc] sm:$0xf] %vm6833_vm2, %v6780_v60  ;;  %v6268_v24 = vpop.permute.xlu0 %6267 }
 0x565   : > { %7505 = vrot.lane.b32.xlu1 %v10930_v37, %s11480_s28  ;;  %6342 = vst.msk [vmem:[#allocation5 + $0x108] sm:$0xf] %vm6319_vm15, %v6268_v24 }
 0x567   : > { %v7742_v30 = vpop.permute.xlu1 %7741  ;;  %7759 = vrot.lane.b32.xlu0 %v10961_v13, %s11482_s25 }
 0x568   : > { %7816 = vst.msk [vmem:[#allocation5 + $0x100] sm:$0xf] %vm6833_vm2, %v7742_v30  ;;  %v7231_v40 = vpop.permute.xlu0 %7230  ;;  %v8059_v31 = vld [vmem:[#allocation5 + $0xf0] sm:$0xff] }
 0x569   : > { %6799 = vrot.lane.b32.xlu1 %v14704_v61, %s11482_s25  ;;  %7304 = vst.msk [vmem:[#allocation5 + $0x10c] sm:$0xf] %vm6319_vm15, %v7231_v40 }
 0x56b   : > { %v6270_v63 = vpop.permute.xlu1 %6269 }
 0x56c   : > { %6343 = vst.msk [vmem:[#allocation5 + $0x114] sm:$0xf] %vm6319_vm15, %v6270_v63  ;;  %v6525_v47 = vpop.permute.xlu0 %6524 }
 0x56d   : > { %7761 = vrot.lane.b32.xlu1 %v10962_v18, %s11482_s25  ;;  %6599 = vst.msk [vmem:[#allocation5 + $0x108] sm:$0xf] %vm6576_vm1, %v6525_v47  ;;  %s15027_s25 = scalar_lea.hbm %s15077_s9, %s10127_s14 }
 0x56f   : > { %v7233_v36 = vpop.permute.xlu1 %7232  ;;  %v8061_v42 = vld [vmem:[#allocation5 + $0xfc] sm:$0xff] }
 0x570   : > { %v11381_v11 = vld [vmem:[#allocation5 + $0xf4] ss:$12 sps:$4 sm:$0xff]   ;;  %7305 = vst.msk [vmem:[#allocation5 + $0x118] sm:$0xf] %vm6319_vm15, %v7233_v36  ;;  %v10072_v3 = vcombine.low %v8059_v31, %v8061_v42  ;;  %v7488_v28 = vpop.permute.xlu0 %7487 }
 0x571   : > { %8634 = vmatprep.mubr.bf16.mxu0 %v11381_v11  ;;  %7561 = vst.msk [vmem:[#allocation5 + $0x10c] sm:$0xf] %vm6576_vm1, %v7488_v28 }
 0x572   : > { %v11041_v38 = vpop.f32.mrf.mxu0  ;;  %8635 = vmatmul.mubr.bf16.gmra.mxu0 %v10072_v3 }
 0x573   : > { %v6527_v22 = vpop.permute.xlu1 %6526 }
 0x574   : > { %6600 = vst.msk [vmem:[#allocation5 + $0x114] sm:$0xf] %vm6576_vm1, %v6527_v22  ;;  %v11042_v8 = vpop.f32.mrf.mxu0  ;;  %v6782_v59 = vpop.permute.xlu0 %6781 }
 0x575   : > { %v14762_v35 = vadd.f32 %v11042_v8, %v11041_v38  ;;  %6856 = vst.msk [vmem:[#allocation5 + $0x108] sm:$0xf] %vm6833_vm2, %v6782_v59 }
 0x576   : > { %v11044_v50 = vpop.f32.mrf.mxu0 }
 0x577   : > { %v7490_v5 = vpop.permute.xlu1 %7489 }
 0x578   : > { %7562 = vst.msk [vmem:[#allocation5 + $0x118] sm:$0xf] %vm6576_vm1, %v7490_v5  ;;  %v11045_v44 = vpop.f32.mrf.mxu0  ;;  %v7744_v23 = vpop.permute.xlu0 %7743 }
 0x579   : > { %v14766_v48 = vadd.f32 %v11045_v44, %v11044_v50  ;;  %7817 = vst.msk [vmem:[#allocation5 + $0x10c] sm:$0xf] %vm6833_vm2, %v7744_v23 }
 0x57b   : > { %v6784_v29 = vpop.permute.xlu1 %6783 }
 0x57c   : > { %6857 = vst.msk [vmem:[#allocation5 + $0x114] sm:$0xf] %vm6833_vm2, %v6784_v29  ;;  %v6272_v41 = vpop.permute.xlu0 %6271 }
 0x57d   : > { %6344 = vst.msk [vmem:[#allocation5 + $0x120] sm:$0xf] %vm6319_vm15, %v6272_v41 }
 0x57f   : > { %v7746_v58 = vpop.permute.xlu1 %7745 }
 0x580   : > { %7818 = vst.msk [vmem:[#allocation5 + $0x118] sm:$0xf] %vm6833_vm2, %v7746_v58  ;;  %v7235_v57 = vpop.permute.xlu0 %7234  ;;  %v8063_v20 = vld [vmem:[#allocation5 + $0x108] sm:$0xff] }
 0x581   : > { %7306 = vst.msk [vmem:[#allocation5 + $0x124] sm:$0xf] %vm6319_vm15, %v7235_v57 }
 0x583   : > { %v6274_v61 = vpop.permute.xlu1 %6273 }
 0x584   : > { %6345 = vst.msk [vmem:[#allocation5 + $0x12c] sm:$0xf] %vm6319_vm15, %v6274_v61  ;;  %v6529_v52 = vpop.permute.xlu0 %6528 }
 0x585   : > { %6601 = vst.msk [vmem:[#allocation5 + $0x120] sm:$0xf] %vm6576_vm1, %v6529_v52 }
 0x587   : > { %v7237_v15 = vpop.permute.xlu1 %7236  ;;  %v8065_v49 = vld [vmem:[#allocation5 + $0x114] sm:$0xff] }
 0x588   : > { %v11383_v62 = vld [vmem:[#allocation5 + $0x10c] ss:$12 sps:$4 sm:$0xff]   ;;  %7307 = vst.msk [vmem:[#allocation5 + $0x130] sm:$0xf] %vm6319_vm15, %v7237_v15  ;;  %v10075_v26 = vcombine.low %v8063_v20, %v8065_v49  ;;  %v7492_v53 = vpop.permute.xlu0 %7491 }
 0x589   : > { %8642 = vmatprep.mubr.bf16.mxu0 %v11383_v62  ;;  %7563 = vst.msk [vmem:[#allocation5 + $0x124] sm:$0xf] %vm6576_vm1, %v7492_v53 }
 0x58a   : > { %8643 = vmatmul.mubr.bf16.gmra.mxu0 %v10075_v26 }
 0x58b   : > { %v6531_v9 = vpop.permute.xlu1 %6530 }
 0x58c   : > { %v11047_v16 = vpop.f32.mrf.mxu0  ;;  %6602 = vst.msk [vmem:[#allocation5 + $0x12c] sm:$0xf] %vm6576_vm1, %v6531_v9  ;;  %v6786_v10 = vpop.permute.xlu0 %6785 }
 0x58d   : > { %6858 = vst.msk [vmem:[#allocation5 + $0x120] sm:$0xf] %vm6833_vm2, %v6786_v10 }
 0x58e   : > { %v11048_v39 = vpop.f32.mrf.mxu0 }
 0x58f   : > { %v14778_v55 = vadd.f32 %v11048_v39, %v11047_v16  ;;  %v7494_v27 = vpop.permute.xlu1 %7493 }
 0x590   : > { %v11050_v4 = vpop.f32.mrf.mxu0  ;;  %7564 = vst.msk [vmem:[#allocation5 + $0x130] sm:$0xf] %vm6576_vm1, %v7494_v27  ;;  %v7748_v33 = vpop.permute.xlu0 %7747 }
 0x591   : > { %7819 = vst.msk [vmem:[#allocation5 + $0x124] sm:$0xf] %vm6833_vm2, %v7748_v33 }
 0x592   : > { %v11051_v54 = vpop.f32.mrf.mxu0 }
 0x593   : > { %v14782_v6 = vadd.f32 %v11051_v54, %v11050_v4  ;;  %v6788_v2 = vpop.permute.xlu1 %6787 }
 0x594   : > { %6859 = vst.msk [vmem:[#allocation5 + $0x12c] sm:$0xf] %vm6833_vm2, %v6788_v2  ;;  %v6276_v21 = vpop.permute.xlu0 %6275 }
 0x595   : > { %6346 = vst.msk [vmem:[#allocation5 + $0x138] sm:$0xf] %vm6319_vm15, %v6276_v21 }
 0x597   : > { %v7750_v12 = vpop.permute.xlu1 %7749 }
 0x598   : > { %7820 = vst.msk [vmem:[#allocation5 + $0x130] sm:$0xf] %vm6833_vm2, %v7750_v12  ;;  %v7239_v56 = vpop.permute.xlu0 %7238  ;;  %v8067_v25 = vld [vmem:[#allocation5 + $0x120] sm:$0xff] }
 0x599   : > { %7308 = vst.msk [vmem:[#allocation5 + $0x13c] sm:$0xf] %vm6319_vm15, %v7239_v56 }
 0x59b   : > { %v6278_v34 = vpop.permute.xlu1 %6277 }
 0x59c   : > { %6347 = vst.msk [vmem:[#allocation5 + $0x144] sm:$0xf] %vm6319_vm15, %v6278_v34 }
 0x59d   : > { %v6533_v17 = vpop.permute.xlu0 %6532 }
 0x59e   : > { %6603 = vst.msk [vmem:[#allocation5 + $0x138] sm:$0xf] %vm6576_vm1, %v6533_v17 }
 0x59f   : > { %v7241_v45 = vpop.permute.xlu1 %7240  ;;  %v8069_v7 = vld [vmem:[#allocation5 + $0x12c] sm:$0xff] }
 0x5a0   : > { %v11385_v19 = vld [vmem:[#allocation5 + $0x124] ss:$12 sps:$4 sm:$0xff]   ;;  %7309 = vst.msk [vmem:[#allocation5 + $0x148] sm:$0xf] %vm6319_vm15, %v7241_v45  ;;  %v10078_v46 = vcombine.low %v8067_v25, %v8069_v7 }
 0x5a1   : > { %v7496_v37 = vpop.permute.xlu0 %7495  ;;  %8650 = vmatprep.mubr.bf16.mxu0 %v11385_v19 }
 0x5a2   : > { %7565 = vst.msk [vmem:[#allocation5 + $0x13c] sm:$0xf] %vm6576_vm1, %v7496_v37  ;;  %v11053_v60 = vpop.f32.mrf.mxu0  ;;  %8651 = vmatmul.mubr.bf16.gmra.mxu0 %v10078_v46 }
 0x5a3   : > { %v6535_v13 = vpop.permute.xlu1 %6534 }
 0x5a4   : > { %6604 = vst.msk [vmem:[#allocation5 + $0x144] sm:$0xf] %vm6576_vm1, %v6535_v13  ;;  %v11054_v24 = vpop.f32.mrf.mxu0 }
 0x5a5   : > { %v6790_v43 = vpop.permute.xlu0 %6789  ;;  %v14794_v30 = vadd.f32 %v11054_v24, %v11053_v60 }
 0x5a6   : > { %6860 = vst.msk [vmem:[#allocation5 + $0x138] sm:$0xf] %vm6833_vm2, %v6790_v43  ;;  %v11056_v40 = vpop.f32.mrf.mxu0  ;;  %v11395_v43 = vld [vmem:[#allocation5 + $0x8] ss:$12 sps:$4 sm:$0xff]  }
 0x5a7   : > { %v7498_v18 = vpop.permute.xlu1 %7497 }
 0x5a8   : > { %7566 = vst.msk [vmem:[#allocation5 + $0x148] sm:$0xf] %vm6576_vm1, %v7498_v18  ;;  %v11057_v63 = vpop.f32.mrf.mxu0 }
 0x5a9   : > { %v7752_v47 = vpop.permute.xlu0 %7751  ;;  %v14798_v36 = vadd.f32 %v11057_v63, %v11056_v40 }
 0x5aa   : > { %7821 = vst.msk [vmem:[#allocation5 + $0x13c] sm:$0xf] %vm6833_vm2, %v7752_v47 }
 0x5ab   : > { %v6792_v31 = vpop.permute.xlu1 %6791 }
 0x5ac   : > { %6861 = vst.msk [vmem:[#allocation5 + $0x144] sm:$0xf] %vm6833_vm2, %v6792_v31 }
 0x5ad   : > { %v6280_v42 = vpop.permute.xlu0 %6279 }
 0x5ae   : > { %6348 = vst.msk [vmem:[#allocation5 + $0x150] sm:$0xf] %vm6319_vm15, %v6280_v42  ;;  %v11396_v42 = vld [vmem:[#allocation5 + $0x20] ss:$12 sps:$4 sm:$0xff]  }
 0x5af   : > { %v7754_v11 = vpop.permute.xlu1 %7753 }
 0x5b0   : > { %7822 = vst.msk [vmem:[#allocation5 + $0x148] sm:$0xf] %vm6833_vm2, %v7754_v11 }
 0x5b1   : > { %v7243_v3 = vpop.permute.xlu0 %7242  ;;  %v8071_v8 = vld [vmem:[#allocation5 + $0x138] sm:$0xff] }
 0x5b2   : > { %7310 = vst.msk [vmem:[#allocation5 + $0x154] sm:$0xf] %vm6319_vm15, %v7243_v3 }
 0x5b3   : > { %v6282_v28 = vpop.permute.xlu1 %6281 }
 0x5b4   : > { %6349 = vst.msk [vmem:[#allocation5 + $0x15c] sm:$0xf] %vm6319_vm15, %v6282_v28 }
 0x5b5   : > { %v6537_v38 = vpop.permute.xlu0 %6536 }
 0x5b6   : > { %6605 = vst.msk [vmem:[#allocation5 + $0x150] sm:$0xf] %vm6576_vm1, %v6537_v38 }
 0x5b7   : > { %v7245_v22 = vpop.permute.xlu1 %7244  ;;  %v8073_v59 = vld [vmem:[#allocation5 + $0x144] sm:$0xff] }
 0x5b8   : > { %v11387_v50 = vld [vmem:[#allocation5 + $0x13c] ss:$12 sps:$4 sm:$0xff]   ;;  %7311 = vst.msk [vmem:[#allocation5 + $0x160] sm:$0xf] %vm6319_vm15, %v7245_v22  ;;  %v10081_v5 = vcombine.low %v8071_v8, %v8073_v59 }
 0x5b9   : > { %v7500_v44 = vpop.permute.xlu0 %7499  ;;  %8658 = vmatprep.mubr.bf16.mxu0 %v11387_v50 }
 0x5ba   : > { %7567 = vst.msk [vmem:[#allocation5 + $0x154] sm:$0xf] %vm6576_vm1, %v7500_v44  ;;  %v11059_v23 = vpop.f32.mrf.mxu0  ;;  %8659 = vmatmul.mubr.bf16.gmra.mxu0 %v10081_v5 }
 0x5bb   : > { %v6539_v29 = vpop.permute.xlu1 %6538 }
 0x5bc   : > { %6606 = vst.msk [vmem:[#allocation5 + $0x15c] sm:$0xf] %vm6576_vm1, %v6539_v29  ;;  %v11060_v41 = vpop.f32.mrf.mxu0 }
 0x5bd   : > { %v6794_v58 = vpop.permute.xlu0 %6793  ;;  %v14810_v57 = vadd.f32 %v11060_v41, %v11059_v23 }
 0x5be   : > { %6862 = vst.msk [vmem:[#allocation5 + $0x150] sm:$0xf] %vm6833_vm2, %v6794_v58  ;;  %v11062_v61 = vpop.f32.mrf.mxu0 }
 0x5bf   : > { %v7502_v52 = vpop.permute.xlu1 %7501 }
 0x5c0   : > { %7568 = vst.msk [vmem:[#allocation5 + $0x160] sm:$0xf] %vm6576_vm1, %v7502_v52  ;;  %v11063_v15 = vpop.f32.mrf.mxu0 }
 0x5c1   : > { %v7756_v20 = vpop.permute.xlu0 %7755  ;;  %v14814_v49 = vadd.f32 %v11063_v15, %v11062_v61 }
 0x5c2   : > { %7823 = vst.msk [vmem:[#allocation5 + $0x154] sm:$0xf] %vm6833_vm2, %v7756_v20 }
 0x5c3   : > { %v6796_v62 = vpop.permute.xlu1 %6795 }
 0x5c4   : > { %6863 = vst.msk [vmem:[#allocation5 + $0x15c] sm:$0xf] %vm6833_vm2, %v6796_v62 }
 0x5c5   : > { %v6284_v26 = vpop.permute.xlu0 %6283 }
 0x5c6   : > { %6350 = vst.msk [vmem:[#allocation5 + $0x168] sm:$0xf] %vm6319_vm15, %v6284_v26 }
 0x5c7   : > { %v7758_v53 = vpop.permute.xlu1 %7757 }
 0x5c8   : > { %7824 = vst.msk [vmem:[#allocation5 + $0x160] sm:$0xf] %vm6833_vm2, %v7758_v53 }
 0x5c9   : > { %v7247_v16 = vpop.permute.xlu0 %7246  ;;  %v8075_v4 = vld [vmem:[#allocation5 + $0x150] sm:$0xff] }
 0x5ca   : > { %7312 = vst.msk [vmem:[#allocation5 + $0x16c] sm:$0xf] %vm6319_vm15, %v7247_v16 }
 0x5cb   : > { %v6286_v9 = vpop.permute.xlu1 %6285 }
 0x5cc   : > { %6351 = vst.msk [vmem:[#allocation5 + $0x174] sm:$0xf] %vm6319_vm15, %v6286_v9 }
 0x5cd   : > { %v6541_v39 = vpop.permute.xlu0 %6540 }
 0x5ce   : > { %6607 = vst.msk [vmem:[#allocation5 + $0x168] sm:$0xf] %vm6576_vm1, %v6541_v39 }
 0x5cf   : > { %v7249_v10 = vpop.permute.xlu1 %7248  ;;  %v8077_v27 = vld [vmem:[#allocation5 + $0x15c] sm:$0xff] }
 0x5d0   : > { %v11389_v54 = vld [vmem:[#allocation5 + $0x154] ss:$12 sps:$4 sm:$0xff]   ;;  %7313 = vst.msk [vmem:[#allocation5 + $0x178] sm:$0xf] %vm6319_vm15, %v7249_v10  ;;  %v10084_v33 = vcombine.low %v8075_v4, %v8077_v27  ;;  %v11397_v27 = vld [vmem:[%s15075_s7 + $0x8] sm:$0xff]  }
 0x5d1   : > { %v7504_v2 = vpop.permute.xlu0 %7503  ;;  %8666 = vmatprep.mubr.bf16.mxu0 %v11389_v54 }
 0x5d2   : > { %7569 = vst.msk [vmem:[#allocation5 + $0x16c] sm:$0xf] %vm6576_vm1, %v7504_v2  ;;  %8667 = vmatmul.mubr.bf16.gmra.mxu0 %v10084_v33  ;;  %v11398_v33 = vld [vmem:[%s15075_s7] sm:$0xff]  }
 0x5d3   : > { %v6543_v12 = vpop.permute.xlu1 %6542 }
 0x5d4   : > { %v11065_v21 = vpop.f32.mrf.mxu0  ;;  %6608 = vst.msk [vmem:[#allocation5 + $0x174] sm:$0xf] %vm6576_vm1, %v6543_v12 }
 0x5d5   : > { %v6798_v34 = vpop.permute.xlu0 %6797 }
 0x5d6   : > { %v11066_v56 = vpop.f32.mrf.mxu0  ;;  %6864 = vst.msk [vmem:[#allocation5 + $0x168] sm:$0xf] %vm6833_vm2, %v6798_v34 }
 0x5d7   : > { %v14826_v17 = vadd.f32 %v11066_v56, %v11065_v21  ;;  %v7506_v25 = vpop.permute.xlu1 %7505 }
 0x5d8   : > { %v11068_v45 = vpop.f32.mrf.mxu0  ;;  %7570 = vst.msk [vmem:[#allocation5 + $0x178] sm:$0xf] %vm6576_vm1, %v7506_v25 }
 0x5d9   : > { %v7760_v19 = vpop.permute.xlu0 %7759 }
 0x5da   : > { %v11069_v7 = vpop.f32.mrf.mxu0  ;;  %7825 = vst.msk [vmem:[#allocation5 + $0x16c] sm:$0xf] %vm6833_vm2, %v7760_v19 }
 0x5db   : > { %v14830_v46 = vadd.f32 %v11069_v7, %v11068_v45  ;;  %v6800_v37 = vpop.permute.xlu1 %6799 }
 0x5dc   : > { %6865 = vst.msk [vmem:[#allocation5 + $0x174] sm:$0xf] %vm6833_vm2, %v6800_v37 }
 0x5df   : > { %v7762_v60 = vpop.permute.xlu1 %7761 }
 0x5e0   : > { %7826 = vst.msk [vmem:[#allocation5 + $0x178] sm:$0xf] %vm6833_vm2, %v7762_v60  ;;  %v11192_v60 = vpop.f32.mrf.mxu1 }
 0x5e3   : > { %v11394_v24 = vld [vmem:[#allocation5 + $0x168] ss:$12 sps:$4 sm:$0xff]  }
 0x5e7   : > { %v11392_v13 = vld [vmem:[#allocation5 + $0x16c] ss:$12 sps:$4 sm:$0xff]  }
 0x5e8   : > { %8674 = vmatprep.mubr.bf16.mxu0 %v11392_v13  ;;  %v8733_v13 = vpop.f32.mrf.mxu1 }
 0x5e9   : > { %8675 = vmatmul.mubr.bf16.gmra.mxu0 %v11394_v24 }
 0x5ea   : > { %v11071_v40 = vpop.f32.mrf.mxu0  ;;  %11186 = vmatprep.mubr.msk.bf16.mxu0 %vm5827_vm3, %v11395_v43  ;;  %v11193_v24 = vpop.f32.mrf.mxu1 }
 0x5ec   : > { %v11072_v18 = vpop.f32.mrf.mxu0  ;;  %v8736_v43 = vpop.f32.mrf.mxu1 }
 0x5ed   : > { %v14836_v63 = vadd.f32 %v11072_v18, %v11071_v40 }
 0x5ee   : > { %v11074_v47 = vpop.f32.mrf.mxu0 }
 0x5f0   : > { %v11075_v31 = vpop.f32.mrf.mxu0 }
 0x5f1   : > { %v14838_v11 = vadd.f32 %v11075_v31, %v11074_v47  ;;  %11187 = vmatmul.mubr.msk.bf16.vlgmr.msra.gmra.mxu0 %vm5827_vm3, %v11396_v42  ;;  %v14875_v47 = vpop.f32.mrf.mxu1 }
 0x5f2   : > { %11222 = vmatprep.mubr.msk.bf16.mxu0 %vm11484_vm5, %v11466_v0  ;;  %11219 = vmatpush3.bf16.msra.mxu0 %v11397_v27 }
 0x5f3   : > { %11220 = vmatprep.subr.bf16.mxu0 %v11466_v0 }
 0x5f6   : > { %11221 = vmatpush3.bf16.msra.mxu0 %v11398_v33 }
 0x602   : > { %v11077_v3 = vpop.f32.mrf.mxu0 }
 0x604   : > { %v11078_v28 = vpop.f32.mrf.mxu0 }
 0x605   : > { %v14841_v38 = vadd.f32 %v11078_v28, %v11077_v3  ;;  %v8749_v28 = vpop.f32.mrf.mxu1 }
 0x606   : > { %v11080_v22 = vpop.f32.mrf.mxu0 }
 0x608   : > { %v11081_v8 = vpop.f32.mrf.mxu0 }
 0x609   : > { %v14843_v59 = vadd.f32 %v11081_v8, %v11080_v22  ;;  %v14879_v22 = vpop.f32.mrf.mxu1 }
 0x60b   : > { %v8752_v8 = vpop.f32.mrf.mxu1 }
 0x61a   : > { %v11083_v50 = vpop.f32.mrf.mxu0 }
 0x61c   : > { %v11084_v5 = vpop.f32.mrf.mxu0 }
 0x61d   : > { %v14845_v44 = vadd.f32 %v11084_v5, %v11083_v50  ;;  %v14881_v50 = vpop.f32.mrf.mxu1 }
 0x61e   : > { %v11086_v23 = vpop.f32.mrf.mxu0 }
 0x61f   : > { %v14883_v5 = vpop.f32.mrf.mxu1 }
 0x620   : > { %v11087_v29 = vpop.f32.mrf.mxu0 }
 0x621   : > { %v14847_v41 = vadd.f32 %v11087_v29, %v11086_v23 }
 0x632   : > { %v11089_v58 = vpop.f32.mrf.mxu0 }
 0x634   : > { %v11090_v61 = vpop.f32.mrf.mxu0 }
 0x635   : > { %v14849_v52 = vadd.f32 %v11090_v61, %v11089_v58  ;;  %v14887_v61 = vpop.f32.mrf.mxu1 }
 0x636   : > { %v11092_v15 = vpop.f32.mrf.mxu0 }
 0x638   : > { %v11093_v20 = vpop.f32.mrf.mxu0 }
 0x639   : > { %v14851_v62 = vadd.f32 %v11093_v20, %v11092_v15  ;;  %v14892_v20 = vld [vmem:[%s15074_s6] ss:$0 sm:$0xff] }
 0x63a   : > { %v8565_v33 = vadd.f32 %v14736_v51, %v14892_v20 }
 0x64a   : > { %v11095_v26 = vpop.f32.mrf.mxu0 }
 0x64c   : > { %v11096_v53 = vpop.f32.mrf.mxu0 }
 0x64d   : > { %v14853_v16 = vadd.f32 %v11096_v53, %v11095_v26 }
 0x64e   : > { %v11098_v9 = vpop.f32.mrf.mxu0 }
 0x650   : > { %v11099_v39 = vpop.f32.mrf.mxu0 }
 0x651   : > { %v14855_v10 = vadd.f32 %v11099_v39, %v11098_v9  ;;  %v14896_v9 = vpop.f32.mrf.mxu1 }
 0x653   : > { %v14900_v27 = vpop.f32.mrf.mxu1 }
 0x662   : > { %v11101_v4 = vpop.f32.mrf.mxu0 }
 0x664   : > { %v11102_v54 = vpop.f32.mrf.mxu0 }
 0x665   : > { %v14864_v2 = vadd.f32 %v11102_v54, %v11101_v4  ;;  %v8557_v4 = vadd.f32 %v14686_v1, %v14892_v20  ;;  %v8576_v1 = vadd.f32 %v14766_v48, %v14892_v20 }
 0x666   : > { %v11104_v21 = vpop.f32.mrf.mxu0 }
 0x668   : > { %v11105_v12 = vpop.f32.mrf.mxu0 }
 0x669   : > { %v14867_v56 = vadd.f32 %v11105_v12, %v11104_v21 }
 0x67a   : > { %v11107_v34 = vpop.f32.mrf.mxu0 }
 0x67c   : > { %v11108_v45 = vpop.f32.mrf.mxu0 }
 0x67d   : > { %v14869_v25 = vadd.f32 %v11108_v45, %v11107_v34  ;;  %v8573_v34 = vadd.f32 %v14762_v35, %v14892_v20  ;;  %v8581_v35 = vadd.f32 %v14778_v55, %v14892_v20 }
 0x67e   : > { %v11110_v7 = vpop.f32.mrf.mxu0 }
 0x680   : > { %v11111_v19 = vpop.f32.mrf.mxu0 }
 0x681   : > { %v14871_v37 = vadd.f32 %v11111_v19, %v11110_v7  ;;  %v8568_v7 = vadd.f32 %v14743_v32, %v14892_v20  ;;  %v8560_v19 = vadd.f32 %v14697_v14, %v14892_v20  ;;  %v8584_v14 = vadd.f32 %v14782_v6, %v14892_v20 }
 0x682   : > { %v8592_v6 = vadd.f32 %v14798_v36, %v14892_v20  ;;  %v8600_v36 = vadd.f32 %v14814_v49, %v14892_v20 }
 0x692   : > { %v11113_v40 = vpop.f32.mrf.mxu0 }
 0x694   : > { %v11114_v18 = vpop.f32.mrf.mxu0 }
 0x695   : > { %v14873_v0 = vadd.f32 %v11114_v18, %v11113_v40  ;;  %v14912_v40 = vpop.f32.mrf.mxu1 }
 0x696   : > { %v11116_v31 = vpop.f32.mrf.mxu0 }
 0x697   : > { %v14916_v32 = vpop.f32.mrf.mxu1 }
 0x698   : > { %v11117_v42 = vpop.f32.mrf.mxu0 }
 0x699   : > { %v14877_v3 = vadd.f32 %v11117_v42, %v11116_v31 }
 0x6a9   : > { %v11119_v23 = vpop.f32.mrf.mxu0 }
 0x6ab   : > { %v11120_v29 = vpop.f32.mrf.mxu0 }
 0x6ac   : > { %v14885_v58 = vadd.f32 %v11120_v29, %v11119_v23  ;;  %v8734_v23 = vadd.f32 %v8733_v13, %v8573_v34  ;;  %v8589_v13 = vadd.f32 %v14794_v30, %v14892_v20  ;;  %v8597_v30 = vadd.f32 %v14810_v57, %v14892_v20 }
 0x6ad   : > { %v11122_v15 = vpop.f32.mrf.mxu0 }
 0x6af   : > { %v11123_v26 = vpop.f32.mrf.mxu0 }
 0x6b0   : > { %v14894_v53 = vadd.f32 %v11123_v26, %v11122_v15  ;;  %v8737_v26 = vadd.f32 %v8736_v43, %v8576_v1 }
 0x6b1   : > { %v11188_v39 = vpop.f32.mrf.mxu0 }
 0x6b2   : > { %v8726_v45 = vadd.f32 %v11188_v39, %v8565_v33  ;;  %v8848_v33 = vmax.f32 %v8734_v23, 0.0  ;;  %v8849_v34 = vmax.f32 %v8737_v26, 0.0 }
 0x6b3   : > { %v8717_v54 = vpop.f32.mrf.mxu0 }
 0x6b4   : > { %v8718_v21 = vadd.f32 %v8717_v54, %v8557_v4  ;;  %v8846_v29 = vmax.f32 %v8726_v45, 0.0  ;;  %v8745_v45 = vadd.f32 %v11193_v24, %v8584_v14  ;;  %v8753_v24 = vadd.f32 %v8752_v8, %v8592_v6 }
 0x6b5   : > { %v11189_v12 = vpop.f32.mrf.mxu0  ;;  %v8758_v14 = vadd.f32 %v14875_v47, %v8597_v30  ;;  %v8608_v8 = vadd.f32 %v14830_v46, %v14892_v20  ;;  %v8616_v46 = vadd.f32 %v14838_v11, %v14892_v20  ;;  %v8624_v11 = vadd.f32 %v14843_v59, %v14892_v20 }
 0x6b6   : > { %v8844_v31 = vmax.f32 %v8718_v21, 0.0  ;;  %v8729_v51 = vadd.f32 %v11189_v12, %v8568_v7  ;;  %v8742_v21 = vadd.f32 %v11192_v60, %v8581_v35  ;;  %v8879_v55 = vsel %vm5827_vm3, %v8846_v29, 0.0  ;;  %v8784_v12 = vpop.f32.mrf.mxu1 }
 0x6b7   : > { %v8720_v18 = vpop.f32.mrf.mxu0  ;;  %v8851_v23 = vmax.f32 %v8745_v45, 0.0 }
 0x6b8   : > { %v8721_v42 = vadd.f32 %v8720_v18, %v8560_v19  ;;  %v8876_v48 = vsel %vm5827_vm3, %v8844_v31, 0.0  ;;  %v8847_v39 = vmax.f32 %v8729_v51, 0.0  ;;  %v14928_v19 = vpop.f32.mrf.mxu1  ;;  %v8883_v18 = vsel %vm5827_vm3, %v8848_v33, 0.0 }
 0x6b9   : > { %v8850_v60 = vmax.f32 %v8742_v21, 0.0  ;;  %v8750_v31 = vadd.f32 %v8749_v28, %v8589_v13  ;;  %v8605_v28 = vadd.f32 %v14826_v17, %v14892_v20  ;;  %v8889_v57 = vsel %vm5827_vm3, %v8851_v23, 0.0 }
 0x6ba   : > { %v8845_v15 = vmax.f32 %v8721_v42, 0.0  ;;  %v8881_v7 = vsel %vm5827_vm3, %v8847_v39, 0.0  ;;  %v8885_v42 = vsel %vm5827_vm3, %v8849_v34, 0.0  ;;  %v8797_v35 = vpop.f32.mrf.mxu1  ;;  %v8853_v39 = vmax.f32 %v8753_v24, 0.0 }
 0x6bb   : > { %v8852_v26 = vmax.f32 %v8750_v31, 0.0  ;;  %v8854_v21 = vmax.f32 %v8758_v14, 0.0  ;;  %v8766_v47 = vadd.f32 %v14883_v5, %v8605_v28  ;;  %v8613_v17 = vadd.f32 %v14836_v63, %v14892_v20 }
 0x6bc   : > { %v8877_v4 = vsel %vm5827_vm3, %v8845_v15, 0.0  ;;  %v8887_v15 = vsel %vm5827_vm3, %v8850_v60, 0.0  ;;  %v14944_v49 = vpop.f32.mrf.mxu1  ;;  %v8621_v5 = vadd.f32 %v14841_v38, %v14892_v20  ;;  %v8629_v38 = vadd.f32 %v14845_v44, %v14892_v20 }
 0x6bd   : > { %v8878_v54 = vadd.f32 %v8877_v4, %v8876_v48  ;;  %v8761_v4 = vadd.f32 %v14879_v22, %v8600_v36  ;;  %v8891_v33 = vsel %vm5827_vm3, %v8852_v26, 0.0  ;;  %v8769_v22 = vadd.f32 %v14896_v9, %v8608_v8 }
 0x6be   : > { %v8800_v34 = vpop.f32.mrf.mxu1  ;;  %v8895_v6 = vsel %vm5827_vm3, %v8854_v21, 0.0  ;;  %v8777_v9 = vadd.f32 %v14887_v61, %v8616_v46  ;;  %v8632_v61 = vadd.f32 %v14847_v41, %v14892_v20  ;;  %v8790_v28 = vadd.f32 %v14900_v27, %v8629_v38 }
 0x6bf   : > { %v8880_v43 = vadd.f32 %v8879_v55, %v8878_v54  ;;  %v8893_v55 = vsel %vm5827_vm3, %v8853_v39, 0.0  ;;  %v8857_v31 = vmax.f32 %v8769_v22, 0.0  ;;  %v8645_v27 = vadd.f32 %v14853_v16, %v14892_v20 }
 0x6c0   : > { %v14958_v63 = vpop.f32.mrf.mxu1  ;;  %v8669_v38 = vadd.f32 %v14873_v0, %v14892_v20 }
 0x6c1   : > { %v8882_v1 = vadd.f32 %v8881_v7, %v8880_v43  ;;  %v8855_v43 = vmax.f32 %v8761_v4, 0.0  ;;  %v8856_v7 = vmax.f32 %v8766_v47, 0.0  ;;  %v8901_v36 = vsel %vm5827_vm3, %v8857_v31, 0.0 }
 0x6c2   : > { %v8813_v23 = vpop.f32.mrf.mxu1  ;;  %v8793_v4 = vadd.f32 %v14916_v32, %v8632_v61  ;;  %v8648_v32 = vadd.f32 %v14855_v10, %v14892_v20  ;;  %v8806_v46 = vadd.f32 %v14928_v19, %v8645_v27  ;;  %v8661_v19 = vadd.f32 %v14869_v25, %v14892_v20 }
 0x6c3   : > { %v8884_v51 = vadd.f32 %v8883_v18, %v8882_v1  ;;  %v8774_v1 = vadd.f32 %v14881_v50, %v8613_v17  ;;  %v8897_v60 = vsel %vm5827_vm3, %v8855_v43, 0.0  ;;  %v8782_v50 = vadd.f32 %v14912_v40, %v8621_v5 }
 0x6c4   : > { %v8637_v40 = vadd.f32 %v14849_v52, %v14892_v20  ;;  %v8863_v17 = vmax.f32 %v8793_v4, 0.0 }
 0x6c5   : > { %v8886_v29 = vadd.f32 %v8885_v42, %v8884_v51  ;;  %v8899_v51 = vsel %vm5827_vm3, %v8856_v7, 0.0  ;;  %v8858_v42 = vmax.f32 %v8774_v1, 0.0  ;;  %v8860_v14 = vmax.f32 %v8782_v50, 0.0 }
 0x6c6   : > { %v8809_v7 = vadd.f32 %v14944_v49, %v8648_v32  ;;  %v8664_v49 = vadd.f32 %v14871_v37, %v14892_v20  ;;  %v8822_v50 = vadd.f32 %v14958_v63, %v8661_v19  ;;  %v8677_v63 = vadd.f32 %v14885_v58, %v14892_v20 }
 0x6c7   : > { %v8888_v48 = vadd.f32 %v8887_v15, %v8886_v29  ;;  %v8859_v29 = vmax.f32 %v8777_v9, 0.0  ;;  %v8785_v15 = vadd.f32 %v8784_v12, %v8624_v11  ;;  %v8903_v59 = vsel %vm5827_vm3, %v8858_v42, 0.0 }
 0x6c8   : > { %v8640_v12 = vadd.f32 %v14851_v62, %v14892_v20  ;;  %v8907_v8 = vsel %vm5827_vm3, %v8860_v14, 0.0  ;;  %v8867_v9 = vmax.f32 %v8809_v7, 0.0 }
 0x6c9   : > { %v8890_v54 = vadd.f32 %v8889_v57, %v8888_v48  ;;  %v11213_v48 = vpop.f32.mrf.mxu1  ;;  %v8905_v57 = vsel %vm5827_vm3, %v8859_v29, 0.0  ;;  %v8861_v39 = vmax.f32 %v8785_v15, 0.0  ;;  %v8672_v29 = vadd.f32 %v14877_v3, %v14892_v20 }
 0x6ca   : > { %v8921_v25 = vsel %vm5827_vm3, %v8867_v9, 0.0 }
 0x6cb   : > { %v8892_v13 = vadd.f32 %v8891_v33, %v8890_v54  ;;  %v8862_v54 = vmax.f32 %v8790_v28, 0.0  ;;  %v8798_v33 = vadd.f32 %v8797_v35, %v8637_v40  ;;  %v8816_v21 = vpop.f32.mrf.mxu1  ;;  %v8909_v47 = vsel %vm5827_vm3, %v8861_v39, 0.0 }
 0x6cc   : > { %v8653_v35 = vadd.f32 %v14864_v2, %v14892_v20 }
 0x6cd   : > { %v8894_v45 = vadd.f32 %v8893_v55, %v8892_v13  ;;  %v8801_v13 = vadd.f32 %v8800_v34, %v8640_v12  ;;  %v11216_v55 = vpop.f32.mrf.mxu1  ;;  %v8911_v62 = vsel %vm5827_vm3, %v8862_v54, 0.0  ;;  %v8864_v22 = vmax.f32 %v8798_v33, 0.0 }
 0x6ce   : > { %v8656_v34 = vadd.f32 %v14867_v56, %v14892_v20  ;;  %v8838_v39 = vadd.f32 %v11216_v55, %v8677_v63 }
 0x6cf   : > { %v8896_v18 = vadd.f32 %v8895_v6, %v8894_v45  ;;  %v8913_v45 = vsel %vm5827_vm3, %v8863_v17, 0.0  ;;  %v8865_v6 = vmax.f32 %v8801_v13, 0.0  ;;  %v8829_v10 = vpop.f32.mrf.mxu1  ;;  %v8915_v5 = vsel %vm5827_vm3, %v8864_v22, 0.0 }
 0x6d0   : > { %v8817_v11 = vadd.f32 %v8816_v21, %v8656_v34  ;;  %v8874_v33 = vmax.f32 %v8838_v39, 0.0 }
 0x6d1   : > { %v8898_v30 = vadd.f32 %v8897_v60, %v8896_v18  ;;  %v8866_v18 = vmax.f32 %v8806_v46, 0.0  ;;  %v8814_v60 = vadd.f32 %v8813_v23, %v8653_v35  ;;  %v8917_v2 = vsel %vm5827_vm3, %v8865_v6, 0.0 }
 0x6d3   : > { %v8900_v24 = vadd.f32 %v8899_v51, %v8898_v30  ;;  %v11217_v30 = vpop.f32.mrf.mxu1  ;;  %v8919_v56 = vsel %vm5827_vm3, %v8866_v18, 0.0  ;;  %v8868_v42 = vmax.f32 %v8814_v60, 0.0 }
 0x6d5   : > { %v8902_v26 = vadd.f32 %v8901_v36, %v8900_v24  ;;  %v8869_v24 = vmax.f32 %v8817_v11, 0.0  ;;  %v8825_v36 = vadd.f32 %v11213_v48, %v8664_v49  ;;  %v8832_v15 = vpop.f32.mrf.mxu1  ;;  %v8923_v61 = vsel %vm5827_vm3, %v8868_v42, 0.0 }
 0x6d6   : > { %v8833_v40 = vadd.f32 %v8832_v15, %v8672_v29  ;;  %v8680_v48 = vadd.f32 %v14894_v53, %v14892_v20  ;;  %v8935_v53 = vsel %vm5827_vm3, %v8874_v33, 0.0 }
 0x6d7   : > { %v8904_v44 = vadd.f32 %v8903_v59, %v8902_v26  ;;  %v8870_v26 = vmax.f32 %v8822_v50, 0.0  ;;  %v8830_v59 = vadd.f32 %v8829_v10, %v8669_v38  ;;  %v8925_v0 = vsel %vm5827_vm3, %v8869_v24, 0.0 }
 0x6d8   : > { %v8871_v28 = vmax.f32 %v8825_v36, 0.0 }
 0x6d9   : > { %v8906_v41 = vadd.f32 %v8905_v57, %v8904_v44  ;;  %v8927_v3 = vsel %vm5827_vm3, %v8870_v26, 0.0  ;;  %v8872_v57 = vmax.f32 %v8830_v59, 0.0 }
 0x6da   : > { %v8929_v12 = vsel %vm5827_vm3, %v8871_v28, 0.0 }
 0x6db   : > { %v8908_v52 = vadd.f32 %v8907_v8, %v8906_v41  ;;  %v8873_v41 = vmax.f32 %v8833_v40, 0.0  ;;  %v8841_v8 = vadd.f32 %v11217_v30, %v8680_v48  ;;  %v8931_v58 = vsel %vm5827_vm3, %v8872_v57, 0.0 }
 0x6dd   : > { %v8910_v43 = vadd.f32 %v8909_v47, %v8908_v52  ;;  %v8933_v21 = vsel %vm5827_vm3, %v8873_v41, 0.0  ;;  %v8875_v52 = vmax.f32 %v8841_v8, 0.0 }
 0x6df   : > { %v8912_v16 = vadd.f32 %v8911_v62, %v8910_v43  ;;  %v8937_v17 = vsel %vm5827_vm3, %v8875_v52, 0.0 }
 0x6e1   : > { %v8914_v1 = vadd.f32 %v8913_v45, %v8912_v16  ;;  %v8952_v45 = vld [vmem:[%s15076_s8] sm:$0x1] }
 0x6e3   : > { %v8916_v31 = vadd.f32 %v8915_v5, %v8914_v1 }
 0x6e5   : > { %v8918_v51 = vadd.f32 %v8917_v2, %v8916_v31 }
 0x6e7   : > { %v8920_v23 = vadd.f32 %v8919_v56, %v8918_v51 }
 0x6e9   : > { %v8922_v37 = vadd.f32 %v8921_v25, %v8920_v23 }
 0x6eb   : > { %v8924_v14 = vadd.f32 %v8923_v61, %v8922_v37 }
 0x6ed   : > { %v8926_v44 = vadd.f32 %v8925_v0, %v8924_v14 }
 0x6ef   : > { %v8928_v4 = vadd.f32 %v8927_v3, %v8926_v44 }
 0x6f1   : > { %v8930_v54 = vadd.f32 %v8929_v12, %v8928_v4 }
 0x6f3   : > { %v8932_v27 = vadd.f32 %v8931_v58, %v8930_v54 }
 0x6f5   : > { %v8934_v20 = vadd.f32 %v8933_v21, %v8932_v27 }
 0x6f7   : > { %v8936_v47 = vadd.f32 %v8935_v53, %v8934_v20 }
 0x6f9   : > { %v8938_v13 = vadd.f32 %v8937_v17, %v8936_v47 }
 0x6fb   : > { %v8939_v32 = vrot.slane %v8938_v13, 4 }
 0x6fd   : > { %v8940_v55 = vadd.f32 %v8939_v32, %v8938_v13 }
 0x6ff   : > { %v8941_v43 = vrot.slane %v8940_v55, 2 }
 0x701   : > { %v8942_v62 = vadd.f32 %v8941_v43, %v8940_v55 }
 0x703   : > { %v8943_v22 = vrot.slane %v8942_v62, 1 }
 0x705   : > { %v8944_v46 = vadd.f32 %v8943_v22, %v8942_v62 }
 0x707   : > { %v8946_v35 = vmul.f32 0.00390625, %v8944_v46 }
 0x709   : > { %v8947_v16 = vpack.c.bf16 %v8946_v35, %v8946_v35 }
 0x70b   : > { %11223 = vmatmul.mubr.msk.bf16.vlgmr.msra.gmra.mxu0 %vm5827_vm3, %v8947_v16 }
 0x7cb   : > { %v9002_v6 = vpop.f32.mrf.mxu0 }
 0x7cc   : > { %v9003_v7 = vadd.f32 %v9002_v6, %v8952_v45 }
 0x7cd   : > { %v11224_v34 = vpop.f32.mrf.mxu0 }
 0x7ce   : > { %9009 = vst.msk [vmem:[%s324_s22] sm:$0x1] %vm9008_vm0, %v9003_v7 }
 0x7cf   : > { %v9005_v10 = vpop.f32.mrf.mxu0 }
 0x7d0   : > { %11417 = shalt.err (!%p11414_p3)
}
 0x7d1   : > { %s11418_s27 = scalar_lea.hbm %s15027_s25, 16  ;;  %s11422_s22 = scalar_lea.hbm %s15077_s9, 32 }
 0x7d2   : > { %p11419_p4 = scmp.ne.s32.totalorder %s15027_s25, %s11418_s27  ;;  %p11423_p9 = scmp.lt.s32.totalorder %s15027_s25, %s15077_s9 }
 0x7d3   : > { %p11424_p10 = scmp.lt.s32.totalorder %s11422_s22, %s11418_s27 }
 0x7d4   : > { %p11420_p7 = pnand %p11419_p4, %p11574_p5 }
 0x7d5   : > { %p11425_p11 = por %p11424_p10, %p11423_p9 }
 0x7d6   : > { %p11421_p8 = pneg %p11420_p7 }
 0x7d8   : > { %p11426_p12 = pnand %p11425_p11, %p11421_p8 }
 0x7da   : > { %11429 = shalt.err (!%p11426_p12)
}
 0x7db   : > { %11230 = dma.vmem_to_hbm [thread:$0]  (%p11574_p5), %s15029_s29, 16, %s15027_s25, %s9011_s17   ;;  %v11225_v1 = vpop.f32.mrf.mxu0 }
 0x7dc PF: > { %p11236_p13 = scmp.ge.s32.totalorder %s11464_s12, 2  ;;  %s9035_s13 = sand.u32 1, %s11452_s30  }
 0x7dd   : > { %s9036_s26 = scalar_lea.sflag [#allocation7], %s9035_s13 }
 0x7de   : > { %p11233_p0 = pnand %p11236_p13, %p11578_p6 }
 0x7e0   : > { %p11234_p1 = pneg %p11233_p0 }
 0x7e2   : > { %11447 = dma.done.wait (%p11234_p1), %s9036_s26, 16  }
 0x7e3   : > { %11449 = vsyncadd (%p11234_p1), %s9036_s26, 4294967280  ;;  %p19_p2 = scmp.ge.s32.totalorder %s11561_s15, 4   ;;  %s15080_s30 = smov %s11456_s10 }
 0x7e4   : > { %s15081_s10 = smov %s11460_s11  ;;  %s15082_s11 = smov %s11572_s18 }
 0x7e5   : > { %s15083_s12 = smov %s11561_s15  ;;  %21 = sbr.rel (!%p19_p2) target bundleno = 3 (0x3), region = 100 }
 0x7ea   :  { %9040 = vsyncpa [#allocation7], 1 }
 0x7eb   :  { %9042 = vsyncpa [#allocation7 + $0x1], 1 }

</bundles_post_ra>
